<compile_context>
chip_gen: v7x
topology: tpu7x:2x2x1
jax: 0.10.0
libtpu: 0.0.40
codegen_flags: <defaults>
</compile_context>

<pallas_src>
import functools

import numpy as np
import jax
import jax.numpy as jnp
from jax import lax
from jax.experimental import pallas as pl
from jax.experimental.pallas import tpu as pltpu


# -----------------------------------------------------------------------------
# Host-side constant construction: bf16 hi/lo splits precomputed once, stacked
# along the contraction (K) axis so the kernel does a single MXU pass per
# product:  a @ b  ~=  a_hi@b_hi + a_lo@b_hi + a_hi@b_lo.
# -----------------------------------------------------------------------------

def _bf16_split_np(m):
    m = np.asarray(m, np.float32)
    hi = m.astype(jnp.bfloat16)
    lo = (m - np.asarray(hi, np.float32)).astype(jnp.bfloat16)
    return hi, lo


def _stack_lhs_k3(m):
    # Constant used as matmul LHS (K along columns): [hi | hi | lo].
    hi, lo = _bf16_split_np(m)
    return np.concatenate([hi, hi, lo], axis=1)


def _stack_rhs_k3(m):
    # Constant used as matmul RHS (K along rows): [hi ; hi ; lo].
    hi, lo = _bf16_split_np(m)
    return np.concatenate([hi, hi, lo], axis=0)


# -----------------------------------------------------------------------------
# Kernel
# -----------------------------------------------------------------------------

def _modl_kernel(lam_ref, mapr_ref, mapi_ref, ksp_ref, mask_ref,
                 bfh_ref, bgh_ref, bfw_ref, bgwa_ref, bgwb_ref, ssum_ref,
                 img_ref, oksp_ref,
                 *, num_coils, max_iter, img_pad):
    C = num_coils
    H = mapr_ref.shape[-2]
    W = ssum_ref.shape[-1]
    CW = C * W
    f32 = jnp.float32
    bf16 = jnp.bfloat16
    kw = dict(preferred_element_type=f32)

    lam = lam_ref[0]                  # traced l2lam scalar (SMEM)
    mr = mapr_ref[0]                  # (H, CW)   maps real, coil lane-stacked
    mi = mapi_ref[0]                  # (H, CW)   maps imag
    kspc = ksp_ref[0]                 # (H, 2CW)  measured k-space [Kr | Ki]
    msk2 = mask_ref[0]                # (H, 2CW)  mask pre-tiled over coil/(r|i) lanes

    # Constants: bf16 hi/lo already stacked along K host-side.
    bfh3 = bfh_ref[...]               # (2H, 6H)    row FFT      [[Fr,-Fi],[Fi,Fr]]
    bgh3 = bgh_ref[...]               # (2H, 6H)    row conj-FFT
    bfw3 = bfw_ref[...]               # (6CW, 2CW)  col FFT, coil block-diagonal
    bgwa3 = bgwa_ref[...]             # (6CW, CW)   col conj-FFT (real columns)
    bgwb3 = bgwb_ref[...]             # (6CW, CW)   col conj-FFT (imag columns)
    ssum2 = ssum_ref[...]             # (2CW, W)    coil-sum [S; S] (S exact in bf16)

    # --- data-side bf16 hi/lo split, stacked along K (matches host stacking) ---
    def split3_rows(x):               # (K, N) -> (3K, N) = [hi ; lo ; hi]
        hi = x.astype(bf16)
        lo = (x - hi.astype(f32)).astype(bf16)
        return jnp.concatenate([hi, lo, hi], axis=0)

    def split3_cols(x):               # (M, K) -> (M, 3K) = [hi | lo | hi]
        hi = x.astype(bf16)
        lo = (x - hi.astype(f32)).astype(bf16)
        return jnp.concatenate([hi, lo, hi], axis=1)

    def split2_cols(x):               # (M, K) -> (M, 2K) = [hi | lo]  (exact-bf16 RHS)
        hi = x.astype(bf16)
        lo = (x - hi.astype(f32)).astype(bf16)
        return jnp.concatenate([hi, lo], axis=1)

    # --- SENSE building blocks (all coils at once, coils on the lane axis) ----
    def left_dft(cmat3, xr, xi):
        # Complex left multiply by an (H,H) DFT applied to ALL coils at once:
        # real/imag stacked along sublanes, ONE fused (2H,6H)@(6H,CW) matmul.
        x = jnp.concatenate([xr, xi], axis=0)                 # (2H, CW) f32
        y = jnp.dot(cmat3, split3_rows(x), **kw)              # (2H, CW) f32
        return y[:H], y[H:]

    def fft2_coils(pr, pi):
        # Per-coil FFT2 of lane-stacked (H, CW) planes -> combined (H, 2CW).
        tr, ti = left_dft(bfh3, pr, pi)
        ts = split3_cols(jnp.concatenate([tr, ti], axis=1))   # (H, 6CW)
        return jnp.dot(ts, bfw3, **kw)                        # (H, 2CW) [Kr | Ki]

    def sense_adjoint(kc):
        # kc: combined (H, 2CW) multi-coil k-space -> (H, W) image r/i planes.
        km = split3_cols(kc * msk2)                           # mask + split
        ur = jnp.dot(km, bgwa3, **kw)                         # (H, CW)
        ui = jnp.dot(km, bgwb3, **kw)
        vr, vi = left_dft(bgh3, ur, ui)       # IFFT2 done (1/HW folded into bgw*)
        ar = split2_cols(mr * vr + mi * vi)   # conj(maps) * v  (real)
        ai = split2_cols(mr * vi - mi * vr)   #                 (imag)
        return jnp.dot(ar, ssum2, **kw), jnp.dot(ai, ssum2, **kw)   # coil sum

    def sense_forward_nomask(xr, xi):
        xtr = jnp.concatenate([xr] * C, axis=1)               # tile image over coils
        xti = jnp.concatenate([xi] * C, axis=1)
        pr = mr * xtr - mi * xti                              # maps * x
        pi = mr * xti + mi * xtr
        return fft2_coils(pr, pi)

    def sense_normal(xr, xi):
        # Mask applied in forward AND adjoint (faithful for non-binary masks too).
        return sense_adjoint(msk2 * sense_forward_nomask(xr, xi))

    # rhs = A^H(ksp);  x0 = A^H(ksp)   (img_init='estimated', meta_idx == 0)
    rhsr, rhsi = sense_adjoint(kspc)
    xr, xi = rhsr, rhsi

    # ZConjGrad on (A^H A + lam) x = rhs, fixed block2_max_iter iterations.
    nr, ni = sense_normal(xr, xi)
    rr = rhsr - (nr + lam * xr)
    ri = rhsi - (ni + lam * xi)
    pr, pi = rr, ri
    rsold = jnp.sum(rr * rr + ri * ri, keepdims=True)         # (1,1) Re<r, r>

    def cg_step(_, carry):
        xr, xi, rr, ri, pr, pi, rsold = carry
        nr, ni = sense_normal(pr, pi)
        apr = nr + lam * pr
        api = ni + lam * pi
        pap = jnp.sum(pr * apr + pi * api, keepdims=True)     # Re<p, Ap>
        alpha = rsold / (pap + 1e-30)        # eps-guarded (degenerate p)
        xr = xr + alpha * pr
        xi = xi + alpha * pi
        rr = rr - alpha * apr
        ri = ri - alpha * api
        rsnew = jnp.sum(rr * rr + ri * ri, keepdims=True)
        beta = rsnew / (rsold + 1e-30)       # eps-guarded (converged r)
        pr = rr + beta * pr
        pi = ri + beta * pi
        return xr, xi, rr, ri, pr, pi, rsnew

    # Fully unrolled CG (short fixed trip count; scalar alpha/beta chain is the
    # latency bottleneck, unrolling lets the scheduler overlap across iterations).
    xr, xi, *_ = lax.fori_loop(0, max_iter, cg_step,
                               (xr, xi, rr, ri, pr, pi, rsold), unroll=True)

    # image_net is Identity (use_img_net=False) -> est_img_kernel = CG solution.
    # Lane-dense store: pad the last dim to a multiple of 128 lanes.
    if img_pad > 0:
        img_ref[0] = jnp.concatenate(
            [xr, xi, jnp.zeros((H, img_pad), f32)], axis=1)
    else:
        img_ref[0] = jnp.concatenate([xr, xi], axis=1)

    # Final forward op with ones_mask (no masking): est_ksp_c = FFT2(maps_c * x).
    oksp_ref[0] = sense_forward_nomask(xr, xi)                # (H, 2CW) [r | i]


# -----------------------------------------------------------------------------
# Wrapper
# -----------------------------------------------------------------------------

def modl_double_unroll(maps, ksp, mask, *, l2lam, max_iter):
    """Forward pass of MoDLDoubleUnroll (meta_unrolls=1).

    maps, ksp: complex64 (B, C, H, W); mask: float32 (B, H, W).
    Returns (est_img_kernel, est_maps_kernel, est_ksp) like the torch module.
    """
    B, C, H, W = maps.shape
    CW = C * W
    img_w = 2 * W
    img_pad = (-img_w) % 128                       # lane-dense est_img slab
    img_out_w = img_w + img_pad

    # --- constant DFT block matrices (host-side, trace-time) -----------------
    jh = np.arange(H)
    jw = np.arange(W)
    fh = np.exp(-2j * np.pi * np.outer(jh, jh) / H)
    fw = np.exp(-2j * np.pi * np.outer(jw, jw) / W)
    gh = np.conj(fh)                               # conj row-DFT
    gw = np.conj(fw) / float(H * W)                # conj col-DFT, IFFT scale folded in

    def left_block(m):                             # [[r,-i],[i,r]] complex LEFT multiply
        return np.block([[m.real, -m.imag], [m.imag, m.real]])

    eye_c = np.eye(C)
    bd_fr = np.kron(eye_c, fw.real)
    bd_fi = np.kron(eye_c, fw.imag)
    bd_gr = np.kron(eye_c, gw.real)
    bd_gi = np.kron(eye_c, gw.imag)

    # bf16 hi/lo pre-split + K-stacked constants.
    bfh3 = _stack_lhs_k3(left_block(fh))                                  # (2H, 6H)
    bgh3 = _stack_lhs_k3(left_block(gh))                                  # (2H, 6H)
    # Complex RIGHT multiply on lane-stacked [Xr | Xi]: [[BDr, BDi], [-BDi, BDr]].
    bfw3 = _stack_rhs_k3(np.block([[bd_fr, bd_fi], [-bd_fi, bd_fr]]))     # (6CW, 2CW)
    bgwa3 = _stack_rhs_k3(np.concatenate([bd_gr, -bd_gi], axis=0))        # (6CW, CW)
    bgwb3 = _stack_rhs_k3(np.concatenate([bd_gi, bd_gr], axis=0))         # (6CW, CW)
    ssum = np.tile(np.eye(W, dtype=np.float32), (C, 1))                   # coil sum (exact bf16)
    ssum2 = np.concatenate([ssum, ssum], axis=0).astype(jnp.bfloat16)     # (2CW, W)

    # --- lane-stacked coil layout: (B, C, H, W) -> (B, H, C*W) r/i planes -----
    def to_lane_stacked(z):
        zt = jnp.transpose(z, (0, 2, 1, 3)).reshape(B, H, CW)
        return (jnp.real(zt).astype(jnp.float32),
                jnp.imag(zt).astype(jnp.float32))

    mapr, mapi = to_lane_stacked(maps)
    kspr, kspi = to_lane_stacked(ksp)
    kspc = jnp.concatenate([kspr, kspi], axis=-1)                         # (B, H, 2CW)
    mask2 = jnp.tile(mask.astype(jnp.float32), (1, 1, 2 * C))             # (B, H, 2CW)
    lam = jnp.asarray(l2lam, jnp.float32).reshape(1)                      # traced scalar

    kernel = functools.partial(_modl_kernel, num_coils=C,
                               max_iter=int(max_iter), img_pad=int(img_pad))

    grid_spec = pltpu.PrefetchScalarGridSpec(
        num_scalar_prefetch=0,
        grid=(B,),
        in_specs=[
            pl.BlockSpec(memory_space=pltpu.MemorySpace.SMEM),            # l2lam
            pl.BlockSpec((1, H, CW), lambda b: (b, 0, 0)),                # maps real
            pl.BlockSpec((1, H, CW), lambda b: (b, 0, 0)),                # maps imag
            pl.BlockSpec((1, H, 2 * CW), lambda b: (b, 0, 0)),            # ksp  [r|i]
            pl.BlockSpec((1, H, 2 * CW), lambda b: (b, 0, 0)),            # mask pre-tiled
            pl.BlockSpec((2 * H, 6 * H), lambda b: (0, 0)),               # BFh [hi|hi|lo]
            pl.BlockSpec((2 * H, 6 * H), lambda b: (0, 0)),               # BGh (conj)
            pl.BlockSpec((6 * CW, 2 * CW), lambda b: (0, 0)),             # BFw block-diag
            pl.BlockSpec((6 * CW, CW), lambda b: (0, 0)),                 # BGw real cols
            pl.BlockSpec((6 * CW, CW), lambda b: (0, 0)),                 # BGw imag cols
            pl.BlockSpec((2 * CW, W), lambda b: (0, 0)),                  # coil-sum [S;S]
        ],
        out_specs=[
            pl.BlockSpec((1, H, img_out_w), lambda b: (b, 0, 0)),         # est_img [r|i|pad]
            pl.BlockSpec((1, H, 2 * CW), lambda b: (b, 0, 0)),            # est_ksp [r|i]
        ],
    )

    out_shape = (
        jax.ShapeDtypeStruct((B, H, img_out_w), jnp.float32),
        jax.ShapeDtypeStruct((B, H, 2 * CW), jnp.float32),
    )

    # VMEM limit derived from actual footprint, capped at 48 MiB (v7x headroom).
    const_bytes = 2 * 2 * int(bfh3.size + bgh3.size + bfw3.size
                              + bgwa3.size + bgwb3.size + ssum2.size)     # bf16, 2x buffered
    io_bytes = 2 * 4 * (2 * H * CW + 2 * H * 2 * CW + H * img_out_w + H * 2 * CW)
    vmem_limit = int(min(48 << 20, max(32 << 20, 2 * (const_bytes + io_bytes))))

    # Advisory cost estimate (single fused bf16 pass per split matmul).
    def mm_flops(m, k, n):
        return 2 * m * k * n
    per_normal = (2 * mm_flops(2 * H, 6 * H, CW)
                  + mm_flops(H, 6 * CW, 2 * CW)
                  + 2 * mm_flops(H, 6 * CW, CW)
                  + 2 * mm_flops(H, 2 * CW, W))
    flops = B * (max_iter + 3) * per_normal
    bytes_accessed = (4 * B * (2 * H * CW + 2 * H * 2 * CW + H * 2 * CW
                               + H * img_out_w + H * 2 * CW)
                      + const_bytes // 2)
    cost = pl.CostEstimate(flops=int(flops), transcendentals=0,
                           bytes_accessed=int(bytes_accessed))

    img_out, ksp_out = pl.pallas_call(
        kernel,
        out_shape=out_shape,
        grid_spec=grid_spec,
        compiler_params=pltpu.CompilerParams(
            # B >= 2 keeps both v7x TensorCores busy on the parallel batch axis.
            dimension_semantics=("parallel",),
            vmem_limit_bytes=vmem_limit),
        cost_estimate=cost,
    )(lam, mapr, mapi, kspc, mask2,
      jnp.asarray(bfh3), jnp.asarray(bgh3), jnp.asarray(bfw3),
      jnp.asarray(bgwa3), jnp.asarray(bgwb3), jnp.asarray(ssum2))

    # Decode the lane-dense outputs back to the PyTorch layout.
    est_img = (img_out[..., :W] + 1j * img_out[..., W:2 * W]).astype(jnp.complex64)
    kr = ksp_out[..., :CW].reshape(B, H, C, W)
    ki = ksp_out[..., CW:].reshape(B, H, C, W)
    est_ksp = jnp.transpose(kr + 1j * ki, (0, 2, 1, 3)).astype(jnp.complex64)
    return est_img, maps, est_ksp


# -----------------------------------------------------------------------------
# Pure-JAX reference of the same forward pass (jnp.fft based).
# -----------------------------------------------------------------------------

def _reference(maps, ksp, mask, l2lam, max_iter):
    m = mask[:, None].astype(jnp.complex64)

    def forward(x, msk):
        return msk * jnp.fft.fft2(maps * x[:, None], axes=(-2, -1))

    def adjoint(y, msk):
        return jnp.sum(jnp.conj(maps) * jnp.fft.ifft2(msk * y, axes=(-2, -1)), axis=1)

    def normal(x):
        return adjoint(forward(x, m), m)

    rhs = adjoint(ksp, m)
    x = rhs
    r = rhs - (normal(x) + l2lam * x)
    p = r
    rsold = jnp.sum(jnp.real(jnp.conj(r) * r), axis=(-2, -1), keepdims=True)
    for _ in range(max_iter):
        Ap = normal(p) + l2lam * p
        pAp = jnp.sum(jnp.real(jnp.conj(p) * Ap), axis=(-2, -1), keepdims=True)
        alpha = (rsold / pAp).astype(jnp.complex64)
        x = x + alpha * p
        r = r - alpha * Ap
        rsnew = jnp.sum(jnp.real(jnp.conj(r) * r), axis=(-2, -1), keepdims=True)
        beta = (rsnew / rsold).astype(jnp.complex64)
        p = r + beta * p
        rsold = rsnew
    est_ksp = jnp.fft.fft2(maps * x[:, None], axes=(-2, -1))
    return x, est_ksp


if __name__ == "__main__":
    B, C, H, W = 2, 4, 16, 16          # batch, coils (mps_kernel_shape[-3]), spatial
    l2lam_init = 0.05                  # block2_l2lam = l2lam_init * ones(1)
    block2_max_iter = 6

    key = jax.random.PRNGKey(0)
    k1, k2, k3, k4, k5 = jax.random.split(key, 5)

    # data['init_maps'] : complex sensitivity maps, normalized per pixel.
    maps = (jax.random.normal(k1, (B, C, H, W)) +
            1j * jax.random.normal(k2, (B, C, H, W))).astype(jnp.complex64)
    maps = maps / jnp.sqrt(jnp.sum(jnp.abs(maps) ** 2, axis=1, keepdims=True))

    # Synthetic ground-truth image, undersampling mask and measured k-space.
    gt = (jax.random.normal(k3, (B, H, W)) +
          1j * jax.random.normal(k4, (B, H, W))).astype(jnp.complex64)
    mask = (jax.random.uniform(k5, (B, H, W)) < 0.5).astype(jnp.float32)
    ksp = (mask[:, None].astype(jnp.complex64) *
           jnp.fft.fft2(maps * gt[:, None], axes=(-2, -1))).astype(jnp.complex64)

    run = jax.jit(functools.partial(
        modl_double_unroll, l2lam=l2lam_init, max_iter=block2_max_iter))
    est_img, est_maps, est_ksp = run(maps, ksp, mask)
    jax.block_until_ready((est_img, est_maps, est_ksp))

    ref_img, ref_ksp = _reference(maps, ksp, mask, l2lam_init, block2_max_iter)
    img_err = float(jnp.max(jnp.abs(est_img - ref_img)) /
                    (jnp.max(jnp.abs(ref_img)) + 1e-8))
    ksp_err = float(jnp.max(jnp.abs(est_ksp - ref_ksp)) /
                    (jnp.max(jnp.abs(ref_ksp)) + 1e-8))
    assert img_err < 1e-2 and ksp_err < 1e-2, (img_err, ksp_err)
    assert bool(jnp.all(est_maps == maps))

    print("KERNEL_OK")
</pallas_src>

<mosaic_0001>
module attributes {stable_mosaic.version = 11 : i64} {
  func.func @_modl_kernel(%arg0: i32, %arg1: memref<1xf32, #tpu.memory_space<smem>>, %arg2: memref<1x16x64xf32, #tpu.memory_space<vmem>>, %arg3: memref<1x16x64xf32, #tpu.memory_space<vmem>>, %arg4: memref<1x16x128xf32, #tpu.memory_space<vmem>>, %arg5: memref<1x16x128xf32, #tpu.memory_space<vmem>>, %arg6: memref<32x96xbf16, #tpu.memory_space<vmem>>, %arg7: memref<32x96xbf16, #tpu.memory_space<vmem>>, %arg8: memref<384x128xbf16, #tpu.memory_space<vmem>>, %arg9: memref<384x64xbf16, #tpu.memory_space<vmem>>, %arg10: memref<384x64xbf16, #tpu.memory_space<vmem>>, %arg11: memref<128x16xbf16, #tpu.memory_space<vmem>>, %arg12: memref<1x16x128xf32, #tpu.memory_space<vmem>>, %arg13: memref<1x16x128xf32, #tpu.memory_space<vmem>>) attributes {dimension_semantics = [#tpu.dimension_semantics<parallel>], iteration_bounds = array<i64: 2>, scalar_prefetch = 0 : i64, scratch_operands = 0 : i64, tpu.core_type = #tpu.core_type<tc>, window_params = [{transform_indices = @transform_0, window_bounds = array<i64: 1>}, {transform_indices = @transform_1, window_bounds = array<i64: 1, 16, 64>}, {transform_indices = @transform_2, window_bounds = array<i64: 1, 16, 64>}, {transform_indices = @transform_3, window_bounds = array<i64: 1, 16, 128>}, {transform_indices = @transform_4, window_bounds = array<i64: 1, 16, 128>}, {pipeline_mode = #tpu.pipeline_mode<synchronous>, transform_indices = @transform_5, window_bounds = array<i64: 32, 96>}, {pipeline_mode = #tpu.pipeline_mode<synchronous>, transform_indices = @transform_6, window_bounds = array<i64: 32, 96>}, {pipeline_mode = #tpu.pipeline_mode<synchronous>, transform_indices = @transform_7, window_bounds = array<i64: 384, 128>}, {pipeline_mode = #tpu.pipeline_mode<synchronous>, transform_indices = @transform_8, window_bounds = array<i64: 384, 64>}, {pipeline_mode = #tpu.pipeline_mode<synchronous>, transform_indices = @transform_9, window_bounds = array<i64: 384, 64>}, {pipeline_mode = #tpu.pipeline_mode<synchronous>, transform_indices = @transform_10, window_bounds = array<i64: 128, 16>}, {transform_indices = @transform_11, window_bounds = array<i64: 1, 16, 128>}, {transform_indices = @transform_12, window_bounds = array<i64: 1, 16, 128>}]} {
    %c0 = arith.constant 0 : index
    %0 = memref.load %arg1[%c0] : memref<1xf32, #tpu.memory_space<smem>>
    %c0_0 = arith.constant 0 : index
    %c0_1 = arith.constant 0 : index
    %c0_2 = arith.constant 0 : index
    %1 = vector.load %arg2[%c0_0, %c0_1, %c0_2] : memref<1x16x64xf32, #tpu.memory_space<vmem>>, vector<1x16x64xf32>
    %2 = vector.shape_cast %1 : vector<1x16x64xf32> to vector<16x64xf32>
    %c0_3 = arith.constant 0 : index
    %c0_4 = arith.constant 0 : index
    %c0_5 = arith.constant 0 : index
    %3 = vector.load %arg3[%c0_3, %c0_4, %c0_5] : memref<1x16x64xf32, #tpu.memory_space<vmem>>, vector<1x16x64xf32>
    %4 = vector.shape_cast %3 : vector<1x16x64xf32> to vector<16x64xf32>
    %c0_6 = arith.constant 0 : index
    %c0_7 = arith.constant 0 : index
    %c0_8 = arith.constant 0 : index
    %5 = vector.load %arg4[%c0_6, %c0_7, %c0_8] : memref<1x16x128xf32, #tpu.memory_space<vmem>>, vector<1x16x128xf32>
    %6 = vector.shape_cast %5 : vector<1x16x128xf32> to vector<16x128xf32>
    %c0_9 = arith.constant 0 : index
    %c0_10 = arith.constant 0 : index
    %c0_11 = arith.constant 0 : index
    %7 = vector.load %arg5[%c0_9, %c0_10, %c0_11] : memref<1x16x128xf32, #tpu.memory_space<vmem>>, vector<1x16x128xf32>
    %8 = vector.shape_cast %7 : vector<1x16x128xf32> to vector<16x128xf32>
    %c0_12 = arith.constant 0 : index
    %c0_13 = arith.constant 0 : index
    %9 = vector.load %arg6[%c0_12, %c0_13] : memref<32x96xbf16, #tpu.memory_space<vmem>>, vector<32x96xbf16>
    %c0_14 = arith.constant 0 : index
    %c0_15 = arith.constant 0 : index
    %10 = vector.load %arg7[%c0_14, %c0_15] : memref<32x96xbf16, #tpu.memory_space<vmem>>, vector<32x96xbf16>
    %c0_16 = arith.constant 0 : index
    %c0_17 = arith.constant 0 : index
    %11 = vector.load %arg8[%c0_16, %c0_17] : memref<384x128xbf16, #tpu.memory_space<vmem>>, vector<384x128xbf16>
    %c0_18 = arith.constant 0 : index
    %c0_19 = arith.constant 0 : index
    %12 = vector.load %arg9[%c0_18, %c0_19] : memref<384x64xbf16, #tpu.memory_space<vmem>>, vector<384x64xbf16>
    %c0_20 = arith.constant 0 : index
    %c0_21 = arith.constant 0 : index
    %13 = vector.load %arg10[%c0_20, %c0_21] : memref<384x64xbf16, #tpu.memory_space<vmem>>, vector<384x64xbf16>
    %c0_22 = arith.constant 0 : index
    %c0_23 = arith.constant 0 : index
    %14 = vector.load %arg11[%c0_22, %c0_23] : memref<128x16xbf16, #tpu.memory_space<vmem>>, vector<128x16xbf16>
    %15 = arith.mulf %6, %8 : vector<16x128xf32>
    %16 = arith.truncf %15 : vector<16x128xf32> to vector<16x128xbf16>
    %17 = arith.extf %16 : vector<16x128xbf16> to vector<16x128xf32>
    %18 = arith.subf %15, %17 : vector<16x128xf32>
    %19 = arith.truncf %18 : vector<16x128xf32> to vector<16x128xbf16>
    %20 = tpu.concatenate %16, %19, %16 in 1 : vector<16x128xbf16>, vector<16x128xbf16>, vector<16x128xbf16> -> vector<16x384xbf16>
    %cst = arith.constant dense<0.000000e+00> : vector<16x64xf32>
    %21 = tpu.matmul %20, %12, %cst {dimension_numbers = #tpu.dot_dimension_numbers<[1], [0], [0], [1], [0, 0, 1, 1], [], []>} : vector<16x384xbf16>, vector<384x64xbf16>, vector<16x64xf32> -> vector<16x64xf32>
    %cst_24 = arith.constant dense<0.000000e+00> : vector<16x64xf32>
    %22 = tpu.matmul %20, %13, %cst_24 {dimension_numbers = #tpu.dot_dimension_numbers<[1], [0], [0], [1], [0, 0, 1, 1], [], []>} : vector<16x384xbf16>, vector<384x64xbf16>, vector<16x64xf32> -> vector<16x64xf32>
    %23 = tpu.concatenate %21, %22 in 0 : vector<16x64xf32>, vector<16x64xf32> -> vector<32x64xf32>
    %24 = arith.truncf %23 : vector<32x64xf32> to vector<32x64xbf16>
    %25 = arith.extf %24 : vector<32x64xbf16> to vector<32x64xf32>
    %26 = arith.subf %23, %25 : vector<32x64xf32>
    %27 = arith.truncf %26 : vector<32x64xf32> to vector<32x64xbf16>
    %28 = tpu.concatenate %24, %27, %24 in 0 : vector<32x64xbf16>, vector<32x64xbf16>, vector<32x64xbf16> -> vector<96x64xbf16>
    %cst_25 = arith.constant dense<0.000000e+00> : vector<32x64xf32>
    %29 = tpu.matmul %10, %28, %cst_25 {dimension_numbers = #tpu.dot_dimension_numbers<[1], [0], [0], [1], [0, 0, 1, 1], [], []>} : vector<32x96xbf16>, vector<96x64xbf16>, vector<32x64xf32> -> vector<32x64xf32>
    %30 = vector.extract_strided_slice %29 {offsets = [0, 0], sizes = [16, 64], strides = [1, 1]} : vector<32x64xf32> to vector<16x64xf32>
    %31 = vector.extract_strided_slice %29 {offsets = [16, 0], sizes = [16, 64], strides = [1, 1]} : vector<32x64xf32> to vector<16x64xf32>
    %32 = arith.mulf %2, %30 : vector<16x64xf32>
    %33 = arith.mulf %4, %31 : vector<16x64xf32>
    %34 = arith.addf %32, %33 : vector<16x64xf32>
    %35 = arith.truncf %34 : vector<16x64xf32> to vector<16x64xbf16>
    %36 = arith.extf %35 : vector<16x64xbf16> to vector<16x64xf32>
    %37 = arith.subf %34, %36 : vector<16x64xf32>
    %38 = arith.truncf %37 : vector<16x64xf32> to vector<16x64xbf16>
    %39 = tpu.concatenate %35, %38 in 1 : vector<16x64xbf16>, vector<16x64xbf16> -> vector<16x128xbf16>
    %40 = arith.mulf %2, %31 : vector<16x64xf32>
    %41 = arith.mulf %4, %30 : vector<16x64xf32>
    %42 = arith.subf %40, %41 : vector<16x64xf32>
    %43 = arith.truncf %42 : vector<16x64xf32> to vector<16x64xbf16>
    %44 = arith.extf %43 : vector<16x64xbf16> to vector<16x64xf32>
    %45 = arith.subf %42, %44 : vector<16x64xf32>
    %46 = arith.truncf %45 : vector<16x64xf32> to vector<16x64xbf16>
    %47 = tpu.concatenate %43, %46 in 1 : vector<16x64xbf16>, vector<16x64xbf16> -> vector<16x128xbf16>
    %cst_26 = arith.constant dense<0.000000e+00> : vector<16x16xf32>
    %48 = tpu.matmul %39, %14, %cst_26 {dimension_numbers = #tpu.dot_dimension_numbers<[1], [0], [0], [1], [0, 0, 1, 1], [], []>} : vector<16x128xbf16>, vector<128x16xbf16>, vector<16x16xf32> -> vector<16x16xf32>
    %cst_27 = arith.constant dense<0.000000e+00> : vector<16x16xf32>
    %49 = tpu.matmul %47, %14, %cst_27 {dimension_numbers = #tpu.dot_dimension_numbers<[1], [0], [0], [1], [0, 0, 1, 1], [], []>} : vector<16x128xbf16>, vector<128x16xbf16>, vector<16x16xf32> -> vector<16x16xf32>
    %50 = tpu.concatenate %48, %48, %48, %48 in 1 : vector<16x16xf32>, vector<16x16xf32>, vector<16x16xf32>, vector<16x16xf32> -> vector<16x64xf32>
    %51 = tpu.concatenate %49, %49, %49, %49 in 1 : vector<16x16xf32>, vector<16x16xf32>, vector<16x16xf32>, vector<16x16xf32> -> vector<16x64xf32>
    %52 = arith.mulf %2, %50 : vector<16x64xf32>
    %53 = arith.mulf %4, %51 : vector<16x64xf32>
    %54 = arith.subf %52, %53 : vector<16x64xf32>
    %55 = arith.mulf %2, %51 : vector<16x64xf32>
    %56 = arith.mulf %4, %50 : vector<16x64xf32>
    %57 = arith.addf %55, %56 : vector<16x64xf32>
    %58 = tpu.concatenate %54, %57 in 0 : vector<16x64xf32>, vector<16x64xf32> -> vector<32x64xf32>
    %59 = arith.truncf %58 : vector<32x64xf32> to vector<32x64xbf16>
    %60 = arith.extf %59 : vector<32x64xbf16> to vector<32x64xf32>
    %61 = arith.subf %58, %60 : vector<32x64xf32>
    %62 = arith.truncf %61 : vector<32x64xf32> to vector<32x64xbf16>
    %63 = tpu.concatenate %59, %62, %59 in 0 : vector<32x64xbf16>, vector<32x64xbf16>, vector<32x64xbf16> -> vector<96x64xbf16>
    %cst_28 = arith.constant dense<0.000000e+00> : vector<32x64xf32>
    %64 = tpu.matmul %9, %63, %cst_28 {dimension_numbers = #tpu.dot_dimension_numbers<[1], [0], [0], [1], [0, 0, 1, 1], [], []>} : vector<32x96xbf16>, vector<96x64xbf16>, vector<32x64xf32> -> vector<32x64xf32>
    %65 = vector.extract_strided_slice %64 {offsets = [0, 0], sizes = [16, 64], strides = [1, 1]} : vector<32x64xf32> to vector<16x64xf32>
    %66 = vector.extract_strided_slice %64 {offsets = [16, 0], sizes = [16, 64], strides = [1, 1]} : vector<32x64xf32> to vector<16x64xf32>
    %67 = tpu.concatenate %65, %66 in 1 : vector<16x64xf32>, vector<16x64xf32> -> vector<16x128xf32>
    %68 = arith.truncf %67 : vector<16x128xf32> to vector<16x128xbf16>
    %69 = arith.extf %68 : vector<16x128xbf16> to vector<16x128xf32>
    %70 = arith.subf %67, %69 : vector<16x128xf32>
    %71 = arith.truncf %70 : vector<16x128xf32> to vector<16x128xbf16>
    %72 = tpu.concatenate %68, %71, %68 in 1 : vector<16x128xbf16>, vector<16x128xbf16>, vector<16x128xbf16> -> vector<16x384xbf16>
    %cst_29 = arith.constant dense<0.000000e+00> : vector<16x128xf32>
    %73 = tpu.matmul %72, %11, %cst_29 {dimension_numbers = #tpu.dot_dimension_numbers<[1], [0], [0], [1], [0, 0, 1, 1], [], []>} : vector<16x384xbf16>, vector<384x128xbf16>, vector<16x128xf32> -> vector<16x128xf32>
    %74 = arith.mulf %8, %73 : vector<16x128xf32>
    %75 = arith.mulf %74, %8 : vector<16x128xf32>
    %76 = arith.truncf %75 : vector<16x128xf32> to vector<16x128xbf16>
    %77 = arith.extf %76 : vector<16x128xbf16> to vector<16x128xf32>
    %78 = arith.subf %75, %77 : vector<16x128xf32>
    %79 = arith.truncf %78 : vector<16x128xf32> to vector<16x128xbf16>
    %80 = tpu.concatenate %76, %79, %76 in 1 : vector<16x128xbf16>, vector<16x128xbf16>, vector<16x128xbf16> -> vector<16x384xbf16>
    %cst_30 = arith.constant dense<0.000000e+00> : vector<16x64xf32>
    %81 = tpu.matmul %80, %12, %cst_30 {dimension_numbers = #tpu.dot_dimension_numbers<[1], [0], [0], [1], [0, 0, 1, 1], [], []>} : vector<16x384xbf16>, vector<384x64xbf16>, vector<16x64xf32> -> vector<16x64xf32>
    %cst_31 = arith.constant dense<0.000000e+00> : vector<16x64xf32>
    %82 = tpu.matmul %80, %13, %cst_31 {dimension_numbers = #tpu.dot_dimension_numbers<[1], [0], [0], [1], [0, 0, 1, 1], [], []>} : vector<16x384xbf16>, vector<384x64xbf16>, vector<16x64xf32> -> vector<16x64xf32>
    %83 = tpu.concatenate %81, %82 in 0 : vector<16x64xf32>, vector<16x64xf32> -> vector<32x64xf32>
    %84 = arith.truncf %83 : vector<32x64xf32> to vector<32x64xbf16>
    %85 = arith.extf %84 : vector<32x64xbf16> to vector<32x64xf32>
    %86 = arith.subf %83, %85 : vector<32x64xf32>
    %87 = arith.truncf %86 : vector<32x64xf32> to vector<32x64xbf16>
    %88 = tpu.concatenate %84, %87, %84 in 0 : vector<32x64xbf16>, vector<32x64xbf16>, vector<32x64xbf16> -> vector<96x64xbf16>
    %cst_32 = arith.constant dense<0.000000e+00> : vector<32x64xf32>
    %89 = tpu.matmul %10, %88, %cst_32 {dimension_numbers = #tpu.dot_dimension_numbers<[1], [0], [0], [1], [0, 0, 1, 1], [], []>} : vector<32x96xbf16>, vector<96x64xbf16>, vector<32x64xf32> -> vector<32x64xf32>
    %90 = vector.extract_strided_slice %89 {offsets = [0, 0], sizes = [16, 64], strides = [1, 1]} : vector<32x64xf32> to vector<16x64xf32>
    %91 = vector.extract_strided_slice %89 {offsets = [16, 0], sizes = [16, 64], strides = [1, 1]} : vector<32x64xf32> to vector<16x64xf32>
    %92 = arith.mulf %2, %90 : vector<16x64xf32>
    %93 = arith.mulf %4, %91 : vector<16x64xf32>
    %94 = arith.addf %92, %93 : vector<16x64xf32>
    %95 = arith.truncf %94 : vector<16x64xf32> to vector<16x64xbf16>
    %96 = arith.extf %95 : vector<16x64xbf16> to vector<16x64xf32>
    %97 = arith.subf %94, %96 : vector<16x64xf32>
    %98 = arith.truncf %97 : vector<16x64xf32> to vector<16x64xbf16>
    %99 = tpu.concatenate %95, %98 in 1 : vector<16x64xbf16>, vector<16x64xbf16> -> vector<16x128xbf16>
    %100 = arith.mulf %2, %91 : vector<16x64xf32>
    %101 = arith.mulf %4, %90 : vector<16x64xf32>
    %102 = arith.subf %100, %101 : vector<16x64xf32>
    %103 = arith.truncf %102 : vector<16x64xf32> to vector<16x64xbf16>
    %104 = arith.extf %103 : vector<16x64xbf16> to vector<16x64xf32>
    %105 = arith.subf %102, %104 : vector<16x64xf32>
    %106 = arith.truncf %105 : vector<16x64xf32> to vector<16x64xbf16>
    %107 = tpu.concatenate %103, %106 in 1 : vector<16x64xbf16>, vector<16x64xbf16> -> vector<16x128xbf16>
    %cst_33 = arith.constant dense<0.000000e+00> : vector<16x16xf32>
    %108 = tpu.matmul %99, %14, %cst_33 {dimension_numbers = #tpu.dot_dimension_numbers<[1], [0], [0], [1], [0, 0, 1, 1], [], []>} : vector<16x128xbf16>, vector<128x16xbf16>, vector<16x16xf32> -> vector<16x16xf32>
    %cst_34 = arith.constant dense<0.000000e+00> : vector<16x16xf32>
    %109 = tpu.matmul %107, %14, %cst_34 {dimension_numbers = #tpu.dot_dimension_numbers<[1], [0], [0], [1], [0, 0, 1, 1], [], []>} : vector<16x128xbf16>, vector<128x16xbf16>, vector<16x16xf32> -> vector<16x16xf32>
    %110 = vector.broadcast %0 : f32 to vector<16x16xf32>
    %111 = arith.mulf %110, %48 : vector<16x16xf32>
    %112 = arith.addf %108, %111 : vector<16x16xf32>
    %113 = arith.subf %48, %112 : vector<16x16xf32>
    %114 = vector.broadcast %0 : f32 to vector<16x16xf32>
    %115 = arith.mulf %114, %49 : vector<16x16xf32>
    %116 = arith.addf %109, %115 : vector<16x16xf32>
    %117 = arith.subf %49, %116 : vector<16x16xf32>
    %118 = arith.mulf %113, %113 : vector<16x16xf32>
    %119 = arith.mulf %117, %117 : vector<16x16xf32>
    %120 = arith.addf %118, %119 : vector<16x16xf32>
    %121 = vector.shape_cast %120 : vector<16x16xf32> to vector<1x16x16xf32>
    %cst_35 = arith.constant dense<0.000000e+00> : vector<1xf32>
    %122 = vector.multi_reduction <add>, %121, %cst_35 [1, 2] : vector<1x16x16xf32> to vector<1xf32>
    %123 = vector.shape_cast %122 : vector<1xf32> to vector<1x1x1xf32>
    %124 = vector.extract %123[0, 0, 0] : f32 from vector<1x1x1xf32>
    %125 = vector.broadcast %124 : f32 to vector<1x1xf32>
    %c0_i32 = arith.constant 0 : i32
    %126 = tpu.concatenate %113, %113, %113, %113 in 1 : vector<16x16xf32>, vector<16x16xf32>, vector<16x16xf32>, vector<16x16xf32> -> vector<16x64xf32>
    %127 = tpu.concatenate %117, %117, %117, %117 in 1 : vector<16x16xf32>, vector<16x16xf32>, vector<16x16xf32>, vector<16x16xf32> -> vector<16x64xf32>
    %128 = arith.mulf %2, %126 : vector<16x64xf32>
    %129 = arith.mulf %4, %127 : vector<16x64xf32>
    %130 = arith.subf %128, %129 : vector<16x64xf32>
    %131 = arith.mulf %2, %127 : vector<16x64xf32>
    %132 = arith.mulf %4, %126 : vector<16x64xf32>
    %133 = arith.addf %131, %132 : vector<16x64xf32>
    %134 = tpu.concatenate %130, %133 in 0 : vector<16x64xf32>, vector<16x64xf32> -> vector<32x64xf32>
    %135 = arith.truncf %134 : vector<32x64xf32> to vector<32x64xbf16>
    %136 = arith.extf %135 : vector<32x64xbf16> to vector<32x64xf32>
    %137 = arith.subf %134, %136 : vector<32x64xf32>
    %138 = arith.truncf %137 : vector<32x64xf32> to vector<32x64xbf16>
    %139 = tpu.concatenate %135, %138, %135 in 0 : vector<32x64xbf16>, vector<32x64xbf16>, vector<32x64xbf16> -> vector<96x64xbf16>
    %cst_36 = arith.constant dense<0.000000e+00> : vector<32x64xf32>
    %140 = tpu.matmul %9, %139, %cst_36 {dimension_numbers = #tpu.dot_dimension_numbers<[1], [0], [0], [1], [0, 0, 1, 1], [], []>} : vector<32x96xbf16>, vector<96x64xbf16>, vector<32x64xf32> -> vector<32x64xf32>
    %141 = vector.extract_strided_slice %140 {offsets = [0, 0], sizes = [16, 64], strides = [1, 1]} : vector<32x64xf32> to vector<16x64xf32>
    %142 = vector.extract_strided_slice %140 {offsets = [16, 0], sizes = [16, 64], strides = [1, 1]} : vector<32x64xf32> to vector<16x64xf32>
    %143 = tpu.concatenate %141, %142 in 1 : vector<16x64xf32>, vector<16x64xf32> -> vector<16x128xf32>
    %144 = arith.truncf %143 : vector<16x128xf32> to vector<16x128xbf16>
    %145 = arith.extf %144 : vector<16x128xbf16> to vector<16x128xf32>
    %146 = arith.subf %143, %145 : vector<16x128xf32>
    %147 = arith.truncf %146 : vector<16x128xf32> to vector<16x128xbf16>
    %148 = tpu.concatenate %144, %147, %144 in 1 : vector<16x128xbf16>, vector<16x128xbf16>, vector<16x128xbf16> -> vector<16x384xbf16>
    %cst_37 = arith.constant dense<0.000000e+00> : vector<16x128xf32>
    %149 = tpu.matmul %148, %11, %cst_37 {dimension_numbers = #tpu.dot_dimension_numbers<[1], [0], [0], [1], [0, 0, 1, 1], [], []>} : vector<16x384xbf16>, vector<384x128xbf16>, vector<16x128xf32> -> vector<16x128xf32>
    %150 = arith.mulf %8, %149 : vector<16x128xf32>
    %151 = arith.mulf %150, %8 : vector<16x128xf32>
    %152 = arith.truncf %151 : vector<16x128xf32> to vector<16x128xbf16>
    %153 = arith.extf %152 : vector<16x128xbf16> to vector<16x128xf32>
    %154 = arith.subf %151, %153 : vector<16x128xf32>
    %155 = arith.truncf %154 : vector<16x128xf32> to vector<16x128xbf16>
    %156 = tpu.concatenate %152, %155, %152 in 1 : vector<16x128xbf16>, vector<16x128xbf16>, vector<16x128xbf16> -> vector<16x384xbf16>
    %cst_38 = arith.constant dense<0.000000e+00> : vector<16x64xf32>
    %157 = tpu.matmul %156, %12, %cst_38 {dimension_numbers = #tpu.dot_dimension_numbers<[1], [0], [0], [1], [0, 0, 1, 1], [], []>} : vector<16x384xbf16>, vector<384x64xbf16>, vector<16x64xf32> -> vector<16x64xf32>
    %cst_39 = arith.constant dense<0.000000e+00> : vector<16x64xf32>
    %158 = tpu.matmul %156, %13, %cst_39 {dimension_numbers = #tpu.dot_dimension_numbers<[1], [0], [0], [1], [0, 0, 1, 1], [], []>} : vector<16x384xbf16>, vector<384x64xbf16>, vector<16x64xf32> -> vector<16x64xf32>
    %159 = tpu.concatenate %157, %158 in 0 : vector<16x64xf32>, vector<16x64xf32> -> vector<32x64xf32>
    %160 = arith.truncf %159 : vector<32x64xf32> to vector<32x64xbf16>
    %161 = arith.extf %160 : vector<32x64xbf16> to vector<32x64xf32>
    %162 = arith.subf %159, %161 : vector<32x64xf32>
    %163 = arith.truncf %162 : vector<32x64xf32> to vector<32x64xbf16>
    %164 = tpu.concatenate %160, %163, %160 in 0 : vector<32x64xbf16>, vector<32x64xbf16>, vector<32x64xbf16> -> vector<96x64xbf16>
    %cst_40 = arith.constant dense<0.000000e+00> : vector<32x64xf32>
    %165 = tpu.matmul %10, %164, %cst_40 {dimension_numbers = #tpu.dot_dimension_numbers<[1], [0], [0], [1], [0, 0, 1, 1], [], []>} : vector<32x96xbf16>, vector<96x64xbf16>, vector<32x64xf32> -> vector<32x64xf32>
    %166 = vector.extract_strided_slice %165 {offsets = [0, 0], sizes = [16, 64], strides = [1, 1]} : vector<32x64xf32> to vector<16x64xf32>
    %167 = vector.extract_strided_slice %165 {offsets = [16, 0], sizes = [16, 64], strides = [1, 1]} : vector<32x64xf32> to vector<16x64xf32>
    %168 = arith.mulf %2, %166 : vector<16x64xf32>
    %169 = arith.mulf %4, %167 : vector<16x64xf32>
    %170 = arith.addf %168, %169 : vector<16x64xf32>
    %171 = arith.truncf %170 : vector<16x64xf32> to vector<16x64xbf16>
    %172 = arith.extf %171 : vector<16x64xbf16> to vector<16x64xf32>
    %173 = arith.subf %170, %172 : vector<16x64xf32>
    %174 = arith.truncf %173 : vector<16x64xf32> to vector<16x64xbf16>
    %175 = tpu.concatenate %171, %174 in 1 : vector<16x64xbf16>, vector<16x64xbf16> -> vector<16x128xbf16>
    %176 = arith.mulf %2, %167 : vector<16x64xf32>
    %177 = arith.mulf %4, %166 : vector<16x64xf32>
    %178 = arith.subf %176, %177 : vector<16x64xf32>
    %179 = arith.truncf %178 : vector<16x64xf32> to vector<16x64xbf16>
    %180 = arith.extf %179 : vector<16x64xbf16> to vector<16x64xf32>
    %181 = arith.subf %178, %180 : vector<16x64xf32>
    %182 = arith.truncf %181 : vector<16x64xf32> to vector<16x64xbf16>
    %183 = tpu.concatenate %179, %182 in 1 : vector<16x64xbf16>, vector<16x64xbf16> -> vector<16x128xbf16>
    %cst_41 = arith.constant dense<0.000000e+00> : vector<16x16xf32>
    %184 = tpu.matmul %175, %14, %cst_41 {dimension_numbers = #tpu.dot_dimension_numbers<[1], [0], [0], [1], [0, 0, 1, 1], [], []>} : vector<16x128xbf16>, vector<128x16xbf16>, vector<16x16xf32> -> vector<16x16xf32>
    %cst_42 = arith.constant dense<0.000000e+00> : vector<16x16xf32>
    %185 = tpu.matmul %183, %14, %cst_42 {dimension_numbers = #tpu.dot_dimension_numbers<[1], [0], [0], [1], [0, 0, 1, 1], [], []>} : vector<16x128xbf16>, vector<128x16xbf16>, vector<16x16xf32> -> vector<16x16xf32>
    %186 = vector.broadcast %0 : f32 to vector<16x16xf32>
    %187 = arith.mulf %186, %113 : vector<16x16xf32>
    %188 = arith.addf %184, %187 : vector<16x16xf32>
    %189 = vector.broadcast %0 : f32 to vector<16x16xf32>
    %190 = arith.mulf %189, %117 : vector<16x16xf32>
    %191 = arith.addf %185, %190 : vector<16x16xf32>
    %192 = arith.mulf %113, %188 : vector<16x16xf32>
    %193 = arith.mulf %117, %191 : vector<16x16xf32>
    %194 = arith.addf %192, %193 : vector<16x16xf32>
    %195 = vector.shape_cast %194 : vector<16x16xf32> to vector<1x16x16xf32>
    %cst_43 = arith.constant dense<0.000000e+00> : vector<1xf32>
    %196 = vector.multi_reduction <add>, %195, %cst_43 [1, 2] : vector<1x16x16xf32> to vector<1xf32>
    %197 = vector.shape_cast %196 : vector<1xf32> to vector<1x1x1xf32>
    %198 = vector.extract %197[0, 0, 0] : f32 from vector<1x1x1xf32>
    %199 = vector.broadcast %198 : f32 to vector<1x1xf32>
    %cst_44 = arith.constant 1.000000e-30 : f32
    %200 = vector.broadcast %cst_44 : f32 to vector<1x1xf32>
    %201 = arith.addf %199, %200 : vector<1x1xf32>
    %202 = arith.divf %125, %201 : vector<1x1xf32>
    %203 = vector.broadcast %202 : vector<1x1xf32> to vector<16x16xf32>
    %204 = arith.mulf %203, %113 : vector<16x16xf32>
    %205 = arith.addf %48, %204 : vector<16x16xf32>
    %206 = vector.broadcast %202 : vector<1x1xf32> to vector<16x16xf32>
    %207 = arith.mulf %206, %117 : vector<16x16xf32>
    %208 = arith.addf %49, %207 : vector<16x16xf32>
    %209 = vector.broadcast %202 : vector<1x1xf32> to vector<16x16xf32>
    %210 = arith.mulf %209, %188 : vector<16x16xf32>
    %211 = arith.subf %113, %210 : vector<16x16xf32>
    %212 = vector.broadcast %202 : vector<1x1xf32> to vector<16x16xf32>
    %213 = arith.mulf %212, %191 : vector<16x16xf32>
    %214 = arith.subf %117, %213 : vector<16x16xf32>
    %215 = arith.mulf %211, %211 : vector<16x16xf32>
    %216 = arith.mulf %214, %214 : vector<16x16xf32>
    %217 = arith.addf %215, %216 : vector<16x16xf32>
    %218 = vector.shape_cast %217 : vector<16x16xf32> to vector<1x16x16xf32>
    %cst_45 = arith.constant dense<0.000000e+00> : vector<1xf32>
    %219 = vector.multi_reduction <add>, %218, %cst_45 [1, 2] : vector<1x16x16xf32> to vector<1xf32>
    %220 = vector.shape_cast %219 : vector<1xf32> to vector<1x1x1xf32>
    %221 = vector.extract %220[0, 0, 0] : f32 from vector<1x1x1xf32>
    %222 = vector.broadcast %221 : f32 to vector<1x1xf32>
    %cst_46 = arith.constant 1.000000e-30 : f32
    %223 = vector.broadcast %cst_46 : f32 to vector<1x1xf32>
    %224 = arith.addf %125, %223 : vector<1x1xf32>
    %225 = arith.divf %222, %224 : vector<1x1xf32>
    %226 = vector.broadcast %225 : vector<1x1xf32> to vector<16x16xf32>
    %227 = arith.mulf %226, %113 : vector<16x16xf32>
    %228 = arith.addf %211, %227 : vector<16x16xf32>
    %229 = vector.broadcast %225 : vector<1x1xf32> to vector<16x16xf32>
    %230 = arith.mulf %229, %117 : vector<16x16xf32>
    %231 = arith.addf %214, %230 : vector<16x16xf32>
    %c1_i32 = arith.constant 1 : i32
    %232 = tpu.concatenate %228, %228, %228, %228 in 1 : vector<16x16xf32>, vector<16x16xf32>, vector<16x16xf32>, vector<16x16xf32> -> vector<16x64xf32>
    %233 = tpu.concatenate %231, %231, %231, %231 in 1 : vector<16x16xf32>, vector<16x16xf32>, vector<16x16xf32>, vector<16x16xf32> -> vector<16x64xf32>
    %234 = arith.mulf %2, %232 : vector<16x64xf32>
    %235 = arith.mulf %4, %233 : vector<16x64xf32>
    %236 = arith.subf %234, %235 : vector<16x64xf32>
    %237 = arith.mulf %2, %233 : vector<16x64xf32>
    %238 = arith.mulf %4, %232 : vector<16x64xf32>
    %239 = arith.addf %237, %238 : vector<16x64xf32>
    %240 = tpu.concatenate %236, %239 in 0 : vector<16x64xf32>, vector<16x64xf32> -> vector<32x64xf32>
    %241 = arith.truncf %240 : vector<32x64xf32> to vector<32x64xbf16>
    %242 = arith.extf %241 : vector<32x64xbf16> to vector<32x64xf32>
    %243 = arith.subf %240, %242 : vector<32x64xf32>
    %244 = arith.truncf %243 : vector<32x64xf32> to vector<32x64xbf16>
    %245 = tpu.concatenate %241, %244, %241 in 0 : vector<32x64xbf16>, vector<32x64xbf16>, vector<32x64xbf16> -> vector<96x64xbf16>
    %cst_47 = arith.constant dense<0.000000e+00> : vector<32x64xf32>
    %246 = tpu.matmul %9, %245, %cst_47 {dimension_numbers = #tpu.dot_dimension_numbers<[1], [0], [0], [1], [0, 0, 1, 1], [], []>} : vector<32x96xbf16>, vector<96x64xbf16>, vector<32x64xf32> -> vector<32x64xf32>
    %247 = vector.extract_strided_slice %246 {offsets = [0, 0], sizes = [16, 64], strides = [1, 1]} : vector<32x64xf32> to vector<16x64xf32>
    %248 = vector.extract_strided_slice %246 {offsets = [16, 0], sizes = [16, 64], strides = [1, 1]} : vector<32x64xf32> to vector<16x64xf32>
    %249 = tpu.concatenate %247, %248 in 1 : vector<16x64xf32>, vector<16x64xf32> -> vector<16x128xf32>
    %250 = arith.truncf %249 : vector<16x128xf32> to vector<16x128xbf16>
    %251 = arith.extf %250 : vector<16x128xbf16> to vector<16x128xf32>
    %252 = arith.subf %249, %251 : vector<16x128xf32>
    %253 = arith.truncf %252 : vector<16x128xf32> to vector<16x128xbf16>
    %254 = tpu.concatenate %250, %253, %250 in 1 : vector<16x128xbf16>, vector<16x128xbf16>, vector<16x128xbf16> -> vector<16x384xbf16>
    %cst_48 = arith.constant dense<0.000000e+00> : vector<16x128xf32>
    %255 = tpu.matmul %254, %11, %cst_48 {dimension_numbers = #tpu.dot_dimension_numbers<[1], [0], [0], [1], [0, 0, 1, 1], [], []>} : vector<16x384xbf16>, vector<384x128xbf16>, vector<16x128xf32> -> vector<16x128xf32>
    %256 = arith.mulf %8, %255 : vector<16x128xf32>
    %257 = arith.mulf %256, %8 : vector<16x128xf32>
    %258 = arith.truncf %257 : vector<16x128xf32> to vector<16x128xbf16>
    %259 = arith.extf %258 : vector<16x128xbf16> to vector<16x128xf32>
    %260 = arith.subf %257, %259 : vector<16x128xf32>
    %261 = arith.truncf %260 : vector<16x128xf32> to vector<16x128xbf16>
    %262 = tpu.concatenate %258, %261, %258 in 1 : vector<16x128xbf16>, vector<16x128xbf16>, vector<16x128xbf16> -> vector<16x384xbf16>
    %cst_49 = arith.constant dense<0.000000e+00> : vector<16x64xf32>
    %263 = tpu.matmul %262, %12, %cst_49 {dimension_numbers = #tpu.dot_dimension_numbers<[1], [0], [0], [1], [0, 0, 1, 1], [], []>} : vector<16x384xbf16>, vector<384x64xbf16>, vector<16x64xf32> -> vector<16x64xf32>
    %cst_50 = arith.constant dense<0.000000e+00> : vector<16x64xf32>
    %264 = tpu.matmul %262, %13, %cst_50 {dimension_numbers = #tpu.dot_dimension_numbers<[1], [0], [0], [1], [0, 0, 1, 1], [], []>} : vector<16x384xbf16>, vector<384x64xbf16>, vector<16x64xf32> -> vector<16x64xf32>
    %265 = tpu.concatenate %263, %264 in 0 : vector<16x64xf32>, vector<16x64xf32> -> vector<32x64xf32>
    %266 = arith.truncf %265 : vector<32x64xf32> to vector<32x64xbf16>
    %267 = arith.extf %266 : vector<32x64xbf16> to vector<32x64xf32>
    %268 = arith.subf %265, %267 : vector<32x64xf32>
    %269 = arith.truncf %268 : vector<32x64xf32> to vector<32x64xbf16>
    %270 = tpu.concatenate %266, %269, %266 in 0 : vector<32x64xbf16>, vector<32x64xbf16>, vector<32x64xbf16> -> vector<96x64xbf16>
    %cst_51 = arith.constant dense<0.000000e+00> : vector<32x64xf32>
    %271 = tpu.matmul %10, %270, %cst_51 {dimension_numbers = #tpu.dot_dimension_numbers<[1], [0], [0], [1], [0, 0, 1, 1], [], []>} : vector<32x96xbf16>, vector<96x64xbf16>, vector<32x64xf32> -> vector<32x64xf32>
    %272 = vector.extract_strided_slice %271 {offsets = [0, 0], sizes = [16, 64], strides = [1, 1]} : vector<32x64xf32> to vector<16x64xf32>
    %273 = vector.extract_strided_slice %271 {offsets = [16, 0], sizes = [16, 64], strides = [1, 1]} : vector<32x64xf32> to vector<16x64xf32>
    %274 = arith.mulf %2, %272 : vector<16x64xf32>
    %275 = arith.mulf %4, %273 : vector<16x64xf32>
    %276 = arith.addf %274, %275 : vector<16x64xf32>
    %277 = arith.truncf %276 : vector<16x64xf32> to vector<16x64xbf16>
    %278 = arith.extf %277 : vector<16x64xbf16> to vector<16x64xf32>
    %279 = arith.subf %276, %278 : vector<16x64xf32>
    %280 = arith.truncf %279 : vector<16x64xf32> to vector<16x64xbf16>
    %281 = tpu.concatenate %277, %280 in 1 : vector<16x64xbf16>, vector<16x64xbf16> -> vector<16x128xbf16>
    %282 = arith.mulf %2, %273 : vector<16x64xf32>
    %283 = arith.mulf %4, %272 : vector<16x64xf32>
    %284 = arith.subf %282, %283 : vector<16x64xf32>
    %285 = arith.truncf %284 : vector<16x64xf32> to vector<16x64xbf16>
    %286 = arith.extf %285 : vector<16x64xbf16> to vector<16x64xf32>
    %287 = arith.subf %284, %286 : vector<16x64xf32>
    %288 = arith.truncf %287 : vector<16x64xf32> to vector<16x64xbf16>
    %289 = tpu.concatenate %285, %288 in 1 : vector<16x64xbf16>, vector<16x64xbf16> -> vector<16x128xbf16>
    %cst_52 = arith.constant dense<0.000000e+00> : vector<16x16xf32>
    %290 = tpu.matmul %281, %14, %cst_52 {dimension_numbers = #tpu.dot_dimension_numbers<[1], [0], [0], [1], [0, 0, 1, 1], [], []>} : vector<16x128xbf16>, vector<128x16xbf16>, vector<16x16xf32> -> vector<16x16xf32>
    %cst_53 = arith.constant dense<0.000000e+00> : vector<16x16xf32>
    %291 = tpu.matmul %289, %14, %cst_53 {dimension_numbers = #tpu.dot_dimension_numbers<[1], [0], [0], [1], [0, 0, 1, 1], [], []>} : vector<16x128xbf16>, vector<128x16xbf16>, vector<16x16xf32> -> vector<16x16xf32>
    %292 = vector.broadcast %0 : f32 to vector<16x16xf32>
    %293 = arith.mulf %292, %228 : vector<16x16xf32>
    %294 = arith.addf %290, %293 : vector<16x16xf32>
    %295 = vector.broadcast %0 : f32 to vector<16x16xf32>
    %296 = arith.mulf %295, %231 : vector<16x16xf32>
    %297 = arith.addf %291, %296 : vector<16x16xf32>
    %298 = arith.mulf %228, %294 : vector<16x16xf32>
    %299 = arith.mulf %231, %297 : vector<16x16xf32>
    %300 = arith.addf %298, %299 : vector<16x16xf32>
    %301 = vector.shape_cast %300 : vector<16x16xf32> to vector<1x16x16xf32>
    %cst_54 = arith.constant dense<0.000000e+00> : vector<1xf32>
    %302 = vector.multi_reduction <add>, %301, %cst_54 [1, 2] : vector<1x16x16xf32> to vector<1xf32>
    %303 = vector.shape_cast %302 : vector<1xf32> to vector<1x1x1xf32>
    %304 = vector.extract %303[0, 0, 0] : f32 from vector<1x1x1xf32>
    %305 = vector.broadcast %304 : f32 to vector<1x1xf32>
    %cst_55 = arith.constant 1.000000e-30 : f32
    %306 = vector.broadcast %cst_55 : f32 to vector<1x1xf32>
    %307 = arith.addf %305, %306 : vector<1x1xf32>
    %308 = arith.divf %222, %307 : vector<1x1xf32>
    %309 = vector.broadcast %308 : vector<1x1xf32> to vector<16x16xf32>
    %310 = arith.mulf %309, %228 : vector<16x16xf32>
    %311 = arith.addf %205, %310 : vector<16x16xf32>
    %312 = vector.broadcast %308 : vector<1x1xf32> to vector<16x16xf32>
    %313 = arith.mulf %312, %231 : vector<16x16xf32>
    %314 = arith.addf %208, %313 : vector<16x16xf32>
    %315 = vector.broadcast %308 : vector<1x1xf32> to vector<16x16xf32>
    %316 = arith.mulf %315, %294 : vector<16x16xf32>
    %317 = arith.subf %211, %316 : vector<16x16xf32>
    %318 = vector.broadcast %308 : vector<1x1xf32> to vector<16x16xf32>
    %319 = arith.mulf %318, %297 : vector<16x16xf32>
    %320 = arith.subf %214, %319 : vector<16x16xf32>
    %321 = arith.mulf %317, %317 : vector<16x16xf32>
    %322 = arith.mulf %320, %320 : vector<16x16xf32>
    %323 = arith.addf %321, %322 : vector<16x16xf32>
    %324 = vector.shape_cast %323 : vector<16x16xf32> to vector<1x16x16xf32>
    %cst_56 = arith.constant dense<0.000000e+00> : vector<1xf32>
    %325 = vector.multi_reduction <add>, %324, %cst_56 [1, 2] : vector<1x16x16xf32> to vector<1xf32>
    %326 = vector.shape_cast %325 : vector<1xf32> to vector<1x1x1xf32>
    %327 = vector.extract %326[0, 0, 0] : f32 from vector<1x1x1xf32>
    %328 = vector.broadcast %327 : f32 to vector<1x1xf32>
    %cst_57 = arith.constant 1.000000e-30 : f32
    %329 = vector.broadcast %cst_57 : f32 to vector<1x1xf32>
    %330 = arith.addf %222, %329 : vector<1x1xf32>
    %331 = arith.divf %328, %330 : vector<1x1xf32>
    %332 = vector.broadcast %331 : vector<1x1xf32> to vector<16x16xf32>
    %333 = arith.mulf %332, %228 : vector<16x16xf32>
    %334 = arith.addf %317, %333 : vector<16x16xf32>
    %335 = vector.broadcast %331 : vector<1x1xf32> to vector<16x16xf32>
    %336 = arith.mulf %335, %231 : vector<16x16xf32>
    %337 = arith.addf %320, %336 : vector<16x16xf32>
    %c2_i32 = arith.constant 2 : i32
    %338 = tpu.concatenate %334, %334, %334, %334 in 1 : vector<16x16xf32>, vector<16x16xf32>, vector<16x16xf32>, vector<16x16xf32> -> vector<16x64xf32>
    %339 = tpu.concatenate %337, %337, %337, %337 in 1 : vector<16x16xf32>, vector<16x16xf32>, vector<16x16xf32>, vector<16x16xf32> -> vector<16x64xf32>
    %340 = arith.mulf %2, %338 : vector<16x64xf32>
    %341 = arith.mulf %4, %339 : vector<16x64xf32>
    %342 = arith.subf %340, %341 : vector<16x64xf32>
    %343 = arith.mulf %2, %339 : vector<16x64xf32>
    %344 = arith.mulf %4, %338 : vector<16x64xf32>
    %345 = arith.addf %343, %344 : vector<16x64xf32>
    %346 = tpu.concatenate %342, %345 in 0 : vector<16x64xf32>, vector<16x64xf32> -> vector<32x64xf32>
    %347 = arith.truncf %346 : vector<32x64xf32> to vector<32x64xbf16>
    %348 = arith.extf %347 : vector<32x64xbf16> to vector<32x64xf32>
    %349 = arith.subf %346, %348 : vector<32x64xf32>
    %350 = arith.truncf %349 : vector<32x64xf32> to vector<32x64xbf16>
    %351 = tpu.concatenate %347, %350, %347 in 0 : vector<32x64xbf16>, vector<32x64xbf16>, vector<32x64xbf16> -> vector<96x64xbf16>
    %cst_58 = arith.constant dense<0.000000e+00> : vector<32x64xf32>
    %352 = tpu.matmul %9, %351, %cst_58 {dimension_numbers = #tpu.dot_dimension_numbers<[1], [0], [0], [1], [0, 0, 1, 1], [], []>} : vector<32x96xbf16>, vector<96x64xbf16>, vector<32x64xf32> -> vector<32x64xf32>
    %353 = vector.extract_strided_slice %352 {offsets = [0, 0], sizes = [16, 64], strides = [1, 1]} : vector<32x64xf32> to vector<16x64xf32>
    %354 = vector.extract_strided_slice %352 {offsets = [16, 0], sizes = [16, 64], strides = [1, 1]} : vector<32x64xf32> to vector<16x64xf32>
    %355 = tpu.concatenate %353, %354 in 1 : vector<16x64xf32>, vector<16x64xf32> -> vector<16x128xf32>
    %356 = arith.truncf %355 : vector<16x128xf32> to vector<16x128xbf16>
    %357 = arith.extf %356 : vector<16x128xbf16> to vector<16x128xf32>
    %358 = arith.subf %355, %357 : vector<16x128xf32>
    %359 = arith.truncf %358 : vector<16x128xf32> to vector<16x128xbf16>
    %360 = tpu.concatenate %356, %359, %356 in 1 : vector<16x128xbf16>, vector<16x128xbf16>, vector<16x128xbf16> -> vector<16x384xbf16>
    %cst_59 = arith.constant dense<0.000000e+00> : vector<16x128xf32>
    %361 = tpu.matmul %360, %11, %cst_59 {dimension_numbers = #tpu.dot_dimension_numbers<[1], [0], [0], [1], [0, 0, 1, 1], [], []>} : vector<16x384xbf16>, vector<384x128xbf16>, vector<16x128xf32> -> vector<16x128xf32>
    %362 = arith.mulf %8, %361 : vector<16x128xf32>
    %363 = arith.mulf %362, %8 : vector<16x128xf32>
    %364 = arith.truncf %363 : vector<16x128xf32> to vector<16x128xbf16>
    %365 = arith.extf %364 : vector<16x128xbf16> to vector<16x128xf32>
    %366 = arith.subf %363, %365 : vector<16x128xf32>
    %367 = arith.truncf %366 : vector<16x128xf32> to vector<16x128xbf16>
    %368 = tpu.concatenate %364, %367, %364 in 1 : vector<16x128xbf16>, vector<16x128xbf16>, vector<16x128xbf16> -> vector<16x384xbf16>
    %cst_60 = arith.constant dense<0.000000e+00> : vector<16x64xf32>
    %369 = tpu.matmul %368, %12, %cst_60 {dimension_numbers = #tpu.dot_dimension_numbers<[1], [0], [0], [1], [0, 0, 1, 1], [], []>} : vector<16x384xbf16>, vector<384x64xbf16>, vector<16x64xf32> -> vector<16x64xf32>
    %cst_61 = arith.constant dense<0.000000e+00> : vector<16x64xf32>
    %370 = tpu.matmul %368, %13, %cst_61 {dimension_numbers = #tpu.dot_dimension_numbers<[1], [0], [0], [1], [0, 0, 1, 1], [], []>} : vector<16x384xbf16>, vector<384x64xbf16>, vector<16x64xf32> -> vector<16x64xf32>
    %371 = tpu.concatenate %369, %370 in 0 : vector<16x64xf32>, vector<16x64xf32> -> vector<32x64xf32>
    %372 = arith.truncf %371 : vector<32x64xf32> to vector<32x64xbf16>
    %373 = arith.extf %372 : vector<32x64xbf16> to vector<32x64xf32>
    %374 = arith.subf %371, %373 : vector<32x64xf32>
    %375 = arith.truncf %374 : vector<32x64xf32> to vector<32x64xbf16>
    %376 = tpu.concatenate %372, %375, %372 in 0 : vector<32x64xbf16>, vector<32x64xbf16>, vector<32x64xbf16> -> vector<96x64xbf16>
    %cst_62 = arith.constant dense<0.000000e+00> : vector<32x64xf32>
    %377 = tpu.matmul %10, %376, %cst_62 {dimension_numbers = #tpu.dot_dimension_numbers<[1], [0], [0], [1], [0, 0, 1, 1], [], []>} : vector<32x96xbf16>, vector<96x64xbf16>, vector<32x64xf32> -> vector<32x64xf32>
    %378 = vector.extract_strided_slice %377 {offsets = [0, 0], sizes = [16, 64], strides = [1, 1]} : vector<32x64xf32> to vector<16x64xf32>
    %379 = vector.extract_strided_slice %377 {offsets = [16, 0], sizes = [16, 64], strides = [1, 1]} : vector<32x64xf32> to vector<16x64xf32>
    %380 = arith.mulf %2, %378 : vector<16x64xf32>
    %381 = arith.mulf %4, %379 : vector<16x64xf32>
    %382 = arith.addf %380, %381 : vector<16x64xf32>
    %383 = arith.truncf %382 : vector<16x64xf32> to vector<16x64xbf16>
    %384 = arith.extf %383 : vector<16x64xbf16> to vector<16x64xf32>
    %385 = arith.subf %382, %384 : vector<16x64xf32>
    %386 = arith.truncf %385 : vector<16x64xf32> to vector<16x64xbf16>
    %387 = tpu.concatenate %383, %386 in 1 : vector<16x64xbf16>, vector<16x64xbf16> -> vector<16x128xbf16>
    %388 = arith.mulf %2, %379 : vector<16x64xf32>
    %389 = arith.mulf %4, %378 : vector<16x64xf32>
    %390 = arith.subf %388, %389 : vector<16x64xf32>
    %391 = arith.truncf %390 : vector<16x64xf32> to vector<16x64xbf16>
    %392 = arith.extf %391 : vector<16x64xbf16> to vector<16x64xf32>
    %393 = arith.subf %390, %392 : vector<16x64xf32>
    %394 = arith.truncf %393 : vector<16x64xf32> to vector<16x64xbf16>
    %395 = tpu.concatenate %391, %394 in 1 : vector<16x64xbf16>, vector<16x64xbf16> -> vector<16x128xbf16>
    %cst_63 = arith.constant dense<0.000000e+00> : vector<16x16xf32>
    %396 = tpu.matmul %387, %14, %cst_63 {dimension_numbers = #tpu.dot_dimension_numbers<[1], [0], [0], [1], [0, 0, 1, 1], [], []>} : vector<16x128xbf16>, vector<128x16xbf16>, vector<16x16xf32> -> vector<16x16xf32>
    %cst_64 = arith.constant dense<0.000000e+00> : vector<16x16xf32>
    %397 = tpu.matmul %395, %14, %cst_64 {dimension_numbers = #tpu.dot_dimension_numbers<[1], [0], [0], [1], [0, 0, 1, 1], [], []>} : vector<16x128xbf16>, vector<128x16xbf16>, vector<16x16xf32> -> vector<16x16xf32>
    %398 = vector.broadcast %0 : f32 to vector<16x16xf32>
    %399 = arith.mulf %398, %334 : vector<16x16xf32>
    %400 = arith.addf %396, %399 : vector<16x16xf32>
    %401 = vector.broadcast %0 : f32 to vector<16x16xf32>
    %402 = arith.mulf %401, %337 : vector<16x16xf32>
    %403 = arith.addf %397, %402 : vector<16x16xf32>
    %404 = arith.mulf %334, %400 : vector<16x16xf32>
    %405 = arith.mulf %337, %403 : vector<16x16xf32>
    %406 = arith.addf %404, %405 : vector<16x16xf32>
    %407 = vector.shape_cast %406 : vector<16x16xf32> to vector<1x16x16xf32>
    %cst_65 = arith.constant dense<0.000000e+00> : vector<1xf32>
    %408 = vector.multi_reduction <add>, %407, %cst_65 [1, 2] : vector<1x16x16xf32> to vector<1xf32>
    %409 = vector.shape_cast %408 : vector<1xf32> to vector<1x1x1xf32>
    %410 = vector.extract %409[0, 0, 0] : f32 from vector<1x1x1xf32>
    %411 = vector.broadcast %410 : f32 to vector<1x1xf32>
    %cst_66 = arith.constant 1.000000e-30 : f32
    %412 = vector.broadcast %cst_66 : f32 to vector<1x1xf32>
    %413 = arith.addf %411, %412 : vector<1x1xf32>
    %414 = arith.divf %328, %413 : vector<1x1xf32>
    %415 = vector.broadcast %414 : vector<1x1xf32> to vector<16x16xf32>
    %416 = arith.mulf %415, %334 : vector<16x16xf32>
    %417 = arith.addf %311, %416 : vector<16x16xf32>
    %418 = vector.broadcast %414 : vector<1x1xf32> to vector<16x16xf32>
    %419 = arith.mulf %418, %337 : vector<16x16xf32>
    %420 = arith.addf %314, %419 : vector<16x16xf32>
    %421 = vector.broadcast %414 : vector<1x1xf32> to vector<16x16xf32>
    %422 = arith.mulf %421, %400 : vector<16x16xf32>
    %423 = arith.subf %317, %422 : vector<16x16xf32>
    %424 = vector.broadcast %414 : vector<1x1xf32> to vector<16x16xf32>
    %425 = arith.mulf %424, %403 : vector<16x16xf32>
    %426 = arith.subf %320, %425 : vector<16x16xf32>
    %427 = arith.mulf %423, %423 : vector<16x16xf32>
    %428 = arith.mulf %426, %426 : vector<16x16xf32>
    %429 = arith.addf %427, %428 : vector<16x16xf32>
    %430 = vector.shape_cast %429 : vector<16x16xf32> to vector<1x16x16xf32>
    %cst_67 = arith.constant dense<0.000000e+00> : vector<1xf32>
    %431 = vector.multi_reduction <add>, %430, %cst_67 [1, 2] : vector<1x16x16xf32> to vector<1xf32>
    %432 = vector.shape_cast %431 : vector<1xf32> to vector<1x1x1xf32>
    %433 = vector.extract %432[0, 0, 0] : f32 from vector<1x1x1xf32>
    %434 = vector.broadcast %433 : f32 to vector<1x1xf32>
    %cst_68 = arith.constant 1.000000e-30 : f32
    %435 = vector.broadcast %cst_68 : f32 to vector<1x1xf32>
    %436 = arith.addf %328, %435 : vector<1x1xf32>
    %437 = arith.divf %434, %436 : vector<1x1xf32>
    %438 = vector.broadcast %437 : vector<1x1xf32> to vector<16x16xf32>
    %439 = arith.mulf %438, %334 : vector<16x16xf32>
    %440 = arith.addf %423, %439 : vector<16x16xf32>
    %441 = vector.broadcast %437 : vector<1x1xf32> to vector<16x16xf32>
    %442 = arith.mulf %441, %337 : vector<16x16xf32>
    %443 = arith.addf %426, %442 : vector<16x16xf32>
    %c3_i32 = arith.constant 3 : i32
    %444 = tpu.concatenate %440, %440, %440, %440 in 1 : vector<16x16xf32>, vector<16x16xf32>, vector<16x16xf32>, vector<16x16xf32> -> vector<16x64xf32>
    %445 = tpu.concatenate %443, %443, %443, %443 in 1 : vector<16x16xf32>, vector<16x16xf32>, vector<16x16xf32>, vector<16x16xf32> -> vector<16x64xf32>
    %446 = arith.mulf %2, %444 : vector<16x64xf32>
    %447 = arith.mulf %4, %445 : vector<16x64xf32>
    %448 = arith.subf %446, %447 : vector<16x64xf32>
    %449 = arith.mulf %2, %445 : vector<16x64xf32>
    %450 = arith.mulf %4, %444 : vector<16x64xf32>
    %451 = arith.addf %449, %450 : vector<16x64xf32>
    %452 = tpu.concatenate %448, %451 in 0 : vector<16x64xf32>, vector<16x64xf32> -> vector<32x64xf32>
    %453 = arith.truncf %452 : vector<32x64xf32> to vector<32x64xbf16>
    %454 = arith.extf %453 : vector<32x64xbf16> to vector<32x64xf32>
    %455 = arith.subf %452, %454 : vector<32x64xf32>
    %456 = arith.truncf %455 : vector<32x64xf32> to vector<32x64xbf16>
    %457 = tpu.concatenate %453, %456, %453 in 0 : vector<32x64xbf16>, vector<32x64xbf16>, vector<32x64xbf16> -> vector<96x64xbf16>
    %cst_69 = arith.constant dense<0.000000e+00> : vector<32x64xf32>
    %458 = tpu.matmul %9, %457, %cst_69 {dimension_numbers = #tpu.dot_dimension_numbers<[1], [0], [0], [1], [0, 0, 1, 1], [], []>} : vector<32x96xbf16>, vector<96x64xbf16>, vector<32x64xf32> -> vector<32x64xf32>
    %459 = vector.extract_strided_slice %458 {offsets = [0, 0], sizes = [16, 64], strides = [1, 1]} : vector<32x64xf32> to vector<16x64xf32>
    %460 = vector.extract_strided_slice %458 {offsets = [16, 0], sizes = [16, 64], strides = [1, 1]} : vector<32x64xf32> to vector<16x64xf32>
    %461 = tpu.concatenate %459, %460 in 1 : vector<16x64xf32>, vector<16x64xf32> -> vector<16x128xf32>
    %462 = arith.truncf %461 : vector<16x128xf32> to vector<16x128xbf16>
    %463 = arith.extf %462 : vector<16x128xbf16> to vector<16x128xf32>
    %464 = arith.subf %461, %463 : vector<16x128xf32>
    %465 = arith.truncf %464 : vector<16x128xf32> to vector<16x128xbf16>
    %466 = tpu.concatenate %462, %465, %462 in 1 : vector<16x128xbf16>, vector<16x128xbf16>, vector<16x128xbf16> -> vector<16x384xbf16>
    %cst_70 = arith.constant dense<0.000000e+00> : vector<16x128xf32>
    %467 = tpu.matmul %466, %11, %cst_70 {dimension_numbers = #tpu.dot_dimension_numbers<[1], [0], [0], [1], [0, 0, 1, 1], [], []>} : vector<16x384xbf16>, vector<384x128xbf16>, vector<16x128xf32> -> vector<16x128xf32>
    %468 = arith.mulf %8, %467 : vector<16x128xf32>
    %469 = arith.mulf %468, %8 : vector<16x128xf32>
    %470 = arith.truncf %469 : vector<16x128xf32> to vector<16x128xbf16>
    %471 = arith.extf %470 : vector<16x128xbf16> to vector<16x128xf32>
    %472 = arith.subf %469, %471 : vector<16x128xf32>
    %473 = arith.truncf %472 : vector<16x128xf32> to vector<16x128xbf16>
    %474 = tpu.concatenate %470, %473, %470 in 1 : vector<16x128xbf16>, vector<16x128xbf16>, vector<16x128xbf16> -> vector<16x384xbf16>
    %cst_71 = arith.constant dense<0.000000e+00> : vector<16x64xf32>
    %475 = tpu.matmul %474, %12, %cst_71 {dimension_numbers = #tpu.dot_dimension_numbers<[1], [0], [0], [1], [0, 0, 1, 1], [], []>} : vector<16x384xbf16>, vector<384x64xbf16>, vector<16x64xf32> -> vector<16x64xf32>
    %cst_72 = arith.constant dense<0.000000e+00> : vector<16x64xf32>
    %476 = tpu.matmul %474, %13, %cst_72 {dimension_numbers = #tpu.dot_dimension_numbers<[1], [0], [0], [1], [0, 0, 1, 1], [], []>} : vector<16x384xbf16>, vector<384x64xbf16>, vector<16x64xf32> -> vector<16x64xf32>
    %477 = tpu.concatenate %475, %476 in 0 : vector<16x64xf32>, vector<16x64xf32> -> vector<32x64xf32>
    %478 = arith.truncf %477 : vector<32x64xf32> to vector<32x64xbf16>
    %479 = arith.extf %478 : vector<32x64xbf16> to vector<32x64xf32>
    %480 = arith.subf %477, %479 : vector<32x64xf32>
    %481 = arith.truncf %480 : vector<32x64xf32> to vector<32x64xbf16>
    %482 = tpu.concatenate %478, %481, %478 in 0 : vector<32x64xbf16>, vector<32x64xbf16>, vector<32x64xbf16> -> vector<96x64xbf16>
    %cst_73 = arith.constant dense<0.000000e+00> : vector<32x64xf32>
    %483 = tpu.matmul %10, %482, %cst_73 {dimension_numbers = #tpu.dot_dimension_numbers<[1], [0], [0], [1], [0, 0, 1, 1], [], []>} : vector<32x96xbf16>, vector<96x64xbf16>, vector<32x64xf32> -> vector<32x64xf32>
    %484 = vector.extract_strided_slice %483 {offsets = [0, 0], sizes = [16, 64], strides = [1, 1]} : vector<32x64xf32> to vector<16x64xf32>
    %485 = vector.extract_strided_slice %483 {offsets = [16, 0], sizes = [16, 64], strides = [1, 1]} : vector<32x64xf32> to vector<16x64xf32>
    %486 = arith.mulf %2, %484 : vector<16x64xf32>
    %487 = arith.mulf %4, %485 : vector<16x64xf32>
    %488 = arith.addf %486, %487 : vector<16x64xf32>
    %489 = arith.truncf %488 : vector<16x64xf32> to vector<16x64xbf16>
    %490 = arith.extf %489 : vector<16x64xbf16> to vector<16x64xf32>
    %491 = arith.subf %488, %490 : vector<16x64xf32>
    %492 = arith.truncf %491 : vector<16x64xf32> to vector<16x64xbf16>
    %493 = tpu.concatenate %489, %492 in 1 : vector<16x64xbf16>, vector<16x64xbf16> -> vector<16x128xbf16>
    %494 = arith.mulf %2, %485 : vector<16x64xf32>
    %495 = arith.mulf %4, %484 : vector<16x64xf32>
    %496 = arith.subf %494, %495 : vector<16x64xf32>
    %497 = arith.truncf %496 : vector<16x64xf32> to vector<16x64xbf16>
    %498 = arith.extf %497 : vector<16x64xbf16> to vector<16x64xf32>
    %499 = arith.subf %496, %498 : vector<16x64xf32>
    %500 = arith.truncf %499 : vector<16x64xf32> to vector<16x64xbf16>
    %501 = tpu.concatenate %497, %500 in 1 : vector<16x64xbf16>, vector<16x64xbf16> -> vector<16x128xbf16>
    %cst_74 = arith.constant dense<0.000000e+00> : vector<16x16xf32>
    %502 = tpu.matmul %493, %14, %cst_74 {dimension_numbers = #tpu.dot_dimension_numbers<[1], [0], [0], [1], [0, 0, 1, 1], [], []>} : vector<16x128xbf16>, vector<128x16xbf16>, vector<16x16xf32> -> vector<16x16xf32>
    %cst_75 = arith.constant dense<0.000000e+00> : vector<16x16xf32>
    %503 = tpu.matmul %501, %14, %cst_75 {dimension_numbers = #tpu.dot_dimension_numbers<[1], [0], [0], [1], [0, 0, 1, 1], [], []>} : vector<16x128xbf16>, vector<128x16xbf16>, vector<16x16xf32> -> vector<16x16xf32>
    %504 = vector.broadcast %0 : f32 to vector<16x16xf32>
    %505 = arith.mulf %504, %440 : vector<16x16xf32>
    %506 = arith.addf %502, %505 : vector<16x16xf32>
    %507 = vector.broadcast %0 : f32 to vector<16x16xf32>
    %508 = arith.mulf %507, %443 : vector<16x16xf32>
    %509 = arith.addf %503, %508 : vector<16x16xf32>
    %510 = arith.mulf %440, %506 : vector<16x16xf32>
    %511 = arith.mulf %443, %509 : vector<16x16xf32>
    %512 = arith.addf %510, %511 : vector<16x16xf32>
    %513 = vector.shape_cast %512 : vector<16x16xf32> to vector<1x16x16xf32>
    %cst_76 = arith.constant dense<0.000000e+00> : vector<1xf32>
    %514 = vector.multi_reduction <add>, %513, %cst_76 [1, 2] : vector<1x16x16xf32> to vector<1xf32>
    %515 = vector.shape_cast %514 : vector<1xf32> to vector<1x1x1xf32>
    %516 = vector.extract %515[0, 0, 0] : f32 from vector<1x1x1xf32>
    %517 = vector.broadcast %516 : f32 to vector<1x1xf32>
    %cst_77 = arith.constant 1.000000e-30 : f32
    %518 = vector.broadcast %cst_77 : f32 to vector<1x1xf32>
    %519 = arith.addf %517, %518 : vector<1x1xf32>
    %520 = arith.divf %434, %519 : vector<1x1xf32>
    %521 = vector.broadcast %520 : vector<1x1xf32> to vector<16x16xf32>
    %522 = arith.mulf %521, %440 : vector<16x16xf32>
    %523 = arith.addf %417, %522 : vector<16x16xf32>
    %524 = vector.broadcast %520 : vector<1x1xf32> to vector<16x16xf32>
    %525 = arith.mulf %524, %443 : vector<16x16xf32>
    %526 = arith.addf %420, %525 : vector<16x16xf32>
    %527 = vector.broadcast %520 : vector<1x1xf32> to vector<16x16xf32>
    %528 = arith.mulf %527, %506 : vector<16x16xf32>
    %529 = arith.subf %423, %528 : vector<16x16xf32>
    %530 = vector.broadcast %520 : vector<1x1xf32> to vector<16x16xf32>
    %531 = arith.mulf %530, %509 : vector<16x16xf32>
    %532 = arith.subf %426, %531 : vector<16x16xf32>
    %533 = arith.mulf %529, %529 : vector<16x16xf32>
    %534 = arith.mulf %532, %532 : vector<16x16xf32>
    %535 = arith.addf %533, %534 : vector<16x16xf32>
    %536 = vector.shape_cast %535 : vector<16x16xf32> to vector<1x16x16xf32>
    %cst_78 = arith.constant dense<0.000000e+00> : vector<1xf32>
    %537 = vector.multi_reduction <add>, %536, %cst_78 [1, 2] : vector<1x16x16xf32> to vector<1xf32>
    %538 = vector.shape_cast %537 : vector<1xf32> to vector<1x1x1xf32>
    %539 = vector.extract %538[0, 0, 0] : f32 from vector<1x1x1xf32>
    %540 = vector.broadcast %539 : f32 to vector<1x1xf32>
    %cst_79 = arith.constant 1.000000e-30 : f32
    %541 = vector.broadcast %cst_79 : f32 to vector<1x1xf32>
    %542 = arith.addf %434, %541 : vector<1x1xf32>
    %543 = arith.divf %540, %542 : vector<1x1xf32>
    %544 = vector.broadcast %543 : vector<1x1xf32> to vector<16x16xf32>
    %545 = arith.mulf %544, %440 : vector<16x16xf32>
    %546 = arith.addf %529, %545 : vector<16x16xf32>
    %547 = vector.broadcast %543 : vector<1x1xf32> to vector<16x16xf32>
    %548 = arith.mulf %547, %443 : vector<16x16xf32>
    %549 = arith.addf %532, %548 : vector<16x16xf32>
    %c4_i32 = arith.constant 4 : i32
    %550 = tpu.concatenate %546, %546, %546, %546 in 1 : vector<16x16xf32>, vector<16x16xf32>, vector<16x16xf32>, vector<16x16xf32> -> vector<16x64xf32>
    %551 = tpu.concatenate %549, %549, %549, %549 in 1 : vector<16x16xf32>, vector<16x16xf32>, vector<16x16xf32>, vector<16x16xf32> -> vector<16x64xf32>
    %552 = arith.mulf %2, %550 : vector<16x64xf32>
    %553 = arith.mulf %4, %551 : vector<16x64xf32>
    %554 = arith.subf %552, %553 : vector<16x64xf32>
    %555 = arith.mulf %2, %551 : vector<16x64xf32>
    %556 = arith.mulf %4, %550 : vector<16x64xf32>
    %557 = arith.addf %555, %556 : vector<16x64xf32>
    %558 = tpu.concatenate %554, %557 in 0 : vector<16x64xf32>, vector<16x64xf32> -> vector<32x64xf32>
    %559 = arith.truncf %558 : vector<32x64xf32> to vector<32x64xbf16>
    %560 = arith.extf %559 : vector<32x64xbf16> to vector<32x64xf32>
    %561 = arith.subf %558, %560 : vector<32x64xf32>
    %562 = arith.truncf %561 : vector<32x64xf32> to vector<32x64xbf16>
    %563 = tpu.concatenate %559, %562, %559 in 0 : vector<32x64xbf16>, vector<32x64xbf16>, vector<32x64xbf16> -> vector<96x64xbf16>
    %cst_80 = arith.constant dense<0.000000e+00> : vector<32x64xf32>
    %564 = tpu.matmul %9, %563, %cst_80 {dimension_numbers = #tpu.dot_dimension_numbers<[1], [0], [0], [1], [0, 0, 1, 1], [], []>} : vector<32x96xbf16>, vector<96x64xbf16>, vector<32x64xf32> -> vector<32x64xf32>
    %565 = vector.extract_strided_slice %564 {offsets = [0, 0], sizes = [16, 64], strides = [1, 1]} : vector<32x64xf32> to vector<16x64xf32>
    %566 = vector.extract_strided_slice %564 {offsets = [16, 0], sizes = [16, 64], strides = [1, 1]} : vector<32x64xf32> to vector<16x64xf32>
    %567 = tpu.concatenate %565, %566 in 1 : vector<16x64xf32>, vector<16x64xf32> -> vector<16x128xf32>
    %568 = arith.truncf %567 : vector<16x128xf32> to vector<16x128xbf16>
    %569 = arith.extf %568 : vector<16x128xbf16> to vector<16x128xf32>
    %570 = arith.subf %567, %569 : vector<16x128xf32>
    %571 = arith.truncf %570 : vector<16x128xf32> to vector<16x128xbf16>
    %572 = tpu.concatenate %568, %571, %568 in 1 : vector<16x128xbf16>, vector<16x128xbf16>, vector<16x128xbf16> -> vector<16x384xbf16>
    %cst_81 = arith.constant dense<0.000000e+00> : vector<16x128xf32>
    %573 = tpu.matmul %572, %11, %cst_81 {dimension_numbers = #tpu.dot_dimension_numbers<[1], [0], [0], [1], [0, 0, 1, 1], [], []>} : vector<16x384xbf16>, vector<384x128xbf16>, vector<16x128xf32> -> vector<16x128xf32>
    %574 = arith.mulf %8, %573 : vector<16x128xf32>
    %575 = arith.mulf %574, %8 : vector<16x128xf32>
    %576 = arith.truncf %575 : vector<16x128xf32> to vector<16x128xbf16>
    %577 = arith.extf %576 : vector<16x128xbf16> to vector<16x128xf32>
    %578 = arith.subf %575, %577 : vector<16x128xf32>
    %579 = arith.truncf %578 : vector<16x128xf32> to vector<16x128xbf16>
    %580 = tpu.concatenate %576, %579, %576 in 1 : vector<16x128xbf16>, vector<16x128xbf16>, vector<16x128xbf16> -> vector<16x384xbf16>
    %cst_82 = arith.constant dense<0.000000e+00> : vector<16x64xf32>
    %581 = tpu.matmul %580, %12, %cst_82 {dimension_numbers = #tpu.dot_dimension_numbers<[1], [0], [0], [1], [0, 0, 1, 1], [], []>} : vector<16x384xbf16>, vector<384x64xbf16>, vector<16x64xf32> -> vector<16x64xf32>
    %cst_83 = arith.constant dense<0.000000e+00> : vector<16x64xf32>
    %582 = tpu.matmul %580, %13, %cst_83 {dimension_numbers = #tpu.dot_dimension_numbers<[1], [0], [0], [1], [0, 0, 1, 1], [], []>} : vector<16x384xbf16>, vector<384x64xbf16>, vector<16x64xf32> -> vector<16x64xf32>
    %583 = tpu.concatenate %581, %582 in 0 : vector<16x64xf32>, vector<16x64xf32> -> vector<32x64xf32>
    %584 = arith.truncf %583 : vector<32x64xf32> to vector<32x64xbf16>
    %585 = arith.extf %584 : vector<32x64xbf16> to vector<32x64xf32>
    %586 = arith.subf %583, %585 : vector<32x64xf32>
    %587 = arith.truncf %586 : vector<32x64xf32> to vector<32x64xbf16>
    %588 = tpu.concatenate %584, %587, %584 in 0 : vector<32x64xbf16>, vector<32x64xbf16>, vector<32x64xbf16> -> vector<96x64xbf16>
    %cst_84 = arith.constant dense<0.000000e+00> : vector<32x64xf32>
    %589 = tpu.matmul %10, %588, %cst_84 {dimension_numbers = #tpu.dot_dimension_numbers<[1], [0], [0], [1], [0, 0, 1, 1], [], []>} : vector<32x96xbf16>, vector<96x64xbf16>, vector<32x64xf32> -> vector<32x64xf32>
    %590 = vector.extract_strided_slice %589 {offsets = [0, 0], sizes = [16, 64], strides = [1, 1]} : vector<32x64xf32> to vector<16x64xf32>
    %591 = vector.extract_strided_slice %589 {offsets = [16, 0], sizes = [16, 64], strides = [1, 1]} : vector<32x64xf32> to vector<16x64xf32>
    %592 = arith.mulf %2, %590 : vector<16x64xf32>
    %593 = arith.mulf %4, %591 : vector<16x64xf32>
    %594 = arith.addf %592, %593 : vector<16x64xf32>
    %595 = arith.truncf %594 : vector<16x64xf32> to vector<16x64xbf16>
    %596 = arith.extf %595 : vector<16x64xbf16> to vector<16x64xf32>
    %597 = arith.subf %594, %596 : vector<16x64xf32>
    %598 = arith.truncf %597 : vector<16x64xf32> to vector<16x64xbf16>
    %599 = tpu.concatenate %595, %598 in 1 : vector<16x64xbf16>, vector<16x64xbf16> -> vector<16x128xbf16>
    %600 = arith.mulf %2, %591 : vector<16x64xf32>
    %601 = arith.mulf %4, %590 : vector<16x64xf32>
    %602 = arith.subf %600, %601 : vector<16x64xf32>
    %603 = arith.truncf %602 : vector<16x64xf32> to vector<16x64xbf16>
    %604 = arith.extf %603 : vector<16x64xbf16> to vector<16x64xf32>
    %605 = arith.subf %602, %604 : vector<16x64xf32>
    %606 = arith.truncf %605 : vector<16x64xf32> to vector<16x64xbf16>
    %607 = tpu.concatenate %603, %606 in 1 : vector<16x64xbf16>, vector<16x64xbf16> -> vector<16x128xbf16>
    %cst_85 = arith.constant dense<0.000000e+00> : vector<16x16xf32>
    %608 = tpu.matmul %599, %14, %cst_85 {dimension_numbers = #tpu.dot_dimension_numbers<[1], [0], [0], [1], [0, 0, 1, 1], [], []>} : vector<16x128xbf16>, vector<128x16xbf16>, vector<16x16xf32> -> vector<16x16xf32>
    %cst_86 = arith.constant dense<0.000000e+00> : vector<16x16xf32>
    %609 = tpu.matmul %607, %14, %cst_86 {dimension_numbers = #tpu.dot_dimension_numbers<[1], [0], [0], [1], [0, 0, 1, 1], [], []>} : vector<16x128xbf16>, vector<128x16xbf16>, vector<16x16xf32> -> vector<16x16xf32>
    %610 = vector.broadcast %0 : f32 to vector<16x16xf32>
    %611 = arith.mulf %610, %546 : vector<16x16xf32>
    %612 = arith.addf %608, %611 : vector<16x16xf32>
    %613 = vector.broadcast %0 : f32 to vector<16x16xf32>
    %614 = arith.mulf %613, %549 : vector<16x16xf32>
    %615 = arith.addf %609, %614 : vector<16x16xf32>
    %616 = arith.mulf %546, %612 : vector<16x16xf32>
    %617 = arith.mulf %549, %615 : vector<16x16xf32>
    %618 = arith.addf %616, %617 : vector<16x16xf32>
    %619 = vector.shape_cast %618 : vector<16x16xf32> to vector<1x16x16xf32>
    %cst_87 = arith.constant dense<0.000000e+00> : vector<1xf32>
    %620 = vector.multi_reduction <add>, %619, %cst_87 [1, 2] : vector<1x16x16xf32> to vector<1xf32>
    %621 = vector.shape_cast %620 : vector<1xf32> to vector<1x1x1xf32>
    %622 = vector.extract %621[0, 0, 0] : f32 from vector<1x1x1xf32>
    %623 = vector.broadcast %622 : f32 to vector<1x1xf32>
    %cst_88 = arith.constant 1.000000e-30 : f32
    %624 = vector.broadcast %cst_88 : f32 to vector<1x1xf32>
    %625 = arith.addf %623, %624 : vector<1x1xf32>
    %626 = arith.divf %540, %625 : vector<1x1xf32>
    %627 = vector.broadcast %626 : vector<1x1xf32> to vector<16x16xf32>
    %628 = arith.mulf %627, %546 : vector<16x16xf32>
    %629 = arith.addf %523, %628 : vector<16x16xf32>
    %630 = vector.broadcast %626 : vector<1x1xf32> to vector<16x16xf32>
    %631 = arith.mulf %630, %549 : vector<16x16xf32>
    %632 = arith.addf %526, %631 : vector<16x16xf32>
    %633 = vector.broadcast %626 : vector<1x1xf32> to vector<16x16xf32>
    %634 = arith.mulf %633, %612 : vector<16x16xf32>
    %635 = arith.subf %529, %634 : vector<16x16xf32>
    %636 = vector.broadcast %626 : vector<1x1xf32> to vector<16x16xf32>
    %637 = arith.mulf %636, %615 : vector<16x16xf32>
    %638 = arith.subf %532, %637 : vector<16x16xf32>
    %639 = arith.mulf %635, %635 : vector<16x16xf32>
    %640 = arith.mulf %638, %638 : vector<16x16xf32>
    %641 = arith.addf %639, %640 : vector<16x16xf32>
    %642 = vector.shape_cast %641 : vector<16x16xf32> to vector<1x16x16xf32>
    %cst_89 = arith.constant dense<0.000000e+00> : vector<1xf32>
    %643 = vector.multi_reduction <add>, %642, %cst_89 [1, 2] : vector<1x16x16xf32> to vector<1xf32>
    %644 = vector.shape_cast %643 : vector<1xf32> to vector<1x1x1xf32>
    %645 = vector.extract %644[0, 0, 0] : f32 from vector<1x1x1xf32>
    %646 = vector.broadcast %645 : f32 to vector<1x1xf32>
    %cst_90 = arith.constant 1.000000e-30 : f32
    %647 = vector.broadcast %cst_90 : f32 to vector<1x1xf32>
    %648 = arith.addf %540, %647 : vector<1x1xf32>
    %649 = arith.divf %646, %648 : vector<1x1xf32>
    %650 = vector.broadcast %649 : vector<1x1xf32> to vector<16x16xf32>
    %651 = arith.mulf %650, %546 : vector<16x16xf32>
    %652 = arith.addf %635, %651 : vector<16x16xf32>
    %653 = vector.broadcast %649 : vector<1x1xf32> to vector<16x16xf32>
    %654 = arith.mulf %653, %549 : vector<16x16xf32>
    %655 = arith.addf %638, %654 : vector<16x16xf32>
    %c5_i32 = arith.constant 5 : i32
    %656 = tpu.concatenate %652, %652, %652, %652 in 1 : vector<16x16xf32>, vector<16x16xf32>, vector<16x16xf32>, vector<16x16xf32> -> vector<16x64xf32>
    %657 = tpu.concatenate %655, %655, %655, %655 in 1 : vector<16x16xf32>, vector<16x16xf32>, vector<16x16xf32>, vector<16x16xf32> -> vector<16x64xf32>
    %658 = arith.mulf %2, %656 : vector<16x64xf32>
    %659 = arith.mulf %4, %657 : vector<16x64xf32>
    %660 = arith.subf %658, %659 : vector<16x64xf32>
    %661 = arith.mulf %2, %657 : vector<16x64xf32>
    %662 = arith.mulf %4, %656 : vector<16x64xf32>
    %663 = arith.addf %661, %662 : vector<16x64xf32>
    %664 = tpu.concatenate %660, %663 in 0 : vector<16x64xf32>, vector<16x64xf32> -> vector<32x64xf32>
    %665 = arith.truncf %664 : vector<32x64xf32> to vector<32x64xbf16>
    %666 = arith.extf %665 : vector<32x64xbf16> to vector<32x64xf32>
    %667 = arith.subf %664, %666 : vector<32x64xf32>
    %668 = arith.truncf %667 : vector<32x64xf32> to vector<32x64xbf16>
    %669 = tpu.concatenate %665, %668, %665 in 0 : vector<32x64xbf16>, vector<32x64xbf16>, vector<32x64xbf16> -> vector<96x64xbf16>
    %cst_91 = arith.constant dense<0.000000e+00> : vector<32x64xf32>
    %670 = tpu.matmul %9, %669, %cst_91 {dimension_numbers = #tpu.dot_dimension_numbers<[1], [0], [0], [1], [0, 0, 1, 1], [], []>} : vector<32x96xbf16>, vector<96x64xbf16>, vector<32x64xf32> -> vector<32x64xf32>
    %671 = vector.extract_strided_slice %670 {offsets = [0, 0], sizes = [16, 64], strides = [1, 1]} : vector<32x64xf32> to vector<16x64xf32>
    %672 = vector.extract_strided_slice %670 {offsets = [16, 0], sizes = [16, 64], strides = [1, 1]} : vector<32x64xf32> to vector<16x64xf32>
    %673 = tpu.concatenate %671, %672 in 1 : vector<16x64xf32>, vector<16x64xf32> -> vector<16x128xf32>
    %674 = arith.truncf %673 : vector<16x128xf32> to vector<16x128xbf16>
    %675 = arith.extf %674 : vector<16x128xbf16> to vector<16x128xf32>
    %676 = arith.subf %673, %675 : vector<16x128xf32>
    %677 = arith.truncf %676 : vector<16x128xf32> to vector<16x128xbf16>
    %678 = tpu.concatenate %674, %677, %674 in 1 : vector<16x128xbf16>, vector<16x128xbf16>, vector<16x128xbf16> -> vector<16x384xbf16>
    %cst_92 = arith.constant dense<0.000000e+00> : vector<16x128xf32>
    %679 = tpu.matmul %678, %11, %cst_92 {dimension_numbers = #tpu.dot_dimension_numbers<[1], [0], [0], [1], [0, 0, 1, 1], [], []>} : vector<16x384xbf16>, vector<384x128xbf16>, vector<16x128xf32> -> vector<16x128xf32>
    %680 = arith.mulf %8, %679 : vector<16x128xf32>
    %681 = arith.mulf %680, %8 : vector<16x128xf32>
    %682 = arith.truncf %681 : vector<16x128xf32> to vector<16x128xbf16>
    %683 = arith.extf %682 : vector<16x128xbf16> to vector<16x128xf32>
    %684 = arith.subf %681, %683 : vector<16x128xf32>
    %685 = arith.truncf %684 : vector<16x128xf32> to vector<16x128xbf16>
    %686 = tpu.concatenate %682, %685, %682 in 1 : vector<16x128xbf16>, vector<16x128xbf16>, vector<16x128xbf16> -> vector<16x384xbf16>
    %cst_93 = arith.constant dense<0.000000e+00> : vector<16x64xf32>
    %687 = tpu.matmul %686, %12, %cst_93 {dimension_numbers = #tpu.dot_dimension_numbers<[1], [0], [0], [1], [0, 0, 1, 1], [], []>} : vector<16x384xbf16>, vector<384x64xbf16>, vector<16x64xf32> -> vector<16x64xf32>
    %cst_94 = arith.constant dense<0.000000e+00> : vector<16x64xf32>
    %688 = tpu.matmul %686, %13, %cst_94 {dimension_numbers = #tpu.dot_dimension_numbers<[1], [0], [0], [1], [0, 0, 1, 1], [], []>} : vector<16x384xbf16>, vector<384x64xbf16>, vector<16x64xf32> -> vector<16x64xf32>
    %689 = tpu.concatenate %687, %688 in 0 : vector<16x64xf32>, vector<16x64xf32> -> vector<32x64xf32>
    %690 = arith.truncf %689 : vector<32x64xf32> to vector<32x64xbf16>
    %691 = arith.extf %690 : vector<32x64xbf16> to vector<32x64xf32>
    %692 = arith.subf %689, %691 : vector<32x64xf32>
    %693 = arith.truncf %692 : vector<32x64xf32> to vector<32x64xbf16>
    %694 = tpu.concatenate %690, %693, %690 in 0 : vector<32x64xbf16>, vector<32x64xbf16>, vector<32x64xbf16> -> vector<96x64xbf16>
    %cst_95 = arith.constant dense<0.000000e+00> : vector<32x64xf32>
    %695 = tpu.matmul %10, %694, %cst_95 {dimension_numbers = #tpu.dot_dimension_numbers<[1], [0], [0], [1], [0, 0, 1, 1], [], []>} : vector<32x96xbf16>, vector<96x64xbf16>, vector<32x64xf32> -> vector<32x64xf32>
    %696 = vector.extract_strided_slice %695 {offsets = [0, 0], sizes = [16, 64], strides = [1, 1]} : vector<32x64xf32> to vector<16x64xf32>
    %697 = vector.extract_strided_slice %695 {offsets = [16, 0], sizes = [16, 64], strides = [1, 1]} : vector<32x64xf32> to vector<16x64xf32>
    %698 = arith.mulf %2, %696 : vector<16x64xf32>
    %699 = arith.mulf %4, %697 : vector<16x64xf32>
    %700 = arith.addf %698, %699 : vector<16x64xf32>
    %701 = arith.truncf %700 : vector<16x64xf32> to vector<16x64xbf16>
    %702 = arith.extf %701 : vector<16x64xbf16> to vector<16x64xf32>
    %703 = arith.subf %700, %702 : vector<16x64xf32>
    %704 = arith.truncf %703 : vector<16x64xf32> to vector<16x64xbf16>
    %705 = tpu.concatenate %701, %704 in 1 : vector<16x64xbf16>, vector<16x64xbf16> -> vector<16x128xbf16>
    %706 = arith.mulf %2, %697 : vector<16x64xf32>
    %707 = arith.mulf %4, %696 : vector<16x64xf32>
    %708 = arith.subf %706, %707 : vector<16x64xf32>
    %709 = arith.truncf %708 : vector<16x64xf32> to vector<16x64xbf16>
    %710 = arith.extf %709 : vector<16x64xbf16> to vector<16x64xf32>
    %711 = arith.subf %708, %710 : vector<16x64xf32>
    %712 = arith.truncf %711 : vector<16x64xf32> to vector<16x64xbf16>
    %713 = tpu.concatenate %709, %712 in 1 : vector<16x64xbf16>, vector<16x64xbf16> -> vector<16x128xbf16>
    %cst_96 = arith.constant dense<0.000000e+00> : vector<16x16xf32>
    %714 = tpu.matmul %705, %14, %cst_96 {dimension_numbers = #tpu.dot_dimension_numbers<[1], [0], [0], [1], [0, 0, 1, 1], [], []>} : vector<16x128xbf16>, vector<128x16xbf16>, vector<16x16xf32> -> vector<16x16xf32>
    %cst_97 = arith.constant dense<0.000000e+00> : vector<16x16xf32>
    %715 = tpu.matmul %713, %14, %cst_97 {dimension_numbers = #tpu.dot_dimension_numbers<[1], [0], [0], [1], [0, 0, 1, 1], [], []>} : vector<16x128xbf16>, vector<128x16xbf16>, vector<16x16xf32> -> vector<16x16xf32>
    %716 = vector.broadcast %0 : f32 to vector<16x16xf32>
    %717 = arith.mulf %716, %652 : vector<16x16xf32>
    %718 = arith.addf %714, %717 : vector<16x16xf32>
    %719 = vector.broadcast %0 : f32 to vector<16x16xf32>
    %720 = arith.mulf %719, %655 : vector<16x16xf32>
    %721 = arith.addf %715, %720 : vector<16x16xf32>
    %722 = arith.mulf %652, %718 : vector<16x16xf32>
    %723 = arith.mulf %655, %721 : vector<16x16xf32>
    %724 = arith.addf %722, %723 : vector<16x16xf32>
    %725 = vector.shape_cast %724 : vector<16x16xf32> to vector<1x16x16xf32>
    %cst_98 = arith.constant dense<0.000000e+00> : vector<1xf32>
    %726 = vector.multi_reduction <add>, %725, %cst_98 [1, 2] : vector<1x16x16xf32> to vector<1xf32>
    %727 = vector.shape_cast %726 : vector<1xf32> to vector<1x1x1xf32>
    %728 = vector.extract %727[0, 0, 0] : f32 from vector<1x1x1xf32>
    %729 = vector.broadcast %728 : f32 to vector<1x1xf32>
    %cst_99 = arith.constant 1.000000e-30 : f32
    %730 = vector.broadcast %cst_99 : f32 to vector<1x1xf32>
    %731 = arith.addf %729, %730 : vector<1x1xf32>
    %732 = arith.divf %646, %731 : vector<1x1xf32>
    %733 = vector.broadcast %732 : vector<1x1xf32> to vector<16x16xf32>
    %734 = arith.mulf %733, %652 : vector<16x16xf32>
    %735 = arith.addf %629, %734 : vector<16x16xf32>
    %736 = vector.broadcast %732 : vector<1x1xf32> to vector<16x16xf32>
    %737 = arith.mulf %736, %655 : vector<16x16xf32>
    %738 = arith.addf %632, %737 : vector<16x16xf32>
    %739 = vector.broadcast %732 : vector<1x1xf32> to vector<16x16xf32>
    %740 = arith.mulf %739, %718 : vector<16x16xf32>
    %741 = arith.subf %635, %740 : vector<16x16xf32>
    %742 = vector.broadcast %732 : vector<1x1xf32> to vector<16x16xf32>
    %743 = arith.mulf %742, %721 : vector<16x16xf32>
    %744 = arith.subf %638, %743 : vector<16x16xf32>
    %745 = arith.mulf %741, %741 : vector<16x16xf32>
    %746 = arith.mulf %744, %744 : vector<16x16xf32>
    %747 = arith.addf %745, %746 : vector<16x16xf32>
    %748 = vector.shape_cast %747 : vector<16x16xf32> to vector<1x16x16xf32>
    %cst_100 = arith.constant dense<0.000000e+00> : vector<1xf32>
    %749 = vector.multi_reduction <add>, %748, %cst_100 [1, 2] : vector<1x16x16xf32> to vector<1xf32>
    %750 = vector.shape_cast %749 : vector<1xf32> to vector<1x1x1xf32>
    %751 = vector.extract %750[0, 0, 0] : f32 from vector<1x1x1xf32>
    %752 = vector.broadcast %751 : f32 to vector<1x1xf32>
    %cst_101 = arith.constant 1.000000e-30 : f32
    %753 = vector.broadcast %cst_101 : f32 to vector<1x1xf32>
    %754 = arith.addf %646, %753 : vector<1x1xf32>
    %755 = arith.divf %752, %754 : vector<1x1xf32>
    %756 = vector.broadcast %755 : vector<1x1xf32> to vector<16x16xf32>
    %757 = arith.mulf %756, %652 : vector<16x16xf32>
    %758 = arith.addf %741, %757 : vector<16x16xf32>
    %759 = vector.broadcast %755 : vector<1x1xf32> to vector<16x16xf32>
    %760 = arith.mulf %759, %655 : vector<16x16xf32>
    %761 = arith.addf %744, %760 : vector<16x16xf32>
    %cst_102 = arith.constant 0.000000e+00 : f32
    %762 = vector.broadcast %cst_102 : f32 to vector<16x96xf32>
    %763 = tpu.concatenate %735, %738, %762 in 1 : vector<16x16xf32>, vector<16x16xf32>, vector<16x96xf32> -> vector<16x128xf32>
    %c0_103 = arith.constant 0 : index
    %c0_104 = arith.constant 0 : index
    %c0_105 = arith.constant 0 : index
    %764 = vector.load %arg12[%c0_103, %c0_104, %c0_105] : memref<1x16x128xf32, #tpu.memory_space<vmem>>, vector<1x16x128xf32>
    %765 = vector.shape_cast %764 : vector<1x16x128xf32> to vector<16x128xf32>
    %766 = vector.shape_cast %763 : vector<16x128xf32> to vector<1x16x128xf32>
    tpu.vector_store %arg12[%c0_103, %c0_104, %c0_105], %766 {strides = array<i32>} : memref<1x16x128xf32, #tpu.memory_space<vmem>>, vector<1x16x128xf32>,
    %767 = tpu.concatenate %735, %735, %735, %735 in 1 : vector<16x16xf32>, vector<16x16xf32>, vector<16x16xf32>, vector<16x16xf32> -> vector<16x64xf32>
    %768 = tpu.concatenate %738, %738, %738, %738 in 1 : vector<16x16xf32>, vector<16x16xf32>, vector<16x16xf32>, vector<16x16xf32> -> vector<16x64xf32>
    %769 = arith.mulf %2, %767 : vector<16x64xf32>
    %770 = arith.mulf %4, %768 : vector<16x64xf32>
    %771 = arith.subf %769, %770 : vector<16x64xf32>
    %772 = arith.mulf %2, %768 : vector<16x64xf32>
    %773 = arith.mulf %4, %767 : vector<16x64xf32>
    %774 = arith.addf %772, %773 : vector<16x64xf32>
    %775 = tpu.concatenate %771, %774 in 0 : vector<16x64xf32>, vector<16x64xf32> -> vector<32x64xf32>
    %776 = arith.truncf %775 : vector<32x64xf32> to vector<32x64xbf16>
    %777 = arith.extf %776 : vector<32x64xbf16> to vector<32x64xf32>
    %778 = arith.subf %775, %777 : vector<32x64xf32>
    %779 = arith.truncf %778 : vector<32x64xf32> to vector<32x64xbf16>
    %780 = tpu.concatenate %776, %779, %776 in 0 : vector<32x64xbf16>, vector<32x64xbf16>, vector<32x64xbf16> -> vector<96x64xbf16>
    %cst_106 = arith.constant dense<0.000000e+00> : vector<32x64xf32>
    %781 = tpu.matmul %9, %780, %cst_106 {dimension_numbers = #tpu.dot_dimension_numbers<[1], [0], [0], [1], [0, 0, 1, 1], [], []>} : vector<32x96xbf16>, vector<96x64xbf16>, vector<32x64xf32> -> vector<32x64xf32>
    %782 = vector.extract_strided_slice %781 {offsets = [0, 0], sizes = [16, 64], strides = [1, 1]} : vector<32x64xf32> to vector<16x64xf32>
    %783 = vector.extract_strided_slice %781 {offsets = [16, 0], sizes = [16, 64], strides = [1, 1]} : vector<32x64xf32> to vector<16x64xf32>
    %784 = tpu.concatenate %782, %783 in 1 : vector<16x64xf32>, vector<16x64xf32> -> vector<16x128xf32>
    %785 = arith.truncf %784 : vector<16x128xf32> to vector<16x128xbf16>
    %786 = arith.extf %785 : vector<16x128xbf16> to vector<16x128xf32>
    %787 = arith.subf %784, %786 : vector<16x128xf32>
    %788 = arith.truncf %787 : vector<16x128xf32> to vector<16x128xbf16>
    %789 = tpu.concatenate %785, %788, %785 in 1 : vector<16x128xbf16>, vector<16x128xbf16>, vector<16x128xbf16> -> vector<16x384xbf16>
    %cst_107 = arith.constant dense<0.000000e+00> : vector<16x128xf32>
    %790 = tpu.matmul %789, %11, %cst_107 {dimension_numbers = #tpu.dot_dimension_numbers<[1], [0], [0], [1], [0, 0, 1, 1], [], []>} : vector<16x384xbf16>, vector<384x128xbf16>, vector<16x128xf32> -> vector<16x128xf32>
    %c0_108 = arith.constant 0 : index
    %c0_109 = arith.constant 0 : index
    %c0_110 = arith.constant 0 : index
    %791 = vector.load %arg13[%c0_108, %c0_109, %c0_110] : memref<1x16x128xf32, #tpu.memory_space<vmem>>, vector<1x16x128xf32>
    %792 = vector.shape_cast %791 : vector<1x16x128xf32> to vector<16x128xf32>
    %793 = vector.shape_cast %790 : vector<16x128xf32> to vector<1x16x128xf32>
    tpu.vector_store %arg13[%c0_108, %c0_109, %c0_110], %793 {strides = array<i32>} : memref<1x16x128xf32, #tpu.memory_space<vmem>>, vector<1x16x128xf32>,
    return
  }
  func.func @transform_0(%arg0: i32) -> i32 {
    %c0_i32 = arith.constant 0 : i32
    %c0_i32_0 = arith.constant 0 : i32
    return %c0_i32 : i32
  }
  func.func @transform_1(%arg0: i32) -> (i32, i32, i32) {
    %c0_i32 = arith.constant 0 : i32
    %c0_i32_0 = arith.constant 0 : i32
    %c0_i32_1 = arith.constant 0 : i32
    return %arg0, %c0_i32, %c0_i32_0 : i32, i32, i32
  }
  func.func @transform_2(%arg0: i32) -> (i32, i32, i32) {
    %c0_i32 = arith.constant 0 : i32
    %c0_i32_0 = arith.constant 0 : i32
    %c0_i32_1 = arith.constant 0 : i32
    return %arg0, %c0_i32, %c0_i32_0 : i32, i32, i32
  }
  func.func @transform_3(%arg0: i32) -> (i32, i32, i32) {
    %c0_i32 = arith.constant 0 : i32
    %c0_i32_0 = arith.constant 0 : i32
    %c0_i32_1 = arith.constant 0 : i32
    return %arg0, %c0_i32, %c0_i32_0 : i32, i32, i32
  }
  func.func @transform_4(%arg0: i32) -> (i32, i32, i32) {
    %c0_i32 = arith.constant 0 : i32
    %c0_i32_0 = arith.constant 0 : i32
    %c0_i32_1 = arith.constant 0 : i32
    return %arg0, %c0_i32, %c0_i32_0 : i32, i32, i32
  }
  func.func @transform_5(%arg0: i32) -> (i32, i32) {
    %c0_i32 = arith.constant 0 : i32
    %c0_i32_0 = arith.constant 0 : i32
    %c0_i32_1 = arith.constant 0 : i32
    return %c0_i32, %c0_i32_0 : i32, i32
  }
  func.func @transform_6(%arg0: i32) -> (i32, i32) {
    %c0_i32 = arith.constant 0 : i32
    %c0_i32_0 = arith.constant 0 : i32
    %c0_i32_1 = arith.constant 0 : i32
    return %c0_i32, %c0_i32_0 : i32, i32
  }
  func.func @transform_7(%arg0: i32) -> (i32, i32) {
    %c0_i32 = arith.constant 0 : i32
    %c0_i32_0 = arith.constant 0 : i32
    %c0_i32_1 = arith.constant 0 : i32
    return %c0_i32, %c0_i32_0 : i32, i32
  }
  func.func @transform_8(%arg0: i32) -> (i32, i32) {
    %c0_i32 = arith.constant 0 : i32
    %c0_i32_0 = arith.constant 0 : i32
    %c0_i32_1 = arith.constant 0 : i32
    return %c0_i32, %c0_i32_0 : i32, i32
  }
  func.func @transform_9(%arg0: i32) -> (i32, i32) {
    %c0_i32 = arith.constant 0 : i32
    %c0_i32_0 = arith.constant 0 : i32
    %c0_i32_1 = arith.constant 0 : i32
    return %c0_i32, %c0_i32_0 : i32, i32
  }
  func.func @transform_10(%arg0: i32) -> (i32, i32) {
    %c0_i32 = arith.constant 0 : i32
    %c0_i32_0 = arith.constant 0 : i32
    %c0_i32_1 = arith.constant 0 : i32
    return %c0_i32, %c0_i32_0 : i32, i32
  }
  func.func @transform_11(%arg0: i32) -> (i32, i32, i32) {
    %c0_i32 = arith.constant 0 : i32
    %c0_i32_0 = arith.constant 0 : i32
    %c0_i32_1 = arith.constant 0 : i32
    return %arg0, %c0_i32, %c0_i32_0 : i32, i32, i32
  }
  func.func @transform_12(%arg0: i32) -> (i32, i32, i32) {
    %c0_i32 = arith.constant 0 : i32
    %c0_i32_0 = arith.constant 0 : i32
    %c0_i32_1 = arith.constant 0 : i32
    return %arg0, %c0_i32, %c0_i32_0 : i32, i32, i32
  }
}

</mosaic_0001>

<bundles_post_ra>
// kernel: custom-call
= control target key start
LH: loop header
LB: loop body
LE: loop exit
PB: predicated region body
PF: predicated region fallthrough
CT: control target
= control target key end

     0   :  { %2 = vsyncpa [#allocation0], 0  ;;  %s61_s0 = inlined_call_operand.hbm [shape: c64[2,4,16,16], index: 0, kind: input, shape index: {}]   ;;  %s62_s1 = inlined_call_operand.vmem [shape: f32[2,4,16,16], index: 1, kind: output, shape index: {}]  }
   0x1   :  { %s3_s8 = sshll.u32 %s62_s1, 4  ;;  %s9_s11 = scalar_lea.hbm %s61_s0, 2048  ;;  %s4_s8 = int_to_ptr.vmem [resolvable:$true] %s3_s8 }
   0x2   :  { %p10_p0 = scmp.ne.s32.totalorder %s61_s0, %s9_s11  ;;  %s11_s16 = scalar_lea.hbm %s61_s0, 4096 }
   0x3   :  { %p12_p1 = scmp.lt.u32.totalorder %s11_s16, %s9_s11  ;;  %p13_p2 = scmp.lt.u32.totalorder %s9_s11, %s61_s0 }
   0x5   :  { %p14_p3 = por %p13_p2, %p12_p1 }
   0x7   :  { %p15_p4 = pnand %p14_p3, %p10_p0 }
   0x9   :  { %18 = shalt.err (!%p15_p4)  }
   0xa   :  { %s19_s1 = scalar_lea.vmem %s4_s8, 2048  ;;  %p24_p6 = scmp.lt.s32.totalorder %s4_s8, %s4_s8 }
   0xb   :  { %p20_p5 = scmp.ne.s32.totalorder %s4_s8, %s19_s1  ;;  %p25_p7 = scmp.lt.s32.totalorder %s19_s1, %s19_s1 }
   0xd   :  { %p26_p8 = por %p25_p7, %p24_p6 }
   0xf   :  { %p27_p9 = pnand %p26_p8, %p20_p5 }
  0x11   :  { %30 = shalt.err (!%p27_p9)  }
  0x12   :  { %6 = dma.hbm_to_vmem [thread:$0]  %s61_s0, 2048, %s4_s8, [#allocation0] }
  0x13   :  { %31 = dma.done.wait [#allocation0], 2048  }
  0x14   :  { %32 = vsyncadd [#allocation0], 4294965248 }
  0x15   :  { %8 = vsyncpa [#allocation0], 1 }

// kernel: custom-call.1
= control target key start
LH: loop header
LB: loop body
LE: loop exit
PB: predicated region body
PF: predicated region fallthrough
CT: control target
= control target key end

     0   :  { %s59_s0 = inlined_call_operand.hbm [shape: c64[2,4,16,16], index: 0, kind: input, shape index: {}]   ;;  %s60_s1 = inlined_call_operand.vmem [shape: f32[2,4,16,16], index: 1, kind: output, shape index: {}]  }
   0x1   :  { %s2_s8 = scalar_lea.hbm %s59_s0, 2048 }
   0x2   :  { %3 = vsyncpa [#allocation0], 0  ;;  %s4_s11 = sshll.u32 %s60_s1, 4  ;;  %s34_s14 = scalar_lea.hbm %s59_s0, 4096  ;;  %s5_s11 = int_to_ptr.vmem [resolvable:$true] %s4_s11 }
   0x3   :  { %p11_p0 = scmp.ne.s32.totalorder %s2_s8, %s34_s14  ;;  %p13_p1 = scmp.lt.u32.totalorder %s2_s8, %s59_s0 }
   0x4   :  { %p14_p2 = scmp.lt.u32.totalorder %s34_s14, %s34_s14  ;;  %p16_p4 = scmp.lt.u32.totalorder %s34_s14, %s2_s8 }
   0x6   :  { %p15_p3 = por %p14_p2, %p13_p1 }
   0x8   :  { %p17_p5 = por %p16_p4, %p15_p3 }
   0xa   :  { %p18_p6 = pnand %p17_p5, %p11_p0 }
   0xc   :  { %21 = shalt.err (!%p18_p6)  }
   0xd   :  { %s22_s17 = scalar_lea.vmem %s5_s11, 2048  ;;  %p27_p8 = scmp.lt.s32.totalorder %s5_s11, %s5_s11 }
   0xe   :  { %p23_p7 = scmp.ne.s32.totalorder %s5_s11, %s22_s17  ;;  %p28_p9 = scmp.lt.s32.totalorder %s22_s17, %s22_s17 }
  0x10   :  { %p29_p10 = por %p28_p9, %p27_p8 }
  0x12   :  { %p30_p11 = pnand %p29_p10, %p23_p7 }
  0x14   :  { %33 = shalt.err (!%p30_p11)  }
  0x15   :  { %7 = dma.hbm_to_vmem [thread:$0]  %s2_s8, 2048, %s5_s11, [#allocation0] }
  0x16   :  { %35 = dma.done.wait [#allocation0], 2048  }
  0x17   :  { %36 = vsyncadd [#allocation0], 4294965248 }
  0x18   :  { %9 = vsyncpa [#allocation0], 1 }

// kernel: tile.9
= control target key start
LH: loop header
LB: loop body
LE: loop exit
PB: predicated region body
PF: predicated region fallthrough
CT: control target
= control target key end

     0   :  { %vm4_vm0 = vcmask 1047556   ;;  %s429_s14 = smov 112   ;;  %s430_s10 = smov 96   ;;  %vm6_vm1 = vcmask 130048   ;;  %vm43_vm2 = vcmask 1048448   ;;  %vm86_vm3 = vcmask 917248   ;;  %s770_s0 = inlined_call_operand.vmem [shape: f32[2,16,8,16], index: 0, kind: input, shape index: {}]   ;;  %s771_s1 = inlined_call_operand.vmem [shape: f32[2,16,128], index: 1, kind: output, shape index: {}]  }
   0x1   :  { %v350_v0 = vld [vmem:[%s770_s0 + $0x87] ss:$8 sm:$0xf]   ;;  %v358_v12 = vld [vmem:[%s770_s0 + $0x46] ss:$8 sm:$0xf]  }
   0x2   :  { %v351_v1 = vld [vmem:[%s770_s0 + $0x87] ss:$8 sm:$0xf0]   ;;  %v359_v13 = vld [vmem:[%s770_s0 + $0x46] ss:$8 sm:$0xf0]  }
   0x3   :  { %v61_v2 = vsel %vm4_vm0, %v351_v1, %v350_v0  ;;  %v345_v3 = vld [vmem:[%s770_s0 + $0x7] ss:$8 sm:$0xf]   ;;  %v356_v14 = vld [vmem:[%s770_s0 + $0x6] ss:$8 sm:$0xf]   ;;  %v93_v16 = vsel %vm4_vm0, %v359_v13, %v358_v12 }
   0x4   :  { %v346_v4 = vld [vmem:[%s770_s0 + $0x7] ss:$8 sm:$0xf0]   ;;  %62 = vrot.lane.b32.xlu1 %v61_v2, %s429_s14  ;;  %v357_v15 = vld [vmem:[%s770_s0 + $0x6] ss:$8 sm:$0xf0]  }
   0x5   :  { %v40_v5 = vsel %vm4_vm0, %v346_v4, %v345_v3  ;;  %v353_v6 = vld [vmem:[%s770_s0 + $0xc7] ss:$8 sm:$0xf]   ;;  %v83_v17 = vsel %vm4_vm0, %v357_v15, %v356_v14  ;;  %v364_v18 = vld [vmem:[%s770_s0 + $0xc6] ss:$8 sm:$0xf]  }
   0x6   :  { %v354_v7 = vld [vmem:[%s770_s0 + $0xc7] ss:$8 sm:$0xf0]   ;;  %41 = vrot.lane.b32.xlu0 %v40_v5, %s429_s14  ;;  %v365_v19 = vld [vmem:[%s770_s0 + $0xc6] ss:$8 sm:$0xf0]  }
   0x7   :  { %v72_v8 = vsel %vm4_vm0, %v354_v7, %v353_v6  ;;  %v347_v9 = vld [vmem:[%s770_s0 + $0x47] ss:$8 sm:$0xf]   ;;  %v361_v20 = vld [vmem:[%s770_s0 + $0x86] ss:$8 sm:$0xf]   ;;  %v115_v22 = vsel %vm4_vm0, %v365_v19, %v364_v18 }
   0x8   :  { %v348_v10 = vld [vmem:[%s770_s0 + $0x47] ss:$8 sm:$0xf0]   ;;  %73 = vrot.lane.b32.xlu1 %v72_v8, %s429_s14  ;;  %v362_v21 = vld [vmem:[%s770_s0 + $0x86] ss:$8 sm:$0xf0]  }
   0x9   :  { %v50_v11 = vsel %vm4_vm0, %v348_v10, %v347_v9  ;;  %v104_v23 = vsel %vm4_vm0, %v362_v21, %v361_v20  ;;  %v369_v24 = vld [vmem:[%s770_s0 + $0x45] ss:$8 sm:$0xf]   ;;  %s431_s27 = smov 80   ;;  %s432_s15 = smov 64   ;;  %vm129_vm4 = vcmask 786048  }
   0xa   :  { %51 = vrot.lane.b32.xlu0 %v50_v11, %s429_s14  ;;  %v370_v25 = vld [vmem:[%s770_s0 + $0x45] ss:$8 sm:$0xf0]   ;;  %v380_v36 = vld [vmem:[%s770_s0 + $0x44] ss:$8 sm:$0xf]  }
   0xb   :  { %v367_v26 = vld [vmem:[%s770_s0 + $0x5] ss:$8 sm:$0xf]   ;;  %v136_v28 = vsel %vm4_vm0, %v370_v25, %v369_v24  ;;  %v381_v37 = vld [vmem:[%s770_s0 + $0x44] ss:$8 sm:$0xf0]  }
   0xc   :  { %94 = vrot.lane.b32.xlu1 %v93_v16, %s430_s10  ;;  %v368_v27 = vld [vmem:[%s770_s0 + $0x5] ss:$8 sm:$0xf0]   ;;  %v378_v38 = vld [vmem:[%s770_s0 + $0x4] ss:$8 sm:$0xf]   ;;  %v179_v40 = vsel %vm4_vm0, %v381_v37, %v380_v36 }
   0xd   :  { %v126_v29 = vsel %vm4_vm0, %v368_v27, %v367_v26  ;;  %v375_v30 = vld [vmem:[%s770_s0 + $0xc5] ss:$8 sm:$0xf]   ;;  %v379_v39 = vld [vmem:[%s770_s0 + $0x4] ss:$8 sm:$0xf0]  }
   0xe   :  { %84 = vrot.lane.b32.xlu0 %v83_v17, %s430_s10  ;;  %v376_v31 = vld [vmem:[%s770_s0 + $0xc5] ss:$8 sm:$0xf0]   ;;  %v169_v41 = vsel %vm4_vm0, %v379_v39, %v378_v38  ;;  %v386_v42 = vld [vmem:[%s770_s0 + $0xc4] ss:$8 sm:$0xf]  }
   0xf   :  { %v372_v32 = vld [vmem:[%s770_s0 + $0x85] ss:$8 sm:$0xf]   ;;  %v158_v34 = vsel %vm4_vm0, %v376_v31, %v375_v30  ;;  %v387_v43 = vld [vmem:[%s770_s0 + $0xc4] ss:$8 sm:$0xf0]  }
  0x10   :  { %116 = vrot.lane.b32.xlu1 %v115_v22, %s430_s10  ;;  %v373_v33 = vld [vmem:[%s770_s0 + $0x85] ss:$8 sm:$0xf0]   ;;  %v383_v44 = vld [vmem:[%s770_s0 + $0x84] ss:$8 sm:$0xf]   ;;  %v201_v46 = vsel %vm4_vm0, %v387_v43, %v386_v42 }
  0x11   :  { %v147_v35 = vsel %vm4_vm0, %v373_v33, %v372_v32  ;;  %v384_v45 = vld [vmem:[%s770_s0 + $0x84] ss:$8 sm:$0xf0]   ;;  %v391_v47 = vld [vmem:[%s770_s0 + $0x43] ss:$8 sm:$0xf]  }
  0x12   :  { %105 = vrot.lane.b32.xlu0 %v104_v23, %s430_s10  ;;  %v190_v48 = vsel %vm4_vm0, %v384_v45, %v383_v44  ;;  %v392_v49 = vld [vmem:[%s770_s0 + $0x43] ss:$8 sm:$0xf0]   ;;  %v339_v52 = vld [vmem:[%s770_s0 + $0x80] ss:$8 sm:$0xf]  }
  0x13   :  { %v389_v50 = vld [vmem:[%s770_s0 + $0x3] ss:$8 sm:$0xf]   ;;  %v340_v55 = vld [vmem:[%s770_s0 + $0x80] ss:$8 sm:$0xf0]   ;;  %v222_v57 = vsel %vm4_vm0, %v392_v49, %v391_v47 }
  0x14   :  { %137 = vrot.lane.b32.xlu1 %v136_v28, %s431_s27  ;;  %v390_v51 = vld [vmem:[%s770_s0 + $0x3] ss:$8 sm:$0xf0]   ;;  %v2_v56 = vld [vmem:[%s770_s0] ss:$8 sm:$0xf]   ;;  %v22_v59 = vsel %vm4_vm0, %v340_v55, %v339_v52 }
  0x15   :  { %v397_v53 = vld [vmem:[%s770_s0 + $0xc3] ss:$8 sm:$0xf]   ;;  %v3_v60 = vld [vmem:[%s770_s0] ss:$8 sm:$0xf0]   ;;  %v212_v62 = vsel %vm4_vm0, %v390_v51, %v389_v50 }
  0x16   :  { %127 = vrot.lane.b32.xlu0 %v126_v29, %s431_s27  ;;  %v398_v54 = vld [vmem:[%s770_s0 + $0xc3] ss:$8 sm:$0xf0]   ;;  %v342_v61 = vld [vmem:[%s770_s0 + $0xc0] ss:$8 sm:$0xf]   ;;  %v5_v63 = vsel %vm4_vm0, %v3_v60, %v2_v56 }
  0x17   :  { %v394_v58 = vld [vmem:[%s770_s0 + $0x83] ss:$8 sm:$0xf]   ;;  %341 = vst.msk [vmem:[%s771_s1 + $0x10] sm:$0xff] %vm6_vm1, %v22_v59   ;;  %7 = vst.msk [vmem:[%s771_s1] sm:$0xff] %vm6_vm1, %v5_v63   ;;  %s433_s23 = smov 48   ;;  %v244_v6 = vsel %vm4_vm0, %v398_v54, %v397_v53 }
  0x18   :  { %159 = vrot.lane.b32.xlu1 %v158_v34, %s431_s27  ;;  %v343_v0 = vld [vmem:[%s770_s0 + $0xc0] ss:$8 sm:$0xf0]   ;;  %v395_v2 = vld [vmem:[%s770_s0 + $0x83] ss:$8 sm:$0xf0]  }
  0x19   :  { %v336_v1 = vld [vmem:[%s770_s0 + $0x40] ss:$8 sm:$0xf]   ;;  %v31_v3 = vsel %vm4_vm0, %v343_v0, %v342_v61  ;;  %v233_v7 = vsel %vm4_vm0, %v395_v2, %v394_v58  ;;  %v402_v8 = vld [vmem:[%s770_s0 + $0x42] ss:$8 sm:$0xf]  }
  0x1a   :  { %148 = vrot.lane.b32.xlu0 %v147_v35, %s431_s27  ;;  %v337_v4 = vld [vmem:[%s770_s0 + $0x40] ss:$8 sm:$0xf0]   ;;  %344 = vst.msk [vmem:[%s771_s1 + $0x18] sm:$0xff] %vm6_vm1, %v31_v3   ;;  %vm172_vm5 = vcmask 654848   ;;  %vm215_vm6 = vcmask 523648  }
  0x1b   :  { %v13_v5 = vsel %vm4_vm0, %v337_v4, %v336_v1  ;;  %v403_v9 = vld [vmem:[%s770_s0 + $0x42] ss:$8 sm:$0xf0]   ;;  %v413_v20 = vld [vmem:[%s770_s0 + $0x41] ss:$8 sm:$0xf]  }
  0x1c   :  { %180 = vrot.lane.b32.xlu1 %v179_v40, %s432_s15  ;;  %338 = vst.msk [vmem:[%s771_s1 + $0x8] sm:$0xff] %vm6_vm1, %v13_v5   ;;  %v400_v10 = vld [vmem:[%s770_s0 + $0x2] ss:$8 sm:$0xf]   ;;  %v265_v12 = vsel %vm4_vm0, %v403_v9, %v402_v8  ;;  %vm258_vm7 = vcmask 392448   ;;  %vm301_vm8 = vcmask 261248  }
  0x1d   :  { %v401_v11 = vld [vmem:[%s770_s0 + $0x2] ss:$8 sm:$0xf0]   ;;  %v414_v21 = vld [vmem:[%s770_s0 + $0x41] ss:$8 sm:$0xf0]  }
  0x1e   :  { %170 = vrot.lane.b32.xlu0 %v169_v41, %s432_s15  ;;  %v255_v13 = vsel %vm4_vm0, %v401_v11, %v400_v10  ;;  %v408_v14 = vld [vmem:[%s770_s0 + $0xc2] ss:$8 sm:$0xf]   ;;  %v411_v22 = vld [vmem:[%s770_s0 + $0x1] ss:$8 sm:$0xf]   ;;  %v308_v24 = vsel %vm4_vm0, %v414_v21, %v413_v20 }
  0x1f   :  { %v409_v15 = vld [vmem:[%s770_s0 + $0xc2] ss:$8 sm:$0xf0]   ;;  %v412_v23 = vld [vmem:[%s770_s0 + $0x1] ss:$8 sm:$0xf0]  }
  0x20   :  { %202 = vrot.lane.b32.xlu1 %v201_v46, %s432_s15  ;;  %v405_v16 = vld [vmem:[%s770_s0 + $0x82] ss:$8 sm:$0xf]   ;;  %v287_v18 = vsel %vm4_vm0, %v409_v15, %v408_v14  ;;  %v298_v25 = vsel %vm4_vm0, %v412_v23, %v411_v22  ;;  %v419_v26 = vld [vmem:[%s770_s0 + $0xc1] ss:$8 sm:$0xf]  }
  0x21   :  { %v406_v17 = vld [vmem:[%s770_s0 + $0x82] ss:$8 sm:$0xf0]   ;;  %v420_v27 = vld [vmem:[%s770_s0 + $0xc1] ss:$8 sm:$0xf0]  }
  0x22   :  { %191 = vrot.lane.b32.xlu0 %v190_v48, %s432_s15  ;;  %s434_s15 = smov 32   ;;  %v276_v19 = vsel %vm4_vm0, %v406_v17, %v405_v16  ;;  %v416_v28 = vld [vmem:[%s770_s0 + $0x81] ss:$8 sm:$0xf]   ;;  %v330_v30 = vsel %vm4_vm0, %v420_v27, %v419_v26 }
  0x23   :  { %v417_v29 = vld [vmem:[%s770_s0 + $0x81] ss:$8 sm:$0xf0]   ;;  %s435_s0 = smov 16  }
  0x24   :  { %223 = vrot.lane.b32.xlu1 %v222_v57, %s433_s23  ;;  %v319_v31 = vsel %vm4_vm0, %v417_v29, %v416_v28 }
  0x26   :  { %213 = vrot.lane.b32.xlu0 %v212_v62, %s433_s23 }
  0x28   :  { %245 = vrot.lane.b32.xlu1 %v244_v6, %s433_s23 }
  0x2a   :  { %234 = vrot.lane.b32.xlu0 %v233_v7, %s433_s23 }
  0x2c   :  { %266 = vrot.lane.b32.xlu1 %v265_v12, %s434_s15 }
  0x2e   :  { %256 = vrot.lane.b32.xlu0 %v255_v13, %s434_s15 }
  0x30   :  { %288 = vrot.lane.b32.xlu1 %v287_v18, %s434_s15 }
  0x32   :  { %277 = vrot.lane.b32.xlu0 %v276_v19, %s434_s15 }
  0x34   :  { %309 = vrot.lane.b32.xlu1 %v308_v24, %s435_s0 }
  0x36   :  { %299 = vrot.lane.b32.xlu0 %v298_v25, %s435_s0 }
  0x38   :  { %331 = vrot.lane.b32.xlu1 %v330_v30, %s435_s0 }
  0x3a   :  { %320 = vrot.lane.b32.xlu0 %v319_v31, %s435_s0 }
  0x76   :  { %v63_v32 = vpop.permute.xlu1 %62  }
  0x77   :  { %352 = vst.msk [vmem:[%s771_s1 + $0x10] sm:$0xff] %vm43_vm2, %v63_v32  }
  0x78   :  { %v42_v33 = vpop.permute.xlu0 %41  }
  0x79   :  { %44 = vst.msk [vmem:[%s771_s1] sm:$0xff] %vm43_vm2, %v42_v33  }
  0x7a   :  { %v74_v34 = vpop.permute.xlu1 %73  }
  0x7b   :  { %355 = vst.msk [vmem:[%s771_s1 + $0x18] sm:$0xff] %vm43_vm2, %v74_v34  }
  0x7c   :  { %v52_v35 = vpop.permute.xlu0 %51  }
  0x7d   :  { %349 = vst.msk [vmem:[%s771_s1 + $0x8] sm:$0xff] %vm43_vm2, %v52_v35  }
  0x7e   :  { %v95_v36 = vpop.permute.xlu1 %94  }
  0x7f   :  { %360 = vst.msk [vmem:[%s771_s1 + $0x8] sm:$0xff] %vm86_vm3, %v95_v36  }
  0x80   :  { %v85_v37 = vpop.permute.xlu0 %84  }
  0x81   :  { %87 = vst.msk [vmem:[%s771_s1] sm:$0xff] %vm86_vm3, %v85_v37  }
  0x82   :  { %v117_v38 = vpop.permute.xlu1 %116  }
  0x83   :  { %366 = vst.msk [vmem:[%s771_s1 + $0x18] sm:$0xff] %vm86_vm3, %v117_v38  }
  0x84   :  { %v106_v39 = vpop.permute.xlu0 %105  }
  0x85   :  { %363 = vst.msk [vmem:[%s771_s1 + $0x10] sm:$0xff] %vm86_vm3, %v106_v39  }
  0x86   :  { %v138_v40 = vpop.permute.xlu1 %137  }
  0x87   :  { %371 = vst.msk [vmem:[%s771_s1 + $0x8] sm:$0xff] %vm129_vm4, %v138_v40  }
  0x88   :  { %v128_v41 = vpop.permute.xlu0 %127  }
  0x89   :  { %130 = vst.msk [vmem:[%s771_s1] sm:$0xff] %vm129_vm4, %v128_v41  }
  0x8a   :  { %v160_v42 = vpop.permute.xlu1 %159  }
  0x8b   :  { %377 = vst.msk [vmem:[%s771_s1 + $0x18] sm:$0xff] %vm129_vm4, %v160_v42  }
  0x8c   :  { %v149_v43 = vpop.permute.xlu0 %148  }
  0x8d   :  { %374 = vst.msk [vmem:[%s771_s1 + $0x10] sm:$0xff] %vm129_vm4, %v149_v43  }
  0x8e   :  { %v181_v44 = vpop.permute.xlu1 %180  }
  0x8f   :  { %382 = vst.msk [vmem:[%s771_s1 + $0x8] sm:$0xff] %vm172_vm5, %v181_v44  }
  0x90   :  { %v171_v45 = vpop.permute.xlu0 %170  }
  0x91   :  { %173 = vst.msk [vmem:[%s771_s1] sm:$0xff] %vm172_vm5, %v171_v45  }
  0x92   :  { %v203_v46 = vpop.permute.xlu1 %202  }
  0x93   :  { %388 = vst.msk [vmem:[%s771_s1 + $0x18] sm:$0xff] %vm172_vm5, %v203_v46  }
  0x94   :  { %v192_v47 = vpop.permute.xlu0 %191  }
  0x95   :  { %385 = vst.msk [vmem:[%s771_s1 + $0x10] sm:$0xff] %vm172_vm5, %v192_v47  }
  0x96   :  { %v224_v48 = vpop.permute.xlu1 %223  }
  0x97   :  { %393 = vst.msk [vmem:[%s771_s1 + $0x8] sm:$0xff] %vm215_vm6, %v224_v48  }
  0x98   :  { %v214_v49 = vpop.permute.xlu0 %213  }
  0x99   :  { %216 = vst.msk [vmem:[%s771_s1] sm:$0xff] %vm215_vm6, %v214_v49  }
  0x9a   :  { %v246_v50 = vpop.permute.xlu1 %245  }
  0x9b   :  { %399 = vst.msk [vmem:[%s771_s1 + $0x18] sm:$0xff] %vm215_vm6, %v246_v50  }
  0x9c   :  { %v235_v51 = vpop.permute.xlu0 %234  }
  0x9d   :  { %396 = vst.msk [vmem:[%s771_s1 + $0x10] sm:$0xff] %vm215_vm6, %v235_v51  }
  0x9e   :  { %v267_v52 = vpop.permute.xlu1 %266  }
  0x9f   :  { %404 = vst.msk [vmem:[%s771_s1 + $0x8] sm:$0xff] %vm258_vm7, %v267_v52  }
  0xa0   :  { %v257_v53 = vpop.permute.xlu0 %256  }
  0xa1   :  { %259 = vst.msk [vmem:[%s771_s1] sm:$0xff] %vm258_vm7, %v257_v53  }
  0xa2   :  { %v289_v54 = vpop.permute.xlu1 %288  }
  0xa3   :  { %410 = vst.msk [vmem:[%s771_s1 + $0x18] sm:$0xff] %vm258_vm7, %v289_v54  }
  0xa4   :  { %v278_v55 = vpop.permute.xlu0 %277  }
  0xa5   :  { %407 = vst.msk [vmem:[%s771_s1 + $0x10] sm:$0xff] %vm258_vm7, %v278_v55  }
  0xa6   :  { %v310_v56 = vpop.permute.xlu1 %309  }
  0xa7   :  { %415 = vst.msk [vmem:[%s771_s1 + $0x8] sm:$0xff] %vm301_vm8, %v310_v56  }
  0xa8   :  { %v300_v57 = vpop.permute.xlu0 %299  }
  0xa9   :  { %302 = vst.msk [vmem:[%s771_s1] sm:$0xff] %vm301_vm8, %v300_v57  }
  0xaa   :  { %v332_v58 = vpop.permute.xlu1 %331  }
  0xab   :  { %421 = vst.msk [vmem:[%s771_s1 + $0x18] sm:$0xff] %vm301_vm8, %v332_v58  }
  0xac   :  { %v321_v59 = vpop.permute.xlu0 %320  }
  0xad   :  { %418 = vst.msk [vmem:[%s771_s1 + $0x10] sm:$0xff] %vm301_vm8, %v321_v59  }

// kernel: custom-call.6
= control target key start
LH: loop header
LB: loop body
LE: loop exit
PB: predicated region body
PF: predicated region fallthrough
CT: control target
= control target key end

     0   :  { %s126_s0 = inlined_call_operand.vmem [shape: f32[2,4,16,16], index: 0, kind: input, shape index: {}]   ;;  %s127_s1 = inlined_call_operand.vmem [shape: f32[2,4,16,16], index: 1, kind: input, shape index: {}]   ;;  %s128_s2 = inlined_call_operand.hbm [shape: c64[2,4,16,16], index: 2, kind: output, shape index: {}]  }
   0x1   :  { %s87_s11 = scalar_lea.hbm %s128_s2, 2048 }
   0x2   :  { %4 = vsyncpa [#allocation0], 0  ;;  %s5_s14 = sshll.u32 %s126_s0, 4  ;;  %s6_s14 = int_to_ptr.vmem [resolvable:$true] %s5_s14 }
   0x3   :  { %s18_s15 = scalar_lea.vmem %s6_s14, 2048  ;;  %p23_p1 = scmp.lt.s32.totalorder %s6_s14, %s6_s14 }
   0x4   :  { %p19_p0 = scmp.ne.s32.totalorder %s6_s14, %s18_s15  ;;  %p24_p2 = scmp.lt.s32.totalorder %s18_s15, %s18_s15 }
   0x6   :  { %p25_p3 = por %p24_p2, %p23_p1 }
   0x8   :  { %p26_p4 = pnand %p25_p3, %p19_p0 }
   0xa   :  { %29 = shalt.err (!%p26_p4)  }
   0xb   :  { %p31_p5 = scmp.ne.s32.totalorder %s128_s2, %s87_s11  ;;  %s32_s0 = scalar_lea.hbm %s128_s2, 4096 }
   0xc   :  { %p33_p6 = scmp.lt.u32.totalorder %s32_s0, %s87_s11  ;;  %p34_p7 = scmp.lt.u32.totalorder %s87_s11, %s128_s2 }
   0xe   :  { %p35_p8 = por %p34_p7, %p33_p6 }
  0x10   :  { %p36_p9 = pnand %p35_p8, %p31_p5 }
  0x12   :  { %39 = shalt.err (!%p36_p9)  }
  0x13   :  { %8 = dma.vmem_to_hbm [thread:$0]  %s6_s14, 2048, %s128_s2, [#allocation0] }
  0x14   :  { %65 = dma.done.wait [#allocation0], 2048  }
  0x15   :  { %66 = vsyncadd [#allocation0], 4294965248 }
  0x16   :  { %10 = vsyncpa [#allocation0], 1 }
  0x17   :  { %11 = vsyncpa [#allocation1], 0  ;;  %s12_s28 = sshll.u32 %s127_s1, 4  ;;  %s13_s28 = int_to_ptr.vmem [resolvable:$true] %s12_s28 }
  0x18   :  { %s40_s29 = scalar_lea.vmem %s13_s28, 2048  ;;  %p45_p11 = scmp.lt.s32.totalorder %s13_s28, %s13_s28 }
  0x19   :  { %p41_p10 = scmp.ne.s32.totalorder %s13_s28, %s40_s29  ;;  %p46_p12 = scmp.lt.s32.totalorder %s40_s29, %s40_s29 }
  0x1b   :  { %p47_p13 = por %p46_p12, %p45_p11 }
  0x1d   :  { %p48_p0 = pnand %p47_p13, %p41_p10 }
  0x1f   :  { %51 = shalt.err (!%p48_p0)  }
  0x20   :  { %p53_p1 = scmp.ne.s32.totalorder %s87_s11, %s32_s0  ;;  %p56_p2 = scmp.lt.u32.totalorder %s32_s0, %s32_s0 }
  0x22   :  { %p57_p3 = por %p56_p2, %p34_p7 }
  0x24   :  { %p59_p4 = por %p57_p3, %p33_p6 }
  0x26   :  { %p60_p5 = pnand %p59_p4, %p53_p1 }
  0x28   :  { %63 = shalt.err (!%p60_p5)  }
  0x29   :  { %15 = dma.vmem_to_hbm [thread:$0]  %s13_s28, 2048, %s87_s11, [#allocation1] }
  0x2a   :  { %67 = dma.done.wait [#allocation1], 2048  }
  0x2b   :  { %68 = vsyncadd [#allocation1], 4294965248 }
  0x2c   :  { %17 = vsyncpa [#allocation1], 1 }

// kernel: custom-call.4
= control target key start
LH: loop header
LB: loop body
LE: loop exit
PB: predicated region body
PF: predicated region fallthrough
CT: control target
= control target key end

     0   :  { %s126_s0 = inlined_call_operand.vmem [shape: f32[2,16,16], index: 0, kind: input, shape index: {}]   ;;  %s127_s1 = inlined_call_operand.vmem [shape: f32[2,16,16], index: 1, kind: input, shape index: {}]   ;;  %s128_s2 = inlined_call_operand.hbm [shape: c64[2,16,16], index: 2, kind: output, shape index: {}]  }
   0x1   :  { %s87_s11 = scalar_lea.hbm %s128_s2, 512 }
   0x2   :  { %4 = vsyncpa [#allocation0], 0  ;;  %s5_s14 = sshll.u32 %s126_s0, 4  ;;  %s6_s14 = int_to_ptr.vmem [resolvable:$true] %s5_s14 }
   0x3   :  { %s18_s15 = scalar_lea.vmem %s6_s14, 512  ;;  %p23_p1 = scmp.lt.s32.totalorder %s6_s14, %s6_s14 }
   0x4   :  { %p19_p0 = scmp.ne.s32.totalorder %s6_s14, %s18_s15  ;;  %p24_p2 = scmp.lt.s32.totalorder %s18_s15, %s18_s15 }
   0x6   :  { %p25_p3 = por %p24_p2, %p23_p1 }
   0x8   :  { %p26_p4 = pnand %p25_p3, %p19_p0 }
   0xa   :  { %29 = shalt.err (!%p26_p4)  }
   0xb   :  { %p31_p5 = scmp.ne.s32.totalorder %s128_s2, %s87_s11  ;;  %s32_s0 = scalar_lea.hbm %s128_s2, 1024 }
   0xc   :  { %p33_p6 = scmp.lt.u32.totalorder %s32_s0, %s87_s11  ;;  %p34_p7 = scmp.lt.u32.totalorder %s87_s11, %s128_s2 }
   0xe   :  { %p35_p8 = por %p34_p7, %p33_p6 }
  0x10   :  { %p36_p9 = pnand %p35_p8, %p31_p5 }
  0x12   :  { %39 = shalt.err (!%p36_p9)  }
  0x13   :  { %8 = dma.vmem_to_hbm [thread:$0]  %s6_s14, 512, %s128_s2, [#allocation0] }
  0x14   :  { %65 = dma.done.wait [#allocation0], 512  }
  0x15   :  { %66 = vsyncadd [#allocation0], 4294966784 }
  0x16   :  { %10 = vsyncpa [#allocation0], 1 }
  0x17   :  { %11 = vsyncpa [#allocation1], 0  ;;  %s12_s28 = sshll.u32 %s127_s1, 4  ;;  %s13_s28 = int_to_ptr.vmem [resolvable:$true] %s12_s28 }
  0x18   :  { %s40_s29 = scalar_lea.vmem %s13_s28, 512  ;;  %p45_p11 = scmp.lt.s32.totalorder %s13_s28, %s13_s28 }
  0x19   :  { %p41_p10 = scmp.ne.s32.totalorder %s13_s28, %s40_s29  ;;  %p46_p12 = scmp.lt.s32.totalorder %s40_s29, %s40_s29 }
  0x1b   :  { %p47_p13 = por %p46_p12, %p45_p11 }
  0x1d   :  { %p48_p0 = pnand %p47_p13, %p41_p10 }
  0x1f   :  { %51 = shalt.err (!%p48_p0)  }
  0x20   :  { %p53_p1 = scmp.ne.s32.totalorder %s87_s11, %s32_s0  ;;  %p56_p2 = scmp.lt.u32.totalorder %s32_s0, %s32_s0 }
  0x22   :  { %p57_p3 = por %p56_p2, %p34_p7 }
  0x24   :  { %p59_p4 = por %p57_p3, %p33_p6 }
  0x26   :  { %p60_p5 = pnand %p59_p4, %p53_p1 }
  0x28   :  { %63 = shalt.err (!%p60_p5)  }
  0x29   :  { %15 = dma.vmem_to_hbm [thread:$0]  %s13_s28, 512, %s87_s11, [#allocation1] }
  0x2a   :  { %67 = dma.done.wait [#allocation1], 512  }
  0x2b   :  { %68 = vsyncadd [#allocation1], 4294966784 }
  0x2c   :  { %17 = vsyncpa [#allocation1], 1 }

// kernel: modl_double_unroll.1
= control target key start
LH: loop header
LB: loop body
LE: loop exit
PB: predicated region body
PF: predicated region fallthrough
CT: control target
= control target key end

     0   :  { %s9113_s23 = smov 0   ;;  %s13067_s0 = inlined_call_operand.<no memory space> [shape: f32[1], index: 0, kind: input, shape index: {}]   ;;  %s13068_s1 = inlined_call_operand.vmem [shape: f32[2,16,64], index: 1, kind: input, shape index: {}]   ;;  %s13069_s2 = inlined_call_operand.vmem [shape: f32[2,16,64], index: 2, kind: input, shape index: {}]   ;;  %s13070_s3 = inlined_call_operand.vmem [shape: f32[2,16,128], index: 3, kind: input, shape index: {}]   ;;  %s13071_s4 = inlined_call_operand.vmem [shape: f32[2,16,128], index: 4, kind: input, shape index: {}]   ;;  %s13072_s5 = inlined_call_operand.vmem [shape: bf16[32,96], index: 5, kind: input, shape index: {}]   ;;  %s13073_s6 = inlined_call_operand.vmem [shape: bf16[32,96], index: 6, kind: input, shape index: {}]   ;;  %s13074_s7 = inlined_call_operand.vmem [shape: bf16[384,128], index: 7, kind: input, shape index: {}]   ;;  %s13075_s8 = inlined_call_operand.vmem [shape: bf16[384,64], index: 8, kind: input, shape index: {}]   ;;  %s13076_s9 = inlined_call_operand.vmem [shape: bf16[384,64], index: 9, kind: input, shape index: {}]   ;;  %s13077_s10 = inlined_call_operand.vmem [shape: bf16[128,16], index: 10, kind: input, shape index: {}]   ;;  %s13078_s11 = inlined_call_operand.vmem [shape: f32[2,16,128], index: 11, kind: output, shape index: {0}]   ;;  %s13079_s12 = inlined_call_operand.vmem [shape: f32[2,16,128], index: 12, kind: output, shape index: {1}]  }
   0x1   :  { %18 = sst [smem:[#allocation2]] %s13067_s0 }
   0x2 LB: > { %s6359_s24 = sadd.s32 4294967295, %s9037_s23   ;;  %p6363_p0 = scmp.ge.s32.totalorder %s9037_s23, 1  ;;  %s9037_s23 = sphi %s9113_s23, %s24_s23  }
   0x3   : > { %p396_p1 = scmp.lt.s32.totalorder %s9037_s23, 3 }
   0x5   : > { %p397_p2 = pnand %p6363_p0, %p396_p1 }
   0x7   : > { %400 = sbr.rel (%p397_p2) target bundleno = 15088 (0x3af0), region = 64 }
   0xe   : > { %v8610_v0 = vld [vmem:[%s13075_s8 + $0x40] sm:$0xff]   ;;  %v13080_v1 = vmov 0.0   ;;  %v8613_v4 = vld [vmem:[%s13075_s8 + $0x48] sm:$0xff]   ;;  %vm9040_vm0 = vmmov 0   ;;  %v8616_v7 = vld [vmem:[%s13075_s8 + $0x50] sm:$0xff]   ;;  %p458_p3 = scmp.lt.s32.totalorder %s6359_s24, 1 }
   0xf   : > { %7516 = vmatprep.subr.bf16.mxu1 %v13080_v1  ;;  %v8611_v2 = vld [vmem:[%s13075_s8] sm:$0xff]   ;;  %6500 = vmatprep.subr.bf16.mxu0 %v8610_v0  ;;  %v8614_v5 = vld [vmem:[%s13075_s8 + $0x8] sm:$0xff]   ;;  %v8617_v8 = vld [vmem:[%s13075_s8 + $0x10] sm:$0xff]   ;;  %vm1148_vm1 = vcmask 785408   ;;  %s9041_s20 = smov 64   ;;  %vm1219_vm2 = vcmask 523264  }
  0x10   : > { %v8612_v3 = vld [vmem:[%s13075_s8 + $0x80] sm:$0xff]   ;;  %6501 = vmatpush3.bf16.msra.mxu0 %v8611_v2  ;;  %7532 = vmatprep.mubr.msk.bf16.mxu1 %vm9040_vm0, %v13080_v1  ;;  %v8615_v6 = vld [vmem:[%s13075_s8 + $0x88] sm:$0xff]   ;;  %v8618_v9 = vld [vmem:[%s13075_s8 + $0x90] sm:$0xff]   ;;  %s13551_s24 = smov (!%p458_p3, %s6359_s24), 1  ;;  %s9042_s21 = smov 16   ;;  %vm1393_vm3 = vcmask 130048  }
  0x11   : > { %7517 = vmatpush3.bf16.msra.mxu1 %v8612_v3  ;;  %6502 = vmatprep.subr.bf16.mxu0 %v8613_v4  ;;  %v8619_v10 = vld [vmem:[%s13075_s8 + $0x58] sm:$0xff]   ;;  %v8622_v13 = vld [vmem:[%s13075_s8 + $0x60] sm:$0xff]   ;;  %v8625_v16 = vld [vmem:[%s13075_s8 + $0x68] sm:$0xff]   ;;  %s9186_s0 = sshll.u32 %s13551_s24, 4  ;;  %s9043_s22 = smov 32   ;;  %vm1396_vm4 = vcmask 261120  }
  0x12   : > { %7518 = vmatprep.subr.bf16.mxu1 %v13080_v1  ;;  %v8620_v11 = vld [vmem:[%s13075_s8 + $0x18] sm:$0xff]   ;;  %v8623_v14 = vld [vmem:[%s13075_s8 + $0x20] sm:$0xff]   ;;  %v8626_v17 = vld [vmem:[%s13075_s8 + $0x28] sm:$0xff]   ;;  %s472_s13 = scalar_lea.vmem %s13070_s3, %s9186_s0  ;;  %s9203_s17 = scalar_lea.vmem %s13071_s4, %s9186_s0  ;;  %vm1399_vm5 = vcmask 392192  }
  0x13   : > { %v8621_v12 = vld [vmem:[%s13075_s8 + $0x98] sm:$0xff]   ;;  %v8624_v15 = vld [vmem:[%s13075_s8 + $0xa0] sm:$0xff]   ;;  %v8627_v18 = vld [vmem:[%s13075_s8 + $0xa8] sm:$0xff]   ;;  %s9456_s24 = scalar_lea.vmem %s13068_s1, %s9186_s0  ;;  %s9462_s19 = scalar_lea.vmem %s13069_s2, %s9186_s0 }
  0x14   : > { %6503 = vmatpush3.bf16.msra.mxu0 %v8614_v5  ;;  %v8628_v19 = vld [vmem:[%s13075_s8 + $0x70] sm:$0xff]   ;;  %v8631_v22 = vld [vmem:[%s13075_s8 + $0x78] sm:$0xff]   ;;  %v494_v24 = vld [vmem:[%s472_s13] sm:$0xff]  ;;  %s9044_s25 = smov 48   ;;  %s489_s30 = sld [smem:[#allocation2]] }
  0x15   : > { %7519 = vmatpush3.bf16.msra.mxu1 %v8615_v6  ;;  %6504 = vmatprep.subr.bf16.mxu0 %v8616_v7  ;;  %v8629_v20 = vld [vmem:[%s13075_s8 + $0x30] sm:$0xff]   ;;  %v8632_v23 = vld [vmem:[%s13075_s8 + $0x38] sm:$0xff]   ;;  %v495_v25 = vld [vmem:[%s472_s13 + $0x8] sm:$0xff] }
  0x16   : > { %7520 = vmatprep.subr.bf16.mxu1 %v13080_v1  ;;  %v8630_v21 = vld [vmem:[%s13075_s8 + $0xb0] sm:$0xff]   ;;  %v496_v26 = vld [vmem:[%s9203_s17] sm:$0xff]  ;;  %v497_v27 = vld [vmem:[%s9203_s17 + $0x8] sm:$0xff] }
  0x17   : > { %v8633_v28 = vld [vmem:[%s13075_s8 + $0xb8] sm:$0xff]   ;;  %v666_v29 = vmul.f32 %v496_v26, %v494_v24  ;;  %v667_v30 = vmul.f32 %v497_v27, %v495_v25  ;;  %v8634_v31 = vld [vmem:[%s13076_s9 + $0x40] sm:$0xff]   ;;  %v8637_v40 = vld [vmem:[%s13076_s9 + $0x48] sm:$0xff]  }
  0x18   : > { %6505 = vmatpush3.bf16.msra.mxu0 %v8617_v8  ;;  %v8636_v35 = vld [vmem:[%s13076_s9 + $0x80] sm:$0xff]   ;;  %v8639_v41 = vld [vmem:[%s13076_s9 + $0x88] sm:$0xff]   ;;  %v8640_v43 = vld [vmem:[%s13076_s9 + $0x50] sm:$0xff]  }
  0x19   : > { %7521 = vmatpush3.bf16.msra.mxu1 %v8618_v9  ;;  %6506 = vmatprep.subr.bf16.mxu0 %v8619_v10  ;;  %v9224_v32 = vpack.c.bf16 %v667_v30, %v666_v29  ;;  %v8635_v38 = vld [vmem:[%s13076_s9] sm:$0xff]   ;;  %v8638_v42 = vld [vmem:[%s13076_s9 + $0x8] sm:$0xff]   ;;  %v9255_v44 = vld [vmem:[%s13076_s9 + $0x90] sm:$0xff]  }
  0x1a   : > { %7522 = vmatprep.subr.bf16.mxu1 %v13080_v1  ;;  %v9261_v45 = vld [vmem:[%s13076_s9 + $0x10] sm:$0xff]   ;;  %v9266_v46 = vld [vmem:[%s13076_s9 + $0x58] sm:$0xff]   ;;  %v9284_v49 = vld [vmem:[%s13076_s9 + $0x60] sm:$0xff]  }
  0x1b   : > { %v669_v33 = vunpack.c.l.bf16 %v9224_v32  ;;  %v670_v34 = vunpack.c.h.bf16 %v9224_v32  ;;  %v9272_v47 = vld [vmem:[%s13076_s9 + $0x98] sm:$0xff]   ;;  %v9291_v50 = vld [vmem:[%s13076_s9 + $0xa0] sm:$0xff]   ;;  %v9302_v52 = vld [vmem:[%s13076_s9 + $0x68] sm:$0xff]  }
  0x1c   : > { %6507 = vmatpush3.bf16.msra.mxu0 %v8620_v11  ;;  %v9278_v48 = vld [vmem:[%s13076_s9 + $0x18] sm:$0xff]   ;;  %v9297_v51 = vld [vmem:[%s13076_s9 + $0x20] sm:$0xff]   ;;  %v9307_v53 = vld [vmem:[%s13076_s9 + $0xa8] sm:$0xff]  }
  0x1d   : > { %7523 = vmatpush3.bf16.msra.mxu1 %v8621_v12  ;;  %6508 = vmatprep.subr.bf16.mxu0 %v8622_v13  ;;  %v671_v36 = vsub.f32 %v666_v29, %v669_v33  ;;  %v672_v37 = vsub.f32 %v667_v30, %v670_v34  ;;  %v9316_v54 = vld [vmem:[%s13076_s9 + $0x28] sm:$0xff]   ;;  %v9321_v55 = vld [vmem:[%s13076_s9 + $0x70] sm:$0xff]   ;;  %v9340_v58 = vld [vmem:[%s13076_s9 + $0x78] sm:$0xff]  }
  0x1e   : > { %7524 = vmatprep.subr.bf16.mxu1 %v13080_v1  ;;  %v9326_v56 = vld [vmem:[%s13076_s9 + $0xb0] sm:$0xff]   ;;  %v9345_v59 = vld [vmem:[%s13076_s9 + $0xb8] sm:$0xff]   ;;  %v9368_v61 = vld [vmem:[%s13073_s6] sm:$0xff]  }
  0x1f   : > { %v673_v39 = vpack.c.bf16 %v672_v37, %v671_v36  ;;  %v9335_v57 = vld [vmem:[%s13076_s9 + $0x30] sm:$0xff]   ;;  %v9354_v60 = vld [vmem:[%s13076_s9 + $0x38] sm:$0xff]   ;;  %v9385_v36 = vld [vmem:[%s13077_s10] sm:$0xff]  }
  0x20   : > { %6509 = vmatpush3.bf16.msra.mxu0 %v8623_v14  ;;  %v9391_v37 = vld [vmem:[%s13077_s10 + $0x8] sm:$0xff]  }
  0x21   : > { %7525 = vmatpush3.bf16.msra.mxu1 %v8624_v15  ;;  %6510 = vmatprep.subr.bf16.mxu0 %v8625_v16 }
  0x22   : > { %7526 = vmatprep.subr.bf16.mxu1 %v13080_v1  ;;  %850 = vmatprep.mubr.bf16.mxu0 %v673_v39 }
  0x24   : > { %6511 = vmatpush3.bf16.msra.mxu0 %v8626_v17 }
  0x25   : > { %7527 = vmatpush3.bf16.msra.mxu1 %v8627_v18  ;;  %6512 = vmatprep.subr.bf16.mxu0 %v8628_v19 }
  0x26   : > { %7528 = vmatprep.subr.bf16.mxu1 %v13080_v1 }
  0x28   : > { %6513 = vmatpush3.bf16.msra.mxu0 %v8629_v20 }
  0x29   : > { %7529 = vmatpush3.bf16.msra.mxu1 %v8630_v21  ;;  %6514 = vmatprep.subr.bf16.mxu0 %v8631_v22 }
  0x2a   : > { %7530 = vmatprep.subr.bf16.mxu1 %v13080_v1 }
  0x2c   : > { %6515 = vmatpush3.bf16.msra.mxu0 %v8632_v23 }
  0x2d   : > { %7531 = vmatpush3.bf16.msra.mxu1 %v8633_v28  ;;  %6531 = vmatprep.subr.bf16.mxu0 %v8634_v31 }
  0x2e   : > { %7536 = vmatprep.subr.bf16.mxu1 %v13080_v1 }
  0x2f   : > { %851 = vmatmul.mubr.bf16.vlgmr.msra.gmra.mrb[0].mxu0 %v9224_v32 }
  0x30   : > { %7533 = vmatmul.mubr.bf16.vlgmr.msra.gmra.mrb[0].mxu1 %v9224_v32  ;;  %6532 = vmatpush3.bf16.msra.mxu0 %v8635_v38  ;;  %v9400_v38 = vld [vmem:[%s13077_s10 + $0x10] sm:$0xff]  }
  0x31   : > { %7537 = vmatpush3.bf16.msra.mxu1 %v8636_v35  ;;  %7552 = vmatprep.mubr.msk.bf16.mxu1 %vm9040_vm0, %v13080_v1  ;;  %v9375_v35 = vld [vmem:[%s13073_s6 + $0x8] sm:$0xff]  }
  0x32   : > { %7538 = vmatprep.subr.bf16.mxu1 %v13080_v1  ;;  %1076 = vmatprep.mubr.bf16.mxu0 %v673_v39  ;;  %v9409_v39 = vld [vmem:[%s13077_s10 + $0x18] sm:$0xff]  }
  0x33   : > { %6533 = vmatprep.subr.bf16.mxu0 %v8637_v40  ;;  %v9418_v40 = vld [vmem:[%s13077_s10 + $0x20] sm:$0xff]  }
  0x34   : > { %6534 = vmatpush3.bf16.msra.mxu0 %v8638_v42  ;;  %v9436_v42 = vld [vmem:[%s13077_s10 + $0x30] sm:$0xff]  }
  0x35   : > { %7539 = vmatpush3.bf16.msra.mxu1 %v8639_v41  ;;  %6535 = vmatprep.subr.bf16.mxu0 %v8640_v43  ;;  %v9427_v41 = vld [vmem:[%s13077_s10 + $0x28] sm:$0xff]   ;;  %v9445_v43 = vld [vmem:[%s13077_s10 + $0x38] sm:$0xff]  }
  0x36   : > { %7540 = vmatprep.subr.bf16.mxu1 %v13080_v1 }
  0x38   : > { %6536 = vmatpush3.bf16.msra.mxu0 %v9261_v45 }
  0x39   : > { %7541 = vmatpush3.bf16.msra.mxu1 %v9255_v44  ;;  %6537 = vmatprep.subr.bf16.mxu0 %v9266_v46 }
  0x3a   : > { %7542 = vmatprep.subr.bf16.mxu1 %v13080_v1 }
  0x3c   : > { %6538 = vmatpush3.bf16.msra.mxu0 %v9278_v48 }
  0x3d   : > { %7543 = vmatpush3.bf16.msra.mxu1 %v9272_v47  ;;  %6539 = vmatprep.subr.bf16.mxu0 %v9284_v49 }
  0x3e   : > { %7544 = vmatprep.subr.bf16.mxu1 %v13080_v1 }
  0x40   : > { %6540 = vmatpush3.bf16.msra.mxu0 %v9297_v51 }
  0x41   : > { %7545 = vmatpush3.bf16.msra.mxu1 %v9291_v50  ;;  %6541 = vmatprep.subr.bf16.mxu0 %v9302_v52 }
  0x42   : > { %7546 = vmatprep.subr.bf16.mxu1 %v13080_v1 }
  0x44   : > { %6542 = vmatpush3.bf16.msra.mxu0 %v9316_v54 }
  0x45   : > { %7547 = vmatpush3.bf16.msra.mxu1 %v9307_v53  ;;  %6543 = vmatprep.subr.bf16.mxu0 %v9321_v55 }
  0x46   : > { %7548 = vmatprep.subr.bf16.mxu1 %v13080_v1 }
  0x48   : > { %6544 = vmatpush3.bf16.msra.mxu0 %v9335_v57 }
  0x49   : > { %7549 = vmatpush3.bf16.msra.mxu1 %v9326_v56  ;;  %6545 = vmatprep.subr.bf16.mxu0 %v9340_v58 }
  0x4a   : > { %7550 = vmatprep.subr.bf16.mxu1 %v13080_v1 }
  0x4c   : > { %6546 = vmatpush3.bf16.msra.mxu0 %v9354_v60 }
  0x4d   : > { %7551 = vmatpush3.bf16.msra.mxu1 %v9345_v59 }
  0x4e   : > { %7572 = vmatprep.subr.bf16.mxu1 %v13080_v1 }
  0x4f   : > { %1077 = vmatmul.mubr.bf16.vlgmr.msra.gmra.mrb[4].mxu0 %v9224_v32 }
  0x50   : > { %7553 = vmatmul.mubr.bf16.vlgmr.msra.gmra.mrb[4].mxu1 %v9224_v32  ;;  %7568 = vmatprep.mubr.msk.bf16.mxu0 %vm1148_vm1, %v9368_v61 }
  0x51   : > { %7588 = vmatprep.mubr.msk.bf16.mxu1 %vm9040_vm0, %v13080_v1  ;;  %7573 = vmatpush3.bf16.msra.mxu1 %v9385_v36 }
  0x52   : > { %7574 = vmatprep.subr.bf16.mxu1 %v13080_v1 }
  0x55   : > { %7575 = vmatpush3.bf16.msra.mxu1 %v9391_v37 }
  0x56   : > { %7576 = vmatprep.subr.bf16.mxu1 %v13080_v1 }
  0x59   : > { %7577 = vmatpush3.bf16.msra.mxu1 %v9400_v38 }
  0x5a   : > { %7578 = vmatprep.subr.bf16.mxu1 %v13080_v1 }
  0x5d   : > { %7579 = vmatpush3.bf16.msra.mxu1 %v9409_v39 }
  0x5e   : > { %7580 = vmatprep.subr.bf16.mxu1 %v13080_v1 }
  0x61   : > { %7581 = vmatpush3.bf16.msra.mxu1 %v9418_v40 }
  0x62   : > { %7582 = vmatprep.subr.bf16.mxu1 %v13080_v1 }
  0x65   : > { %7583 = vmatpush3.bf16.msra.mxu1 %v9427_v41 }
  0x66   : > { %7584 = vmatprep.subr.bf16.mxu1 %v13080_v1 }
  0x69   : > { %7585 = vmatpush3.bf16.msra.mxu1 %v9436_v42 }
  0x6a   : > { %7586 = vmatprep.subr.bf16.mxu1 %v13080_v1 }
  0x6d   : > { %7587 = vmatpush3.bf16.msra.mxu1 %v9445_v43 }
 0x102   : > { %v6516_v2 = vpop.f32.mrb[0].mxu0 }
 0x103   : > { %v893_v62 = vpop.f32.mrb[0].mxu1  ;;  %v6517_v4 = vpop.f32.mrb[1].mxu0 }
 0x104   : > { %v7534_v63 = vpop.f32.mrb[1].mxu1  ;;  %v6518_v5 = vadd.f32 %v6517_v4, %v6516_v2  ;;  %v6519_v6 = vpop.f32.mrb[2].mxu0  ;;  %v9474_v2 = vld [vmem:[%s9462_s19 + $0x8] sm:$0xff] }
 0x105   : > { %v896_v0 = vpop.f32.mrb[2].mxu1  ;;  %v6520_v7 = vpop.f32.mrb[3].mxu0  ;;  %v9468_v63 = vld [vmem:[%s9462_s19] sm:$0xff] }
 0x106   : > { %v7535_v3 = vpop.f32.mrb[3].mxu1  ;;  %v894_v8 = vadd.f32 %v6518_v5, %v893_v62  ;;  %v6521_v9 = vadd.f32 %v6520_v7, %v6519_v6  ;;  %v9465_v62 = vld [vmem:[%s9456_s24] sm:$0xff] }
 0x108   : > { %v897_v10 = vadd.f32 %v6521_v9, %v896_v0  ;;  %v9471_v0 = vld [vmem:[%s9456_s24 + $0x8] sm:$0xff] }
 0x10a   : > { %v1126_v11 = vpack.c.bf16 %v897_v10, %v894_v8 }
 0x10c   : > { %v1129_v12 = vunpack.c.h.bf16 %v1126_v11  ;;  %7556 = vmatprep.subr.bf16.mxu0 %v1126_v11  ;;  %v1128_v13 = vunpack.c.l.bf16 %v1126_v11 }
 0x10d   : > { %7557 = vmatpush3.bf16.msra.mxu0 %v1126_v11 }
 0x10e   : > { %v1133_v14 = vsub.f32 %v897_v10, %v1129_v12  ;;  %v1132_v15 = vsub.f32 %v894_v8, %v1128_v13 }
 0x110   : > { %v1136_v16 = vpack.c.bf16 %v1133_v14, %v1132_v15 }
 0x122   : > { %v6547_v20 = vpop.f32.mrb[4].mxu0 }
 0x123   : > { %v1119_v17 = vpop.f32.mrb[4].mxu1  ;;  %v6548_v22 = vpop.f32.mrb[5].mxu0 }
 0x124   : > { %v7554_v18 = vpop.f32.mrb[5].mxu1  ;;  %v6549_v23 = vadd.f32 %v6548_v22, %v6547_v20  ;;  %v6550_v24 = vpop.f32.mrb[6].mxu0 }
 0x125   : > { %v1122_v19 = vpop.f32.mrb[6].mxu1  ;;  %v6551_v25 = vpop.f32.mrb[7].mxu0 }
 0x126   : > { %v7555_v21 = vpop.f32.mrb[7].mxu1  ;;  %v1120_v26 = vadd.f32 %v6549_v23, %v1119_v17  ;;  %v6552_v27 = vadd.f32 %v6551_v25, %v6550_v24 }
 0x128   : > { %v1123_v28 = vadd.f32 %v6552_v27, %v1122_v19 }
 0x12a   : > { %v1127_v29 = vpack.c.bf16 %v1123_v28, %v1120_v26 }
 0x12c   : > { %v1131_v30 = vunpack.c.h.bf16 %v1127_v29  ;;  %7558 = vmatprep.subr.bf16.mxu0 %v1127_v29  ;;  %v1130_v31 = vunpack.c.l.bf16 %v1127_v29 }
 0x12d   : > { %7559 = vmatpush3.bf16.msra.mxu0 %v1127_v29 }
 0x12e   : > { %v1135_v32 = vsub.f32 %v1123_v28, %v1131_v30  ;;  %7560 = vmatprep.subr.bf16.mxu0 %v1136_v16  ;;  %v1134_v33 = vsub.f32 %v1120_v26, %v1130_v31 }
 0x130   : > { %v1137_v34 = vpack.c.bf16 %v1135_v32, %v1134_v33 }
 0x131   : > { %7561 = vmatpush3.bf16.msra.mxu0 %v1136_v16 }
 0x132   : > { %7562 = vmatprep.subr.bf16.mxu0 %v1137_v34 }
 0x135   : > { %7563 = vmatpush3.bf16.msra.mxu0 %v1137_v34 }
 0x136   : > { %7564 = vmatprep.subr.bf16.mxu0 %v1126_v11 }
 0x139   : > { %7565 = vmatpush3.bf16.msra.mxu0 %v1126_v11 }
 0x13a   : > { %7566 = vmatprep.subr.bf16.mxu0 %v1127_v29 }
 0x13d   : > { %7567 = vmatpush3.bf16.msra.mxu0 %v1127_v29 }
 0x13e   : > { %7592 = vmatprep.subr.bf16.mxu0 %v13080_v1 }
 0x140   : > { %7569 = vmatmul.mubr.msk.bf16.vlgmr.msra.gmra.mrb[8].mxu0 %vm1148_vm1, %v9375_v35 }
 0x141   : > { %7608 = vmatprep.mubr.msk.bf16.mxu0 %vm9040_vm0, %v13080_v1  ;;  %7593 = vmatpush3.bf16.msra.mxu0 %v9385_v36 }
 0x142   : > { %7594 = vmatprep.subr.bf16.mxu0 %v13080_v1 }
 0x145   : > { %7595 = vmatpush3.bf16.msra.mxu0 %v9391_v37 }
 0x146   : > { %7596 = vmatprep.subr.bf16.mxu0 %v13080_v1 }
 0x149   : > { %7597 = vmatpush3.bf16.msra.mxu0 %v9400_v38 }
 0x14a   : > { %7598 = vmatprep.subr.bf16.mxu0 %v13080_v1 }
 0x14d   : > { %7599 = vmatpush3.bf16.msra.mxu0 %v9409_v39 }
 0x14e   : > { %7600 = vmatprep.subr.bf16.mxu0 %v13080_v1 }
 0x151   : > { %7601 = vmatpush3.bf16.msra.mxu0 %v9418_v40 }
 0x152   : > { %7602 = vmatprep.subr.bf16.mxu0 %v13080_v1 }
 0x155   : > { %7603 = vmatpush3.bf16.msra.mxu0 %v9427_v41 }
 0x156   : > { %7604 = vmatprep.subr.bf16.mxu0 %v13080_v1 }
 0x159   : > { %7605 = vmatpush3.bf16.msra.mxu0 %v9436_v42 }
 0x15a   : > { %7606 = vmatprep.subr.bf16.mxu0 %v13080_v1 }
 0x15d   : > { %7607 = vmatpush3.bf16.msra.mxu0 %v9445_v43 }
 0x213   : > { %v7570_v3 = vpop.f32.mrb[8].mxu0 }
 0x214   : > { %v1206_v4 = vmul.f32 %v7570_v3, %v9468_v63  ;;  %v1224_v5 = vmul.f32 %v7570_v3, %v9465_v62  ;;  %v1189_v6 = vpop.f32.mrb[9].mxu0 }
 0x215   : > { %v1204_v7 = vmul.f32 %v1189_v6, %v9465_v62  ;;  %v1226_v8 = vmul.f32 %v1189_v6, %v9468_v63  ;;  %v7571_v9 = vpop.f32.mrb[10].mxu0 }
 0x216   : > { %v1207_v10 = vmul.f32 %v7571_v9, %v9474_v2  ;;  %v1225_v11 = vmul.f32 %v7571_v9, %v9471_v0  ;;  %v1192_v12 = vpop.f32.mrb[11].mxu0 }
 0x217   : > { %v1208_v13 = vadd.f32 %v1206_v4, %v1204_v7  ;;  %v1228_v14 = vsub.f32 %v1224_v5, %v1226_v8  ;;  %v1205_v15 = vmul.f32 %v1192_v12, %v9471_v0  ;;  %v1227_v16 = vmul.f32 %v1192_v12, %v9474_v2 }
 0x219   : > { %v1209_v17 = vadd.f32 %v1207_v10, %v1205_v15  ;;  %v1229_v18 = vsub.f32 %v1225_v11, %v1227_v16  ;;  %v9523_v11 = vld [vmem:[%s13072_s5] sm:$0xff]  }
 0x21b   : > { %v1210_v19 = vpack.c.bf16 %v1209_v17, %v1208_v13  ;;  %v1230_v20 = vpack.c.bf16 %v1229_v18, %v1228_v14 }
 0x21d   : > { %v1232_v21 = vunpack.c.h.bf16 %v1230_v20  ;;  %v1211_v22 = vunpack.c.l.bf16 %v1210_v19  ;;  %v1212_v23 = vunpack.c.h.bf16 %v1210_v19  ;;  %v1231_v24 = vunpack.c.l.bf16 %v1230_v20 }
 0x21f   : > { %v1234_v25 = vsub.f32 %v1229_v18, %v1232_v21  ;;  %v1213_v26 = vsub.f32 %v1208_v13, %v1211_v22  ;;  %v1214_v27 = vsub.f32 %v1209_v17, %v1212_v23  ;;  %v1233_v28 = vsub.f32 %v1228_v14, %v1231_v24 }
 0x221   : > { %v1215_v29 = vpack.c.bf16 %v1214_v27, %v1213_v26  ;;  %v1235_v30 = vpack.c.bf16 %v1234_v25, %v1233_v28 }
 0x223   : > { %1217 = vrot.lane.b32.xlu0 %v1215_v29, %s9041_s20 }
 0x227   : > { %1237 = vrot.lane.b32.xlu0 %v1235_v30, %s9041_s20 }
 0x295   : > { %v1218_v31 = vpop.permute.xlu0 %1217 }
 0x296   : > { %v1222_v32 = vsel %vm1219_vm2, %v1210_v19, %v1218_v31 }
 0x297   : > { %7589 = vmatmul.mubr.bf16.vlgmr.msra.gmra.mrb[8].mxu1 %v1222_v32 }
 0x298   : > { %7624 = vmatprep.mubr.msk.bf16.mxu1 %vm1148_vm1, %v9523_v11 }
 0x299   : > { %v1238_v33 = vpop.permute.xlu0 %1237 }
 0x29a   : > { %v1241_v34 = vsel %vm1219_vm2, %v1230_v20, %v1238_v33 }
 0x29b   : > { %7609 = vmatmul.mubr.bf16.vlgmr.msra.gmra.mrb[12].mxu0 %v1241_v34 }
 0x36a   : > { %v9488_v3 = vpop.f32.mrb[8].mxu1 }
 0x36b   : > { %13240 = vst [vmem:[#allocation3_spill] sm:$0xff] %v9488_v3  ;;  %1375 = vrot.lane.b32.xlu1 %v9488_v3, %s9042_s21  ;;  %v7590_v4 = vpop.f32.mrb[9].mxu1 }
 0x36c   : > { %v9492_v5 = vpop.f32.mrb[10].mxu1 }
 0x36d   : > { %13241 = vst [vmem:[#allocation4_spill] sm:$0xff] %v9492_v5  ;;  %v7591_v6 = vpop.f32.mrb[11].mxu1 }
 0x36e   : > { %v9494_v7 = vpop.f32.mrb[12].mxu0 }
 0x36f   : > { %13242 = vst [vmem:[#allocation5_spill] sm:$0xff] %v9494_v7  ;;  %1377 = vrot.lane.b32.xlu1 %v9492_v5, %s9042_s21  ;;  %1404 = vrot.lane.b32.xlu0 %v9494_v7, %s9042_s21  ;;  %v7610_v8 = vpop.f32.mrb[13].mxu0 }
 0x370   : > { %v9500_v9 = vpop.f32.mrb[14].mxu0 }
 0x371   : > { %13243 = vst [vmem:[#allocation6_spill] sm:$0xff] %v9500_v9  ;;  %v7611_v10 = vpop.f32.mrb[15].mxu0 }
 0x373   : > { %1381 = vrot.lane.b32.xlu0 %v9488_v3, %s9043_s22  ;;  %1406 = vrot.lane.b32.xlu1 %v9500_v9, %s9042_s21 }
 0x377   : > { %1410 = vrot.lane.b32.xlu0 %v9494_v7, %s9043_s22  ;;  %1383 = vrot.lane.b32.xlu1 %v9492_v5, %s9043_s22 }
 0x37b   : > { %1387 = vrot.lane.b32.xlu0 %v9488_v3, %s9044_s25  ;;  %1412 = vrot.lane.b32.xlu1 %v9500_v9, %s9043_s22 }
 0x37f   : > { %1416 = vrot.lane.b32.xlu0 %v9494_v7, %s9044_s25  ;;  %1389 = vrot.lane.b32.xlu1 %v9492_v5, %s9044_s25 }
 0x383   : > { %1418 = vrot.lane.b32.xlu1 %v9500_v9, %s9044_s25 }
 0x3dd   : > { %v1376_v12 = vpop.permute.xlu1 %1375 }
 0x3de   : > { %v1394_v21 = vsel %vm1393_vm3, %v9488_v3, %v1376_v12 }
 0x3e1   : > { %v1378_v13 = vpop.permute.xlu1 %1377  ;;  %v1405_v14 = vpop.permute.xlu0 %1404 }
 0x3e2   : > { %v1422_v23 = vsel %vm1393_vm3, %v9494_v7, %v1405_v14  ;;  %v1395_v25 = vsel %vm1393_vm3, %v9492_v5, %v1378_v13 }
 0x3e5   : > { %v1382_v15 = vpop.permute.xlu0 %1381  ;;  %v1407_v16 = vpop.permute.xlu1 %1406 }
 0x3e6   : > { %v1397_v22 = vsel %vm1396_vm4, %v1394_v21, %v1382_v15  ;;  %v1423_v4 = vsel %vm1393_vm3, %v9500_v9, %v1407_v16  ;;  %v9726_v9 = vld [vmem:[%s13075_s8 + $0x80] sm:$0xff]  }
 0x3e7   : > { %13256 = vst [vmem:[#allocation19_spill] sm:$0xff] %v9726_v9 }
 0x3e9   : > { %v1411_v17 = vpop.permute.xlu0 %1410  ;;  %v1384_v18 = vpop.permute.xlu1 %1383 }
 0x3ea   : > { %v1424_v26 = vsel %vm1396_vm4, %v1422_v23, %v1411_v17  ;;  %v1398_v29 = vsel %vm1396_vm4, %v1395_v25, %v1384_v18 }
 0x3ed   : > { %v1388_v19 = vpop.permute.xlu0 %1387  ;;  %v1413_v20 = vpop.permute.xlu1 %1412 }
 0x3ee   : > { %v1400_v24 = vsel %vm1399_vm5, %v1397_v22, %v1388_v19  ;;  %v1425_v8 = vsel %vm1396_vm4, %v1423_v4, %v1413_v20  ;;  %v9569_v4 = vld [vmem:[%s13074_s7 + $0x40] sm:$0xff]  }
 0x3ef   : > { %v1428_v31 = vmul.f32 %v1400_v24, %v9465_v62  ;;  %v1436_v32 = vmul.f32 %v1400_v24, %v9468_v63  ;;  %6596 = vmatprep.subr.bf16.mxu0 %v9569_v4 }
 0x3f1   : > { %v1417_v27 = vpop.permute.xlu0 %1416  ;;  %v1390_v28 = vpop.permute.xlu1 %1389 }
 0x3f2   : > { %v1426_v30 = vsel %vm1399_vm5, %v1424_v26, %v1417_v27  ;;  %v1401_v6 = vsel %vm1399_vm5, %v1398_v29, %v1390_v28 }
 0x3f3   : > { %v1430_v33 = vmul.f32 %v1426_v30, %v9468_v63  ;;  %v1434_v34 = vmul.f32 %v1426_v30, %v9465_v62  ;;  %v1429_v15 = vmul.f32 %v1401_v6, %v9471_v0  ;;  %v1437_v17 = vmul.f32 %v1401_v6, %v9474_v2  ;;  %v9574_v6 = vld [vmem:[%s13074_s7] sm:$0xff]  }
 0x3f4   : > { %6597 = vmatpush3.bf16.msra.mxu0 %v9574_v6 }
 0x3f5   : > { %v1432_v10 = vsub.f32 %v1428_v31, %v1430_v33  ;;  %v1438_v12 = vadd.f32 %v1436_v32, %v1434_v34  ;;  %v1419_v13 = vpop.permute.xlu1 %1418  ;;  %v9554_v33 = vld [vmem:[%s13072_s5 + $0x8] sm:$0xff]   ;;  %v9564_v34 = vld [vmem:[%s13074_s7 + $0x80] sm:$0xff]  }
 0x3f6   : > { %v1427_v14 = vsel %vm1399_vm5, %v1425_v8, %v1419_v13  ;;  %13244 = vst [vmem:[#allocation7_spill] sm:$0xff] %v9554_v33  ;;  %13245 = vst [vmem:[#allocation8_spill] sm:$0xff] %v9564_v34  ;;  %v9579_v8 = vld [vmem:[%s13074_s7 + $0x48] sm:$0xff]   ;;  %v9599_v13 = vld [vmem:[%s13074_s7 + $0x50] sm:$0xff]  }
 0x3f7   : > { %v1431_v18 = vmul.f32 %v1427_v14, %v9474_v2  ;;  %v1435_v19 = vmul.f32 %v1427_v14, %v9471_v0  ;;  %6598 = vmatprep.subr.bf16.mxu0 %v9579_v8  ;;  %v9605_v14 = vld [vmem:[%s13074_s7 + $0x90] sm:$0xff]  }
 0x3f8   : > { %13247 = vst [vmem:[#allocation10_spill] sm:$0xff] %v9605_v14 }
 0x3f9   : > { %v1433_v21 = vsub.f32 %v1429_v15, %v1431_v18  ;;  %v1439_v22 = vadd.f32 %v1437_v17, %v1435_v19  ;;  %v9612_v15 = vld [vmem:[%s13074_s7 + $0x10] sm:$0xff]   ;;  %v9618_v17 = vld [vmem:[%s13074_s7 + $0x58] sm:$0xff]  }
 0x3fa   : > { %v9624_v18 = vld [vmem:[%s13074_s7 + $0x98] sm:$0xff]  }
 0x3fb   : > { %v1440_v16 = vpack.c.bf16 %v1433_v21, %v1432_v10  ;;  %v1441_v23 = vpack.c.bf16 %v1439_v22, %v1438_v12  ;;  %13248 = vst [vmem:[#allocation11_spill] sm:$0xff] %v9624_v18  ;;  %v9631_v19 = vld [vmem:[%s13074_s7 + $0x18] sm:$0xff]  }
 0x3fd   : > { %7612 = vmatprep.subr.bf16.mxu1 %v1440_v16  ;;  %v1442_v24 = vunpack.c.l.bf16 %v1440_v16  ;;  %v1443_v20 = vunpack.c.h.bf16 %v1440_v16  ;;  %v1444_v25 = vunpack.c.l.bf16 %v1441_v23  ;;  %v1445_v26 = vunpack.c.h.bf16 %v1441_v23 }
 0x3fe   : > { %7613 = vmatpush3.bf16.msra.mxu1 %v1440_v16 }
 0x3ff   : > { %7614 = vmatprep.subr.bf16.mxu1 %v1441_v23  ;;  %v1446_v27 = vsub.f32 %v1432_v10, %v1442_v24  ;;  %v1447_v28 = vsub.f32 %v1433_v21, %v1443_v20  ;;  %v1448_v29 = vsub.f32 %v1438_v12, %v1444_v25  ;;  %v1449_v30 = vsub.f32 %v1439_v22, %v1445_v26  ;;  %v9585_v10 = vld [vmem:[%s13074_s7 + $0x88] sm:$0xff]   ;;  %v9637_v21 = vld [vmem:[%s13074_s7 + $0x60] sm:$0xff]   ;;  %v9665_v24 = vld [vmem:[%s13074_s7 + $0xb0] sm:$0xff]  }
 0x400   : > { %13246 = vst [vmem:[#allocation9_spill] sm:$0xff] %v9585_v10  ;;  %v9593_v12 = vld [vmem:[%s13074_s7 + $0x8] sm:$0xff]   ;;  %v9643_v22 = vld [vmem:[%s13074_s7 + $0xa0] sm:$0xff]   ;;  %13251 = vst [vmem:[#allocation14_spill] sm:$0xff] %v9665_v24 }
 0x401   : > { %v1450_v31 = vpack.c.bf16 %v1447_v28, %v1446_v27  ;;  %v1451_v32 = vpack.c.bf16 %v1449_v30, %v1448_v29  ;;  %6599 = vmatpush3.bf16.msra.mxu0 %v9593_v12  ;;  %13249 = vst [vmem:[#allocation12_spill] sm:$0xff] %v9643_v22  ;;  %v9673_v20 = vld [vmem:[%s13074_s7 + $0x68] sm:$0xff]   ;;  %v9684_v26 = vld [vmem:[%s13074_s7 + $0xb8] sm:$0xff]   ;;  %v9691_v27 = vld [vmem:[%s13074_s7 + $0x70] sm:$0xff]  }
 0x402   : > { %7615 = vmatpush3.bf16.msra.mxu1 %v1441_v23  ;;  %6600 = vmatprep.subr.bf16.mxu0 %v9599_v13  ;;  %v9678_v25 = vld [vmem:[%s13074_s7 + $0x28] sm:$0xff]   ;;  %13252 = vst [vmem:[#allocation15_spill] sm:$0xff] %v9684_v26  ;;  %v9696_v28 = vld [vmem:[%s13074_s7 + $0x30] sm:$0xff]   ;;  %v9704_v29 = vld [vmem:[%s13074_s7 + $0x78] sm:$0xff]  }
 0x403   : > { %7616 = vmatprep.subr.bf16.mxu1 %v1450_v31  ;;  %13253 = vst [vmem:[#allocation16_spill] sm:$0xff] %v9704_v29  ;;  %v9709_v30 = vld [vmem:[%s13074_s7 + $0x38] sm:$0xff]  }
 0x404   : > { %13254 = vst [vmem:[#allocation17_spill] sm:$0xff] %v9709_v30 }
 0x405   : > { %6601 = vmatpush3.bf16.msra.mxu0 %v9612_v15 }
 0x406   : > { %7617 = vmatpush3.bf16.msra.mxu1 %v1450_v31  ;;  %6602 = vmatprep.subr.bf16.mxu0 %v9618_v17  ;;  %v9716_v31 = vld [vmem:[%s13075_s8 + $0x40] sm:$0xff]  }
 0x407   : > { %7618 = vmatprep.subr.bf16.mxu1 %v1451_v32  ;;  %13255 = vst [vmem:[#allocation18_spill] sm:$0xff] %v9716_v31 }
 0x409   : > { %6603 = vmatpush3.bf16.msra.mxu0 %v9631_v19 }
 0x40a   : > { %7619 = vmatpush3.bf16.msra.mxu1 %v1451_v32  ;;  %6604 = vmatprep.subr.bf16.mxu0 %v9637_v21 }
 0x40b   : > { %7620 = vmatprep.subr.bf16.mxu1 %v1440_v16 }
 0x40e   : > { %7621 = vmatpush3.bf16.msra.mxu1 %v1440_v16  ;;  %v9650_v16 = vld [vmem:[%s13074_s7 + $0x20] sm:$0xff]  }
 0x40f   : > { %7622 = vmatprep.subr.bf16.mxu1 %v1441_v23  ;;  %6605 = vmatpush3.bf16.msra.mxu0 %v9650_v16 }
 0x410   : > { %6606 = vmatprep.subr.bf16.mxu0 %v9673_v20 }
 0x412   : > { %7623 = vmatpush3.bf16.msra.mxu1 %v1441_v23  ;;  %v9657_v23 = vld [vmem:[%s13074_s7 + $0xa8] sm:$0xff]  }
 0x413   : > { %7628 = vmatprep.subr.bf16.mxu1 %v13080_v1  ;;  %13250 = vst [vmem:[#allocation13_spill] sm:$0xff] %v9657_v23  ;;  %6607 = vmatpush3.bf16.msra.mxu0 %v9678_v25 }
 0x414   : > { %6608 = vmatprep.subr.bf16.mxu0 %v9691_v27 }
 0x415   : > { %7625 = vmatmul.mubr.msk.bf16.vlgmr.msra.gmra.mrb[12].mxu1 %vm1148_vm1, %v9554_v33 }
 0x416   : > { %7644 = vmatprep.mubr.msk.bf16.mxu1 %vm9040_vm0, %v13080_v1  ;;  %7629 = vmatpush3.bf16.msra.mxu1 %v9564_v34 }
 0x417   : > { %7630 = vmatprep.subr.bf16.mxu1 %v13080_v1  ;;  %6609 = vmatpush3.bf16.msra.mxu0 %v9696_v28 }
 0x418   : > { %6610 = vmatprep.subr.bf16.mxu0 %v9704_v29 }
 0x41a   : > { %7631 = vmatpush3.bf16.msra.mxu1 %v9585_v10 }
 0x41b   : > { %7632 = vmatprep.subr.bf16.mxu1 %v13080_v1  ;;  %6611 = vmatpush3.bf16.msra.mxu0 %v9709_v30  ;;  %v9882_v30 = vld [vmem:[%s9203_s17 + $0x8] sm:$0xff] }
 0x41c   : > { %6627 = vmatprep.subr.bf16.mxu0 %v9716_v31 }
 0x41e   : > { %7633 = vmatpush3.bf16.msra.mxu1 %v9605_v14 }
 0x41f   : > { %7634 = vmatprep.subr.bf16.mxu1 %v13080_v1 }
 0x422   : > { %7635 = vmatpush3.bf16.msra.mxu1 %v9624_v18 }
 0x423   : > { %7636 = vmatprep.subr.bf16.mxu1 %v13080_v1 }
 0x426   : > { %7637 = vmatpush3.bf16.msra.mxu1 %v9643_v22 }
 0x427   : > { %7638 = vmatprep.subr.bf16.mxu1 %v13080_v1 }
 0x42a   : > { %7639 = vmatpush3.bf16.msra.mxu1 %v9657_v23 }
 0x42b   : > { %7640 = vmatprep.subr.bf16.mxu1 %v13080_v1 }
 0x42e   : > { %7641 = vmatpush3.bf16.msra.mxu1 %v9665_v24 }
 0x42f   : > { %7642 = vmatprep.subr.bf16.mxu1 %v13080_v1 }
 0x432   : > { %7643 = vmatpush3.bf16.msra.mxu1 %v9684_v26 }
 0x433   : > { %7648 = vmatprep.subr.bf16.mxu1 %v13080_v1 }
 0x4e8   : > { %v7626_v32 = vpop.f32.mrb[12].mxu1 }
 0x4e9   : > { %1519 = vrot.lane.b32.xlu0 %v7626_v32, %s9041_s20  ;;  %v1502_v1 = vpop.f32.mrb[13].mxu1  ;;  %v13257_v32 = vmov 0.0  }
 0x4ea   : > { %v7627_v26 = vpop.f32.mrb[14].mxu1 }
 0x4eb   : > { %1521 = vrot.lane.b32.xlu1 %v7627_v26, %s9041_s20  ;;  %v1505_v24 = vpop.f32.mrb[15].mxu1 }
 0x55b   : > { %v1520_v23 = vpop.permute.xlu0 %1519 }
 0x55c   : > { %v1525_v18 = vsel %vm1219_vm2, %v1502_v1, %v1520_v23  ;;  %v9742_v23 = vld [vmem:[%s13075_s8] sm:$0xff]  }
 0x55d   : > { %v1522_v22 = vpop.permute.xlu1 %1521  ;;  %13259 = vst [vmem:[#allocation21_spill] sm:$0xff] %v9742_v23 }
 0x55e   : > { %v1526_v14 = vsel %vm1219_vm2, %v1505_v24, %v1522_v22  ;;  %v9735_v22 = vld [vmem:[%s13075_s8 + $0x88] sm:$0xff]   ;;  %v9786_v24 = vld [vmem:[%s13075_s8 + $0xa0] sm:$0xff]  }
 0x55f   : > { %v1527_v10 = vpack.c.bf16 %v1526_v14, %v1525_v18  ;;  %13258 = vst [vmem:[#allocation20_spill] sm:$0xff] %v9735_v22  ;;  %13266 = vst [vmem:[#allocation28_spill] sm:$0xff] %v9786_v24 }
 0x561   : > { %v1529_v34 = vunpack.c.h.bf16 %v1527_v10  ;;  %7645 = vmatmul.mubr.bf16.vlgmr.msra.gmra.mrb[16].mxu1 %v1527_v10  ;;  %v1528_v33 = vunpack.c.l.bf16 %v1527_v10 }
 0x562   : > { %7649 = vmatpush3.bf16.msra.mxu1 %v9726_v9  ;;  %7664 = vmatprep.mubr.msk.bf16.mxu1 %vm9040_vm0, %v13257_v32 }
 0x563   : > { %v1531_v26 = vsub.f32 %v1526_v14, %v1529_v34  ;;  %v1530_v5 = vsub.f32 %v1525_v18, %v1528_v33  ;;  %7650 = vmatprep.subr.bf16.mxu1 %v13257_v32  ;;  %v9754_v33 = vld [vmem:[%s13075_s8 + $0x48] sm:$0xff]   ;;  %v9773_v14 = vld [vmem:[%s13075_s8 + $0x50] sm:$0xff]  }
 0x564   : > { %13261 = vst [vmem:[#allocation23_spill] sm:$0xff] %v9754_v33  ;;  %v9761_v34 = vld [vmem:[%s13075_s8 + $0x8] sm:$0xff]   ;;  %13264 = vst [vmem:[#allocation26_spill] sm:$0xff] %v9773_v14  ;;  %v9780_v18 = vld [vmem:[%s13075_s8 + $0x10] sm:$0xff]  }
 0x565   : > { %v1532_v1 = vpack.c.bf16 %v1531_v26, %v1530_v5  ;;  %v9748_v5 = vld [vmem:[%s13075_s8 + $0x90] sm:$0xff]   ;;  %13262 = vst [vmem:[#allocation24_spill] sm:$0xff] %v9761_v34  ;;  %13265 = vst [vmem:[#allocation27_spill] sm:$0xff] %v9780_v18  ;;  %v9792_v26 = vld [vmem:[%s13075_s8 + $0x58] sm:$0xff]  }
 0x566   : > { %7651 = vmatpush3.bf16.msra.mxu1 %v9735_v22  ;;  %13260 = vst [vmem:[#allocation22_spill] sm:$0xff] %v9748_v5  ;;  %13267 = vst [vmem:[#allocation29_spill] sm:$0xff] %v9792_v26 }
 0x567   : > { %1709 = vmatprep.mubr.bf16.mxu0 %v1532_v1  ;;  %7652 = vmatprep.subr.bf16.mxu1 %v13257_v32  ;;  %v9799_v1 = vld [vmem:[%s13075_s8 + $0x18] sm:$0xff]  }
 0x568   : > { %1710 = vmatmul.mubr.bf16.vlgmr.msra.gmra.mrb[16].mxu0 %v1527_v10  ;;  %v9767_v10 = vld [vmem:[%s13075_s8 + $0x98] sm:$0xff]   ;;  %13268 = vst [vmem:[#allocation30_spill] sm:$0xff] %v9799_v1 }
 0x569   : > { %6628 = vmatpush3.bf16.msra.mxu0 %v9742_v23  ;;  %13263 = vst [vmem:[#allocation25_spill] sm:$0xff] %v9767_v10 }
 0x56a   : > { %7653 = vmatpush3.bf16.msra.mxu1 %v9748_v5  ;;  %6629 = vmatprep.subr.bf16.mxu0 %v9754_v33 }
 0x56b   : > { %7654 = vmatprep.subr.bf16.mxu1 %v13257_v32 }
 0x56d   : > { %6630 = vmatpush3.bf16.msra.mxu0 %v9761_v34 }
 0x56e   : > { %7655 = vmatpush3.bf16.msra.mxu1 %v9767_v10  ;;  %6631 = vmatprep.subr.bf16.mxu0 %v9773_v14 }
 0x56f   : > { %7656 = vmatprep.subr.bf16.mxu1 %v13257_v32 }
 0x571   : > { %6632 = vmatpush3.bf16.msra.mxu0 %v9780_v18  ;;  %v9874_v18 = vld [vmem:[%s13076_s9 + $0x40] sm:$0xff]  }
 0x572   : > { %7657 = vmatpush3.bf16.msra.mxu1 %v9786_v24  ;;  %6633 = vmatprep.subr.bf16.mxu0 %v9792_v26  ;;  %v9805_v24 = vld [vmem:[%s13075_s8 + $0xa8] sm:$0xff]   ;;  %v9811_v26 = vld [vmem:[%s13075_s8 + $0x60] sm:$0xff]   ;;  %13280 = vst [vmem:[#allocation42_spill] sm:$0xff] %v9874_v18 }
 0x573   : > { %7658 = vmatprep.subr.bf16.mxu1 %v13257_v32  ;;  %13269 = vst [vmem:[#allocation31_spill] sm:$0xff] %v9805_v24  ;;  %13270 = vst [vmem:[#allocation32_spill] sm:$0xff] %v9811_v26 }
 0x575   : > { %6634 = vmatpush3.bf16.msra.mxu0 %v9799_v1  ;;  %v9818_v1 = vld [vmem:[%s13075_s8 + $0x20] sm:$0xff]  }
 0x576   : > { %7659 = vmatpush3.bf16.msra.mxu1 %v9805_v24  ;;  %6635 = vmatprep.subr.bf16.mxu0 %v9811_v26  ;;  %13271 = vst [vmem:[#allocation33_spill] sm:$0xff] %v9818_v1  ;;  %v9824_v24 = vld [vmem:[%s13075_s8 + $0xb0] sm:$0xff]   ;;  %v9830_v26 = vld [vmem:[%s13075_s8 + $0x68] sm:$0xff]  }
 0x577   : > { %7660 = vmatprep.subr.bf16.mxu1 %v13257_v32  ;;  %13272 = vst [vmem:[#allocation34_spill] sm:$0xff] %v9824_v24  ;;  %13273 = vst [vmem:[#allocation35_spill] sm:$0xff] %v9830_v26 }
 0x579   : > { %6636 = vmatpush3.bf16.msra.mxu0 %v9818_v1  ;;  %v9837_v1 = vld [vmem:[%s13075_s8 + $0x28] sm:$0xff]  }
 0x57a   : > { %7661 = vmatpush3.bf16.msra.mxu1 %v9824_v24  ;;  %6637 = vmatprep.subr.bf16.mxu0 %v9830_v26  ;;  %13274 = vst [vmem:[#allocation36_spill] sm:$0xff] %v9837_v1  ;;  %v9843_v24 = vld [vmem:[%s13075_s8 + $0xb8] sm:$0xff]   ;;  %v9849_v26 = vld [vmem:[%s13075_s8 + $0x70] sm:$0xff]  }
 0x57b   : > { %7662 = vmatprep.subr.bf16.mxu1 %v13257_v32  ;;  %13275 = vst [vmem:[#allocation37_spill] sm:$0xff] %v9843_v24  ;;  %13276 = vst [vmem:[#allocation38_spill] sm:$0xff] %v9849_v26 }
 0x57d   : > { %6638 = vmatpush3.bf16.msra.mxu0 %v9837_v1  ;;  %v9856_v1 = vld [vmem:[%s13075_s8 + $0x30] sm:$0xff]  }
 0x57e   : > { %7663 = vmatpush3.bf16.msra.mxu1 %v9843_v24  ;;  %6639 = vmatprep.subr.bf16.mxu0 %v9849_v26  ;;  %13277 = vst [vmem:[#allocation39_spill] sm:$0xff] %v9856_v1  ;;  %v9862_v24 = vld [vmem:[%s13075_s8 + $0x78] sm:$0xff]  }
 0x57f   : > { %7668 = vmatprep.subr.bf16.mxu1 %v13257_v32  ;;  %13278 = vst [vmem:[#allocation40_spill] sm:$0xff] %v9862_v24  ;;  %v9868_v26 = vld [vmem:[%s13075_s8 + $0x38] sm:$0xff]  }
 0x580   : > { %13279 = vst [vmem:[#allocation41_spill] sm:$0xff] %v9868_v26 }
 0x581   : > { %6640 = vmatpush3.bf16.msra.mxu0 %v9856_v1 }
 0x582   : > { %6641 = vmatprep.subr.bf16.mxu0 %v9862_v24 }
 0x585   : > { %6642 = vmatpush3.bf16.msra.mxu0 %v9868_v26  ;;  %v9878_v26 = vld [vmem:[%s9203_s17] sm:$0xff] }
 0x586   : > { %6658 = vmatprep.subr.bf16.mxu0 %v9874_v18 }
 0x634   : > { %v1752_v1 = vpop.f32.mrb[16].mxu1 }
 0x635   : > { %v7646_v14 = vpop.f32.mrb[17].mxu1 }
 0x636   : > { %v1755_v10 = vpop.f32.mrb[18].mxu1 }
 0x637   : > { %v7647_v24 = vpop.f32.mrb[19].mxu1 }
 0x63b   : > { %v6612_v34 = vpop.f32.mrb[16].mxu0 }
 0x63c   : > { %v6613_v33 = vpop.f32.mrb[17].mxu0 }
 0x63d   : > { %v6614_v5 = vadd.f32 %v6613_v33, %v6612_v34  ;;  %v6615_v23 = vpop.f32.mrb[18].mxu0 }
 0x63e   : > { %v6616_v22 = vpop.f32.mrb[19].mxu0 }
 0x63f   : > { %v1753_v9 = vadd.f32 %v6614_v5, %v1752_v1  ;;  %v6617_v7 = vadd.f32 %v6616_v22, %v6615_v23  ;;  %v9890_v22 = vld [vmem:[%s13076_s9 + $0x80] sm:$0xff]   ;;  %v9913_v5 = vld [vmem:[%s13076_s9 + $0x48] sm:$0xff]  }
 0x640   : > { %v9906_v23 = vld [vmem:[%s13076_s9] sm:$0xff]  }
 0x641   : > { %v1759_v3 = vmul.f32 %v9878_v26, %v1753_v9  ;;  %v1756_v31 = vadd.f32 %v6617_v7, %v1755_v10  ;;  %v9920_v10 = vld [vmem:[%s13076_s9 + $0x8] sm:$0xff]  }
 0x643   : > { %v1760_v18 = vmul.f32 %v9882_v30, %v1756_v31  ;;  %v1761_v14 = vmul.f32 %v9878_v26, %v1759_v3  ;;  %v9899_v31 = vld [vmem:[%s13076_s9 + $0x88] sm:$0xff]  }
 0x645   : > { %v1762_v24 = vmul.f32 %v9882_v30, %v1760_v18 }
 0x647   : > { %v1763_v29 = vpack.c.bf16 %v1762_v24, %v1761_v14 }
 0x649   : > { %7665 = vmatmul.mubr.bf16.vlgmr.msra.gmra.mrb[20].mxu1 %v1763_v29  ;;  %v1764_v33 = vunpack.c.l.bf16 %v1763_v29  ;;  %v1765_v34 = vunpack.c.h.bf16 %v1763_v29 }
 0x64a   : > { %7669 = vmatpush3.bf16.msra.mxu1 %v9890_v22  ;;  %7684 = vmatprep.mubr.msk.bf16.mxu1 %vm9040_vm0, %v13257_v32 }
 0x64b   : > { %7670 = vmatprep.subr.bf16.mxu1 %v13257_v32  ;;  %v1766_v7 = vsub.f32 %v1761_v14, %v1764_v33  ;;  %v1767_v3 = vsub.f32 %v1762_v24, %v1765_v34 }
 0x64d   : > { %v1768_v9 = vpack.c.bf16 %v1767_v3, %v1766_v7 }
 0x64e   : > { %7671 = vmatpush3.bf16.msra.mxu1 %v9899_v31 }
 0x64f   : > { %1801 = vmatprep.mubr.bf16.mxu0 %v1768_v9  ;;  %7672 = vmatprep.subr.bf16.mxu1 %v13257_v32 }
 0x650   : > { %1802 = vmatmul.mubr.bf16.vlgmr.msra.gmra.mrb[20].mxu0 %v1763_v29 }
 0x651   : > { %6659 = vmatpush3.bf16.msra.mxu0 %v9906_v23  ;;  %1883 = vmatprep.mubr.bf16.mxu0 %v1768_v9 }
 0x652   : > { %7673 = vmatpush3.bf16.msra.mxu1 %v9255_v44  ;;  %6660 = vmatprep.subr.bf16.mxu0 %v9913_v5  ;;  %v9927_v44 = vld [vmem:[%s13076_s9 + $0x50] sm:$0xff]  }
 0x653   : > { %7674 = vmatprep.subr.bf16.mxu1 %v13257_v32 }
 0x655   : > { %6661 = vmatpush3.bf16.msra.mxu0 %v9920_v10 }
 0x656   : > { %7675 = vmatpush3.bf16.msra.mxu1 %v9272_v47  ;;  %6662 = vmatprep.subr.bf16.mxu0 %v9927_v44 }
 0x657   : > { %7676 = vmatprep.subr.bf16.mxu1 %v13257_v32 }
 0x659   : > { %6663 = vmatpush3.bf16.msra.mxu0 %v9261_v45 }
 0x65a   : > { %7677 = vmatpush3.bf16.msra.mxu1 %v9291_v50  ;;  %6664 = vmatprep.subr.bf16.mxu0 %v9266_v46 }
 0x65b   : > { %7678 = vmatprep.subr.bf16.mxu1 %v13257_v32 }
 0x65d   : > { %6665 = vmatpush3.bf16.msra.mxu0 %v9278_v48 }
 0x65e   : > { %7679 = vmatpush3.bf16.msra.mxu1 %v9307_v53  ;;  %6666 = vmatprep.subr.bf16.mxu0 %v9284_v49 }
 0x65f   : > { %7680 = vmatprep.subr.bf16.mxu1 %v13257_v32 }
 0x661   : > { %6667 = vmatpush3.bf16.msra.mxu0 %v9297_v51 }
 0x662   : > { %7681 = vmatpush3.bf16.msra.mxu1 %v9326_v56  ;;  %6668 = vmatprep.subr.bf16.mxu0 %v9302_v52 }
 0x663   : > { %7682 = vmatprep.subr.bf16.mxu1 %v13257_v32 }
 0x665   : > { %6669 = vmatpush3.bf16.msra.mxu0 %v9316_v54 }
 0x666   : > { %7683 = vmatpush3.bf16.msra.mxu1 %v9345_v59  ;;  %6670 = vmatprep.subr.bf16.mxu0 %v9321_v55 }
 0x667   : > { %7704 = vmatprep.subr.bf16.mxu1 %v13257_v32 }
 0x669   : > { %6671 = vmatpush3.bf16.msra.mxu0 %v9335_v57  ;;  %7685 = vmatmul.mubr.bf16.vlgmr.msra.gmra.mrb[24].mxu1 %v1763_v29 }
 0x66a   : > { %6672 = vmatprep.subr.bf16.mxu0 %v9340_v58  ;;  %7705 = vmatpush3.bf16.msra.mxu1 %v9385_v36 }
 0x66b   : > { %7706 = vmatprep.subr.bf16.mxu1 %v13257_v32  ;;  %7720 = vmatprep.mubr.msk.bf16.mxu1 %vm9040_vm0, %v13257_v32 }
 0x66d   : > { %6673 = vmatpush3.bf16.msra.mxu0 %v9354_v60 }
 0x66e   : > { %7707 = vmatpush3.bf16.msra.mxu1 %v9391_v37 }
 0x66f   : > { %7708 = vmatprep.subr.bf16.mxu1 %v13257_v32 }
 0x670   : > { %1884 = vmatmul.mubr.bf16.vlgmr.msra.gmra.mrb[24].mxu0 %v1763_v29 }
 0x671   : > { %7700 = vmatprep.mubr.msk.bf16.mxu0 %vm1148_vm1, %v9368_v61 }
 0x672   : > { %7709 = vmatpush3.bf16.msra.mxu1 %v9400_v38 }
 0x673   : > { %7710 = vmatprep.subr.bf16.mxu1 %v13257_v32 }
 0x676   : > { %7711 = vmatpush3.bf16.msra.mxu1 %v9409_v39 }
 0x677   : > { %7712 = vmatprep.subr.bf16.mxu1 %v13257_v32 }
 0x67a   : > { %7713 = vmatpush3.bf16.msra.mxu1 %v9418_v40 }
 0x67b   : > { %7714 = vmatprep.subr.bf16.mxu1 %v13257_v32 }
 0x67e   : > { %7715 = vmatpush3.bf16.msra.mxu1 %v9427_v41 }
 0x67f   : > { %7716 = vmatprep.subr.bf16.mxu1 %v13257_v32 }
 0x682   : > { %7717 = vmatpush3.bf16.msra.mxu1 %v9436_v42 }
 0x683   : > { %7718 = vmatprep.subr.bf16.mxu1 %v13257_v32 }
 0x686   : > { %7719 = vmatpush3.bf16.msra.mxu1 %v9445_v43 }
 0x71c   : > { %v1844_v45 = vpop.f32.mrb[20].mxu1 }
 0x71d   : > { %v7666_v46 = vpop.f32.mrb[21].mxu1 }
 0x71e   : > { %v1847_v47 = vpop.f32.mrb[22].mxu1 }
 0x71f   : > { %v7667_v48 = vpop.f32.mrb[23].mxu1 }
 0x723   : > { %v6643_v49 = vpop.f32.mrb[20].mxu0 }
 0x724   : > { %v6644_v50 = vpop.f32.mrb[21].mxu0 }
 0x725   : > { %v6645_v51 = vadd.f32 %v6644_v50, %v6643_v49  ;;  %v6646_v52 = vpop.f32.mrb[22].mxu0 }
 0x726   : > { %v6647_v53 = vpop.f32.mrb[23].mxu0 }
 0x727   : > { %v1845_v54 = vadd.f32 %v6645_v51, %v1844_v45  ;;  %v6648_v55 = vadd.f32 %v6647_v53, %v6646_v52 }
 0x729   : > { %v1848_v56 = vadd.f32 %v6648_v55, %v1847_v47 }
 0x72b   : > { %v1933_v57 = vpack.c.bf16 %v1848_v56, %v1845_v54 }
 0x72d   : > { %v1936_v58 = vunpack.c.h.bf16 %v1933_v57  ;;  %7688 = vmatprep.subr.bf16.mxu0 %v1933_v57  ;;  %v1935_v59 = vunpack.c.l.bf16 %v1933_v57 }
 0x72e   : > { %7689 = vmatpush3.bf16.msra.mxu0 %v1933_v57 }
 0x72f   : > { %v1940_v60 = vsub.f32 %v1848_v56, %v1936_v58  ;;  %v1939_v61 = vsub.f32 %v1845_v54, %v1935_v59 }
 0x731   : > { %v1943_v29 = vpack.c.bf16 %v1940_v60, %v1939_v61 }
 0x73c   : > { %v1926_v18 = vpop.f32.mrb[24].mxu1 }
 0x73d   : > { %v7686_v1 = vpop.f32.mrb[25].mxu1 }
 0x73e   : > { %v1929_v14 = vpop.f32.mrb[26].mxu1 }
 0x73f   : > { %v7687_v24 = vpop.f32.mrb[27].mxu1 }
 0x743   : > { %v6674_v33 = vpop.f32.mrb[24].mxu0 }
 0x744   : > { %v6675_v34 = vpop.f32.mrb[25].mxu0 }
 0x745   : > { %v6676_v7 = vadd.f32 %v6675_v34, %v6674_v33  ;;  %v6677_v3 = vpop.f32.mrb[26].mxu0 }
 0x746   : > { %v6678_v9 = vpop.f32.mrb[27].mxu0 }
 0x747   : > { %v1927_v45 = vadd.f32 %v6676_v7, %v1926_v18  ;;  %v6679_v46 = vadd.f32 %v6678_v9, %v6677_v3 }
 0x749   : > { %v1930_v47 = vadd.f32 %v6679_v46, %v1929_v14 }
 0x74b   : > { %v1934_v48 = vpack.c.bf16 %v1930_v47, %v1927_v45 }
 0x74d   : > { %v1938_v49 = vunpack.c.h.bf16 %v1934_v48  ;;  %7690 = vmatprep.subr.bf16.mxu0 %v1934_v48  ;;  %v1937_v50 = vunpack.c.l.bf16 %v1934_v48 }
 0x74e   : > { %7691 = vmatpush3.bf16.msra.mxu0 %v1934_v48 }
 0x74f   : > { %v1942_v51 = vsub.f32 %v1930_v47, %v1938_v49  ;;  %7692 = vmatprep.subr.bf16.mxu0 %v1943_v29  ;;  %v1941_v52 = vsub.f32 %v1927_v45, %v1937_v50  ;;  %v13287_v49 = vld [vmem:[#allocation4_spill] sm:$0xff] }
 0x751   : > { %v1944_v53 = vpack.c.bf16 %v1942_v51, %v1941_v52  ;;  %v13288_v51 = vld [vmem:[#allocation6_spill] sm:$0xff] }
 0x752   : > { %7693 = vmatpush3.bf16.msra.mxu0 %v1943_v29 }
 0x753   : > { %7694 = vmatprep.subr.bf16.mxu0 %v1944_v53 }
 0x756   : > { %7695 = vmatpush3.bf16.msra.mxu0 %v1944_v53 }
 0x757   : > { %7696 = vmatprep.subr.bf16.mxu0 %v1933_v57 }
 0x75a   : > { %7697 = vmatpush3.bf16.msra.mxu0 %v1933_v57 }
 0x75b   : > { %7698 = vmatprep.subr.bf16.mxu0 %v1934_v48 }
 0x75e   : > { %7699 = vmatpush3.bf16.msra.mxu0 %v1934_v48 }
 0x75f   : > { %7724 = vmatprep.subr.bf16.mxu0 %v13257_v32 }
 0x761   : > { %7701 = vmatmul.mubr.msk.bf16.vlgmr.msra.gmra.mrb[28].mxu0 %vm1148_vm1, %v9375_v35 }
 0x762   : > { %7725 = vmatpush3.bf16.msra.mxu0 %v9385_v36  ;;  %7740 = vmatprep.mubr.msk.bf16.mxu0 %vm9040_vm0, %v13257_v32 }
 0x763   : > { %7726 = vmatprep.subr.bf16.mxu0 %v13257_v32 }
 0x766   : > { %7727 = vmatpush3.bf16.msra.mxu0 %v9391_v37 }
 0x767   : > { %7728 = vmatprep.subr.bf16.mxu0 %v13257_v32 }
 0x76a   : > { %7729 = vmatpush3.bf16.msra.mxu0 %v9400_v38 }
 0x76b   : > { %7730 = vmatprep.subr.bf16.mxu0 %v13257_v32 }
 0x76e   : > { %7731 = vmatpush3.bf16.msra.mxu0 %v9409_v39 }
 0x76f   : > { %7732 = vmatprep.subr.bf16.mxu0 %v13257_v32 }
 0x772   : > { %7733 = vmatpush3.bf16.msra.mxu0 %v9418_v40 }
 0x773   : > { %7734 = vmatprep.subr.bf16.mxu0 %v13257_v32 }
 0x776   : > { %7735 = vmatpush3.bf16.msra.mxu0 %v9427_v41 }
 0x777   : > { %7736 = vmatprep.subr.bf16.mxu0 %v13257_v32 }
 0x77a   : > { %7737 = vmatpush3.bf16.msra.mxu0 %v9436_v42 }
 0x77b   : > { %7738 = vmatprep.subr.bf16.mxu0 %v13257_v32 }
 0x77e   : > { %7739 = vmatpush3.bf16.msra.mxu0 %v9445_v43 }
 0x77f   : > { %6723 = vmatprep.subr.bf16.mxu0 %v9569_v4 }
 0x834   : > { %v7702_v35 = vpop.f32.mrb[28].mxu0 }
 0x835   : > { %v1996_v36 = vmul.f32 %v7702_v35, %v9468_v63  ;;  %v2013_v37 = vmul.f32 %v7702_v35, %v9465_v62  ;;  %v1979_v38 = vpop.f32.mrb[29].mxu0 }
 0x836   : > { %v1994_v39 = vmul.f32 %v1979_v38, %v9465_v62  ;;  %v2015_v40 = vmul.f32 %v1979_v38, %v9468_v63  ;;  %v7703_v41 = vpop.f32.mrb[30].mxu0 }
 0x837   : > { %v1997_v54 = vmul.f32 %v7703_v41, %v9474_v2  ;;  %v2014_v42 = vmul.f32 %v7703_v41, %v9471_v0  ;;  %v1982_v55 = vpop.f32.mrb[31].mxu0 }
 0x838   : > { %v1998_v56 = vadd.f32 %v1996_v36, %v1994_v39  ;;  %v2017_v43 = vsub.f32 %v2013_v37, %v2015_v40  ;;  %v1995_v4 = vmul.f32 %v1982_v55, %v9471_v0  ;;  %v2016_v57 = vmul.f32 %v1982_v55, %v9474_v2 }
 0x83a   : > { %v1999_v58 = vadd.f32 %v1997_v54, %v1995_v4  ;;  %v2018_v59 = vsub.f32 %v2014_v42, %v2016_v57 }
 0x83c   : > { %v2000_v60 = vpack.c.bf16 %v1999_v58, %v1998_v56  ;;  %v2019_v61 = vpack.c.bf16 %v2018_v59, %v2017_v43 }
 0x83e   : > { %v2002_v29 = vunpack.c.h.bf16 %v2000_v60  ;;  %v2021_v18 = vunpack.c.h.bf16 %v2019_v61  ;;  %v2020_v1 = vunpack.c.l.bf16 %v2019_v61  ;;  %v2001_v14 = vunpack.c.l.bf16 %v2000_v60 }
 0x840   : > { %v2004_v24 = vsub.f32 %v1999_v58, %v2002_v29  ;;  %v2023_v33 = vsub.f32 %v2018_v59, %v2021_v18  ;;  %v2022_v34 = vsub.f32 %v2017_v43, %v2020_v1  ;;  %v2003_v7 = vsub.f32 %v1998_v56, %v2001_v14 }
 0x842   : > { %v2024_v3 = vpack.c.bf16 %v2023_v33, %v2022_v34  ;;  %v2005_v9 = vpack.c.bf16 %v2004_v24, %v2003_v7 }
 0x844   : > { %2026 = vrot.lane.b32.xlu1 %v2024_v3, %s9041_s20  ;;  %2007 = vrot.lane.b32.xlu0 %v2005_v9, %s9041_s20 }
 0x8b6   : > { %v2027_v45 = vpop.permute.xlu1 %2026  ;;  %v2008_v46 = vpop.permute.xlu0 %2007 }
 0x8b7   : > { %v2030_v47 = vsel %vm1219_vm2, %v2019_v61, %v2027_v45  ;;  %v2011_v48 = vsel %vm1219_vm2, %v2000_v60, %v2008_v46 }
 0x8b8   : > { %7721 = vmatmul.mubr.bf16.vlgmr.msra.gmra.mrb[28].mxu1 %v2011_v48  ;;  %7741 = vmatmul.mubr.bf16.vlgmr.msra.gmra.mrb[32].mxu0 %v2030_v47 }
 0x8b9   : > { %7756 = vmatprep.mubr.msk.bf16.mxu1 %vm1148_vm1, %v9523_v11  ;;  %6724 = vmatpush3.bf16.msra.mxu0 %v9574_v6  ;;  %v13281_v11 = vld [vmem:[#allocation16_spill] sm:$0xff]  ;;  %v13282_v6 = vld [vmem:[#allocation17_spill] sm:$0xff] }
 0x8ba   : > { %6725 = vmatprep.subr.bf16.mxu0 %v9579_v8  ;;  %v13283_v8 = vld [vmem:[#allocation18_spill] sm:$0xff] }
 0x8bd   : > { %6726 = vmatpush3.bf16.msra.mxu0 %v9593_v12  ;;  %v10020_v12 = vstv %s489_s30 }
 0x8be   : > { %6727 = vmatprep.subr.bf16.mxu0 %v9599_v13  ;;  %13284 = vst [vmem:[#allocation16_spill] sm:$0xff] %v10020_v12  ;;  %v13285_v13 = vld [vmem:[#allocation3_spill] sm:$0xff]  ;;  %v2034_v50 = vmul.f32 %v10020_v12, %v13287_v49  ;;  %v2079_v52 = vmul.f32 %v10020_v12, %v13288_v51 }
 0x8c1   : > { %6728 = vmatpush3.bf16.msra.mxu0 %v9612_v15  ;;  %v2033_v15 = vmul.f32 %v10020_v12, %v13285_v13 }
 0x8c2   : > { %6729 = vmatprep.subr.bf16.mxu0 %v9618_v17  ;;  %v13286_v17 = vld [vmem:[#allocation5_spill] sm:$0xff] }
 0x8c5   : > { %6730 = vmatpush3.bf16.msra.mxu0 %v9631_v19  ;;  %v2078_v19 = vmul.f32 %v10020_v12, %v13286_v17 }
 0x8c6   : > { %6731 = vmatprep.subr.bf16.mxu0 %v9637_v21 }
 0x8c9   : > { %6732 = vmatpush3.bf16.msra.mxu0 %v9650_v16 }
 0x8ca   : > { %6733 = vmatprep.subr.bf16.mxu0 %v9673_v20 }
 0x8cd   : > { %6734 = vmatpush3.bf16.msra.mxu0 %v9678_v25 }
 0x8ce   : > { %6735 = vmatprep.subr.bf16.mxu0 %v9691_v27 }
 0x8d1   : > { %6736 = vmatpush3.bf16.msra.mxu0 %v9696_v28 }
 0x8d2   : > { %6737 = vmatprep.subr.bf16.mxu0 %v13281_v11 }
 0x8d5   : > { %6738 = vmatpush3.bf16.msra.mxu0 %v13282_v6 }
 0x8d6   : > { %6754 = vmatprep.subr.bf16.mxu0 %v13283_v8 }
 0x98b   : > { %v2069_v21 = vpop.f32.mrb[28].mxu1  ;;  %v2114_v16 = vpop.f32.mrb[32].mxu0 }
 0x98c   : > { %v2070_v20 = vadd.f32 %v2069_v21, %v2033_v15  ;;  %v2115_v25 = vadd.f32 %v2114_v16, %v2078_v19  ;;  %v7722_v27 = vpop.f32.mrb[29].mxu1  ;;  %v7742_v28 = vpop.f32.mrb[33].mxu0 }
 0x98d   : > { %v2072_v53 = vpop.f32.mrb[30].mxu1  ;;  %v2117_v35 = vpop.f32.mrb[34].mxu0 }
 0x98e   : > { %v10031_v36 = vsub.f32 %v13285_v13, %v2070_v20  ;;  %v10034_v37 = vsub.f32 %v13286_v17, %v2115_v25  ;;  %v2073_v38 = vadd.f32 %v2072_v53, %v2034_v50  ;;  %v2118_v39 = vadd.f32 %v2117_v35, %v2079_v52  ;;  %v7723_v40 = vpop.f32.mrb[31].mxu1  ;;  %v7743_v41 = vpop.f32.mrb[35].mxu0 }
 0x990   : > { %v10037_v54 = vsub.f32 %v13287_v49, %v2073_v38  ;;  %v10040_v42 = vsub.f32 %v13288_v51, %v2118_v39  ;;  %2144 = vrot.lane.b32.xlu0 %v10031_v36, %s9042_s21 }
 0x992   : > { %2146 = vrot.lane.b32.xlu1 %v10037_v54, %s9042_s21 }
 0x994   : > { %2170 = vrot.lane.b32.xlu0 %v10034_v37, %s9042_s21 }
 0x996   : > { %2172 = vrot.lane.b32.xlu1 %v10040_v42, %s9042_s21 }
 0x998   : > { %2150 = vrot.lane.b32.xlu0 %v10031_v36, %s9043_s22 }
 0x99a   : > { %2152 = vrot.lane.b32.xlu1 %v10037_v54, %s9043_s22 }
 0x99c   : > { %2176 = vrot.lane.b32.xlu0 %v10034_v37, %s9043_s22 }
 0x99e   : > { %2178 = vrot.lane.b32.xlu1 %v10040_v42, %s9043_s22 }
 0x9a0   : > { %2156 = vrot.lane.b32.xlu0 %v10031_v36, %s9044_s25 }
 0x9a2   : > { %2158 = vrot.lane.b32.xlu1 %v10037_v54, %s9044_s25 }
 0x9a4   : > { %2182 = vrot.lane.b32.xlu0 %v10034_v37, %s9044_s25 }
 0x9a6   : > { %2184 = vrot.lane.b32.xlu1 %v10040_v42, %s9044_s25 }
 0xa02   : > { %v2145_v55 = vpop.permute.xlu0 %2144 }
 0xa03   : > { %v2162_v29 = vsel %vm1393_vm3, %v10031_v36, %v2145_v55 }
 0xa04   : > { %v2147_v56 = vpop.permute.xlu1 %2146 }
 0xa05   : > { %v2163_v1 = vsel %vm1393_vm3, %v10037_v54, %v2147_v56 }
 0xa06   : > { %v2171_v43 = vpop.permute.xlu0 %2170 }
 0xa07   : > { %v2188_v14 = vsel %vm1393_vm3, %v10034_v37, %v2171_v43  ;;  %v13289_v43 = vld [vmem:[#allocation7_spill] sm:$0xff] }
 0xa08   : > { %v2173_v4 = vpop.permute.xlu1 %2172 }
 0xa09   : > { %v2189_v9 = vsel %vm1393_vm3, %v10040_v42, %v2173_v4  ;;  %v13290_v4 = vld [vmem:[#allocation8_spill] sm:$0xff] }
 0xa0a   : > { %v2151_v57 = vpop.permute.xlu0 %2150 }
 0xa0b   : > { %v2164_v24 = vsel %vm1396_vm4, %v2162_v29, %v2151_v57  ;;  %v13291_v57 = vld [vmem:[#allocation9_spill] sm:$0xff]  ;;  %v13296_v29 = vld [vmem:[#allocation14_spill] sm:$0xff] }
 0xa0c   : > { %v2153_v58 = vpop.permute.xlu1 %2152 }
 0xa0d   : > { %v2165_v33 = vsel %vm1396_vm4, %v2163_v1, %v2153_v58  ;;  %v13292_v58 = vld [vmem:[#allocation10_spill] sm:$0xff] }
 0xa0e   : > { %v2177_v59 = vpop.permute.xlu0 %2176 }
 0xa0f   : > { %v2190_v34 = vsel %vm1396_vm4, %v2188_v14, %v2177_v59  ;;  %v13293_v59 = vld [vmem:[#allocation11_spill] sm:$0xff] }
 0xa10   : > { %v2179_v60 = vpop.permute.xlu1 %2178 }
 0xa11   : > { %v2191_v47 = vsel %vm1396_vm4, %v2189_v9, %v2179_v60  ;;  %v13294_v60 = vld [vmem:[#allocation12_spill] sm:$0xff] }
 0xa12   : > { %v2157_v61 = vpop.permute.xlu0 %2156 }
 0xa13   : > { %v2166_v7 = vsel %vm1399_vm5, %v2164_v24, %v2157_v61  ;;  %v13295_v61 = vld [vmem:[#allocation13_spill] sm:$0xff] }
 0xa14   : > { %v2159_v18 = vpop.permute.xlu1 %2158  ;;  %v2194_v8 = vmul.f32 %v2166_v7, %v9465_v62  ;;  %v2202_v15 = vmul.f32 %v2166_v7, %v9468_v63 }
 0xa15   : > { %v2167_v45 = vsel %vm1399_vm5, %v2165_v33, %v2159_v18  ;;  %v13297_v18 = vld [vmem:[#allocation15_spill] sm:$0xff] }
 0xa16   : > { %v2183_v3 = vpop.permute.xlu0 %2182  ;;  %v2195_v21 = vmul.f32 %v2167_v45, %v9471_v0  ;;  %v2203_v16 = vmul.f32 %v2167_v45, %v9474_v2 }
 0xa17   : > { %v2192_v46 = vsel %vm1399_vm5, %v2190_v34, %v2183_v3 }
 0xa18   : > { %v2196_v48 = vmul.f32 %v2192_v46, %v9468_v63  ;;  %v2200_v11 = vmul.f32 %v2192_v46, %v9465_v62  ;;  %v2185_v6 = vpop.permute.xlu1 %2184 }
 0xa19   : > { %v2193_v19 = vsel %vm1399_vm5, %v2191_v47, %v2185_v6 }
 0xa1a   : > { %v2197_v20 = vmul.f32 %v2193_v19, %v9474_v2  ;;  %v2201_v25 = vmul.f32 %v2193_v19, %v9471_v0  ;;  %v2198_v27 = vsub.f32 %v2194_v8, %v2196_v48  ;;  %v2204_v28 = vadd.f32 %v2202_v15, %v2200_v11  ;;  %v13298_v48 = vld [vmem:[#allocation19_spill] sm:$0xff]  ;;  %v13299_v15 = vld [vmem:[#allocation20_spill] sm:$0xff]  ;;  %v13300_v19 = vld [vmem:[#allocation21_spill] sm:$0xff] }
 0xa1c   : > { %v2199_v50 = vsub.f32 %v2195_v21, %v2197_v20  ;;  %v2205_v52 = vadd.f32 %v2203_v16, %v2201_v25  ;;  %v13301_v21 = vld [vmem:[#allocation22_spill] sm:$0xff]  ;;  %v13302_v16 = vld [vmem:[#allocation23_spill] sm:$0xff]  ;;  %v13303_v20 = vld [vmem:[#allocation24_spill] sm:$0xff] }
 0xa1d   : > { %v13304_v25 = vld [vmem:[#allocation25_spill] sm:$0xff] }
 0xa1e   : > { %v2206_v53 = vpack.c.bf16 %v2199_v50, %v2198_v27  ;;  %v2207_v35 = vpack.c.bf16 %v2205_v52, %v2204_v28 }
 0xa20   : > { %7744 = vmatprep.subr.bf16.mxu1 %v2206_v53  ;;  %v2208_v62 = vunpack.c.l.bf16 %v2206_v53  ;;  %v2209_v38 = vunpack.c.h.bf16 %v2206_v53  ;;  %v2210_v63 = vunpack.c.l.bf16 %v2207_v35  ;;  %v2211_v39 = vunpack.c.h.bf16 %v2207_v35 }
 0xa21   : > { %7745 = vmatpush3.bf16.msra.mxu1 %v2206_v53 }
 0xa22   : > { %7746 = vmatprep.subr.bf16.mxu1 %v2207_v35  ;;  %v2212_v40 = vsub.f32 %v2198_v27, %v2208_v62  ;;  %v2213_v41 = vsub.f32 %v2199_v50, %v2209_v38  ;;  %v2214_v56 = vsub.f32 %v2204_v28, %v2210_v63  ;;  %v2215_v2 = vsub.f32 %v2205_v52, %v2211_v39  ;;  %v13305_v27 = vld [vmem:[#allocation26_spill] sm:$0xff]  ;;  %v13306_v28 = vld [vmem:[#allocation27_spill] sm:$0xff]  ;;  %v13307_v50 = vld [vmem:[#allocation28_spill] sm:$0xff] }
 0xa23   : > { %v13308_v52 = vld [vmem:[#allocation29_spill] sm:$0xff]  ;;  %v13311_v62 = vld [vmem:[#allocation32_spill] sm:$0xff]  ;;  %v13313_v63 = vld [vmem:[#allocation34_spill] sm:$0xff] }
 0xa24   : > { %v2216_v55 = vpack.c.bf16 %v2213_v41, %v2212_v40  ;;  %v2217_v0 = vpack.c.bf16 %v2215_v2, %v2214_v56  ;;  %v13312_v38 = vld [vmem:[#allocation33_spill] sm:$0xff]  ;;  %v13314_v39 = vld [vmem:[#allocation35_spill] sm:$0xff]  ;;  %v13315_v40 = vld [vmem:[#allocation36_spill] sm:$0xff] }
 0xa25   : > { %7747 = vmatpush3.bf16.msra.mxu1 %v2207_v35  ;;  %v13316_v41 = vld [vmem:[#allocation37_spill] sm:$0xff]  ;;  %v13318_v56 = vld [vmem:[#allocation39_spill] sm:$0xff]  ;;  %v13319_v2 = vld [vmem:[#allocation40_spill] sm:$0xff] }
 0xa26   : > { %7748 = vmatprep.subr.bf16.mxu1 %v2216_v55 }
 0xa29   : > { %7749 = vmatpush3.bf16.msra.mxu1 %v2216_v55  ;;  %v13317_v55 = vld [vmem:[#allocation38_spill] sm:$0xff] }
 0xa2a   : > { %7750 = vmatprep.subr.bf16.mxu1 %v2217_v0 }
 0xa2d   : > { %7751 = vmatpush3.bf16.msra.mxu1 %v2217_v0  ;;  %v13320_v0 = vld [vmem:[#allocation41_spill] sm:$0xff] }
 0xa2e   : > { %7752 = vmatprep.subr.bf16.mxu1 %v2206_v53 }
 0xa31   : > { %7753 = vmatpush3.bf16.msra.mxu1 %v2206_v53  ;;  %v13309_v53 = vld [vmem:[#allocation30_spill] sm:$0xff] }
 0xa32   : > { %7754 = vmatprep.subr.bf16.mxu1 %v2207_v35 }
 0xa35   : > { %7755 = vmatpush3.bf16.msra.mxu1 %v2207_v35  ;;  %v13310_v35 = vld [vmem:[#allocation31_spill] sm:$0xff] }
 0xa36   : > { %7760 = vmatprep.subr.bf16.mxu1 %v13257_v32 }
 0xa38   : > { %7757 = vmatmul.mubr.msk.bf16.vlgmr.msra.gmra.mrb[32].mxu1 %vm1148_vm1, %v13289_v43  ;;  %v13321_v43 = vld [vmem:[#allocation42_spill] sm:$0xff] }
 0xa39   : > { %7761 = vmatpush3.bf16.msra.mxu1 %v13290_v4  ;;  %7776 = vmatprep.mubr.msk.bf16.mxu1 %vm9040_vm0, %v13257_v32 }
 0xa3a   : > { %7762 = vmatprep.subr.bf16.mxu1 %v13257_v32 }
 0xa3d   : > { %7763 = vmatpush3.bf16.msra.mxu1 %v13291_v57 }
 0xa3e   : > { %7764 = vmatprep.subr.bf16.mxu1 %v13257_v32 }
 0xa41   : > { %7765 = vmatpush3.bf16.msra.mxu1 %v13292_v58 }
 0xa42   : > { %7766 = vmatprep.subr.bf16.mxu1 %v13257_v32 }
 0xa45   : > { %7767 = vmatpush3.bf16.msra.mxu1 %v13293_v59 }
 0xa46   : > { %7768 = vmatprep.subr.bf16.mxu1 %v13257_v32 }
 0xa49   : > { %7769 = vmatpush3.bf16.msra.mxu1 %v13294_v60 }
 0xa4a   : > { %7770 = vmatprep.subr.bf16.mxu1 %v13257_v32 }
 0xa4d   : > { %7771 = vmatpush3.bf16.msra.mxu1 %v13295_v61 }
 0xa4e   : > { %7772 = vmatprep.subr.bf16.mxu1 %v13257_v32 }
 0xa51   : > { %7773 = vmatpush3.bf16.msra.mxu1 %v13296_v29 }
 0xa52   : > { %7774 = vmatprep.subr.bf16.mxu1 %v13257_v32 }
 0xa55   : > { %7775 = vmatpush3.bf16.msra.mxu1 %v13297_v18 }
 0xa56   : > { %7780 = vmatprep.subr.bf16.mxu1 %v13257_v32 }
 0xb0b   : > { %v7758_v1 = vpop.f32.mrb[32].mxu1 }
 0xb0c   : > { %2269 = vrot.lane.b32.xlu0 %v7758_v1, %s9041_s20  ;;  %v2252_v14 = vpop.f32.mrb[33].mxu1 }
 0xb0d   : > { %v7759_v24 = vpop.f32.mrb[34].mxu1 }
 0xb0e   : > { %2271 = vrot.lane.b32.xlu1 %v7759_v24, %s9041_s20  ;;  %v2255_v33 = vpop.f32.mrb[35].mxu1 }
 0xb7e   : > { %v2270_v34 = vpop.permute.xlu0 %2269 }
 0xb7f   : > { %v2275_v3 = vsel %vm1219_vm2, %v2252_v14, %v2270_v34 }
 0xb80   : > { %v2272_v7 = vpop.permute.xlu1 %2271 }
 0xb81   : > { %v2276_v9 = vsel %vm1219_vm2, %v2255_v33, %v2272_v7 }
 0xb82   : > { %v2277_v45 = vpack.c.bf16 %v2276_v9, %v2275_v3 }
 0xb84   : > { %v2279_v46 = vunpack.c.h.bf16 %v2277_v45  ;;  %7777 = vmatmul.mubr.bf16.vlgmr.msra.gmra.mrb[36].mxu1 %v2277_v45  ;;  %v2278_v47 = vunpack.c.l.bf16 %v2277_v45 }
 0xb85   : > { %7781 = vmatpush3.bf16.msra.mxu1 %v13298_v48  ;;  %7796 = vmatprep.mubr.msk.bf16.mxu1 %vm9040_vm0, %v13257_v32 }
 0xb86   : > { %v2281_v11 = vsub.f32 %v2276_v9, %v2279_v46  ;;  %v2280_v6 = vsub.f32 %v2275_v3, %v2278_v47  ;;  %7782 = vmatprep.subr.bf16.mxu1 %v13257_v32 }
 0xb88   : > { %v2282_v8 = vpack.c.bf16 %v2281_v11, %v2280_v6  ;;  %v10217_v6 = vld [vmem:[%s13076_s9 + $0x60] sm:$0xff]  }
 0xb89   : > { %7783 = vmatpush3.bf16.msra.mxu1 %v13299_v15  ;;  %v10230_v15 = vld [vmem:[%s13076_s9 + $0xb0] sm:$0xff]  }
 0xb8a   : > { %2315 = vmatprep.mubr.bf16.mxu0 %v2282_v8  ;;  %7784 = vmatprep.subr.bf16.mxu1 %v13257_v32  ;;  %v10224_v8 = vld [vmem:[%s13076_s9 + $0x20] sm:$0xff]  }
 0xb8b   : > { %2316 = vmatmul.mubr.bf16.vlgmr.msra.gmra.mrb[36].mxu0 %v2277_v45 }
 0xb8c   : > { %6755 = vmatpush3.bf16.msra.mxu0 %v13300_v19  ;;  %v10236_v19 = vld [vmem:[%s13076_s9 + $0x68] sm:$0xff]  }
 0xb8d   : > { %7785 = vmatpush3.bf16.msra.mxu1 %v13301_v21  ;;  %6756 = vmatprep.subr.bf16.mxu0 %v13302_v16  ;;  %v10243_v21 = vld [vmem:[%s13076_s9 + $0x28] sm:$0xff]   ;;  %v10249_v16 = vld [vmem:[%s13076_s9 + $0xb8] sm:$0xff]  }
 0xb8e   : > { %7786 = vmatprep.subr.bf16.mxu1 %v13257_v32 }
 0xb90   : > { %6757 = vmatpush3.bf16.msra.mxu0 %v13303_v20  ;;  %v10255_v20 = vld [vmem:[%s13076_s9 + $0x70] sm:$0xff]  }
 0xb91   : > { %7787 = vmatpush3.bf16.msra.mxu1 %v13304_v25  ;;  %6758 = vmatprep.subr.bf16.mxu0 %v13305_v27  ;;  %v10262_v25 = vld [vmem:[%s13076_s9 + $0x30] sm:$0xff]   ;;  %v10269_v27 = vld [vmem:[%s13076_s9 + $0x78] sm:$0xff]  }
 0xb92   : > { %7788 = vmatprep.subr.bf16.mxu1 %v13257_v32 }
 0xb94   : > { %6759 = vmatpush3.bf16.msra.mxu0 %v13306_v28  ;;  %v10275_v28 = vld [vmem:[%s13077_s10] sm:$0xff]  }
 0xb95   : > { %7789 = vmatpush3.bf16.msra.mxu1 %v13307_v50  ;;  %6760 = vmatprep.subr.bf16.mxu0 %v13308_v52  ;;  %v10284_v50 = vld [vmem:[%s13076_s9 + $0x38] sm:$0xff]   ;;  %v10290_v52 = vld [vmem:[%s13077_s10 + $0x8] sm:$0xff]  }
 0xb96   : > { %7790 = vmatprep.subr.bf16.mxu1 %v13257_v32 }
 0xb98   : > { %6761 = vmatpush3.bf16.msra.mxu0 %v13309_v53  ;;  %v10298_v53 = vld [vmem:[%s13073_s6] sm:$0xff]  }
 0xb99   : > { %7791 = vmatpush3.bf16.msra.mxu1 %v13310_v35  ;;  %6762 = vmatprep.subr.bf16.mxu0 %v13311_v62  ;;  %v10305_v35 = vld [vmem:[%s13077_s10 + $0x10] sm:$0xff]   ;;  %v10312_v62 = vld [vmem:[%s13077_s10 + $0x18] sm:$0xff]  }
 0xb9a   : > { %7792 = vmatprep.subr.bf16.mxu1 %v13257_v32 }
 0xb9c   : > { %6763 = vmatpush3.bf16.msra.mxu0 %v13312_v38  ;;  %v10319_v38 = vld [vmem:[%s13077_s10 + $0x20] sm:$0xff]  }
 0xb9d   : > { %7793 = vmatpush3.bf16.msra.mxu1 %v13313_v63  ;;  %6764 = vmatprep.subr.bf16.mxu0 %v13314_v39  ;;  %v10326_v63 = vld [vmem:[%s13077_s10 + $0x28] sm:$0xff]   ;;  %v10333_v39 = vld [vmem:[%s13077_s10 + $0x30] sm:$0xff]  }
 0xb9e   : > { %7794 = vmatprep.subr.bf16.mxu1 %v13257_v32 }
 0xba0   : > { %6765 = vmatpush3.bf16.msra.mxu0 %v13315_v40  ;;  %v10340_v40 = vld [vmem:[%s13077_s10 + $0x38] sm:$0xff]  }
 0xba1   : > { %7795 = vmatpush3.bf16.msra.mxu1 %v13316_v41  ;;  %6766 = vmatprep.subr.bf16.mxu0 %v13317_v55  ;;  %13322 = vst [vmem:[#allocation17_spill] sm:$0xff] %v10340_v40 }
 0xba2   : > { %7800 = vmatprep.subr.bf16.mxu1 %v13257_v32 }
 0xba4   : > { %6767 = vmatpush3.bf16.msra.mxu0 %v13318_v56 }
 0xba5   : > { %6768 = vmatprep.subr.bf16.mxu0 %v13319_v2 }
 0xba8   : > { %6769 = vmatpush3.bf16.msra.mxu0 %v13320_v0 }
 0xba9   : > { %6785 = vmatprep.subr.bf16.mxu0 %v13321_v43 }
 0xc57   : > { %v2358_v4 = vpop.f32.mrb[36].mxu1 }
 0xc58   : > { %v7778_v57 = vpop.f32.mrb[37].mxu1 }
 0xc59   : > { %v2361_v58 = vpop.f32.mrb[38].mxu1 }
 0xc5a   : > { %v7779_v59 = vpop.f32.mrb[39].mxu1 }
 0xc5e   : > { %v6739_v60 = vpop.f32.mrb[36].mxu0 }
 0xc5f   : > { %v6740_v61 = vpop.f32.mrb[37].mxu0 }
 0xc60   : > { %v6741_v29 = vadd.f32 %v6740_v61, %v6739_v60  ;;  %v6742_v18 = vpop.f32.mrb[38].mxu0 }
 0xc61   : > { %v6743_v1 = vpop.f32.mrb[39].mxu0 }
 0xc62   : > { %v2359_v14 = vadd.f32 %v6741_v29, %v2358_v4  ;;  %v6744_v24 = vadd.f32 %v6743_v1, %v6742_v18 }
 0xc64   : > { %v2365_v33 = vmul.f32 %v9878_v26, %v2359_v14  ;;  %v2362_v34 = vadd.f32 %v6744_v24, %v2361_v58 }
 0xc66   : > { %v2366_v7 = vmul.f32 %v9882_v30, %v2362_v34  ;;  %v2367_v3 = vmul.f32 %v9878_v26, %v2365_v33 }
 0xc68   : > { %v2368_v9 = vmul.f32 %v9882_v30, %v2366_v7  ;;  %v10169_v30 = vld [vmem:[%s13076_s9 + $0x90] sm:$0xff]  }
 0xc6a   : > { %v10153_v45 = vpack.c.bf16 %v2368_v9, %v2367_v3 }
 0xc6c   : > { %7797 = vmatmul.mubr.bf16.vlgmr.msra.gmra.mrb[40].mxu1 %v10153_v45  ;;  %v2370_v46 = vunpack.c.l.bf16 %v10153_v45  ;;  %v2371_v47 = vunpack.c.h.bf16 %v10153_v45 }
 0xc6d   : > { %7801 = vmatpush3.bf16.msra.mxu1 %v9890_v22  ;;  %7816 = vmatprep.mubr.msk.bf16.mxu1 %vm9040_vm0, %v13257_v32  ;;  %v10178_v22 = vld [vmem:[%s13076_s9 + $0x98] sm:$0xff]  }
 0xc6e   : > { %7802 = vmatprep.subr.bf16.mxu1 %v13257_v32  ;;  %v2372_v48 = vsub.f32 %v2367_v3, %v2370_v46  ;;  %v2373_v11 = vsub.f32 %v2368_v9, %v2371_v47 }
 0xc70   : > { %v2374_v26 = vpack.c.bf16 %v2373_v11, %v2372_v48 }
 0xc71   : > { %7803 = vmatpush3.bf16.msra.mxu1 %v9899_v31  ;;  %v10186_v31 = vld [vmem:[%s13076_s9 + $0x10] sm:$0xff]  }
 0xc72   : > { %2407 = vmatprep.mubr.bf16.mxu0 %v2374_v26  ;;  %7804 = vmatprep.subr.bf16.mxu1 %v13257_v32 }
 0xc73   : > { %2408 = vmatmul.mubr.bf16.vlgmr.msra.gmra.mrb[40].mxu0 %v10153_v45 }
 0xc74   : > { %6786 = vmatpush3.bf16.msra.mxu0 %v9906_v23  ;;  %2489 = vmatprep.mubr.bf16.mxu0 %v2374_v26  ;;  %v10192_v23 = vld [vmem:[%s13076_s9 + $0xa0] sm:$0xff]  }
 0xc75   : > { %7805 = vmatpush3.bf16.msra.mxu1 %v10169_v30  ;;  %6787 = vmatprep.subr.bf16.mxu0 %v9913_v5  ;;  %v10198_v5 = vld [vmem:[%s13076_s9 + $0x58] sm:$0xff]  }
 0xc76   : > { %7806 = vmatprep.subr.bf16.mxu1 %v13257_v32 }
 0xc78   : > { %6788 = vmatpush3.bf16.msra.mxu0 %v9920_v10  ;;  %v10205_v10 = vld [vmem:[%s13076_s9 + $0x18] sm:$0xff]  }
 0xc79   : > { %7807 = vmatpush3.bf16.msra.mxu1 %v10178_v22  ;;  %6789 = vmatprep.subr.bf16.mxu0 %v9927_v44  ;;  %v10211_v44 = vld [vmem:[%s13076_s9 + $0xa8] sm:$0xff]  }
 0xc7a   : > { %7808 = vmatprep.subr.bf16.mxu1 %v13257_v32 }
 0xc7c   : > { %6790 = vmatpush3.bf16.msra.mxu0 %v10186_v31 }
 0xc7d   : > { %7809 = vmatpush3.bf16.msra.mxu1 %v10192_v23  ;;  %6791 = vmatprep.subr.bf16.mxu0 %v10198_v5 }
 0xc7e   : > { %7810 = vmatprep.subr.bf16.mxu1 %v13257_v32 }
 0xc80   : > { %6792 = vmatpush3.bf16.msra.mxu0 %v10205_v10 }
 0xc81   : > { %7811 = vmatpush3.bf16.msra.mxu1 %v10211_v44  ;;  %6793 = vmatprep.subr.bf16.mxu0 %v10217_v6 }
 0xc82   : > { %7812 = vmatprep.subr.bf16.mxu1 %v13257_v32 }
 0xc84   : > { %6794 = vmatpush3.bf16.msra.mxu0 %v10224_v8 }
 0xc85   : > { %7813 = vmatpush3.bf16.msra.mxu1 %v10230_v15  ;;  %6795 = vmatprep.subr.bf16.mxu0 %v10236_v19 }
 0xc86   : > { %7814 = vmatprep.subr.bf16.mxu1 %v13257_v32 }
 0xc88   : > { %6796 = vmatpush3.bf16.msra.mxu0 %v10243_v21 }
 0xc89   : > { %7815 = vmatpush3.bf16.msra.mxu1 %v10249_v16  ;;  %6797 = vmatprep.subr.bf16.mxu0 %v10255_v20 }
 0xc8a   : > { %7836 = vmatprep.subr.bf16.mxu1 %v13257_v32 }
 0xc8c   : > { %6798 = vmatpush3.bf16.msra.mxu0 %v10262_v25  ;;  %7817 = vmatmul.mubr.bf16.vlgmr.msra.gmra.mrb[44].mxu1 %v10153_v45 }
 0xc8d   : > { %6799 = vmatprep.subr.bf16.mxu0 %v10269_v27  ;;  %7837 = vmatpush3.bf16.msra.mxu1 %v10275_v28 }
 0xc8e   : > { %7838 = vmatprep.subr.bf16.mxu1 %v13257_v32  ;;  %7852 = vmatprep.mubr.msk.bf16.mxu1 %vm9040_vm0, %v13257_v32 }
 0xc90   : > { %6800 = vmatpush3.bf16.msra.mxu0 %v10284_v50 }
 0xc91   : > { %7839 = vmatpush3.bf16.msra.mxu1 %v10290_v52 }
 0xc92   : > { %7840 = vmatprep.subr.bf16.mxu1 %v13257_v32 }
 0xc93   : > { %2490 = vmatmul.mubr.bf16.vlgmr.msra.gmra.mrb[44].mxu0 %v10153_v45 }
 0xc94   : > { %7832 = vmatprep.mubr.msk.bf16.mxu0 %vm1148_vm1, %v10298_v53 }
 0xc95   : > { %7841 = vmatpush3.bf16.msra.mxu1 %v10305_v35 }
 0xc96   : > { %7842 = vmatprep.subr.bf16.mxu1 %v13257_v32 }
 0xc99   : > { %7843 = vmatpush3.bf16.msra.mxu1 %v10312_v62 }
 0xc9a   : > { %7844 = vmatprep.subr.bf16.mxu1 %v13257_v32 }
 0xc9d   : > { %7845 = vmatpush3.bf16.msra.mxu1 %v10319_v38 }
 0xc9e   : > { %7846 = vmatprep.subr.bf16.mxu1 %v13257_v32 }
 0xca1   : > { %7847 = vmatpush3.bf16.msra.mxu1 %v10326_v63 }
 0xca2   : > { %7848 = vmatprep.subr.bf16.mxu1 %v13257_v32 }
 0xca5   : > { %7849 = vmatpush3.bf16.msra.mxu1 %v10333_v39 }
 0xca6   : > { %7850 = vmatprep.subr.bf16.mxu1 %v13257_v32 }
 0xca9   : > { %7851 = vmatpush3.bf16.msra.mxu1 %v10340_v40 }
 0xd3f   : > { %v2450_v41 = vpop.f32.mrb[40].mxu1 }
 0xd40   : > { %v7798_v55 = vpop.f32.mrb[41].mxu1 }
 0xd41   : > { %v2453_v56 = vpop.f32.mrb[42].mxu1 }
 0xd42   : > { %v7799_v2 = vpop.f32.mrb[43].mxu1 }
 0xd46   : > { %v6770_v0 = vpop.f32.mrb[40].mxu0 }
 0xd47   : > { %v6771_v43 = vpop.f32.mrb[41].mxu0 }
 0xd48   : > { %v6772_v4 = vadd.f32 %v6771_v43, %v6770_v0  ;;  %v6773_v57 = vpop.f32.mrb[42].mxu0 }
 0xd49   : > { %v6774_v58 = vpop.f32.mrb[43].mxu0 }
 0xd4a   : > { %v2451_v59 = vadd.f32 %v6772_v4, %v2450_v41  ;;  %v6775_v60 = vadd.f32 %v6774_v58, %v6773_v57  ;;  %v10347_v58 = vld [vmem:[%s13073_s6 + $0x8] sm:$0xff]  }
 0xd4b   : > { %13323 = vst [vmem:[#allocation18_spill] sm:$0xff] %v10347_v58 }
 0xd4c   : > { %v2454_v61 = vadd.f32 %v6775_v60, %v2453_v56 }
 0xd4e   : > { %v2539_v29 = vpack.c.bf16 %v2454_v61, %v2451_v59 }
 0xd50   : > { %v2542_v18 = vunpack.c.h.bf16 %v2539_v29  ;;  %7820 = vmatprep.subr.bf16.mxu0 %v2539_v29  ;;  %v2541_v1 = vunpack.c.l.bf16 %v2539_v29 }
 0xd51   : > { %7821 = vmatpush3.bf16.msra.mxu0 %v2539_v29 }
 0xd52   : > { %v2546_v14 = vsub.f32 %v2454_v61, %v2542_v18  ;;  %v2545_v24 = vsub.f32 %v2451_v59, %v2541_v1  ;;  %v10371_v59 = vld [vmem:[%s13074_s7 + $0x40] sm:$0xff]  }
 0xd53   : > { %13324 = vst [vmem:[#allocation3_spill] sm:$0xff] %v10371_v59  ;;  %v10375_v61 = vld [vmem:[%s9462_s19] sm:$0xff] }
 0xd54   : > { %v2549_v33 = vpack.c.bf16 %v2546_v14, %v2545_v24  ;;  %v10379_v18 = vld [vmem:[%s9456_s24] sm:$0xff] }
 0xd5f   : > { %v2532_v34 = vpop.f32.mrb[44].mxu1 }
 0xd60   : > { %v7818_v7 = vpop.f32.mrb[45].mxu1 }
 0xd61   : > { %v2535_v3 = vpop.f32.mrb[46].mxu1  ;;  %v10385_v7 = vld [vmem:[%s9462_s19 + $0x8] sm:$0xff] }
 0xd62   : > { %v7819_v9 = vpop.f32.mrb[47].mxu1 }
 0xd63   : > { %v10389_v9 = vld [vmem:[%s9456_s24 + $0x8] sm:$0xff] }
 0xd66   : > { %v6801_v45 = vpop.f32.mrb[44].mxu0 }
 0xd67   : > { %v6802_v46 = vpop.f32.mrb[45].mxu0 }
 0xd68   : > { %v6803_v47 = vadd.f32 %v6802_v46, %v6801_v45  ;;  %v6804_v48 = vpop.f32.mrb[46].mxu0 }
 0xd69   : > { %v6805_v11 = vpop.f32.mrb[47].mxu0 }
 0xd6a   : > { %v2533_v26 = vadd.f32 %v6803_v47, %v2532_v34  ;;  %v6806_v41 = vadd.f32 %v6805_v11, %v6804_v48 }
 0xd6c   : > { %v2536_v55 = vadd.f32 %v6806_v41, %v2535_v3 }
 0xd6e   : > { %v2540_v56 = vpack.c.bf16 %v2536_v55, %v2533_v26 }
 0xd70   : > { %v2544_v2 = vunpack.c.h.bf16 %v2540_v56  ;;  %7822 = vmatprep.subr.bf16.mxu0 %v2540_v56  ;;  %v2543_v0 = vunpack.c.l.bf16 %v2540_v56 }
 0xd71   : > { %7823 = vmatpush3.bf16.msra.mxu0 %v2540_v56 }
 0xd72   : > { %v2548_v43 = vsub.f32 %v2536_v55, %v2544_v2  ;;  %7824 = vmatprep.subr.bf16.mxu0 %v2549_v33  ;;  %v2547_v4 = vsub.f32 %v2533_v26, %v2543_v0 }
 0xd74   : > { %v2550_v57 = vpack.c.bf16 %v2548_v43, %v2547_v4 }
 0xd75   : > { %7825 = vmatpush3.bf16.msra.mxu0 %v2549_v33 }
 0xd76   : > { %7826 = vmatprep.subr.bf16.mxu0 %v2550_v57 }
 0xd79   : > { %7827 = vmatpush3.bf16.msra.mxu0 %v2550_v57 }
 0xd7a   : > { %7828 = vmatprep.subr.bf16.mxu0 %v2539_v29 }
 0xd7d   : > { %7829 = vmatpush3.bf16.msra.mxu0 %v2539_v29 }
 0xd7e   : > { %7830 = vmatprep.subr.bf16.mxu0 %v2540_v56 }
 0xd81   : > { %7831 = vmatpush3.bf16.msra.mxu0 %v2540_v56 }
 0xd82   : > { %7856 = vmatprep.subr.bf16.mxu0 %v13257_v32 }
 0xd84   : > { %7833 = vmatmul.mubr.msk.bf16.vlgmr.msra.gmra.mrb[48].mxu0 %vm1148_vm1, %v10347_v58 }
 0xd85   : > { %7857 = vmatpush3.bf16.msra.mxu0 %v10275_v28  ;;  %7872 = vmatprep.mubr.msk.bf16.mxu0 %vm9040_vm0, %v13257_v32 }
 0xd86   : > { %7858 = vmatprep.subr.bf16.mxu0 %v13257_v32 }
 0xd89   : > { %7859 = vmatpush3.bf16.msra.mxu0 %v10290_v52 }
 0xd8a   : > { %7860 = vmatprep.subr.bf16.mxu0 %v13257_v32 }
 0xd8d   : > { %7861 = vmatpush3.bf16.msra.mxu0 %v10305_v35 }
 0xd8e   : > { %7862 = vmatprep.subr.bf16.mxu0 %v13257_v32 }
 0xd91   : > { %7863 = vmatpush3.bf16.msra.mxu0 %v10312_v62 }
 0xd92   : > { %7864 = vmatprep.subr.bf16.mxu0 %v13257_v32 }
 0xd95   : > { %7865 = vmatpush3.bf16.msra.mxu0 %v10319_v38 }
 0xd96   : > { %7866 = vmatprep.subr.bf16.mxu0 %v13257_v32 }
 0xd99   : > { %7867 = vmatpush3.bf16.msra.mxu0 %v10326_v63 }
 0xd9a   : > { %7868 = vmatprep.subr.bf16.mxu0 %v13257_v32 }
 0xd9d   : > { %7869 = vmatpush3.bf16.msra.mxu0 %v10333_v39 }
 0xd9e   : > { %7870 = vmatprep.subr.bf16.mxu0 %v13257_v32 }
 0xda1   : > { %7871 = vmatpush3.bf16.msra.mxu0 %v10340_v40 }
 0xda2   : > { %6850 = vmatprep.subr.bf16.mxu0 %v10371_v59 }
 0xe57   : > { %v7834_v60 = vpop.f32.mrb[48].mxu0 }
 0xe58   : > { %v2602_v29 = vmul.f32 %v10375_v61, %v7834_v60  ;;  %v2619_v1 = vmul.f32 %v10379_v18, %v7834_v60  ;;  %v2585_v14 = vpop.f32.mrb[49].mxu0 }
 0xe59   : > { %v2600_v24 = vmul.f32 %v10379_v18, %v2585_v14  ;;  %v2621_v33 = vmul.f32 %v10375_v61, %v2585_v14  ;;  %v7835_v34 = vpop.f32.mrb[50].mxu0 }
 0xe5a   : > { %v2603_v3 = vmul.f32 %v10385_v7, %v7835_v34  ;;  %v2620_v45 = vmul.f32 %v10389_v9, %v7835_v34  ;;  %v2588_v46 = vpop.f32.mrb[51].mxu0 }
 0xe5b   : > { %v2604_v47 = vadd.f32 %v2602_v29, %v2600_v24  ;;  %v2623_v48 = vsub.f32 %v2619_v1, %v2621_v33  ;;  %v2601_v11 = vmul.f32 %v10389_v9, %v2588_v46  ;;  %v2622_v26 = vmul.f32 %v10385_v7, %v2588_v46 }
 0xe5c   : > { %v2124_v29 = vmul.f32 %v10037_v54, %v10037_v54  ;;  %v2126_v1 = vmul.f32 %v10040_v42, %v10040_v42  ;;  %v2123_v24 = vmul.f32 %v10031_v36, %v10031_v36  ;;  %v2125_v33 = vmul.f32 %v10034_v37, %v10034_v37 }
 0xe5d   : > { %v2605_v41 = vadd.f32 %v2603_v3, %v2601_v11  ;;  %v2624_v55 = vsub.f32 %v2620_v45, %v2622_v26  ;;  %v10411_v26 = vld [vmem:[%s13072_s5] sm:$0xff]  }
 0xe5e   : > { %v2128_v3 = vadd.f32 %v2126_v1, %v2124_v29  ;;  %v2127_v45 = vadd.f32 %v2125_v33, %v2123_v24  ;;  %v10484_v29 = vld [vmem:[%s13074_s7 + $0x70] sm:$0xff]   ;;  %v10496_v24 = vld [vmem:[%s13074_s7 + $0x78] sm:$0xff]  }
 0xe5f   : > { %v2606_v56 = vpack.c.bf16 %v2605_v41, %v2604_v47  ;;  %v2625_v2 = vpack.c.bf16 %v2624_v55, %v2623_v48  ;;  %13334 = vst [vmem:[#allocation13_spill] sm:$0xff] %v10484_v29  ;;  %v10490_v1 = vld [vmem:[%s13074_s7 + $0x30] sm:$0xff]   ;;  %13336 = vst [vmem:[#allocation15_spill] sm:$0xff] %v10496_v24  ;;  %v10502_v33 = vld [vmem:[%s13074_s7 + $0x38] sm:$0xff]  }
 0xe60   : > { %13335 = vst [vmem:[#allocation14_spill] sm:$0xff] %v10490_v1  ;;  %13337 = vst [vmem:[#allocation19_spill] sm:$0xff] %v10502_v33 }
 0xe61   : > { %v2608_v0 = vunpack.c.h.bf16 %v2606_v56  ;;  %v2627_v43 = vunpack.c.h.bf16 %v2625_v2  ;;  %v2626_v4 = vunpack.c.l.bf16 %v2625_v2  ;;  %v2607_v57 = vunpack.c.l.bf16 %v2606_v56 }
 0xe63   : > { %v2610_v60 = vsub.f32 %v2605_v41, %v2608_v0  ;;  %v2629_v14 = vsub.f32 %v2624_v55, %v2627_v43  ;;  %v2628_v59 = vsub.f32 %v2623_v48, %v2626_v4  ;;  %v2609_v58 = vsub.f32 %v2604_v47, %v2607_v57  ;;  %v10418_v41 = vld [vmem:[%s13074_s7] sm:$0xff]   ;;  %v10424_v55 = vld [vmem:[%s13074_s7 + $0x48] sm:$0xff]   ;;  %v10442_v0 = vld [vmem:[%s13074_s7 + $0x10] sm:$0xff]  }
 0xe64   : > { %13327 = vst [vmem:[#allocation6_spill] sm:$0xff] %v10442_v0  ;;  %v10448_v43 = vld [vmem:[%s13074_s7 + $0x58] sm:$0xff]   ;;  %v10460_v57 = vld [vmem:[%s13074_s7 + $0x60] sm:$0xff]  }
 0xe65   : > { %v2630_v34 = vpack.c.bf16 %v2629_v14, %v2628_v59  ;;  %v2611_v40 = vpack.c.bf16 %v2610_v60, %v2609_v58  ;;  %v2130_v58 = vsel %vm1393_vm3, %v2128_v3, 0.0  ;;  %v2129_v59 = vsel %vm1393_vm3, %v2127_v45, 0.0  ;;  %13328 = vst [vmem:[#allocation7_spill] sm:$0xff] %v10448_v43  ;;  %v10454_v4 = vld [vmem:[%s13074_s7 + $0x18] sm:$0xff]   ;;  %13330 = vst [vmem:[#allocation9_spill] sm:$0xff] %v10460_v57  ;;  %v10466_v60 = vld [vmem:[%s13074_s7 + $0x20] sm:$0xff]  }
 0xe66   : > { %v2131_v46 = vadd.f32 %v2130_v58, %v2129_v59  ;;  %13329 = vst [vmem:[#allocation8_spill] sm:$0xff] %v10454_v4  ;;  %13331 = vst [vmem:[#allocation10_spill] sm:$0xff] %v10466_v60  ;;  %v10472_v14 = vld [vmem:[%s13074_s7 + $0x68] sm:$0xff]   ;;  %v10508_v3 = vld [vmem:[%s13075_s8 + $0x40] sm:$0xff]  }
 0xe67   : > { %2632 = vrot.lane.b32.xlu1 %v2630_v34, %s9041_s20  ;;  %2613 = vrot.lane.b32.xlu0 %v2611_v40, %s9041_s20  ;;  %13332 = vst [vmem:[#allocation11_spill] sm:$0xff] %v10472_v14  ;;  %v10478_v34 = vld [vmem:[%s13074_s7 + $0x28] sm:$0xff]   ;;  %13338 = vst [vmem:[#allocation20_spill] sm:$0xff] %v10508_v3 }
 0xe68   : > { %13333 = vst [vmem:[#allocation12_spill] sm:$0xff] %v10478_v34 }
 0xe86   : > { %2132 = vadd.xlane.f32.xlu0 %v2131_v46 }
 0xed9   : > { %v2633_v40 = vpop.permute.xlu1 %2632  ;;  %v2614_v47 = vpop.permute.xlu0 %2613 }
 0xeda   : > { %v2636_v48 = vsel %vm1219_vm2, %v2625_v2, %v2633_v40  ;;  %v2617_v11 = vsel %vm1219_vm2, %v2606_v56, %v2614_v47  ;;  %v10430_v56 = vld [vmem:[%s13074_s7 + $0x8] sm:$0xff]   ;;  %v10436_v2 = vld [vmem:[%s13074_s7 + $0x50] sm:$0xff]  }
 0xedb   : > { %7853 = vmatmul.mubr.bf16.vlgmr.msra.gmra.mrb[48].mxu1 %v2617_v11  ;;  %7873 = vmatmul.mubr.bf16.vlgmr.msra.gmra.mrb[52].mxu0 %v2636_v48  ;;  %13325 = vst [vmem:[#allocation5_spill] sm:$0xff] %v10430_v56  ;;  %13326 = vst [vmem:[#allocation4_spill] sm:$0xff] %v10436_v2  ;;  %v2638_v11 = vmul.f32 %v10031_v36, %v10020_v12 }
 0xedc   : > { %7888 = vmatprep.mubr.msk.bf16.mxu1 %vm1148_vm1, %v10411_v26  ;;  %6851 = vmatpush3.bf16.msra.mxu0 %v10418_v41 }
 0xedd   : > { %6852 = vmatprep.subr.bf16.mxu0 %v10424_v55 }
 0xee0   : > { %6853 = vmatpush3.bf16.msra.mxu0 %v10430_v56 }
 0xee1   : > { %6854 = vmatprep.subr.bf16.mxu0 %v10436_v2 }
 0xee4   : > { %6855 = vmatpush3.bf16.msra.mxu0 %v10442_v0 }
 0xee5   : > { %6856 = vmatprep.subr.bf16.mxu0 %v10448_v43 }
 0xee8   : > { %6857 = vmatpush3.bf16.msra.mxu0 %v10454_v4 }
 0xee9   : > { %6858 = vmatprep.subr.bf16.mxu0 %v10460_v57 }
 0xeec   : > { %6859 = vmatpush3.bf16.msra.mxu0 %v10466_v60 }
 0xeed   : > { %6860 = vmatprep.subr.bf16.mxu0 %v10472_v14 }
 0xef0   : > { %6861 = vmatpush3.bf16.msra.mxu0 %v10478_v34 }
 0xef1   : > { %6862 = vmatprep.subr.bf16.mxu0 %v10484_v29 }
 0xef4   : > { %6863 = vmatpush3.bf16.msra.mxu0 %v10490_v1 }
 0xef5   : > { %6864 = vmatprep.subr.bf16.mxu0 %v10496_v24 }
 0xef8   : > { %6865 = vmatpush3.bf16.msra.mxu0 %v10502_v33  ;;  %v2681_v33 = vmul.f32 %v10034_v37, %v10020_v12 }
 0xef9   : > { %6881 = vmatprep.subr.bf16.mxu0 %v10508_v3 }
 0xf13   : > { %v2133_v45 = vpop.xlane.xlu0 %2132 }
 0xf14   : > { %v2134_v58 = vrot.slane %v2133_v45, 4 }
 0xf16   : > { %v2135_v59 = vadd.f32 %v2134_v58, %v2133_v45  ;;  %v2639_v45 = vmul.f32 %v10037_v54, %v10020_v12  ;;  %v2682_v58 = vmul.f32 %v10040_v42, %v10020_v12 }
 0xf18   : > { %v2136_v46 = vrot.slane %v2135_v59, 2 }
 0xf1a   : > { %v2137_v40 = vadd.f32 %v2136_v46, %v2135_v59 }
 0xf1c   : > { %v2138_v47 = vrot.slane %v2137_v40, 1 }
 0xf1e   : > { %v2139_v48 = vadd.f32 %v2138_v47, %v2137_v40 }
 0xf20   : > { %8572 = vpush %v2139_v48 }
 0xf51   : > { %s10525_s13 = spop %8572 }
 0xfae   : > { %v2674_v24 = vpop.f32.mrb[48].mxu1  ;;  %v2717_v1 = vpop.f32.mrb[52].mxu0 }
 0xfaf   : > { %v2675_v29 = vadd.f32 %v2674_v24, %v2638_v11  ;;  %v2718_v34 = vadd.f32 %v2717_v1, %v2681_v33  ;;  %v7854_v14 = vpop.f32.mrb[49].mxu1  ;;  %v7874_v3 = vpop.f32.mrb[53].mxu0 }
 0xfb0   : > { %v2677_v59 = vpop.f32.mrb[50].mxu1  ;;  %v2720_v46 = vpop.f32.mrb[54].mxu0 }
 0xfb1   : > { %v2724_v40 = vmul.f32 %v2675_v29, %v10031_v36  ;;  %v2726_v47 = vmul.f32 %v2718_v34, %v10034_v37  ;;  %v2678_v48 = vadd.f32 %v2677_v59, %v2639_v45  ;;  %v2721_v60 = vadd.f32 %v2720_v46, %v2682_v58  ;;  %v7855_v57 = vpop.f32.mrb[51].mxu1  ;;  %v7875_v4 = vpop.f32.mrb[55].mxu0 }
 0xfb3   : > { %v2725_v1 = vmul.f32 %v2678_v48, %v10037_v54  ;;  %v2727_v14 = vmul.f32 %v2721_v60, %v10040_v42  ;;  %v2728_v24 = vadd.f32 %v2726_v47, %v2724_v40  ;;  %v2141_v40 = vstv %s10525_s13 }
 0xfb5   : > { %v2729_v33 = vadd.f32 %v2727_v14, %v2725_v1  ;;  %v2730_v3 = vsel %vm1393_vm3, %v2728_v24, 0.0 }
 0xfb7   : > { %v2731_v11 = vsel %vm1393_vm3, %v2729_v33, 0.0 }
 0xfb8   : > { %v2732_v12 = vadd.f32 %v2731_v11, %v2730_v3 }
 0xfba   : > { %2733 = vadd.xlane.f32.xlu1 %v2732_v12 }
0x1047   : > { %v2734_v43 = vpop.xlane.xlu1 %2733 }
0x1048   : > { %v2735_v0 = vrot.slane %v2734_v43, 4 }
0x104a   : > { %v2736_v2 = vadd.f32 %v2735_v0, %v2734_v43 }
0x104c   : > { %v2737_v56 = vrot.slane %v2736_v2, 2 }
0x104e   : > { %v2738_v45 = vadd.f32 %v2737_v56, %v2736_v2 }
0x1050   : > { %v2739_v58 = vrot.slane %v2738_v45, 1 }
0x1052   : > { %v2740_v57 = vadd.f32 %v2739_v58, %v2738_v45 }
0x1054   : > { %8574 = vpush %v2740_v57 }
0x1085   : > { %s8575_s14 = spop %8574 }
0x1086   : > { %v2742_v4 = vstv %s8575_s14 }
0x1087   : > { %v2743_v59 = vadd.f32 1e-30, %v2742_v4 }
0x1089   : > { %8694 = vrcp.f32 %v2743_v59 }
0x1093   : > { %v8695_v46 = vpop.eup %8694 }
0x1094   : > { %v2745_v47 = vmul.f32 %v8695_v46, %v2141_v40 }
0x1096   : > { %v2754_v1 = vmul.f32 %v2745_v47, %v2675_v29  ;;  %v2755_v12 = vmul.f32 %v2745_v47, %v2678_v48  ;;  %v2758_v14 = vmul.f32 %v2745_v47, %v2718_v34  ;;  %v2759_v24 = vmul.f32 %v2745_v47, %v2721_v60 }
0x1097   : > { %v2750_v0 = vmul.f32 %v2745_v47, %v10034_v37  ;;  %v2747_v56 = vmul.f32 %v2745_v47, %v10037_v54  ;;  %v2751_v2 = vmul.f32 %v2745_v47, %v10040_v42  ;;  %v2746_v43 = vmul.f32 %v2745_v47, %v10031_v36 }
0x1098   : > { %v10533_v33 = vsub.f32 %v10031_v36, %v2754_v1  ;;  %v10536_v3 = vsub.f32 %v10037_v54, %v2755_v12  ;;  %v10539_v11 = vsub.f32 %v10034_v37, %v2758_v14  ;;  %v10542_v34 = vsub.f32 %v10040_v42, %v2759_v24 }
0x1099   : > { %v10545_v60 = vadd.f32 %v2750_v0, %v13286_v17  ;;  %v10548_v29 = vadd.f32 %v2747_v56, %v13287_v49  ;;  %v10551_v48 = vadd.f32 %v2751_v2, %v13288_v51  ;;  %v10554_v45 = vadd.f32 %v2746_v43, %v13285_v13 }
0x109a   : > { %13339 = vst [vmem:[#allocation21_spill] sm:$0xff] %v10539_v11  ;;  %13340 = vst [vmem:[#allocation22_spill] sm:$0xff] %v10542_v34  ;;  %v2762_v58 = vmul.f32 %v10533_v33, %v10533_v33  ;;  %v2763_v57 = vmul.f32 %v10536_v3, %v10536_v3  ;;  %v2764_v4 = vmul.f32 %v10539_v11, %v10539_v11  ;;  %v2781_v2 = vadd.f32 1e-30, %v2141_v40 }
0x109b   : > { %13341 = vst [vmem:[#allocation23_spill] sm:$0xff] %v10545_v60  ;;  %13342 = vst [vmem:[#allocation24_spill] sm:$0xff] %v10548_v29  ;;  %v2765_v17 = vmul.f32 %v10542_v34, %v10542_v34 }
0x109c   : > { %13343 = vst [vmem:[#allocation25_spill] sm:$0xff] %v10551_v48  ;;  %13344 = vst [vmem:[#allocation26_spill] sm:$0xff] %v10554_v45  ;;  %v2766_v49 = vadd.f32 %v2764_v4, %v2762_v58  ;;  %8696 = vrcp.f32 %v2781_v2 }
0x109d   : > { %v2767_v59 = vadd.f32 %v2765_v17, %v2763_v57 }
0x109e   : > { %v2768_v51 = vsel %vm1393_vm3, %v2766_v49, 0.0 }
0x109f   : > { %v2769_v46 = vsel %vm1393_vm3, %v2767_v59, 0.0 }
0x10a0   : > { %v2770_v13 = vadd.f32 %v2769_v46, %v2768_v51 }
0x10a2   : > { %2771 = vadd.xlane.f32.xlu0 %v2770_v13 }
0x10a6   : > { %v8697_v43 = vpop.eup %8696 }
0x112f   : > { %v2772_v47 = vpop.xlane.xlu0 %2771 }
0x1130   : > { %v2773_v1 = vrot.slane %v2772_v47, 4 }
0x1132   : > { %v2774_v12 = vadd.f32 %v2773_v1, %v2772_v47 }
0x1134   : > { %v2775_v14 = vrot.slane %v2774_v12, 2 }
0x1136   : > { %v2776_v24 = vadd.f32 %v2775_v14, %v2774_v12 }
0x1138   : > { %v2777_v0 = vrot.slane %v2776_v24, 1 }
0x113a   : > { %v2778_v56 = vadd.f32 %v2777_v0, %v2776_v24 }
0x113c   : > { %8576 = vpush %v2778_v56 }
0x116d   : > { %s8577_s15 = spop %8576 }
0x116e   : > { %v10566_v58 = vstv %s8577_s15 }
0x116f   : > { %v2783_v57 = vmul.f32 %v8697_v43, %v10566_v58 }
0x1171   : > { %v2784_v4 = vmul.f32 %v2783_v57, %v10031_v36  ;;  %v2785_v17 = vmul.f32 %v2783_v57, %v10037_v54  ;;  %v2788_v51 = vmul.f32 %v2783_v57, %v10034_v37  ;;  %v2789_v40 = vmul.f32 %v2783_v57, %v10040_v42 }
0x1173   : > { %v10572_v49 = vadd.f32 %v2784_v4, %v10533_v33  ;;  %v10575_v59 = vadd.f32 %v2785_v17, %v10536_v3  ;;  %v10584_v36 = vadd.f32 %v2788_v51, %v10539_v11  ;;  %v10587_v54 = vadd.f32 %v2789_v40, %v10542_v34 }
0x1175   : > { %2796 = vrot.lane.b32.xlu1 %v10575_v59, %s9042_s21  ;;  %2794 = vrot.lane.b32.xlu0 %v10572_v49, %s9042_s21 }
0x1179   : > { %2820 = vrot.lane.b32.xlu1 %v10584_v36, %s9042_s21  ;;  %2822 = vrot.lane.b32.xlu0 %v10587_v54, %s9042_s21 }
0x117d   : > { %2800 = vrot.lane.b32.xlu1 %v10572_v49, %s9043_s22  ;;  %2802 = vrot.lane.b32.xlu0 %v10575_v59, %s9043_s22 }
0x1181   : > { %2826 = vrot.lane.b32.xlu1 %v10584_v36, %s9043_s22  ;;  %2828 = vrot.lane.b32.xlu0 %v10587_v54, %s9043_s22 }
0x1185   : > { %2806 = vrot.lane.b32.xlu1 %v10572_v49, %s9044_s25  ;;  %2808 = vrot.lane.b32.xlu0 %v10575_v59, %s9044_s25 }
0x1189   : > { %2832 = vrot.lane.b32.xlu1 %v10584_v36, %s9044_s25  ;;  %2834 = vrot.lane.b32.xlu0 %v10587_v54, %s9044_s25 }
0x11e7   : > { %v2797_v37 = vpop.permute.xlu1 %2796  ;;  %v2795_v42 = vpop.permute.xlu0 %2794 }
0x11e8   : > { %v2812_v24 = vsel %vm1393_vm3, %v10572_v49, %v2795_v42  ;;  %v2813_v0 = vsel %vm1393_vm3, %v10575_v59, %v2797_v37 }
0x11eb   : > { %v2821_v46 = vpop.permute.xlu1 %2820  ;;  %v2823_v13 = vpop.permute.xlu0 %2822 }
0x11ec   : > { %v2838_v51 = vsel %vm1393_vm3, %v10584_v36, %v2821_v46  ;;  %v2839_v40 = vsel %vm1393_vm3, %v10587_v54, %v2823_v13 }
0x11ef   : > { %v2801_v47 = vpop.permute.xlu1 %2800  ;;  %v2803_v1 = vpop.permute.xlu0 %2802 }
0x11f0   : > { %v2814_v56 = vsel %vm1396_vm4, %v2812_v24, %v2801_v47  ;;  %v2815_v57 = vsel %vm1396_vm4, %v2813_v0, %v2803_v1 }
0x11f3   : > { %v2827_v12 = vpop.permute.xlu1 %2826  ;;  %v2829_v14 = vpop.permute.xlu0 %2828 }
0x11f4   : > { %v2840_v42 = vsel %vm1396_vm4, %v2838_v51, %v2827_v12  ;;  %v2841_v37 = vsel %vm1396_vm4, %v2839_v40, %v2829_v14 }
0x11f7   : > { %v2807_v2 = vpop.permute.xlu1 %2806  ;;  %v2809_v43 = vpop.permute.xlu0 %2808 }
0x11f8   : > { %v2816_v4 = vsel %vm1399_vm5, %v2814_v56, %v2807_v2  ;;  %v2817_v17 = vsel %vm1399_vm5, %v2815_v57, %v2809_v43 }
0x11f9   : > { %v2844_v47 = vmul.f32 %v10379_v18, %v2816_v4  ;;  %v2852_v24 = vmul.f32 %v10375_v61, %v2816_v4  ;;  %v2845_v0 = vmul.f32 %v10389_v9, %v2817_v17  ;;  %v2853_v56 = vmul.f32 %v10385_v7, %v2817_v17 }
0x11fb   : > { %v2833_v45 = vpop.permute.xlu1 %2832  ;;  %v2835_v1 = vpop.permute.xlu0 %2834 }
0x11fc   : > { %v2842_v2 = vsel %vm1399_vm5, %v2840_v42, %v2833_v45  ;;  %v2843_v46 = vsel %vm1399_vm5, %v2841_v37, %v2835_v1 }
0x11fd   : > { %v2846_v13 = vmul.f32 %v10375_v61, %v2842_v2  ;;  %v2850_v12 = vmul.f32 %v10379_v18, %v2842_v2  ;;  %v2847_v14 = vmul.f32 %v10385_v7, %v2843_v46  ;;  %v2851_v43 = vmul.f32 %v10389_v9, %v2843_v46  ;;  %v10695_v46 = vld [vmem:[%s13074_s7 + $0xb8] sm:$0xff]  }
0x11fe   : > { %13346 = vst [vmem:[#allocation28_spill] sm:$0xff] %v10695_v46 }
0x11ff   : > { %v2848_v57 = vsub.f32 %v2844_v47, %v2846_v13  ;;  %v2854_v4 = vadd.f32 %v2852_v24, %v2850_v12  ;;  %v2849_v51 = vsub.f32 %v2845_v0, %v2847_v14  ;;  %v2855_v40 = vadd.f32 %v2853_v56, %v2851_v43  ;;  %v10637_v24 = vld [vmem:[%s13072_s5 + $0x8] sm:$0xff]   ;;  %v10688_v56 = vld [vmem:[%s13074_s7 + $0xb0] sm:$0xff]  }
0x1200   : > { %v10681_v0 = vld [vmem:[%s13074_s7 + $0xa8] sm:$0xff]   ;;  %13345 = vst [vmem:[#allocation27_spill] sm:$0xff] %v10688_v56 }
0x1201   : > { %v2856_v48 = vpack.c.bf16 %v2849_v51, %v2848_v57  ;;  %v2857_v29 = vpack.c.bf16 %v2855_v40, %v2854_v4 }
0x1203   : > { %7876 = vmatprep.subr.bf16.mxu1 %v2856_v48  ;;  %v2858_v17 = vunpack.c.l.bf16 %v2856_v48  ;;  %v2859_v60 = vunpack.c.h.bf16 %v2856_v48  ;;  %v2860_v45 = vunpack.c.l.bf16 %v2857_v29  ;;  %v2861_v42 = vunpack.c.h.bf16 %v2857_v29 }
0x1204   : > { %7877 = vmatpush3.bf16.msra.mxu1 %v2856_v48 }
0x1205   : > { %7878 = vmatprep.subr.bf16.mxu1 %v2857_v29  ;;  %v2862_v37 = vsub.f32 %v2848_v57, %v2858_v17  ;;  %v2863_v1 = vsub.f32 %v2849_v51, %v2859_v60  ;;  %v2864_v34 = vsub.f32 %v2854_v4, %v2860_v45  ;;  %v2865_v11 = vsub.f32 %v2855_v40, %v2861_v42  ;;  %v10660_v60 = vld [vmem:[%s13074_s7 + $0x90] sm:$0xff]  }
0x1207   : > { %v2866_v2 = vpack.c.bf16 %v2863_v1, %v2862_v37  ;;  %v2867_v47 = vpack.c.bf16 %v2865_v11, %v2864_v34  ;;  %v10644_v11 = vld [vmem:[%s13074_s7 + $0x80] sm:$0xff]   ;;  %v10653_v34 = vld [vmem:[%s13074_s7 + $0x88] sm:$0xff]  }
0x1208   : > { %7879 = vmatpush3.bf16.msra.mxu1 %v2857_v29  ;;  %v10706_v37 = vld [vmem:[%s13075_s8 + $0x80] sm:$0xff]  }
0x1209   : > { %7880 = vmatprep.subr.bf16.mxu1 %v2866_v2  ;;  %13347 = vst [vmem:[#allocation29_spill] sm:$0xff] %v10706_v37 }
0x120c   : > { %7881 = vmatpush3.bf16.msra.mxu1 %v2866_v2 }
0x120d   : > { %7882 = vmatprep.subr.bf16.mxu1 %v2867_v47 }
0x1210   : > { %7883 = vmatpush3.bf16.msra.mxu1 %v2867_v47 }
0x1211   : > { %7884 = vmatprep.subr.bf16.mxu1 %v2856_v48 }
0x1214   : > { %7885 = vmatpush3.bf16.msra.mxu1 %v2856_v48  ;;  %v10674_v48 = vld [vmem:[%s13074_s7 + $0xa0] sm:$0xff]  }
0x1215   : > { %7886 = vmatprep.subr.bf16.mxu1 %v2857_v29 }
0x1218   : > { %7887 = vmatpush3.bf16.msra.mxu1 %v2857_v29  ;;  %v10667_v29 = vld [vmem:[%s13074_s7 + $0x98] sm:$0xff]  }
0x1219   : > { %7892 = vmatprep.subr.bf16.mxu1 %v13257_v32 }
0x121b   : > { %7889 = vmatmul.mubr.msk.bf16.vlgmr.msra.gmra.mrb[52].mxu1 %vm1148_vm1, %v10637_v24 }
0x121c   : > { %7893 = vmatpush3.bf16.msra.mxu1 %v10644_v11  ;;  %7908 = vmatprep.mubr.msk.bf16.mxu1 %vm9040_vm0, %v13257_v32 }
0x121d   : > { %7894 = vmatprep.subr.bf16.mxu1 %v13257_v32 }
0x1220   : > { %7895 = vmatpush3.bf16.msra.mxu1 %v10653_v34 }
0x1221   : > { %7896 = vmatprep.subr.bf16.mxu1 %v13257_v32 }
0x1224   : > { %7897 = vmatpush3.bf16.msra.mxu1 %v10660_v60 }
0x1225   : > { %7898 = vmatprep.subr.bf16.mxu1 %v13257_v32 }
0x1228   : > { %7899 = vmatpush3.bf16.msra.mxu1 %v10667_v29 }
0x1229   : > { %7900 = vmatprep.subr.bf16.mxu1 %v13257_v32 }
0x122c   : > { %7901 = vmatpush3.bf16.msra.mxu1 %v10674_v48 }
0x122d   : > { %7902 = vmatprep.subr.bf16.mxu1 %v13257_v32 }
0x1230   : > { %7903 = vmatpush3.bf16.msra.mxu1 %v10681_v0 }
0x1231   : > { %7904 = vmatprep.subr.bf16.mxu1 %v13257_v32 }
0x1234   : > { %7905 = vmatpush3.bf16.msra.mxu1 %v10688_v56 }
0x1235   : > { %7906 = vmatprep.subr.bf16.mxu1 %v13257_v32 }
0x1238   : > { %7907 = vmatpush3.bf16.msra.mxu1 %v10695_v46  ;;  %v10862_v46 = vld [vmem:[%s9203_s17 + $0x8] sm:$0xff] }
0x1239   : > { %7912 = vmatprep.subr.bf16.mxu1 %v13257_v32 }
0x12ee   : > { %v7890_v13 = vpop.f32.mrb[52].mxu1 }
0x12ef   : > { %2919 = vrot.lane.b32.xlu1 %v7890_v13, %s9041_s20  ;;  %v2902_v12 = vpop.f32.mrb[53].mxu1  ;;  %v10715_v13 = vld [vmem:[%s13075_s8 + $0x88] sm:$0xff]  }
0x12f0   : > { %v7891_v14 = vpop.f32.mrb[54].mxu1  ;;  %13348 = vst [vmem:[#allocation30_spill] sm:$0xff] %v10715_v13 }
0x12f1   : > { %2921 = vrot.lane.b32.xlu0 %v7891_v14, %s9041_s20  ;;  %v2905_v43 = vpop.f32.mrb[55].mxu1  ;;  %v10728_v14 = vld [vmem:[%s13075_s8 + $0x90] sm:$0xff]  }
0x12f2   : > { %13350 = vst [vmem:[#allocation32_spill] sm:$0xff] %v10728_v14 }
0x1361   : > { %v2920_v57 = vpop.permute.xlu1 %2919 }
0x1362   : > { %v2925_v51 = vsel %vm1219_vm2, %v2902_v12, %v2920_v57  ;;  %v10722_v12 = vld [vmem:[%s13075_s8] sm:$0xff]   ;;  %v10741_v57 = vld [vmem:[%s13075_s8 + $0x8] sm:$0xff]  }
0x1363   : > { %v2922_v4 = vpop.permute.xlu0 %2921  ;;  %13349 = vst [vmem:[#allocation31_spill] sm:$0xff] %v10722_v12  ;;  %13352 = vst [vmem:[#allocation34_spill] sm:$0xff] %v10741_v57 }
0x1364   : > { %v2926_v40 = vsel %vm1219_vm2, %v2905_v43, %v2922_v4  ;;  %v10734_v43 = vld [vmem:[%s13075_s8 + $0x48] sm:$0xff]   ;;  %v10747_v4 = vld [vmem:[%s13075_s8 + $0x98] sm:$0xff]  }
0x1365   : > { %v2927_v17 = vpack.c.bf16 %v2926_v40, %v2925_v51  ;;  %13351 = vst [vmem:[#allocation33_spill] sm:$0xff] %v10734_v43  ;;  %13353 = vst [vmem:[#allocation35_spill] sm:$0xff] %v10747_v4 }
0x1367   : > { %v2929_v45 = vunpack.c.h.bf16 %v2927_v17  ;;  %7909 = vmatmul.mubr.bf16.vlgmr.msra.gmra.mrb[56].mxu1 %v2927_v17  ;;  %v2928_v42 = vunpack.c.l.bf16 %v2927_v17 }
0x1368   : > { %7913 = vmatpush3.bf16.msra.mxu1 %v10706_v37  ;;  %7928 = vmatprep.mubr.msk.bf16.mxu1 %vm9040_vm0, %v13257_v32 }
0x1369   : > { %v2931_v1 = vsub.f32 %v2926_v40, %v2929_v45  ;;  %v2930_v2 = vsub.f32 %v2925_v51, %v2928_v42  ;;  %7914 = vmatprep.subr.bf16.mxu1 %v13257_v32  ;;  %v10753_v51 = vld [vmem:[%s13075_s8 + $0x50] sm:$0xff]   ;;  %v10772_v45 = vld [vmem:[%s13075_s8 + $0x58] sm:$0xff]  }
0x136a   : > { %13354 = vst [vmem:[#allocation36_spill] sm:$0xff] %v10753_v51  ;;  %v10760_v40 = vld [vmem:[%s13075_s8 + $0x10] sm:$0xff]   ;;  %13357 = vst [vmem:[#allocation39_spill] sm:$0xff] %v10772_v45  ;;  %v10779_v42 = vld [vmem:[%s13075_s8 + $0x18] sm:$0xff]  }
0x136b   : > { %v2932_v47 = vpack.c.bf16 %v2931_v1, %v2930_v2  ;;  %13355 = vst [vmem:[#allocation37_spill] sm:$0xff] %v10760_v40  ;;  %13358 = vst [vmem:[#allocation40_spill] sm:$0xff] %v10779_v42  ;;  %v10785_v1 = vld [vmem:[%s13075_s8 + $0xa8] sm:$0xff]   ;;  %v10791_v2 = vld [vmem:[%s13075_s8 + $0x60] sm:$0xff]  }
0x136c   : > { %7915 = vmatpush3.bf16.msra.mxu1 %v10715_v13  ;;  %13359 = vst [vmem:[#allocation41_spill] sm:$0xff] %v10785_v1  ;;  %13360 = vst [vmem:[#allocation42_spill] sm:$0xff] %v10791_v2 }
0x136d   : > { %2965 = vmatprep.mubr.bf16.mxu0 %v2932_v47  ;;  %7916 = vmatprep.subr.bf16.mxu1 %v13257_v32  ;;  %v10798_v47 = vld [vmem:[%s13075_s8 + $0x20] sm:$0xff]  }
0x136e   : > { %2966 = vmatmul.mubr.bf16.vlgmr.msra.gmra.mrb[56].mxu0 %v2927_v17  ;;  %v10766_v17 = vld [vmem:[%s13075_s8 + $0xa0] sm:$0xff]   ;;  %13361 = vst [vmem:[#allocation43_spill] sm:$0xff] %v10798_v47 }
0x136f   : > { %6882 = vmatpush3.bf16.msra.mxu0 %v10722_v12  ;;  %13356 = vst [vmem:[#allocation38_spill] sm:$0xff] %v10766_v17 }
0x1370   : > { %7917 = vmatpush3.bf16.msra.mxu1 %v10728_v14  ;;  %6883 = vmatprep.subr.bf16.mxu0 %v10734_v43 }
0x1371   : > { %7918 = vmatprep.subr.bf16.mxu1 %v13257_v32 }
0x1373   : > { %6884 = vmatpush3.bf16.msra.mxu0 %v10741_v57 }
0x1374   : > { %7919 = vmatpush3.bf16.msra.mxu1 %v10747_v4  ;;  %6885 = vmatprep.subr.bf16.mxu0 %v10753_v51 }
0x1375   : > { %7920 = vmatprep.subr.bf16.mxu1 %v13257_v32 }
0x1377   : > { %6886 = vmatpush3.bf16.msra.mxu0 %v10760_v40 }
0x1378   : > { %7921 = vmatpush3.bf16.msra.mxu1 %v10766_v17  ;;  %6887 = vmatprep.subr.bf16.mxu0 %v10772_v45 }
0x1379   : > { %7922 = vmatprep.subr.bf16.mxu1 %v13257_v32 }
0x137b   : > { %6888 = vmatpush3.bf16.msra.mxu0 %v10779_v42  ;;  %v10854_v42 = vld [vmem:[%s13076_s9 + $0x40] sm:$0xff]  }
0x137c   : > { %7923 = vmatpush3.bf16.msra.mxu1 %v10785_v1  ;;  %6889 = vmatprep.subr.bf16.mxu0 %v10791_v2  ;;  %v10804_v1 = vld [vmem:[%s13075_s8 + $0xb0] sm:$0xff]   ;;  %v10810_v2 = vld [vmem:[%s13075_s8 + $0x68] sm:$0xff]   ;;  %13370 = vst [vmem:[#allocation52_spill] sm:$0xff] %v10854_v42 }
0x137d   : > { %7924 = vmatprep.subr.bf16.mxu1 %v13257_v32  ;;  %13362 = vst [vmem:[#allocation44_spill] sm:$0xff] %v10804_v1  ;;  %13363 = vst [vmem:[#allocation45_spill] sm:$0xff] %v10810_v2 }
0x137f   : > { %6890 = vmatpush3.bf16.msra.mxu0 %v10798_v47  ;;  %v10817_v47 = vld [vmem:[%s13075_s8 + $0x28] sm:$0xff]  }
0x1380   : > { %7925 = vmatpush3.bf16.msra.mxu1 %v10804_v1  ;;  %6891 = vmatprep.subr.bf16.mxu0 %v10810_v2  ;;  %13364 = vst [vmem:[#allocation46_spill] sm:$0xff] %v10817_v47  ;;  %v10823_v1 = vld [vmem:[%s13075_s8 + $0xb8] sm:$0xff]   ;;  %v10829_v2 = vld [vmem:[%s13075_s8 + $0x70] sm:$0xff]  }
0x1381   : > { %7926 = vmatprep.subr.bf16.mxu1 %v13257_v32  ;;  %13365 = vst [vmem:[#allocation47_spill] sm:$0xff] %v10823_v1  ;;  %13366 = vst [vmem:[#allocation48_spill] sm:$0xff] %v10829_v2 }
0x1383   : > { %6892 = vmatpush3.bf16.msra.mxu0 %v10817_v47  ;;  %v10836_v47 = vld [vmem:[%s13075_s8 + $0x30] sm:$0xff]  }
0x1384   : > { %7927 = vmatpush3.bf16.msra.mxu1 %v10823_v1  ;;  %6893 = vmatprep.subr.bf16.mxu0 %v10829_v2  ;;  %13367 = vst [vmem:[#allocation49_spill] sm:$0xff] %v10836_v47  ;;  %v10842_v1 = vld [vmem:[%s13075_s8 + $0x78] sm:$0xff]  }
0x1385   : > { %7932 = vmatprep.subr.bf16.mxu1 %v13257_v32  ;;  %13368 = vst [vmem:[#allocation50_spill] sm:$0xff] %v10842_v1  ;;  %v10848_v2 = vld [vmem:[%s13075_s8 + $0x38] sm:$0xff]  }
0x1386   : > { %13369 = vst [vmem:[#allocation51_spill] sm:$0xff] %v10848_v2 }
0x1387   : > { %6894 = vmatpush3.bf16.msra.mxu0 %v10836_v47 }
0x1388   : > { %6895 = vmatprep.subr.bf16.mxu0 %v10842_v1 }
0x138b   : > { %6896 = vmatpush3.bf16.msra.mxu0 %v10848_v2  ;;  %v10858_v2 = vld [vmem:[%s9203_s17] sm:$0xff] }
0x138c   : > { %6912 = vmatprep.subr.bf16.mxu0 %v10854_v42 }
0x143a   : > { %v3008_v47 = vpop.f32.mrb[56].mxu1 }
0x143b   : > { %v7910_v45 = vpop.f32.mrb[57].mxu1 }
0x143c   : > { %v3011_v17 = vpop.f32.mrb[58].mxu1 }
0x143d   : > { %v7911_v1 = vpop.f32.mrb[59].mxu1 }
0x1441   : > { %v6866_v40 = vpop.f32.mrb[56].mxu0 }
0x1442   : > { %v6867_v51 = vpop.f32.mrb[57].mxu0 }
0x1443   : > { %v6868_v4 = vadd.f32 %v6867_v51, %v6866_v40  ;;  %v6869_v57 = vpop.f32.mrb[58].mxu0 }
0x1444   : > { %v6870_v43 = vpop.f32.mrb[59].mxu0 }
0x1445   : > { %v3009_v14 = vadd.f32 %v6868_v4, %v3008_v47  ;;  %v6871_v12 = vadd.f32 %v6870_v43, %v6869_v57  ;;  %v10870_v43 = vld [vmem:[%s13076_s9 + $0x80] sm:$0xff]   ;;  %v10893_v4 = vld [vmem:[%s13076_s9 + $0x48] sm:$0xff]  }
0x1446   : > { %v10886_v57 = vld [vmem:[%s13076_s9] sm:$0xff]  }
0x1447   : > { %v3015_v13 = vmul.f32 %v10858_v2, %v3009_v14  ;;  %v3012_v37 = vadd.f32 %v6871_v12, %v3011_v17  ;;  %v10879_v14 = vld [vmem:[%s13076_s9 + $0x88] sm:$0xff]  }
0x1448   : > { %v10900_v17 = vld [vmem:[%s13076_s9 + $0x8] sm:$0xff]  }
0x1449   : > { %v3016_v42 = vmul.f32 %v10862_v46, %v3012_v37  ;;  %v3017_v45 = vmul.f32 %v10858_v2, %v3015_v13 }
0x144b   : > { %v3018_v1 = vmul.f32 %v10862_v46, %v3016_v42 }
0x144d   : > { %v3019_v56 = vpack.c.bf16 %v3018_v1, %v3017_v45 }
0x144f   : > { %7929 = vmatmul.mubr.bf16.vlgmr.msra.gmra.mrb[60].mxu1 %v3019_v56  ;;  %v3020_v51 = vunpack.c.l.bf16 %v3019_v56  ;;  %v3021_v40 = vunpack.c.h.bf16 %v3019_v56 }
0x1450   : > { %7933 = vmatpush3.bf16.msra.mxu1 %v10870_v43  ;;  %7948 = vmatprep.mubr.msk.bf16.mxu1 %vm9040_vm0, %v13257_v32 }
0x1451   : > { %7934 = vmatprep.subr.bf16.mxu1 %v13257_v32  ;;  %v3022_v37 = vsub.f32 %v3017_v45, %v3020_v51  ;;  %v3023_v13 = vsub.f32 %v3018_v1, %v3021_v40 }
0x1453   : > { %v3024_v12 = vpack.c.bf16 %v3023_v13, %v3022_v37 }
0x1454   : > { %7935 = vmatpush3.bf16.msra.mxu1 %v10879_v14 }
0x1455   : > { %3057 = vmatprep.mubr.bf16.mxu0 %v3024_v12  ;;  %7936 = vmatprep.subr.bf16.mxu1 %v13257_v32 }
0x1456   : > { %3058 = vmatmul.mubr.bf16.vlgmr.msra.gmra.mrb[60].mxu0 %v3019_v56 }
0x1457   : > { %6913 = vmatpush3.bf16.msra.mxu0 %v10886_v57  ;;  %3139 = vmatprep.mubr.bf16.mxu0 %v3024_v12 }
0x1458   : > { %7937 = vmatpush3.bf16.msra.mxu1 %v10169_v30  ;;  %6914 = vmatprep.subr.bf16.mxu0 %v10893_v4  ;;  %v10907_v30 = vld [vmem:[%s13076_s9 + $0x50] sm:$0xff]  }
0x1459   : > { %7938 = vmatprep.subr.bf16.mxu1 %v13257_v32 }
0x145b   : > { %6915 = vmatpush3.bf16.msra.mxu0 %v10900_v17 }
0x145c   : > { %7939 = vmatpush3.bf16.msra.mxu1 %v10178_v22  ;;  %6916 = vmatprep.subr.bf16.mxu0 %v10907_v30  ;;  %v13371_v22 = vld [vmem:[#allocation17_spill] sm:$0xff] }
0x145d   : > { %7940 = vmatprep.subr.bf16.mxu1 %v13257_v32 }
0x145f   : > { %6917 = vmatpush3.bf16.msra.mxu0 %v10186_v31 }
0x1460   : > { %7941 = vmatpush3.bf16.msra.mxu1 %v10192_v23  ;;  %6918 = vmatprep.subr.bf16.mxu0 %v10198_v5 }
0x1461   : > { %7942 = vmatprep.subr.bf16.mxu1 %v13257_v32 }
0x1463   : > { %6919 = vmatpush3.bf16.msra.mxu0 %v10205_v10 }
0x1464   : > { %7943 = vmatpush3.bf16.msra.mxu1 %v10211_v44  ;;  %6920 = vmatprep.subr.bf16.mxu0 %v10217_v6 }
0x1465   : > { %7944 = vmatprep.subr.bf16.mxu1 %v13257_v32 }
0x1467   : > { %6921 = vmatpush3.bf16.msra.mxu0 %v10224_v8 }
0x1468   : > { %7945 = vmatpush3.bf16.msra.mxu1 %v10230_v15  ;;  %6922 = vmatprep.subr.bf16.mxu0 %v10236_v19 }
0x1469   : > { %7946 = vmatprep.subr.bf16.mxu1 %v13257_v32 }
0x146b   : > { %6923 = vmatpush3.bf16.msra.mxu0 %v10243_v21 }
0x146c   : > { %7947 = vmatpush3.bf16.msra.mxu1 %v10249_v16  ;;  %6924 = vmatprep.subr.bf16.mxu0 %v10255_v20 }
0x146d   : > { %7968 = vmatprep.subr.bf16.mxu1 %v13257_v32 }
0x146f   : > { %6925 = vmatpush3.bf16.msra.mxu0 %v10262_v25  ;;  %7949 = vmatmul.mubr.bf16.vlgmr.msra.gmra.mrb[64].mxu1 %v3019_v56 }
0x1470   : > { %6926 = vmatprep.subr.bf16.mxu0 %v10269_v27  ;;  %7969 = vmatpush3.bf16.msra.mxu1 %v10275_v28 }
0x1471   : > { %7970 = vmatprep.subr.bf16.mxu1 %v13257_v32  ;;  %7984 = vmatprep.mubr.msk.bf16.mxu1 %vm9040_vm0, %v13257_v32 }
0x1473   : > { %6927 = vmatpush3.bf16.msra.mxu0 %v10284_v50 }
0x1474   : > { %7971 = vmatpush3.bf16.msra.mxu1 %v10290_v52 }
0x1475   : > { %7972 = vmatprep.subr.bf16.mxu1 %v13257_v32 }
0x1476   : > { %3140 = vmatmul.mubr.bf16.vlgmr.msra.gmra.mrb[64].mxu0 %v3019_v56 }
0x1477   : > { %7964 = vmatprep.mubr.msk.bf16.mxu0 %vm1148_vm1, %v10298_v53 }
0x1478   : > { %7973 = vmatpush3.bf16.msra.mxu1 %v10305_v35 }
0x1479   : > { %7974 = vmatprep.subr.bf16.mxu1 %v13257_v32 }
0x147c   : > { %7975 = vmatpush3.bf16.msra.mxu1 %v10312_v62 }
0x147d   : > { %7976 = vmatprep.subr.bf16.mxu1 %v13257_v32 }
0x1480   : > { %7977 = vmatpush3.bf16.msra.mxu1 %v10319_v38 }
0x1481   : > { %7978 = vmatprep.subr.bf16.mxu1 %v13257_v32 }
0x1484   : > { %7979 = vmatpush3.bf16.msra.mxu1 %v10326_v63 }
0x1485   : > { %7980 = vmatprep.subr.bf16.mxu1 %v13257_v32 }
0x1488   : > { %7981 = vmatpush3.bf16.msra.mxu1 %v10333_v39 }
0x1489   : > { %7982 = vmatprep.subr.bf16.mxu1 %v13257_v32 }
0x148c   : > { %7983 = vmatpush3.bf16.msra.mxu1 %v13371_v22 }
0x1522   : > { %v3100_v31 = vpop.f32.mrb[60].mxu1 }
0x1523   : > { %v7930_v23 = vpop.f32.mrb[61].mxu1 }
0x1524   : > { %v3103_v5 = vpop.f32.mrb[62].mxu1 }
0x1525   : > { %v7931_v10 = vpop.f32.mrb[63].mxu1 }
0x1526   : > { %v10955_v10 = vld [vmem:[%s13077_s10] sm:$0xff]  }
0x1529   : > { %v6897_v44 = vpop.f32.mrb[60].mxu0 }
0x152a   : > { %v6898_v6 = vpop.f32.mrb[61].mxu0 }
0x152b   : > { %v6899_v8 = vadd.f32 %v6898_v6, %v6897_v44  ;;  %v6900_v15 = vpop.f32.mrb[62].mxu0  ;;  %v10964_v44 = vld [vmem:[%s13077_s10 + $0x8] sm:$0xff]   ;;  %v10971_v6 = vld [vmem:[%s13077_s10 + $0x10] sm:$0xff]  }
0x152c   : > { %v6901_v19 = vpop.f32.mrb[63].mxu0 }
0x152d   : > { %v3101_v21 = vadd.f32 %v6899_v8, %v3100_v31  ;;  %v6902_v16 = vadd.f32 %v6901_v19, %v6900_v15  ;;  %v10978_v8 = vld [vmem:[%s13077_s10 + $0x18] sm:$0xff]   ;;  %v10985_v15 = vld [vmem:[%s13077_s10 + $0x20] sm:$0xff]   ;;  %v10992_v19 = vld [vmem:[%s13077_s10 + $0x28] sm:$0xff]  }
0x152f   : > { %v3104_v20 = vadd.f32 %v6902_v16, %v3103_v5  ;;  %v13372_v5 = vld [vmem:[#allocation18_spill] sm:$0xff] }
0x1530   : > { %v11006_v16 = vld [vmem:[%s13077_s10 + $0x38] sm:$0xff]  }
0x1531   : > { %v3189_v25 = vpack.c.bf16 %v3104_v20, %v3101_v21 }
0x1533   : > { %v3192_v27 = vunpack.c.h.bf16 %v3189_v25  ;;  %7952 = vmatprep.subr.bf16.mxu0 %v3189_v25  ;;  %v3191_v28 = vunpack.c.l.bf16 %v3189_v25 }
0x1534   : > { %7953 = vmatpush3.bf16.msra.mxu0 %v3189_v25 }
0x1535   : > { %v3196_v50 = vsub.f32 %v3104_v20, %v3192_v27  ;;  %v3195_v52 = vsub.f32 %v3101_v21, %v3191_v28  ;;  %v10999_v21 = vld [vmem:[%s13077_s10 + $0x30] sm:$0xff]   ;;  %v13373_v20 = vld [vmem:[#allocation3_spill] sm:$0xff] }
0x1537   : > { %v3199_v53 = vpack.c.bf16 %v3196_v50, %v3195_v52 }
0x1542   : > { %v3182_v35 = vpop.f32.mrb[64].mxu1 }
0x1543   : > { %v7950_v62 = vpop.f32.mrb[65].mxu1 }
0x1544   : > { %v3185_v38 = vpop.f32.mrb[66].mxu1 }
0x1545   : > { %v7951_v63 = vpop.f32.mrb[67].mxu1 }
0x1549   : > { %v6928_v39 = vpop.f32.mrb[64].mxu0 }
0x154a   : > { %v6929_v56 = vpop.f32.mrb[65].mxu0 }
0x154b   : > { %v6930_v42 = vadd.f32 %v6929_v56, %v6928_v39  ;;  %v6931_v47 = vpop.f32.mrb[66].mxu0 }
0x154c   : > { %v6932_v45 = vpop.f32.mrb[67].mxu0 }
0x154d   : > { %v3183_v1 = vadd.f32 %v6930_v42, %v3182_v35  ;;  %v6933_v51 = vadd.f32 %v6932_v45, %v6931_v47 }
0x154f   : > { %v3186_v40 = vadd.f32 %v6933_v51, %v3185_v38 }
0x1551   : > { %v3190_v37 = vpack.c.bf16 %v3186_v40, %v3183_v1 }
0x1553   : > { %v3194_v13 = vunpack.c.h.bf16 %v3190_v37  ;;  %7954 = vmatprep.subr.bf16.mxu0 %v3190_v37  ;;  %v3193_v12 = vunpack.c.l.bf16 %v3190_v37 }
0x1554   : > { %7955 = vmatpush3.bf16.msra.mxu0 %v3190_v37 }
0x1555   : > { %v3198_v22 = vsub.f32 %v3186_v40, %v3194_v13  ;;  %7956 = vmatprep.subr.bf16.mxu0 %v3199_v53  ;;  %v3197_v31 = vsub.f32 %v3183_v1, %v3193_v12 }
0x1557   : > { %v3200_v23 = vpack.c.bf16 %v3198_v22, %v3197_v31 }
0x1558   : > { %7957 = vmatpush3.bf16.msra.mxu0 %v3199_v53 }
0x1559   : > { %7958 = vmatprep.subr.bf16.mxu0 %v3200_v23 }
0x155c   : > { %7959 = vmatpush3.bf16.msra.mxu0 %v3200_v23 }
0x155d   : > { %7960 = vmatprep.subr.bf16.mxu0 %v3189_v25 }
0x1560   : > { %7961 = vmatpush3.bf16.msra.mxu0 %v3189_v25 }
0x1561   : > { %7962 = vmatprep.subr.bf16.mxu0 %v3190_v37 }
0x1564   : > { %7963 = vmatpush3.bf16.msra.mxu0 %v3190_v37 }
0x1565   : > { %7988 = vmatprep.subr.bf16.mxu0 %v13257_v32 }
0x1567   : > { %7965 = vmatmul.mubr.msk.bf16.vlgmr.msra.gmra.mrb[68].mxu0 %vm1148_vm1, %v13372_v5 }
0x1568   : > { %7989 = vmatpush3.bf16.msra.mxu0 %v10955_v10  ;;  %8004 = vmatprep.mubr.msk.bf16.mxu0 %vm9040_vm0, %v13257_v32 }
0x1569   : > { %7990 = vmatprep.subr.bf16.mxu0 %v13257_v32 }
0x156c   : > { %7991 = vmatpush3.bf16.msra.mxu0 %v10964_v44 }
0x156d   : > { %7992 = vmatprep.subr.bf16.mxu0 %v13257_v32 }
0x1570   : > { %7993 = vmatpush3.bf16.msra.mxu0 %v10971_v6 }
0x1571   : > { %7994 = vmatprep.subr.bf16.mxu0 %v13257_v32 }
0x1574   : > { %7995 = vmatpush3.bf16.msra.mxu0 %v10978_v8 }
0x1575   : > { %7996 = vmatprep.subr.bf16.mxu0 %v13257_v32 }
0x1578   : > { %7997 = vmatpush3.bf16.msra.mxu0 %v10985_v15 }
0x1579   : > { %7998 = vmatprep.subr.bf16.mxu0 %v13257_v32 }
0x157c   : > { %7999 = vmatpush3.bf16.msra.mxu0 %v10992_v19 }
0x157d   : > { %8000 = vmatprep.subr.bf16.mxu0 %v13257_v32 }
0x1580   : > { %8001 = vmatpush3.bf16.msra.mxu0 %v10999_v21 }
0x1581   : > { %8002 = vmatprep.subr.bf16.mxu0 %v13257_v32 }
0x1584   : > { %8003 = vmatpush3.bf16.msra.mxu0 %v11006_v16 }
0x1585   : > { %6977 = vmatprep.subr.bf16.mxu0 %v13373_v20 }
0x163a   : > { %v7966_v25 = vpop.f32.mrb[68].mxu0 }
0x163b   : > { %v3252_v27 = vmul.f32 %v10375_v61, %v7966_v25  ;;  %v3269_v28 = vmul.f32 %v10379_v18, %v7966_v25  ;;  %v3235_v50 = vpop.f32.mrb[69].mxu0 }
0x163c   : > { %v3250_v52 = vmul.f32 %v10379_v18, %v3235_v50  ;;  %v3271_v53 = vmul.f32 %v10375_v61, %v3235_v50  ;;  %v7967_v35 = vpop.f32.mrb[70].mxu0  ;;  %v13375_v50 = vld [vmem:[#allocation4_spill] sm:$0xff] }
0x163d   : > { %v3253_v62 = vmul.f32 %v10385_v7, %v7967_v35  ;;  %v3270_v38 = vmul.f32 %v10389_v9, %v7967_v35  ;;  %v3238_v63 = vpop.f32.mrb[71].mxu0  ;;  %v13378_v35 = vld [vmem:[#allocation8_spill] sm:$0xff] }
0x163e   : > { %v3254_v39 = vadd.f32 %v3252_v27, %v3250_v52  ;;  %v3273_v56 = vsub.f32 %v3269_v28, %v3271_v53  ;;  %v3251_v42 = vmul.f32 %v10389_v9, %v3238_v63  ;;  %v3272_v47 = vmul.f32 %v10385_v7, %v3238_v63  ;;  %v13374_v28 = vld [vmem:[#allocation5_spill] sm:$0xff]  ;;  %v13376_v52 = vld [vmem:[#allocation6_spill] sm:$0xff]  ;;  %v13377_v53 = vld [vmem:[#allocation7_spill] sm:$0xff] }
0x163f   : > { %v13381_v63 = vld [vmem:[#allocation11_spill] sm:$0xff] }
0x1640   : > { %v3255_v45 = vadd.f32 %v3253_v62, %v3251_v42  ;;  %v3274_v1 = vsub.f32 %v3270_v38, %v3272_v47  ;;  %v13379_v62 = vld [vmem:[#allocation9_spill] sm:$0xff]  ;;  %v13380_v38 = vld [vmem:[#allocation10_spill] sm:$0xff]  ;;  %v13387_v42 = vld [vmem:[#allocation20_spill] sm:$0xff] }
0x1641   : > { %v13388_v47 = vld [vmem:[#allocation16_spill] sm:$0xff] }
0x1642   : > { %v3256_v51 = vpack.c.bf16 %v3255_v45, %v3254_v39  ;;  %v3275_v40 = vpack.c.bf16 %v3274_v1, %v3273_v56 }
0x1644   : > { %v3258_v37 = vunpack.c.h.bf16 %v3256_v51  ;;  %v3277_v18 = vunpack.c.h.bf16 %v3275_v40  ;;  %v3276_v13 = vunpack.c.l.bf16 %v3275_v40  ;;  %v3257_v61 = vunpack.c.l.bf16 %v3256_v51 }
0x1646   : > { %v3260_v12 = vsub.f32 %v3255_v45, %v3258_v37  ;;  %v3279_v22 = vsub.f32 %v3274_v1, %v3277_v18  ;;  %v3278_v31 = vsub.f32 %v3273_v56, %v3276_v13  ;;  %v3259_v23 = vsub.f32 %v3254_v39, %v3257_v61  ;;  %v13385_v39 = vld [vmem:[#allocation15_spill] sm:$0xff] }
0x1647   : > { %v13386_v56 = vld [vmem:[#allocation19_spill] sm:$0xff]  ;;  %v3288_v45 = vmul.f32 %v10572_v49, %v13388_v47  ;;  %v3331_v1 = vmul.f32 %v10584_v36, %v13388_v47 }
0x1648   : > { %v3280_v5 = vpack.c.bf16 %v3279_v22, %v3278_v31  ;;  %v3261_v20 = vpack.c.bf16 %v3260_v12, %v3259_v23  ;;  %v3289_v12 = vmul.f32 %v10575_v59, %v13388_v47  ;;  %v3332_v22 = vmul.f32 %v10587_v54, %v13388_v47 }
0x164a   : > { %3282 = vrot.lane.b32.xlu0 %v3280_v5, %s9041_s20  ;;  %3263 = vrot.lane.b32.xlu1 %v3261_v20, %s9041_s20 }
0x16bc   : > { %v3283_v9 = vpop.permute.xlu0 %3282  ;;  %v3264_v7 = vpop.permute.xlu1 %3263 }
0x16bd   : > { %v3286_v25 = vsel %vm1219_vm2, %v3275_v40, %v3283_v9  ;;  %v3267_v27 = vsel %vm1219_vm2, %v3256_v51, %v3264_v7 }
0x16be   : > { %7985 = vmatmul.mubr.bf16.vlgmr.msra.gmra.mrb[68].mxu1 %v3267_v27  ;;  %8005 = vmatmul.mubr.bf16.vlgmr.msra.gmra.mrb[72].mxu0 %v3286_v25 }
0x16bf   : > { %8020 = vmatprep.mubr.msk.bf16.mxu1 %vm1148_vm1, %v10411_v26  ;;  %6978 = vmatpush3.bf16.msra.mxu0 %v10418_v41  ;;  %v13382_v26 = vld [vmem:[#allocation12_spill] sm:$0xff]  ;;  %v13383_v41 = vld [vmem:[#allocation13_spill] sm:$0xff] }
0x16c0   : > { %6979 = vmatprep.subr.bf16.mxu0 %v10424_v55  ;;  %v13384_v55 = vld [vmem:[#allocation14_spill] sm:$0xff] }
0x16c3   : > { %6980 = vmatpush3.bf16.msra.mxu0 %v13374_v28 }
0x16c4   : > { %6981 = vmatprep.subr.bf16.mxu0 %v13375_v50 }
0x16c7   : > { %6982 = vmatpush3.bf16.msra.mxu0 %v13376_v52 }
0x16c8   : > { %6983 = vmatprep.subr.bf16.mxu0 %v13377_v53 }
0x16cb   : > { %6984 = vmatpush3.bf16.msra.mxu0 %v13378_v35 }
0x16cc   : > { %6985 = vmatprep.subr.bf16.mxu0 %v13379_v62 }
0x16cf   : > { %6986 = vmatpush3.bf16.msra.mxu0 %v13380_v38 }
0x16d0   : > { %6987 = vmatprep.subr.bf16.mxu0 %v13381_v63 }
0x16d3   : > { %6988 = vmatpush3.bf16.msra.mxu0 %v13382_v26 }
0x16d4   : > { %6989 = vmatprep.subr.bf16.mxu0 %v13383_v41 }
0x16d7   : > { %6990 = vmatpush3.bf16.msra.mxu0 %v13384_v55 }
0x16d8   : > { %6991 = vmatprep.subr.bf16.mxu0 %v13385_v39 }
0x16db   : > { %6992 = vmatpush3.bf16.msra.mxu0 %v13386_v56 }
0x16dc   : > { %7008 = vmatprep.subr.bf16.mxu0 %v13387_v42 }
0x1791   : > { %v3324_v51 = vpop.f32.mrb[68].mxu1  ;;  %v3367_v40 = vpop.f32.mrb[72].mxu0 }
0x1792   : > { %v3325_v37 = vadd.f32 %v3324_v51, %v3288_v45  ;;  %v3368_v18 = vadd.f32 %v3367_v40, %v3331_v1  ;;  %v7986_v13 = vpop.f32.mrb[69].mxu1  ;;  %v8006_v61 = vpop.f32.mrb[73].mxu0 }
0x1793   : > { %v3327_v31 = vpop.f32.mrb[70].mxu1  ;;  %v3370_v23 = vpop.f32.mrb[74].mxu0 }
0x1794   : > { %v3374_v5 = vmul.f32 %v3325_v37, %v10572_v49  ;;  %v3376_v20 = vmul.f32 %v3368_v18, %v10584_v36  ;;  %v3328_v9 = vadd.f32 %v3327_v31, %v3289_v12  ;;  %v3371_v7 = vadd.f32 %v3370_v23, %v3332_v22  ;;  %v7987_v25 = vpop.f32.mrb[71].mxu1  ;;  %v8007_v27 = vpop.f32.mrb[75].mxu0 }
0x1796   : > { %v3375_v28 = vmul.f32 %v3328_v9, %v10575_v59  ;;  %v3377_v50 = vmul.f32 %v3371_v7, %v10587_v54  ;;  %v3378_v52 = vadd.f32 %v3376_v20, %v3374_v5 }
0x1798   : > { %v3379_v53 = vadd.f32 %v3377_v50, %v3375_v28  ;;  %v3380_v35 = vsel %vm1393_vm3, %v3378_v52, 0.0  ;;  %v13389_v28 = vld [vmem:[#allocation21_spill] sm:$0xff]  ;;  %v13392_v52 = vld [vmem:[#allocation24_spill] sm:$0xff] }
0x179a   : > { %v3381_v62 = vsel %vm1393_vm3, %v3379_v53, 0.0 }
0x179b   : > { %v3382_v38 = vadd.f32 %v3381_v62, %v3380_v35  ;;  %v13393_v35 = vld [vmem:[#allocation25_spill] sm:$0xff] }
0x179d   : > { %3383 = vadd.xlane.f32.xlu1 %v3382_v38 }
0x182a   : > { %v3384_v63 = vpop.xlane.xlu1 %3383 }
0x182b   : > { %v3385_v26 = vrot.slane %v3384_v63, 4 }
0x182d   : > { %v3386_v41 = vadd.f32 %v3385_v26, %v3384_v63 }
0x182f   : > { %v3387_v55 = vrot.slane %v3386_v41, 2 }
0x1831   : > { %v3388_v39 = vadd.f32 %v3387_v55, %v3386_v41 }
0x1833   : > { %v3389_v56 = vrot.slane %v3388_v39, 1 }
0x1835   : > { %v3390_v42 = vadd.f32 %v3389_v56, %v3388_v39 }
0x1837   : > { %8578 = vpush %v3390_v42 }
0x1868   : > { %s8579_s28 = spop %8578 }
0x1869   : > { %v3392_v45 = vstv %s8579_s28 }
0x186a   : > { %v3393_v1 = vadd.f32 1e-30, %v3392_v45 }
0x186c   : > { %8698 = vrcp.f32 %v3393_v1 }
0x1876   : > { %v8699_v51 = vpop.eup %8698 }
0x1877   : > { %v3395_v40 = vmul.f32 %v8699_v51, %v10566_v58 }
0x1879   : > { %v3404_v13 = vmul.f32 %v3395_v40, %v3325_v37  ;;  %v3405_v61 = vmul.f32 %v3395_v40, %v3328_v9  ;;  %v3408_v12 = vmul.f32 %v3395_v40, %v3368_v18  ;;  %v3409_v22 = vmul.f32 %v3395_v40, %v3371_v7  ;;  %v13390_v37 = vld [vmem:[#allocation22_spill] sm:$0xff]  ;;  %v13391_v9 = vld [vmem:[#allocation23_spill] sm:$0xff] }
0x187a   : > { %v3400_v31 = vmul.f32 %v3395_v40, %v10584_v36  ;;  %v3397_v23 = vmul.f32 %v3395_v40, %v10575_v59  ;;  %v3401_v5 = vmul.f32 %v3395_v40, %v10587_v54  ;;  %v3396_v20 = vmul.f32 %v3395_v40, %v10572_v49 }
0x187b   : > { %v11060_v25 = vsub.f32 %v10533_v33, %v3404_v13  ;;  %v11063_v27 = vsub.f32 %v10536_v3, %v3405_v61  ;;  %v11066_v50 = vsub.f32 %v13389_v28, %v3408_v12  ;;  %v11069_v18 = vsub.f32 %v13390_v37, %v3409_v22  ;;  %v13395_v33 = vld [vmem:[#allocation26_spill] sm:$0xff] }
0x187c   : > { %v11072_v7 = vadd.f32 %v3400_v31, %v13391_v9  ;;  %v11075_v53 = vadd.f32 %v3397_v23, %v13392_v52  ;;  %v11078_v62 = vadd.f32 %v3401_v5, %v13393_v35  ;;  %v11081_v38 = vadd.f32 %v3396_v20, %v13395_v33 }
0x187d   : > { %v3412_v3 = vmul.f32 %v11060_v25, %v11060_v25  ;;  %v3413_v63 = vmul.f32 %v11063_v27, %v11063_v27  ;;  %v3414_v26 = vmul.f32 %v11066_v50, %v11066_v50  ;;  %v3415_v41 = vmul.f32 %v11069_v18, %v11069_v18 }
0x187e   : > { %13394 = vst [vmem:[#allocation17_spill] sm:$0xff] %v11078_v62  ;;  %13396 = vst [vmem:[#allocation18_spill] sm:$0xff] %v11081_v38  ;;  %v3431_v31 = vadd.f32 1e-30, %v10566_v58 }
0x187f   : > { %v3416_v55 = vadd.f32 %v3414_v26, %v3412_v3  ;;  %v3417_v39 = vadd.f32 %v3415_v41, %v3413_v63 }
0x1880   : > { %8700 = vrcp.f32 %v3431_v31 }
0x1881   : > { %v3418_v56 = vsel %vm1393_vm3, %v3416_v55, 0.0  ;;  %v3419_v42 = vsel %vm1393_vm3, %v3417_v39, 0.0 }
0x1882   : > { %v3420_v45 = vadd.f32 %v3419_v42, %v3418_v56 }
0x1884   : > { %3421 = vadd.xlane.f32.xlu0 %v3420_v45 }
0x188a   : > { %v8701_v23 = vpop.eup %8700 }
0x1911   : > { %v3422_v1 = vpop.xlane.xlu0 %3421 }
0x1912   : > { %v3423_v51 = vrot.slane %v3422_v1, 4 }
0x1914   : > { %v3424_v40 = vadd.f32 %v3423_v51, %v3422_v1 }
0x1916   : > { %v3425_v13 = vrot.slane %v3424_v40, 2 }
0x1918   : > { %v3426_v61 = vadd.f32 %v3425_v13, %v3424_v40 }
0x191a   : > { %v3427_v12 = vrot.slane %v3426_v61, 1 }
0x191c   : > { %v3428_v22 = vadd.f32 %v3427_v12, %v3426_v61 }
0x191e   : > { %8580 = vpush %v3428_v22 }
0x194f   : > { %s8581_s29 = spop %8580 }
0x1950   : > { %v11094_v5 = vstv %s8581_s29 }
0x1951   : > { %v3433_v20 = vmul.f32 %v8701_v23, %v11094_v5  ;;  %v11152_v23 = vld [vmem:[%s9456_s24] sm:$0xff] }
0x1953   : > { %v3434_v28 = vmul.f32 %v3433_v20, %v10572_v49  ;;  %v3435_v37 = vmul.f32 %v3433_v20, %v10575_v59  ;;  %v3438_v35 = vmul.f32 %v3433_v20, %v10584_v36  ;;  %v3439_v58 = vmul.f32 %v3433_v20, %v10587_v54 }
0x1955   : > { %v11100_v9 = vadd.f32 %v3434_v28, %v11060_v25  ;;  %v11103_v52 = vadd.f32 %v3435_v37, %v11063_v27  ;;  %v11112_v49 = vadd.f32 %v3438_v35, %v11066_v50  ;;  %v11115_v59 = vadd.f32 %v3439_v58, %v11069_v18  ;;  %v11156_v28 = vld [vmem:[%s9462_s19] sm:$0xff] }
0x1957   : > { %3446 = vrot.lane.b32.xlu1 %v11103_v52, %s9042_s21  ;;  %3444 = vrot.lane.b32.xlu0 %v11100_v9, %s9042_s21 }
0x195b   : > { %3470 = vrot.lane.b32.xlu1 %v11112_v49, %s9042_s21  ;;  %3472 = vrot.lane.b32.xlu0 %v11115_v59, %s9042_s21 }
0x195f   : > { %3450 = vrot.lane.b32.xlu1 %v11100_v9, %s9043_s22  ;;  %3452 = vrot.lane.b32.xlu0 %v11103_v52, %s9043_s22 }
0x1963   : > { %3476 = vrot.lane.b32.xlu1 %v11112_v49, %s9043_s22  ;;  %3478 = vrot.lane.b32.xlu0 %v11115_v59, %s9043_s22 }
0x1967   : > { %3456 = vrot.lane.b32.xlu1 %v11100_v9, %s9044_s25  ;;  %3458 = vrot.lane.b32.xlu0 %v11103_v52, %s9044_s25 }
0x196b   : > { %3482 = vrot.lane.b32.xlu1 %v11112_v49, %s9044_s25  ;;  %3484 = vrot.lane.b32.xlu0 %v11115_v59, %s9044_s25 }
0x19c9   : > { %v3447_v36 = vpop.permute.xlu1 %3446  ;;  %v3445_v54 = vpop.permute.xlu0 %3444 }
0x19ca   : > { %v3462_v39 = vsel %vm1393_vm3, %v11100_v9, %v3445_v54  ;;  %v3463_v56 = vsel %vm1393_vm3, %v11103_v52, %v3447_v36  ;;  %v11160_v36 = vld [vmem:[%s9456_s24 + $0x8] sm:$0xff] }
0x19cd   : > { %v3471_v33 = vpop.permute.xlu1 %3470  ;;  %v3473_v3 = vpop.permute.xlu0 %3472 }
0x19ce   : > { %v3488_v61 = vsel %vm1393_vm3, %v11112_v49, %v3471_v33  ;;  %v3489_v12 = vsel %vm1393_vm3, %v11115_v59, %v3473_v3  ;;  %v11164_v33 = vld [vmem:[%s9462_s19 + $0x8] sm:$0xff] }
0x19d1   : > { %v3451_v63 = vpop.permute.xlu1 %3450  ;;  %v3453_v26 = vpop.permute.xlu0 %3452 }
0x19d2   : > { %v3464_v42 = vsel %vm1396_vm4, %v3462_v39, %v3451_v63  ;;  %v3465_v51 = vsel %vm1396_vm4, %v3463_v56, %v3453_v26 }
0x19d5   : > { %v3477_v41 = vpop.permute.xlu1 %3476  ;;  %v3479_v55 = vpop.permute.xlu0 %3478 }
0x19d6   : > { %v3490_v22 = vsel %vm1396_vm4, %v3488_v61, %v3477_v41  ;;  %v3491_v31 = vsel %vm1396_vm4, %v3489_v12, %v3479_v55 }
0x19d9   : > { %v3457_v45 = vpop.permute.xlu1 %3456  ;;  %v3459_v1 = vpop.permute.xlu0 %3458 }
0x19da   : > { %v3466_v40 = vsel %vm1399_vm5, %v3464_v42, %v3457_v45  ;;  %v3467_v13 = vsel %vm1399_vm5, %v3465_v51, %v3459_v1 }
0x19db   : > { %v3494_v20 = vmul.f32 %v11152_v23, %v3466_v40  ;;  %v3502_v37 = vmul.f32 %v11156_v28, %v3466_v40  ;;  %v3495_v54 = vmul.f32 %v11160_v36, %v3467_v13  ;;  %v3503_v3 = vmul.f32 %v11164_v33, %v3467_v13 }
0x19dd   : > { %v3483_v35 = vpop.permute.xlu1 %3482  ;;  %v3485_v58 = vpop.permute.xlu0 %3484 }
0x19de   : > { %v3492_v63 = vsel %vm1399_vm5, %v3490_v22, %v3483_v35  ;;  %v3493_v26 = vsel %vm1399_vm5, %v3491_v31, %v3485_v58 }
0x19df   : > { %v3496_v41 = vmul.f32 %v11156_v28, %v3492_v63  ;;  %v3500_v55 = vmul.f32 %v11152_v23, %v3492_v63  ;;  %v3497_v39 = vmul.f32 %v11164_v33, %v3493_v26  ;;  %v3501_v56 = vmul.f32 %v11160_v36, %v3493_v26 }
0x19e1   : > { %v3498_v42 = vsub.f32 %v3494_v20, %v3496_v41  ;;  %v3504_v45 = vadd.f32 %v3502_v37, %v3500_v55  ;;  %v3499_v1 = vsub.f32 %v3495_v54, %v3497_v39  ;;  %v3505_v51 = vadd.f32 %v3503_v3, %v3501_v56  ;;  %v13399_v41 = vld [vmem:[#allocation29_spill] sm:$0xff] }
0x19e3   : > { %v3506_v40 = vpack.c.bf16 %v3499_v1, %v3498_v42  ;;  %v3507_v61 = vpack.c.bf16 %v3505_v51, %v3504_v45 }
0x19e5   : > { %8008 = vmatprep.subr.bf16.mxu1 %v3506_v40  ;;  %v3508_v13 = vunpack.c.l.bf16 %v3506_v40  ;;  %v3509_v12 = vunpack.c.h.bf16 %v3506_v40  ;;  %v3510_v22 = vunpack.c.l.bf16 %v3507_v61  ;;  %v3511_v35 = vunpack.c.h.bf16 %v3507_v61 }
0x19e6   : > { %8009 = vmatpush3.bf16.msra.mxu1 %v3506_v40 }
0x19e7   : > { %8010 = vmatprep.subr.bf16.mxu1 %v3507_v61  ;;  %v3512_v31 = vsub.f32 %v3498_v42, %v3508_v13  ;;  %v3513_v58 = vsub.f32 %v3499_v1, %v3509_v12  ;;  %v3514_v38 = vsub.f32 %v3504_v45, %v3510_v22  ;;  %v3515_v62 = vsub.f32 %v3505_v51, %v3511_v35  ;;  %v13400_v42 = vld [vmem:[#allocation30_spill] sm:$0xff]  ;;  %v13401_v45 = vld [vmem:[#allocation31_spill] sm:$0xff]  ;;  %v13402_v1 = vld [vmem:[#allocation32_spill] sm:$0xff] }
0x19e8   : > { %v13403_v51 = vld [vmem:[#allocation33_spill] sm:$0xff]  ;;  %v13406_v13 = vld [vmem:[#allocation36_spill] sm:$0xff]  ;;  %v13408_v22 = vld [vmem:[#allocation38_spill] sm:$0xff] }
0x19e9   : > { %v3516_v63 = vpack.c.bf16 %v3513_v58, %v3512_v31  ;;  %v3517_v20 = vpack.c.bf16 %v3515_v62, %v3514_v38  ;;  %v13407_v12 = vld [vmem:[#allocation37_spill] sm:$0xff]  ;;  %v13409_v35 = vld [vmem:[#allocation39_spill] sm:$0xff]  ;;  %v13410_v31 = vld [vmem:[#allocation40_spill] sm:$0xff] }
0x19ea   : > { %8011 = vmatpush3.bf16.msra.mxu1 %v3507_v61  ;;  %v13411_v58 = vld [vmem:[#allocation41_spill] sm:$0xff] }
0x19eb   : > { %8012 = vmatprep.subr.bf16.mxu1 %v3516_v63 }
0x19ee   : > { %8013 = vmatpush3.bf16.msra.mxu1 %v3516_v63  ;;  %v13412_v63 = vld [vmem:[#allocation42_spill] sm:$0xff] }
0x19ef   : > { %8014 = vmatprep.subr.bf16.mxu1 %v3517_v20 }
0x19f2   : > { %8015 = vmatpush3.bf16.msra.mxu1 %v3517_v20  ;;  %v13413_v20 = vld [vmem:[#allocation43_spill] sm:$0xff] }
0x19f3   : > { %8016 = vmatprep.subr.bf16.mxu1 %v3506_v40 }
0x19f6   : > { %8017 = vmatpush3.bf16.msra.mxu1 %v3506_v40  ;;  %v13404_v40 = vld [vmem:[#allocation34_spill] sm:$0xff] }
0x19f7   : > { %8018 = vmatprep.subr.bf16.mxu1 %v3507_v61 }
0x19fa   : > { %8019 = vmatpush3.bf16.msra.mxu1 %v3507_v61  ;;  %v13405_v61 = vld [vmem:[#allocation35_spill] sm:$0xff] }
0x19fb   : > { %8024 = vmatprep.subr.bf16.mxu1 %v13257_v32 }
0x19fd   : > { %8021 = vmatmul.mubr.msk.bf16.vlgmr.msra.gmra.mrb[72].mxu1 %vm1148_vm1, %v10637_v24  ;;  %v13397_v24 = vld [vmem:[#allocation27_spill] sm:$0xff] }
0x19fe   : > { %8025 = vmatpush3.bf16.msra.mxu1 %v10644_v11  ;;  %8040 = vmatprep.mubr.msk.bf16.mxu1 %vm9040_vm0, %v13257_v32  ;;  %v13398_v11 = vld [vmem:[#allocation28_spill] sm:$0xff] }
0x19ff   : > { %8026 = vmatprep.subr.bf16.mxu1 %v13257_v32 }
0x1a02   : > { %8027 = vmatpush3.bf16.msra.mxu1 %v10653_v34 }
0x1a03   : > { %8028 = vmatprep.subr.bf16.mxu1 %v13257_v32 }
0x1a06   : > { %8029 = vmatpush3.bf16.msra.mxu1 %v10660_v60 }
0x1a07   : > { %8030 = vmatprep.subr.bf16.mxu1 %v13257_v32 }
0x1a0a   : > { %8031 = vmatpush3.bf16.msra.mxu1 %v10667_v29 }
0x1a0b   : > { %8032 = vmatprep.subr.bf16.mxu1 %v13257_v32 }
0x1a0e   : > { %8033 = vmatpush3.bf16.msra.mxu1 %v10674_v48 }
0x1a0f   : > { %8034 = vmatprep.subr.bf16.mxu1 %v13257_v32 }
0x1a12   : > { %8035 = vmatpush3.bf16.msra.mxu1 %v10681_v0 }
0x1a13   : > { %8036 = vmatprep.subr.bf16.mxu1 %v13257_v32 }
0x1a16   : > { %8037 = vmatpush3.bf16.msra.mxu1 %v13397_v24  ;;  %v13414_v24 = vld [vmem:[#allocation44_spill] sm:$0xff] }
0x1a17   : > { %8038 = vmatprep.subr.bf16.mxu1 %v13257_v32 }
0x1a1a   : > { %8039 = vmatpush3.bf16.msra.mxu1 %v13398_v11  ;;  %v13415_v11 = vld [vmem:[#allocation45_spill] sm:$0xff] }
0x1a1b   : > { %8044 = vmatprep.subr.bf16.mxu1 %v13257_v32 }
0x1ad0   : > { %v8022_v34 = vpop.f32.mrb[72].mxu1 }
0x1ad1   : > { %3569 = vrot.lane.b32.xlu1 %v8022_v34, %s9041_s20  ;;  %v3552_v60 = vpop.f32.mrb[73].mxu1  ;;  %v13416_v34 = vld [vmem:[#allocation46_spill] sm:$0xff] }
0x1ad2   : > { %v8023_v29 = vpop.f32.mrb[74].mxu1 }
0x1ad3   : > { %3571 = vrot.lane.b32.xlu0 %v8023_v29, %s9041_s20  ;;  %v3555_v48 = vpop.f32.mrb[75].mxu1  ;;  %v13418_v29 = vld [vmem:[#allocation48_spill] sm:$0xff] }
0x1b43   : > { %v3570_v62 = vpop.permute.xlu1 %3569 }
0x1b44   : > { %v3575_v38 = vsel %vm1219_vm2, %v3552_v60, %v3570_v62  ;;  %v13417_v60 = vld [vmem:[#allocation47_spill] sm:$0xff]  ;;  %v13420_v62 = vld [vmem:[#allocation50_spill] sm:$0xff] }
0x1b45   : > { %v3572_v0 = vpop.permute.xlu0 %3571 }
0x1b46   : > { %v3576_v37 = vsel %vm1219_vm2, %v3555_v48, %v3572_v0  ;;  %v13419_v48 = vld [vmem:[#allocation49_spill] sm:$0xff]  ;;  %v13421_v0 = vld [vmem:[#allocation51_spill] sm:$0xff] }
0x1b47   : > { %v3577_v54 = vpack.c.bf16 %v3576_v37, %v3575_v38 }
0x1b49   : > { %v3579_v3 = vunpack.c.h.bf16 %v3577_v54  ;;  %8041 = vmatmul.mubr.bf16.vlgmr.msra.gmra.mrb[76].mxu1 %v3577_v54  ;;  %v3578_v26 = vunpack.c.l.bf16 %v3577_v54 }
0x1b4a   : > { %8045 = vmatpush3.bf16.msra.mxu1 %v13399_v41  ;;  %8060 = vmatprep.mubr.msk.bf16.mxu1 %vm9040_vm0, %v13257_v32 }
0x1b4b   : > { %v3581_v55 = vsub.f32 %v3576_v37, %v3579_v3  ;;  %v3580_v39 = vsub.f32 %v3575_v38, %v3578_v26  ;;  %8046 = vmatprep.subr.bf16.mxu1 %v13257_v32  ;;  %v13422_v38 = vld [vmem:[#allocation52_spill] sm:$0xff] }
0x1b4d   : > { %v3582_v56 = vpack.c.bf16 %v3581_v55, %v3580_v39 }
0x1b4e   : > { %8047 = vmatpush3.bf16.msra.mxu1 %v13400_v42 }
0x1b4f   : > { %3615 = vmatprep.mubr.bf16.mxu0 %v3582_v56  ;;  %8048 = vmatprep.subr.bf16.mxu1 %v13257_v32 }
0x1b50   : > { %3616 = vmatmul.mubr.bf16.vlgmr.msra.gmra.mrb[76].mxu0 %v3577_v54 }
0x1b51   : > { %7009 = vmatpush3.bf16.msra.mxu0 %v13401_v45 }
0x1b52   : > { %8049 = vmatpush3.bf16.msra.mxu1 %v13402_v1  ;;  %7010 = vmatprep.subr.bf16.mxu0 %v13403_v51 }
0x1b53   : > { %8050 = vmatprep.subr.bf16.mxu1 %v13257_v32 }
0x1b55   : > { %7011 = vmatpush3.bf16.msra.mxu0 %v13404_v40 }
0x1b56   : > { %8051 = vmatpush3.bf16.msra.mxu1 %v13405_v61  ;;  %7012 = vmatprep.subr.bf16.mxu0 %v13406_v13 }
0x1b57   : > { %8052 = vmatprep.subr.bf16.mxu1 %v13257_v32 }
0x1b59   : > { %7013 = vmatpush3.bf16.msra.mxu0 %v13407_v12 }
0x1b5a   : > { %8053 = vmatpush3.bf16.msra.mxu1 %v13408_v22  ;;  %7014 = vmatprep.subr.bf16.mxu0 %v13409_v35 }
0x1b5b   : > { %8054 = vmatprep.subr.bf16.mxu1 %v13257_v32 }
0x1b5d   : > { %7015 = vmatpush3.bf16.msra.mxu0 %v13410_v31 }
0x1b5e   : > { %8055 = vmatpush3.bf16.msra.mxu1 %v13411_v58  ;;  %7016 = vmatprep.subr.bf16.mxu0 %v13412_v63 }
0x1b5f   : > { %8056 = vmatprep.subr.bf16.mxu1 %v13257_v32 }
0x1b61   : > { %7017 = vmatpush3.bf16.msra.mxu0 %v13413_v20  ;;  %v11300_v20 = vld [vmem:[%s13076_s9 + $0x60] sm:$0xff]  }
0x1b62   : > { %8057 = vmatpush3.bf16.msra.mxu1 %v13414_v24  ;;  %7018 = vmatprep.subr.bf16.mxu0 %v13415_v11  ;;  %v11307_v24 = vld [vmem:[%s13076_s9 + $0x20] sm:$0xff]   ;;  %v11313_v11 = vld [vmem:[%s13076_s9 + $0xb0] sm:$0xff]  }
0x1b63   : > { %8058 = vmatprep.subr.bf16.mxu1 %v13257_v32 }
0x1b65   : > { %7019 = vmatpush3.bf16.msra.mxu0 %v13416_v34  ;;  %v11319_v34 = vld [vmem:[%s13076_s9 + $0x68] sm:$0xff]  }
0x1b66   : > { %8059 = vmatpush3.bf16.msra.mxu1 %v13417_v60  ;;  %7020 = vmatprep.subr.bf16.mxu0 %v13418_v29  ;;  %v11326_v60 = vld [vmem:[%s13076_s9 + $0x28] sm:$0xff]   ;;  %v11332_v29 = vld [vmem:[%s13076_s9 + $0xb8] sm:$0xff]  }
0x1b67   : > { %8064 = vmatprep.subr.bf16.mxu1 %v13257_v32 }
0x1b69   : > { %7021 = vmatpush3.bf16.msra.mxu0 %v13419_v48  ;;  %v11338_v48 = vld [vmem:[%s13076_s9 + $0x70] sm:$0xff]  }
0x1b6a   : > { %7022 = vmatprep.subr.bf16.mxu0 %v13420_v62  ;;  %v11345_v62 = vld [vmem:[%s13076_s9 + $0x30] sm:$0xff]  }
0x1b6d   : > { %7023 = vmatpush3.bf16.msra.mxu0 %v13421_v0  ;;  %v11352_v0 = vld [vmem:[%s13076_s9 + $0x78] sm:$0xff]  }
0x1b6e   : > { %7039 = vmatprep.subr.bf16.mxu0 %v13422_v38  ;;  %v11362_v38 = vld [vmem:[%s13076_s9 + $0x38] sm:$0xff]  }
0x1b6f   : > { %13423 = vst [vmem:[#allocation3_spill] sm:$0xff] %v11362_v38 }
0x1c1c   : > { %v3658_v37 = vpop.f32.mrb[76].mxu1 }
0x1c1d   : > { %v8042_v54 = vpop.f32.mrb[77].mxu1 }
0x1c1e   : > { %v3661_v3 = vpop.f32.mrb[78].mxu1 }
0x1c1f   : > { %v8043_v26 = vpop.f32.mrb[79].mxu1 }
0x1c23   : > { %v6993_v41 = vpop.f32.mrb[76].mxu0 }
0x1c24   : > { %v6994_v55 = vpop.f32.mrb[77].mxu0 }
0x1c25   : > { %v6995_v39 = vadd.f32 %v6994_v55, %v6993_v41  ;;  %v6996_v56 = vpop.f32.mrb[78].mxu0 }
0x1c26   : > { %v6997_v42 = vpop.f32.mrb[79].mxu0 }
0x1c27   : > { %v3659_v45 = vadd.f32 %v6995_v39, %v3658_v37  ;;  %v6998_v1 = vadd.f32 %v6997_v42, %v6996_v56  ;;  %v11371_v37 = vld [vmem:[%s13073_s6] sm:$0xff]  }
0x1c28   : > { %13424 = vst [vmem:[#allocation5_spill] sm:$0xff] %v11371_v37 }
0x1c29   : > { %v3665_v51 = vmul.f32 %v10858_v2, %v3659_v45  ;;  %v3662_v40 = vadd.f32 %v6998_v1, %v3661_v3 }
0x1c2b   : > { %v3666_v61 = vmul.f32 %v10862_v46, %v3662_v40  ;;  %v3667_v13 = vmul.f32 %v10858_v2, %v3665_v51 }
0x1c2d   : > { %v3668_v12 = vmul.f32 %v10862_v46, %v3666_v61  ;;  %v11252_v46 = vld [vmem:[%s13076_s9 + $0x90] sm:$0xff]  }
0x1c2f   : > { %v11236_v22 = vpack.c.bf16 %v3668_v12, %v3667_v13 }
0x1c31   : > { %8061 = vmatmul.mubr.bf16.vlgmr.msra.gmra.mrb[80].mxu1 %v11236_v22  ;;  %v3670_v35 = vunpack.c.l.bf16 %v11236_v22  ;;  %v3671_v31 = vunpack.c.h.bf16 %v11236_v22 }
0x1c32   : > { %8065 = vmatpush3.bf16.msra.mxu1 %v10870_v43  ;;  %8080 = vmatprep.mubr.msk.bf16.mxu1 %vm9040_vm0, %v13257_v32  ;;  %v11261_v43 = vld [vmem:[%s13076_s9 + $0x98] sm:$0xff]  }
0x1c33   : > { %8066 = vmatprep.subr.bf16.mxu1 %v13257_v32  ;;  %v3672_v58 = vsub.f32 %v3667_v13, %v3670_v35  ;;  %v3673_v63 = vsub.f32 %v3668_v12, %v3671_v31 }
0x1c35   : > { %v3674_v2 = vpack.c.bf16 %v3673_v63, %v3672_v58 }
0x1c36   : > { %8067 = vmatpush3.bf16.msra.mxu1 %v10879_v14  ;;  %v11269_v14 = vld [vmem:[%s13076_s9 + $0x10] sm:$0xff]  }
0x1c37   : > { %3707 = vmatprep.mubr.bf16.mxu0 %v3674_v2  ;;  %8068 = vmatprep.subr.bf16.mxu1 %v13257_v32 }
0x1c38   : > { %3708 = vmatmul.mubr.bf16.vlgmr.msra.gmra.mrb[80].mxu0 %v11236_v22 }
0x1c39   : > { %7040 = vmatpush3.bf16.msra.mxu0 %v10886_v57  ;;  %3789 = vmatprep.mubr.bf16.mxu0 %v3674_v2  ;;  %v11275_v57 = vld [vmem:[%s13076_s9 + $0xa0] sm:$0xff]  }
0x1c3a   : > { %8069 = vmatpush3.bf16.msra.mxu1 %v11252_v46  ;;  %7041 = vmatprep.subr.bf16.mxu0 %v10893_v4  ;;  %v11281_v4 = vld [vmem:[%s13076_s9 + $0x58] sm:$0xff]  }
0x1c3b   : > { %8070 = vmatprep.subr.bf16.mxu1 %v13257_v32 }
0x1c3d   : > { %7042 = vmatpush3.bf16.msra.mxu0 %v10900_v17  ;;  %v11288_v17 = vld [vmem:[%s13076_s9 + $0x18] sm:$0xff]  }
0x1c3e   : > { %8071 = vmatpush3.bf16.msra.mxu1 %v11261_v43  ;;  %7043 = vmatprep.subr.bf16.mxu0 %v10907_v30  ;;  %v11294_v30 = vld [vmem:[%s13076_s9 + $0xa8] sm:$0xff]  }
0x1c3f   : > { %8072 = vmatprep.subr.bf16.mxu1 %v13257_v32 }
0x1c41   : > { %7044 = vmatpush3.bf16.msra.mxu0 %v11269_v14 }
0x1c42   : > { %8073 = vmatpush3.bf16.msra.mxu1 %v11275_v57  ;;  %7045 = vmatprep.subr.bf16.mxu0 %v11281_v4 }
0x1c43   : > { %8074 = vmatprep.subr.bf16.mxu1 %v13257_v32 }
0x1c45   : > { %7046 = vmatpush3.bf16.msra.mxu0 %v11288_v17 }
0x1c46   : > { %8075 = vmatpush3.bf16.msra.mxu1 %v11294_v30  ;;  %7047 = vmatprep.subr.bf16.mxu0 %v11300_v20 }
0x1c47   : > { %8076 = vmatprep.subr.bf16.mxu1 %v13257_v32 }
0x1c49   : > { %7048 = vmatpush3.bf16.msra.mxu0 %v11307_v24 }
0x1c4a   : > { %8077 = vmatpush3.bf16.msra.mxu1 %v11313_v11  ;;  %7049 = vmatprep.subr.bf16.mxu0 %v11319_v34 }
0x1c4b   : > { %8078 = vmatprep.subr.bf16.mxu1 %v13257_v32 }
0x1c4d   : > { %7050 = vmatpush3.bf16.msra.mxu0 %v11326_v60 }
0x1c4e   : > { %8079 = vmatpush3.bf16.msra.mxu1 %v11332_v29  ;;  %7051 = vmatprep.subr.bf16.mxu0 %v11338_v48 }
0x1c4f   : > { %8100 = vmatprep.subr.bf16.mxu1 %v13257_v32 }
0x1c51   : > { %7052 = vmatpush3.bf16.msra.mxu0 %v11345_v62  ;;  %8081 = vmatmul.mubr.bf16.vlgmr.msra.gmra.mrb[84].mxu1 %v11236_v22 }
0x1c52   : > { %7053 = vmatprep.subr.bf16.mxu0 %v11352_v0  ;;  %8101 = vmatpush3.bf16.msra.mxu1 %v10955_v10 }
0x1c53   : > { %8102 = vmatprep.subr.bf16.mxu1 %v13257_v32  ;;  %8116 = vmatprep.mubr.msk.bf16.mxu1 %vm9040_vm0, %v13257_v32 }
0x1c55   : > { %7054 = vmatpush3.bf16.msra.mxu0 %v11362_v38 }
0x1c56   : > { %8103 = vmatpush3.bf16.msra.mxu1 %v10964_v44 }
0x1c57   : > { %8104 = vmatprep.subr.bf16.mxu1 %v13257_v32 }
0x1c58   : > { %3790 = vmatmul.mubr.bf16.vlgmr.msra.gmra.mrb[84].mxu0 %v11236_v22 }
0x1c59   : > { %8096 = vmatprep.mubr.msk.bf16.mxu0 %vm1148_vm1, %v11371_v37 }
0x1c5a   : > { %8105 = vmatpush3.bf16.msra.mxu1 %v10971_v6 }
0x1c5b   : > { %8106 = vmatprep.subr.bf16.mxu1 %v13257_v32 }
0x1c5e   : > { %8107 = vmatpush3.bf16.msra.mxu1 %v10978_v8 }
0x1c5f   : > { %8108 = vmatprep.subr.bf16.mxu1 %v13257_v32 }
0x1c62   : > { %8109 = vmatpush3.bf16.msra.mxu1 %v10985_v15 }
0x1c63   : > { %8110 = vmatprep.subr.bf16.mxu1 %v13257_v32 }
0x1c66   : > { %8111 = vmatpush3.bf16.msra.mxu1 %v10992_v19 }
0x1c67   : > { %8112 = vmatprep.subr.bf16.mxu1 %v13257_v32 }
0x1c6a   : > { %8113 = vmatpush3.bf16.msra.mxu1 %v10999_v21 }
0x1c6b   : > { %8114 = vmatprep.subr.bf16.mxu1 %v13257_v32 }
0x1c6e   : > { %8115 = vmatpush3.bf16.msra.mxu1 %v11006_v16 }
0x1d04   : > { %v3750_v54 = vpop.f32.mrb[80].mxu1 }
0x1d05   : > { %v8062_v3 = vpop.f32.mrb[81].mxu1 }
0x1d06   : > { %v3753_v26 = vpop.f32.mrb[82].mxu1 }
0x1d07   : > { %v8063_v41 = vpop.f32.mrb[83].mxu1 }
0x1d0b   : > { %v7024_v55 = vpop.f32.mrb[80].mxu0 }
0x1d0c   : > { %v7025_v39 = vpop.f32.mrb[81].mxu0 }
0x1d0d   : > { %v7026_v56 = vadd.f32 %v7025_v39, %v7024_v55  ;;  %v7027_v42 = vpop.f32.mrb[82].mxu0 }
0x1d0e   : > { %v7028_v45 = vpop.f32.mrb[83].mxu0 }
0x1d0f   : > { %v3751_v1 = vadd.f32 %v7026_v56, %v3750_v54  ;;  %v7029_v51 = vadd.f32 %v7028_v45, %v7027_v42 }
0x1d11   : > { %v3754_v40 = vadd.f32 %v7029_v51, %v3753_v26 }
0x1d13   : > { %v3839_v61 = vpack.c.bf16 %v3754_v40, %v3751_v1 }
0x1d15   : > { %v3842_v13 = vunpack.c.h.bf16 %v3839_v61  ;;  %8084 = vmatprep.subr.bf16.mxu0 %v3839_v61  ;;  %v3841_v12 = vunpack.c.l.bf16 %v3839_v61 }
0x1d16   : > { %8085 = vmatpush3.bf16.msra.mxu0 %v3839_v61 }
0x1d17   : > { %v3846_v22 = vsub.f32 %v3754_v40, %v3842_v13  ;;  %v3845_v35 = vsub.f32 %v3751_v1, %v3841_v12 }
0x1d19   : > { %v3849_v31 = vpack.c.bf16 %v3846_v22, %v3845_v35 }
0x1d24   : > { %v3832_v58 = vpop.f32.mrb[84].mxu1 }
0x1d25   : > { %v8082_v63 = vpop.f32.mrb[85].mxu1 }
0x1d26   : > { %v3835_v2 = vpop.f32.mrb[86].mxu1 }
0x1d27   : > { %v8083_v3 = vpop.f32.mrb[87].mxu1 }
0x1d2b   : > { %v7055_v41 = vpop.f32.mrb[84].mxu0 }
0x1d2c   : > { %v7056_v37 = vpop.f32.mrb[85].mxu0 }
0x1d2d   : > { %v7057_v55 = vadd.f32 %v7056_v37, %v7055_v41  ;;  %v7058_v39 = vpop.f32.mrb[86].mxu0 }
0x1d2e   : > { %v7059_v38 = vpop.f32.mrb[87].mxu0 }
0x1d2f   : > { %v3833_v54 = vadd.f32 %v7057_v55, %v3832_v58  ;;  %v7060_v56 = vadd.f32 %v7059_v38, %v7058_v39  ;;  %v11390_v38 = vld [vmem:[%s13073_s6 + $0x8] sm:$0xff]  }
0x1d31   : > { %v3836_v26 = vadd.f32 %v7060_v56, %v3835_v2 }
0x1d33   : > { %v3840_v42 = vpack.c.bf16 %v3836_v26, %v3833_v54 }
0x1d35   : > { %v3844_v45 = vunpack.c.h.bf16 %v3840_v42  ;;  %8086 = vmatprep.subr.bf16.mxu0 %v3840_v42  ;;  %v3843_v51 = vunpack.c.l.bf16 %v3840_v42 }
0x1d36   : > { %8087 = vmatpush3.bf16.msra.mxu0 %v3840_v42 }
0x1d37   : > { %v3848_v40 = vsub.f32 %v3836_v26, %v3844_v45  ;;  %8088 = vmatprep.subr.bf16.mxu0 %v3849_v31  ;;  %v3847_v1 = vsub.f32 %v3833_v54, %v3843_v51 }
0x1d39   : > { %v3850_v13 = vpack.c.bf16 %v3848_v40, %v3847_v1 }
0x1d3a   : > { %8089 = vmatpush3.bf16.msra.mxu0 %v3849_v31 }
0x1d3b   : > { %8090 = vmatprep.subr.bf16.mxu0 %v3850_v13 }
0x1d3e   : > { %8091 = vmatpush3.bf16.msra.mxu0 %v3850_v13 }
0x1d3f   : > { %8092 = vmatprep.subr.bf16.mxu0 %v3839_v61 }
0x1d42   : > { %8093 = vmatpush3.bf16.msra.mxu0 %v3839_v61 }
0x1d43   : > { %8094 = vmatprep.subr.bf16.mxu0 %v3840_v42 }
0x1d46   : > { %8095 = vmatpush3.bf16.msra.mxu0 %v3840_v42 }
0x1d47   : > { %8120 = vmatprep.subr.bf16.mxu0 %v13257_v32 }
0x1d49   : > { %8097 = vmatmul.mubr.msk.bf16.vlgmr.msra.gmra.mrb[88].mxu0 %vm1148_vm1, %v11390_v38 }
0x1d4a   : > { %8121 = vmatpush3.bf16.msra.mxu0 %v10955_v10  ;;  %8136 = vmatprep.mubr.msk.bf16.mxu0 %vm9040_vm0, %v13257_v32  ;;  %v11414_v10 = vld [vmem:[%s13074_s7 + $0x40] sm:$0xff]  }
0x1d4b   : > { %8122 = vmatprep.subr.bf16.mxu0 %v13257_v32 }
0x1d4e   : > { %8123 = vmatpush3.bf16.msra.mxu0 %v10964_v44 }
0x1d4f   : > { %8124 = vmatprep.subr.bf16.mxu0 %v13257_v32 }
0x1d52   : > { %8125 = vmatpush3.bf16.msra.mxu0 %v10971_v6 }
0x1d53   : > { %8126 = vmatprep.subr.bf16.mxu0 %v13257_v32 }
0x1d56   : > { %8127 = vmatpush3.bf16.msra.mxu0 %v10978_v8 }
0x1d57   : > { %8128 = vmatprep.subr.bf16.mxu0 %v13257_v32 }
0x1d5a   : > { %8129 = vmatpush3.bf16.msra.mxu0 %v10985_v15 }
0x1d5b   : > { %8130 = vmatprep.subr.bf16.mxu0 %v13257_v32 }
0x1d5e   : > { %8131 = vmatpush3.bf16.msra.mxu0 %v10992_v19 }
0x1d5f   : > { %8132 = vmatprep.subr.bf16.mxu0 %v13257_v32 }
0x1d62   : > { %8133 = vmatpush3.bf16.msra.mxu0 %v10999_v21 }
0x1d63   : > { %8134 = vmatprep.subr.bf16.mxu0 %v13257_v32 }
0x1d66   : > { %8135 = vmatpush3.bf16.msra.mxu0 %v11006_v16 }
0x1d67   : > { %7104 = vmatprep.subr.bf16.mxu0 %v11414_v10 }
0x1e1c   : > { %v8098_v44 = vpop.f32.mrb[88].mxu0 }
0x1e1d   : > { %v3902_v6 = vmul.f32 %v11156_v28, %v8098_v44  ;;  %v3919_v8 = vmul.f32 %v11152_v23, %v8098_v44  ;;  %v3885_v15 = vpop.f32.mrb[89].mxu0 }
0x1e1e   : > { %v3900_v19 = vmul.f32 %v11152_v23, %v3885_v15  ;;  %v3921_v21 = vmul.f32 %v11156_v28, %v3885_v15  ;;  %v8099_v37 = vpop.f32.mrb[90].mxu0  ;;  %v11432_v15 = vld [vmem:[%s13072_s5] sm:$0xff]  }
0x1e1f   : > { %v3903_v16 = vmul.f32 %v11164_v33, %v8099_v37  ;;  %v3920_v61 = vmul.f32 %v11160_v36, %v8099_v37  ;;  %v3888_v12 = vpop.f32.mrb[91].mxu0  ;;  %v11451_v37 = vld [vmem:[%s13074_s7 + $0x8] sm:$0xff]  }
0x1e20   : > { %v3904_v22 = vadd.f32 %v3902_v6, %v3900_v19  ;;  %v3923_v35 = vsub.f32 %v3919_v8, %v3921_v21  ;;  %v3901_v31 = vmul.f32 %v11160_v36, %v3888_v12  ;;  %v3922_v58 = vmul.f32 %v11164_v33, %v3888_v12  ;;  %v11439_v19 = vld [vmem:[%s13074_s7] sm:$0xff]   ;;  %v11445_v21 = vld [vmem:[%s13074_s7 + $0x48] sm:$0xff]   ;;  %v11469_v12 = vld [vmem:[%s13074_s7 + $0x58] sm:$0xff]  }
0x1e22   : > { %v3905_v63 = vadd.f32 %v3903_v16, %v3901_v31  ;;  %v3924_v2 = vsub.f32 %v3920_v61, %v3922_v58  ;;  %v11457_v16 = vld [vmem:[%s13074_s7 + $0x50] sm:$0xff]   ;;  %v11487_v31 = vld [vmem:[%s13074_s7 + $0x20] sm:$0xff]   ;;  %v11493_v58 = vld [vmem:[%s13074_s7 + $0x68] sm:$0xff]  }
0x1e23   : > { %v11463_v61 = vld [vmem:[%s13074_s7 + $0x10] sm:$0xff]   ;;  %13427 = vst [vmem:[#allocation7_spill] sm:$0xff] %v11487_v31  ;;  %13428 = vst [vmem:[#allocation8_spill] sm:$0xff] %v11493_v58 }
0x1e24   : > { %v3906_v3 = vpack.c.bf16 %v3905_v63, %v3904_v22  ;;  %v3925_v41 = vpack.c.bf16 %v3924_v2, %v3923_v35 }
0x1e26   : > { %v3908_v55 = vunpack.c.h.bf16 %v3906_v3  ;;  %v3927_v39 = vunpack.c.h.bf16 %v3925_v41  ;;  %v3926_v54 = vunpack.c.l.bf16 %v3925_v41  ;;  %v3907_v56 = vunpack.c.l.bf16 %v3906_v3 }
0x1e28   : > { %v3910_v26 = vsub.f32 %v3905_v63, %v3908_v55  ;;  %v3929_v42 = vsub.f32 %v3924_v2, %v3927_v39  ;;  %v3928_v45 = vsub.f32 %v3923_v35, %v3926_v54  ;;  %v3909_v51 = vsub.f32 %v3904_v22, %v3907_v56  ;;  %v11475_v22 = vld [vmem:[%s13074_s7 + $0x18] sm:$0xff]   ;;  %v11481_v35 = vld [vmem:[%s13074_s7 + $0x60] sm:$0xff]   ;;  %v11499_v63 = vld [vmem:[%s13074_s7 + $0x28] sm:$0xff]  }
0x1e29   : > { %13425 = vst [vmem:[#allocation4_spill] sm:$0xff] %v11475_v22  ;;  %13426 = vst [vmem:[#allocation6_spill] sm:$0xff] %v11481_v35  ;;  %v11505_v2 = vld [vmem:[%s13074_s7 + $0x70] sm:$0xff]   ;;  %v11523_v55 = vld [vmem:[%s13074_s7 + $0x38] sm:$0xff]   ;;  %v3938_v54 = vmul.f32 %v11100_v9, %v13388_v47  ;;  %v3981_v56 = vmul.f32 %v11112_v49, %v13388_v47 }
0x1e2a   : > { %v3930_v40 = vpack.c.bf16 %v3929_v42, %v3928_v45  ;;  %v3911_v1 = vpack.c.bf16 %v3910_v26, %v3909_v51  ;;  %13429 = vst [vmem:[#allocation9_spill] sm:$0xff] %v11499_v63  ;;  %13430 = vst [vmem:[#allocation10_spill] sm:$0xff] %v11505_v2  ;;  %v11529_v39 = vld [vmem:[%s13075_s8 + $0x40] sm:$0xff]  }
0x1e2b   : > { %13433 = vst [vmem:[#allocation13_spill] sm:$0xff] %v11523_v55  ;;  %13434 = vst [vmem:[#allocation14_spill] sm:$0xff] %v11529_v39 }
0x1e2c   : > { %3932 = vrot.lane.b32.xlu0 %v3930_v40, %s9041_s20  ;;  %3913 = vrot.lane.b32.xlu1 %v3911_v1, %s9041_s20 }
0x1e9e   : > { %v3933_v13 = vpop.permute.xlu0 %3932  ;;  %v3914_v44 = vpop.permute.xlu1 %3913 }
0x1e9f   : > { %v3936_v6 = vsel %vm1219_vm2, %v3925_v41, %v3933_v13  ;;  %v3917_v8 = vsel %vm1219_vm2, %v3906_v3, %v3914_v44  ;;  %v11511_v3 = vld [vmem:[%s13074_s7 + $0x30] sm:$0xff]   ;;  %v11517_v41 = vld [vmem:[%s13074_s7 + $0x78] sm:$0xff]   ;;  %v3939_v13 = vmul.f32 %v11103_v52, %v13388_v47  ;;  %v3982_v44 = vmul.f32 %v11115_v59, %v13388_v47 }
0x1ea0   : > { %8117 = vmatmul.mubr.bf16.vlgmr.msra.gmra.mrb[88].mxu1 %v3917_v8  ;;  %8137 = vmatmul.mubr.bf16.vlgmr.msra.gmra.mrb[92].mxu0 %v3936_v6  ;;  %13431 = vst [vmem:[#allocation11_spill] sm:$0xff] %v11511_v3  ;;  %13432 = vst [vmem:[#allocation12_spill] sm:$0xff] %v11517_v41 }
0x1ea1   : > { %8152 = vmatprep.mubr.msk.bf16.mxu1 %vm1148_vm1, %v11432_v15  ;;  %7105 = vmatpush3.bf16.msra.mxu0 %v11439_v19 }
0x1ea2   : > { %7106 = vmatprep.subr.bf16.mxu0 %v11445_v21 }
0x1ea5   : > { %7107 = vmatpush3.bf16.msra.mxu0 %v11451_v37 }
0x1ea6   : > { %7108 = vmatprep.subr.bf16.mxu0 %v11457_v16 }
0x1ea9   : > { %7109 = vmatpush3.bf16.msra.mxu0 %v11463_v61 }
0x1eaa   : > { %7110 = vmatprep.subr.bf16.mxu0 %v11469_v12 }
0x1ead   : > { %7111 = vmatpush3.bf16.msra.mxu0 %v11475_v22 }
0x1eae   : > { %7112 = vmatprep.subr.bf16.mxu0 %v11481_v35 }
0x1eb1   : > { %7113 = vmatpush3.bf16.msra.mxu0 %v11487_v31 }
0x1eb2   : > { %7114 = vmatprep.subr.bf16.mxu0 %v11493_v58 }
0x1eb5   : > { %7115 = vmatpush3.bf16.msra.mxu0 %v11499_v63 }
0x1eb6   : > { %7116 = vmatprep.subr.bf16.mxu0 %v11505_v2 }
0x1eb9   : > { %7117 = vmatpush3.bf16.msra.mxu0 %v11511_v3 }
0x1eba   : > { %7118 = vmatprep.subr.bf16.mxu0 %v11517_v41 }
0x1ebd   : > { %7119 = vmatpush3.bf16.msra.mxu0 %v11523_v55 }
0x1ebe   : > { %7135 = vmatprep.subr.bf16.mxu0 %v11529_v39 }
0x1f73   : > { %v3974_v26 = vpop.f32.mrb[88].mxu1  ;;  %v4017_v42 = vpop.f32.mrb[92].mxu0 }
0x1f74   : > { %v3975_v45 = vadd.f32 %v3974_v26, %v3938_v54  ;;  %v4018_v51 = vadd.f32 %v4017_v42, %v3981_v56  ;;  %v8118_v40 = vpop.f32.mrb[89].mxu1  ;;  %v8138_v1 = vpop.f32.mrb[93].mxu0 }
0x1f75   : > { %v3977_v6 = vpop.f32.mrb[90].mxu1  ;;  %v4020_v8 = vpop.f32.mrb[94].mxu0 }
0x1f76   : > { %v4024_v39 = vmul.f32 %v3975_v45, %v11100_v9  ;;  %v4026_v55 = vmul.f32 %v4018_v51, %v11112_v49  ;;  %v3978_v41 = vadd.f32 %v3977_v6, %v3939_v13  ;;  %v4021_v3 = vadd.f32 %v4020_v8, %v3982_v44  ;;  %v8119_v2 = vpop.f32.mrb[91].mxu1  ;;  %v8139_v63 = vpop.f32.mrb[95].mxu0 }
0x1f78   : > { %v4025_v54 = vmul.f32 %v3978_v41, %v11103_v52  ;;  %v4027_v56 = vmul.f32 %v4021_v3, %v11115_v59  ;;  %v4028_v26 = vadd.f32 %v4026_v55, %v4024_v39 }
0x1f7a   : > { %v4029_v42 = vadd.f32 %v4027_v56, %v4025_v54  ;;  %v4030_v40 = vsel %vm1393_vm3, %v4028_v26, 0.0 }
0x1f7c   : > { %v4031_v1 = vsel %vm1393_vm3, %v4029_v42, 0.0 }
0x1f7d   : > { %v4032_v47 = vadd.f32 %v4031_v1, %v4030_v40 }
0x1f7f   : > { %4033 = vadd.xlane.f32.xlu1 %v4032_v47 }
0x200c   : > { %v4034_v58 = vpop.xlane.xlu1 %4033 }
0x200d   : > { %v4035_v31 = vrot.slane %v4034_v58, 4 }
0x200f   : > { %v4036_v35 = vadd.f32 %v4035_v31, %v4034_v58 }
0x2011   : > { %v4037_v22 = vrot.slane %v4036_v35, 2 }
0x2013   : > { %v4038_v13 = vadd.f32 %v4037_v22, %v4036_v35 }
0x2015   : > { %v4039_v44 = vrot.slane %v4038_v13, 1 }
0x2017   : > { %v4040_v2 = vadd.f32 %v4039_v44, %v4038_v13 }
0x2019   : > { %8582 = vpush %v4040_v2 }
0x204a   : > { %s8583_s16 = spop %8582 }
0x204b   : > { %v4042_v63 = vstv %s8583_s16 }
0x204c   : > { %v4043_v6 = vadd.f32 1e-30, %v4042_v63 }
0x204e   : > { %8702 = vrcp.f32 %v4043_v6 }
0x2058   : > { %v8703_v55 = vpop.eup %8702 }
0x2059   : > { %v4045_v39 = vmul.f32 %v8703_v55, %v11094_v5 }
0x205b   : > { %v4054_v8 = vmul.f32 %v4045_v39, %v3975_v45  ;;  %v4055_v54 = vmul.f32 %v4045_v39, %v3978_v41  ;;  %v4058_v56 = vmul.f32 %v4045_v39, %v4018_v51  ;;  %v4059_v26 = vmul.f32 %v4045_v39, %v4021_v3  ;;  %v13435_v51 = vld [vmem:[#allocation17_spill] sm:$0xff] }
0x205c   : > { %v4050_v47 = vmul.f32 %v4045_v39, %v11112_v49  ;;  %v4047_v31 = vmul.f32 %v4045_v39, %v11103_v52  ;;  %v4051_v22 = vmul.f32 %v4045_v39, %v11115_v59  ;;  %v4046_v35 = vmul.f32 %v4045_v39, %v11100_v9 }
0x205d   : > { %v11552_v58 = vsub.f32 %v11060_v25, %v4054_v8  ;;  %v11555_v42 = vsub.f32 %v11063_v27, %v4055_v54  ;;  %v11558_v40 = vsub.f32 %v11066_v50, %v4058_v56  ;;  %v11561_v41 = vsub.f32 %v11069_v18, %v4059_v26  ;;  %v13436_v25 = vld [vmem:[#allocation18_spill] sm:$0xff] }
0x205e   : > { %v11564_v3 = vadd.f32 %v4050_v47, %v11072_v7  ;;  %v11567_v45 = vadd.f32 %v4047_v31, %v11075_v53  ;;  %v11570_v1 = vadd.f32 %v4051_v22, %v13435_v51  ;;  %v11573_v13 = vadd.f32 %v4046_v35, %v13436_v25 }
0x205f   : > { %v4062_v27 = vmul.f32 %v11552_v58, %v11552_v58  ;;  %v4063_v50 = vmul.f32 %v11555_v42, %v11555_v42  ;;  %v4064_v18 = vmul.f32 %v11558_v40, %v11558_v40  ;;  %v4065_v7 = vmul.f32 %v11561_v41, %v11561_v41 }
0x2060   : > { %13437 = vst [vmem:[#allocation15_spill] sm:$0xff] %v11573_v13  ;;  %v4081_v31 = vadd.f32 1e-30, %v11094_v5 }
0x2061   : > { %v4066_v53 = vadd.f32 %v4064_v18, %v4062_v27  ;;  %v4067_v44 = vadd.f32 %v4065_v7, %v4063_v50 }
0x2062   : > { %8704 = vrcp.f32 %v4081_v31 }
0x2063   : > { %v4068_v2 = vsel %vm1393_vm3, %v4066_v53, 0.0  ;;  %v4069_v63 = vsel %vm1393_vm3, %v4067_v44, 0.0 }
0x2064   : > { %v4070_v6 = vadd.f32 %v4069_v63, %v4068_v2 }
0x2066   : > { %4071 = vadd.xlane.f32.xlu0 %v4070_v6 }
0x206c   : > { %v8705_v22 = vpop.eup %8704 }
0x20f3   : > { %v4072_v55 = vpop.xlane.xlu0 %4071 }
0x20f4   : > { %v4073_v39 = vrot.slane %v4072_v55, 4 }
0x20f6   : > { %v4074_v8 = vadd.f32 %v4073_v39, %v4072_v55 }
0x20f8   : > { %v4075_v54 = vrot.slane %v4074_v8, 2 }
0x20fa   : > { %v4076_v56 = vadd.f32 %v4075_v54, %v4074_v8 }
0x20fc   : > { %v4077_v26 = vrot.slane %v4076_v56, 1 }
0x20fe   : > { %v4078_v47 = vadd.f32 %v4077_v26, %v4076_v56 }
0x2100   : > { %8584 = vpush %v4078_v47 }
0x2131   : > { %s8585_s18 = spop %8584 }
0x2132   : > { %v11586_v35 = vstv %s8585_s18 }
0x2133   : > { %v4083_v51 = vmul.f32 %v8705_v22, %v11586_v35 }
0x2135   : > { %v4084_v25 = vmul.f32 %v4083_v51, %v11100_v9  ;;  %v4085_v27 = vmul.f32 %v4083_v51, %v11103_v52  ;;  %v4088_v7 = vmul.f32 %v4083_v51, %v11112_v49  ;;  %v4089_v5 = vmul.f32 %v4083_v51, %v11115_v59 }
0x2137   : > { %v11592_v50 = vadd.f32 %v4084_v25, %v11552_v58  ;;  %v11595_v18 = vadd.f32 %v4085_v27, %v11555_v42  ;;  %v11604_v9 = vadd.f32 %v4088_v7, %v11558_v40  ;;  %v11607_v52 = vadd.f32 %v4089_v5, %v11561_v41 }
0x2139   : > { %4096 = vrot.lane.b32.xlu1 %v11595_v18, %s9042_s21  ;;  %4094 = vrot.lane.b32.xlu0 %v11592_v50, %s9042_s21 }
0x213d   : > { %4120 = vrot.lane.b32.xlu1 %v11604_v9, %s9042_s21  ;;  %4122 = vrot.lane.b32.xlu0 %v11607_v52, %s9042_s21 }
0x2141   : > { %4100 = vrot.lane.b32.xlu1 %v11592_v50, %s9043_s22  ;;  %4102 = vrot.lane.b32.xlu0 %v11595_v18, %s9043_s22 }
0x2145   : > { %4126 = vrot.lane.b32.xlu1 %v11604_v9, %s9043_s22  ;;  %4128 = vrot.lane.b32.xlu0 %v11607_v52, %s9043_s22 }
0x2149   : > { %4106 = vrot.lane.b32.xlu1 %v11592_v50, %s9044_s25  ;;  %4108 = vrot.lane.b32.xlu0 %v11595_v18, %s9044_s25 }
0x214d   : > { %4132 = vrot.lane.b32.xlu1 %v11604_v9, %s9044_s25  ;;  %4134 = vrot.lane.b32.xlu0 %v11607_v52, %s9044_s25 }
0x21ab   : > { %v4097_v49 = vpop.permute.xlu1 %4096  ;;  %v4095_v59 = vpop.permute.xlu0 %4094 }
0x21ac   : > { %v4112_v39 = vsel %vm1393_vm3, %v11592_v50, %v4095_v59  ;;  %v4113_v8 = vsel %vm1393_vm3, %v11595_v18, %v4097_v49 }
0x21af   : > { %v4121_v53 = vpop.permute.xlu1 %4120  ;;  %v4123_v44 = vpop.permute.xlu0 %4122 }
0x21b0   : > { %v4138_v51 = vsel %vm1393_vm3, %v11604_v9, %v4121_v53  ;;  %v4139_v25 = vsel %vm1393_vm3, %v11607_v52, %v4123_v44 }
0x21b3   : > { %v4101_v2 = vpop.permute.xlu1 %4100  ;;  %v4103_v63 = vpop.permute.xlu0 %4102 }
0x21b4   : > { %v4114_v54 = vsel %vm1396_vm4, %v4112_v39, %v4101_v2  ;;  %v4115_v47 = vsel %vm1396_vm4, %v4113_v8, %v4103_v63 }
0x21b7   : > { %v4127_v6 = vpop.permute.xlu1 %4126  ;;  %v4129_v55 = vpop.permute.xlu0 %4128 }
0x21b8   : > { %v4140_v27 = vsel %vm1396_vm4, %v4138_v51, %v4127_v6  ;;  %v4141_v7 = vsel %vm1396_vm4, %v4139_v25, %v4129_v55 }
0x21bb   : > { %v4107_v56 = vpop.permute.xlu1 %4106  ;;  %v4109_v26 = vpop.permute.xlu0 %4108 }
0x21bc   : > { %v4116_v31 = vsel %vm1399_vm5, %v4114_v54, %v4107_v56  ;;  %v4117_v22 = vsel %vm1399_vm5, %v4115_v47, %v4109_v26 }
0x21bd   : > { %v4144_v5 = vmul.f32 %v11152_v23, %v4116_v31  ;;  %v4152_v49 = vmul.f32 %v11156_v28, %v4116_v31  ;;  %v4145_v63 = vmul.f32 %v11160_v36, %v4117_v22  ;;  %v4153_v39 = vmul.f32 %v11164_v33, %v4117_v22 }
0x21bf   : > { %v4133_v59 = vpop.permute.xlu1 %4132  ;;  %v4135_v2 = vpop.permute.xlu0 %4134 }
0x21c0   : > { %v4142_v8 = vsel %vm1399_vm5, %v4140_v27, %v4133_v59  ;;  %v4143_v53 = vsel %vm1399_vm5, %v4141_v7, %v4135_v2 }
0x21c1   : > { %v4146_v44 = vmul.f32 %v11156_v28, %v4142_v8  ;;  %v4150_v6 = vmul.f32 %v11152_v23, %v4142_v8  ;;  %v4147_v55 = vmul.f32 %v11164_v33, %v4143_v53  ;;  %v4151_v54 = vmul.f32 %v11160_v36, %v4143_v53  ;;  %v11694_v8 = vld [vmem:[%s13074_s7 + $0xa0] sm:$0xff]   ;;  %v11701_v53 = vld [vmem:[%s13074_s7 + $0xa8] sm:$0xff]  }
0x21c3   : > { %v4148_v56 = vsub.f32 %v4144_v5, %v4146_v44  ;;  %v4154_v26 = vadd.f32 %v4152_v49, %v4150_v6  ;;  %v4149_v47 = vsub.f32 %v4145_v63, %v4147_v55  ;;  %v4155_v31 = vadd.f32 %v4153_v39, %v4151_v54  ;;  %v11657_v5 = vld [vmem:[%s13072_s5 + $0x8] sm:$0xff]   ;;  %v11680_v63 = vld [vmem:[%s13074_s7 + $0x90] sm:$0xff]   ;;  %v11687_v39 = vld [vmem:[%s13074_s7 + $0x98] sm:$0xff]  }
0x21c4   : > { %v11673_v49 = vld [vmem:[%s13074_s7 + $0x88] sm:$0xff]   ;;  %v11708_v44 = vld [vmem:[%s13074_s7 + $0xb0] sm:$0xff]   ;;  %v11715_v6 = vld [vmem:[%s13074_s7 + $0xb8] sm:$0xff]  }
0x21c5   : > { %v4156_v51 = vpack.c.bf16 %v4149_v47, %v4148_v56  ;;  %v4157_v25 = vpack.c.bf16 %v4155_v31, %v4154_v26 }
0x21c7   : > { %8140 = vmatprep.subr.bf16.mxu1 %v4156_v51  ;;  %v4158_v22 = vunpack.c.l.bf16 %v4156_v51  ;;  %v4159_v13 = vunpack.c.h.bf16 %v4156_v51  ;;  %v4160_v27 = vunpack.c.l.bf16 %v4157_v25  ;;  %v4161_v59 = vunpack.c.h.bf16 %v4157_v25 }
0x21c8   : > { %8141 = vmatpush3.bf16.msra.mxu1 %v4156_v51 }
0x21c9   : > { %8142 = vmatprep.subr.bf16.mxu1 %v4157_v25  ;;  %v4162_v28 = vsub.f32 %v4148_v56, %v4158_v22  ;;  %v4163_v7 = vsub.f32 %v4149_v47, %v4159_v13  ;;  %v4164_v2 = vsub.f32 %v4154_v26, %v4160_v27  ;;  %v4165_v33 = vsub.f32 %v4155_v31, %v4161_v59  ;;  %v11664_v13 = vld [vmem:[%s13074_s7 + $0x80] sm:$0xff]  }
0x21cb   : > { %v4166_v23 = vpack.c.bf16 %v4163_v7, %v4162_v28  ;;  %v4167_v36 = vpack.c.bf16 %v4165_v33, %v4164_v2  ;;  %v11726_v28 = vld [vmem:[%s13075_s8 + $0x80] sm:$0xff]   ;;  %v11735_v33 = vld [vmem:[%s13075_s8 + $0x88] sm:$0xff]  }
0x21cc   : > { %8143 = vmatpush3.bf16.msra.mxu1 %v4157_v25  ;;  %13438 = vst [vmem:[#allocation19_spill] sm:$0xff] %v11726_v28  ;;  %13439 = vst [vmem:[#allocation20_spill] sm:$0xff] %v11735_v33 }
0x21cd   : > { %8144 = vmatprep.subr.bf16.mxu1 %v4166_v23 }
0x21d0   : > { %8145 = vmatpush3.bf16.msra.mxu1 %v4166_v23 }
0x21d1   : > { %8146 = vmatprep.subr.bf16.mxu1 %v4167_v36 }
0x21d4   : > { %8147 = vmatpush3.bf16.msra.mxu1 %v4167_v36  ;;  %v11742_v36 = vld [vmem:[%s13075_s8] sm:$0xff]  }
0x21d5   : > { %8148 = vmatprep.subr.bf16.mxu1 %v4156_v51  ;;  %13440 = vst [vmem:[#allocation21_spill] sm:$0xff] %v11742_v36 }
0x21d8   : > { %8149 = vmatpush3.bf16.msra.mxu1 %v4156_v51 }
0x21d9   : > { %8150 = vmatprep.subr.bf16.mxu1 %v4157_v25 }
0x21dc   : > { %8151 = vmatpush3.bf16.msra.mxu1 %v4157_v25 }
0x21dd   : > { %8156 = vmatprep.subr.bf16.mxu1 %v13257_v32 }
0x21df   : > { %8153 = vmatmul.mubr.msk.bf16.vlgmr.msra.gmra.mrb[92].mxu1 %vm1148_vm1, %v11657_v5 }
0x21e0   : > { %8157 = vmatpush3.bf16.msra.mxu1 %v11664_v13  ;;  %8172 = vmatprep.mubr.msk.bf16.mxu1 %vm9040_vm0, %v13257_v32 }
0x21e1   : > { %8158 = vmatprep.subr.bf16.mxu1 %v13257_v32 }
0x21e4   : > { %8159 = vmatpush3.bf16.msra.mxu1 %v11673_v49 }
0x21e5   : > { %8160 = vmatprep.subr.bf16.mxu1 %v13257_v32 }
0x21e8   : > { %8161 = vmatpush3.bf16.msra.mxu1 %v11680_v63 }
0x21e9   : > { %8162 = vmatprep.subr.bf16.mxu1 %v13257_v32 }
0x21ec   : > { %8163 = vmatpush3.bf16.msra.mxu1 %v11687_v39 }
0x21ed   : > { %8164 = vmatprep.subr.bf16.mxu1 %v13257_v32 }
0x21f0   : > { %8165 = vmatpush3.bf16.msra.mxu1 %v11694_v8 }
0x21f1   : > { %8166 = vmatprep.subr.bf16.mxu1 %v13257_v32 }
0x21f4   : > { %8167 = vmatpush3.bf16.msra.mxu1 %v11701_v53 }
0x21f5   : > { %8168 = vmatprep.subr.bf16.mxu1 %v13257_v32 }
0x21f8   : > { %8169 = vmatpush3.bf16.msra.mxu1 %v11708_v44 }
0x21f9   : > { %8170 = vmatprep.subr.bf16.mxu1 %v13257_v32 }
0x21fc   : > { %8171 = vmatpush3.bf16.msra.mxu1 %v11715_v6 }
0x21fd   : > { %8176 = vmatprep.subr.bf16.mxu1 %v13257_v32 }
0x22b2   : > { %v8154_v55 = vpop.f32.mrb[92].mxu1 }
0x22b3   : > { %4219 = vrot.lane.b32.xlu1 %v8154_v55, %s9041_s20  ;;  %v4202_v54 = vpop.f32.mrb[93].mxu1  ;;  %v11748_v55 = vld [vmem:[%s13075_s8 + $0x90] sm:$0xff]  }
0x22b4   : > { %v8155_v56 = vpop.f32.mrb[94].mxu1  ;;  %13441 = vst [vmem:[#allocation22_spill] sm:$0xff] %v11748_v55 }
0x22b5   : > { %4221 = vrot.lane.b32.xlu0 %v8155_v56, %s9041_s20  ;;  %v4205_v26 = vpop.f32.mrb[95].mxu1  ;;  %v11761_v56 = vld [vmem:[%s13075_s8 + $0x8] sm:$0xff]  }
0x22b6   : > { %13443 = vst [vmem:[#allocation24_spill] sm:$0xff] %v11761_v56 }
0x2325   : > { %v4220_v47 = vpop.permute.xlu1 %4219 }
0x2326   : > { %v4225_v51 = vsel %vm1219_vm2, %v4202_v54, %v4220_v47  ;;  %v11754_v54 = vld [vmem:[%s13075_s8 + $0x48] sm:$0xff]   ;;  %v11773_v47 = vld [vmem:[%s13075_s8 + $0x50] sm:$0xff]  }
0x2327   : > { %v4222_v31 = vpop.permute.xlu0 %4221  ;;  %13442 = vst [vmem:[#allocation23_spill] sm:$0xff] %v11754_v54  ;;  %13445 = vst [vmem:[#allocation26_spill] sm:$0xff] %v11773_v47 }
0x2328   : > { %v4226_v25 = vsel %vm1219_vm2, %v4205_v26, %v4222_v31  ;;  %v11767_v26 = vld [vmem:[%s13075_s8 + $0x98] sm:$0xff]   ;;  %v11780_v31 = vld [vmem:[%s13075_s8 + $0x10] sm:$0xff]  }
0x2329   : > { %v4227_v22 = vpack.c.bf16 %v4226_v25, %v4225_v51  ;;  %13444 = vst [vmem:[#allocation25_spill] sm:$0xff] %v11767_v26  ;;  %13446 = vst [vmem:[#allocation27_spill] sm:$0xff] %v11780_v31 }
0x232b   : > { %v4229_v27 = vunpack.c.h.bf16 %v4227_v22  ;;  %8173 = vmatmul.mubr.bf16.vlgmr.msra.gmra.mrb[96].mxu1 %v4227_v22  ;;  %v4228_v59 = vunpack.c.l.bf16 %v4227_v22 }
0x232c   : > { %8177 = vmatpush3.bf16.msra.mxu1 %v11726_v28  ;;  %8192 = vmatprep.mubr.msk.bf16.mxu1 %vm9040_vm0, %v13257_v32 }
0x232d   : > { %v4231_v7 = vsub.f32 %v4226_v25, %v4229_v27  ;;  %v4230_v23 = vsub.f32 %v4225_v51, %v4228_v59  ;;  %8178 = vmatprep.subr.bf16.mxu1 %v13257_v32  ;;  %v11786_v51 = vld [vmem:[%s13075_s8 + $0xa0] sm:$0xff]   ;;  %v11792_v25 = vld [vmem:[%s13075_s8 + $0x58] sm:$0xff]   ;;  %v11805_v27 = vld [vmem:[%s13075_s8 + $0xa8] sm:$0xff]  }
0x232e   : > { %13447 = vst [vmem:[#allocation28_spill] sm:$0xff] %v11786_v51  ;;  %13448 = vst [vmem:[#allocation29_spill] sm:$0xff] %v11792_v25  ;;  %v11811_v59 = vld [vmem:[%s13075_s8 + $0x60] sm:$0xff]  }
0x232f   : > { %v4232_v2 = vpack.c.bf16 %v4231_v7, %v4230_v23  ;;  %13450 = vst [vmem:[#allocation31_spill] sm:$0xff] %v11805_v27  ;;  %13451 = vst [vmem:[#allocation32_spill] sm:$0xff] %v11811_v59  ;;  %v11818_v7 = vld [vmem:[%s13075_s8 + $0x20] sm:$0xff]   ;;  %v11824_v23 = vld [vmem:[%s13075_s8 + $0xb0] sm:$0xff]  }
0x2330   : > { %8179 = vmatpush3.bf16.msra.mxu1 %v11735_v33  ;;  %13452 = vst [vmem:[#allocation33_spill] sm:$0xff] %v11818_v7  ;;  %13453 = vst [vmem:[#allocation34_spill] sm:$0xff] %v11824_v23  ;;  %v11882_v33 = vld [vmem:[%s9203_s17 + $0x8] sm:$0xff] }
0x2331   : > { %4265 = vmatprep.mubr.bf16.mxu0 %v4232_v2  ;;  %8180 = vmatprep.subr.bf16.mxu1 %v13257_v32  ;;  %v11830_v2 = vld [vmem:[%s13075_s8 + $0x68] sm:$0xff]  }
0x2332   : > { %4266 = vmatmul.mubr.bf16.vlgmr.msra.gmra.mrb[96].mxu0 %v4227_v22  ;;  %v11799_v22 = vld [vmem:[%s13075_s8 + $0x18] sm:$0xff]   ;;  %13454 = vst [vmem:[#allocation35_spill] sm:$0xff] %v11830_v2 }
0x2333   : > { %7136 = vmatpush3.bf16.msra.mxu0 %v11742_v36  ;;  %13449 = vst [vmem:[#allocation30_spill] sm:$0xff] %v11799_v22 }
0x2334   : > { %8181 = vmatpush3.bf16.msra.mxu1 %v11748_v55  ;;  %7137 = vmatprep.subr.bf16.mxu0 %v11754_v54 }
0x2335   : > { %8182 = vmatprep.subr.bf16.mxu1 %v13257_v32 }
0x2337   : > { %7138 = vmatpush3.bf16.msra.mxu0 %v11761_v56 }
0x2338   : > { %8183 = vmatpush3.bf16.msra.mxu1 %v11767_v26  ;;  %7139 = vmatprep.subr.bf16.mxu0 %v11773_v47 }
0x2339   : > { %8184 = vmatprep.subr.bf16.mxu1 %v13257_v32 }
0x233b   : > { %7140 = vmatpush3.bf16.msra.mxu0 %v11780_v31 }
0x233c   : > { %8185 = vmatpush3.bf16.msra.mxu1 %v11786_v51  ;;  %7141 = vmatprep.subr.bf16.mxu0 %v11792_v25 }
0x233d   : > { %8186 = vmatprep.subr.bf16.mxu1 %v13257_v32 }
0x233f   : > { %7142 = vmatpush3.bf16.msra.mxu0 %v11799_v22 }
0x2340   : > { %8187 = vmatpush3.bf16.msra.mxu1 %v11805_v27  ;;  %7143 = vmatprep.subr.bf16.mxu0 %v11811_v59  ;;  %v11874_v59 = vld [vmem:[%s13076_s9 + $0x40] sm:$0xff]  }
0x2341   : > { %8188 = vmatprep.subr.bf16.mxu1 %v13257_v32  ;;  %13461 = vst [vmem:[#allocation42_spill] sm:$0xff] %v11874_v59 }
0x2343   : > { %7144 = vmatpush3.bf16.msra.mxu0 %v11818_v7  ;;  %v11837_v7 = vld [vmem:[%s13075_s8 + $0x28] sm:$0xff]  }
0x2344   : > { %8189 = vmatpush3.bf16.msra.mxu1 %v11824_v23  ;;  %7145 = vmatprep.subr.bf16.mxu0 %v11830_v2  ;;  %13455 = vst [vmem:[#allocation36_spill] sm:$0xff] %v11837_v7  ;;  %v11843_v23 = vld [vmem:[%s13075_s8 + $0xb8] sm:$0xff]   ;;  %v11849_v2 = vld [vmem:[%s13075_s8 + $0x70] sm:$0xff]  }
0x2345   : > { %8190 = vmatprep.subr.bf16.mxu1 %v13257_v32  ;;  %13456 = vst [vmem:[#allocation37_spill] sm:$0xff] %v11843_v23  ;;  %13457 = vst [vmem:[#allocation38_spill] sm:$0xff] %v11849_v2 }
0x2347   : > { %7146 = vmatpush3.bf16.msra.mxu0 %v11837_v7  ;;  %v11856_v7 = vld [vmem:[%s13075_s8 + $0x30] sm:$0xff]  }
0x2348   : > { %8191 = vmatpush3.bf16.msra.mxu1 %v11843_v23  ;;  %7147 = vmatprep.subr.bf16.mxu0 %v11849_v2  ;;  %13458 = vst [vmem:[#allocation39_spill] sm:$0xff] %v11856_v7  ;;  %v11862_v23 = vld [vmem:[%s13075_s8 + $0x78] sm:$0xff]  }
0x2349   : > { %8196 = vmatprep.subr.bf16.mxu1 %v13257_v32  ;;  %13459 = vst [vmem:[#allocation40_spill] sm:$0xff] %v11862_v23  ;;  %v11868_v2 = vld [vmem:[%s13075_s8 + $0x38] sm:$0xff]  }
0x234a   : > { %13460 = vst [vmem:[#allocation41_spill] sm:$0xff] %v11868_v2 }
0x234b   : > { %7148 = vmatpush3.bf16.msra.mxu0 %v11856_v7 }
0x234c   : > { %7149 = vmatprep.subr.bf16.mxu0 %v11862_v23 }
0x234f   : > { %7150 = vmatpush3.bf16.msra.mxu0 %v11868_v2  ;;  %v11878_v2 = vld [vmem:[%s9203_s17] sm:$0xff] }
0x2350   : > { %7166 = vmatprep.subr.bf16.mxu0 %v11874_v59 }
0x23fe   : > { %v4308_v7 = vpop.f32.mrb[96].mxu1 }
0x23ff   : > { %v8174_v27 = vpop.f32.mrb[97].mxu1 }
0x2400   : > { %v4311_v22 = vpop.f32.mrb[98].mxu1 }
0x2401   : > { %v8175_v23 = vpop.f32.mrb[99].mxu1 }
0x2405   : > { %v7120_v25 = vpop.f32.mrb[96].mxu0 }
0x2406   : > { %v7121_v51 = vpop.f32.mrb[97].mxu0 }
0x2407   : > { %v7122_v31 = vadd.f32 %v7121_v51, %v7120_v25  ;;  %v7123_v47 = vpop.f32.mrb[98].mxu0 }
0x2408   : > { %v7124_v26 = vpop.f32.mrb[99].mxu0 }
0x2409   : > { %v4309_v56 = vadd.f32 %v7122_v31, %v4308_v7  ;;  %v7125_v54 = vadd.f32 %v7124_v26, %v7123_v47  ;;  %v11890_v26 = vld [vmem:[%s13076_s9 + $0x80] sm:$0xff]   ;;  %v11913_v31 = vld [vmem:[%s13076_s9 + $0x48] sm:$0xff]  }
0x240a   : > { %13462 = vst [vmem:[#allocation43_spill] sm:$0xff] %v11890_v26  ;;  %v11906_v47 = vld [vmem:[%s13076_s9] sm:$0xff]   ;;  %13465 = vst [vmem:[#allocation46_spill] sm:$0xff] %v11913_v31 }
0x240b   : > { %v4315_v55 = vmul.f32 %v11878_v2, %v4309_v56  ;;  %v4312_v36 = vadd.f32 %v7125_v54, %v4311_v22  ;;  %v11899_v56 = vld [vmem:[%s13076_s9 + $0x88] sm:$0xff]   ;;  %13464 = vst [vmem:[#allocation45_spill] sm:$0xff] %v11906_v47 }
0x240c   : > { %13463 = vst [vmem:[#allocation44_spill] sm:$0xff] %v11899_v56  ;;  %v11920_v22 = vld [vmem:[%s13076_s9 + $0x8] sm:$0xff]  }
0x240d   : > { %v4316_v59 = vmul.f32 %v11882_v33, %v4312_v36  ;;  %v4317_v27 = vmul.f32 %v11878_v2, %v4315_v55  ;;  %13466 = vst [vmem:[#allocation47_spill] sm:$0xff] %v11920_v22 }
0x240f   : > { %v4318_v23 = vmul.f32 %v11882_v33, %v4316_v59 }
0x2411   : > { %v4319_v28 = vpack.c.bf16 %v4318_v23, %v4317_v27 }
0x2413   : > { %8193 = vmatmul.mubr.bf16.vlgmr.msra.gmra.mrb[100].mxu1 %v4319_v28  ;;  %v4320_v51 = vunpack.c.l.bf16 %v4319_v28  ;;  %v4321_v25 = vunpack.c.h.bf16 %v4319_v28 }
0x2414   : > { %8197 = vmatpush3.bf16.msra.mxu1 %v11890_v26  ;;  %8212 = vmatprep.mubr.msk.bf16.mxu1 %vm9040_vm0, %v13257_v32 }
0x2415   : > { %8198 = vmatprep.subr.bf16.mxu1 %v13257_v32  ;;  %v4322_v36 = vsub.f32 %v4317_v27, %v4320_v51  ;;  %v4323_v55 = vsub.f32 %v4318_v23, %v4321_v25 }
0x2417   : > { %v4324_v54 = vpack.c.bf16 %v4323_v55, %v4322_v36 }
0x2418   : > { %8199 = vmatpush3.bf16.msra.mxu1 %v11899_v56 }
0x2419   : > { %4357 = vmatprep.mubr.bf16.mxu0 %v4324_v54  ;;  %8200 = vmatprep.subr.bf16.mxu1 %v13257_v32 }
0x241a   : > { %4358 = vmatmul.mubr.bf16.vlgmr.msra.gmra.mrb[100].mxu0 %v4319_v28 }
0x241b   : > { %7167 = vmatpush3.bf16.msra.mxu0 %v11906_v47  ;;  %4439 = vmatprep.mubr.bf16.mxu0 %v4324_v54 }
0x241c   : > { %8201 = vmatpush3.bf16.msra.mxu1 %v11252_v46  ;;  %7168 = vmatprep.subr.bf16.mxu0 %v11913_v31  ;;  %v11927_v46 = vld [vmem:[%s13076_s9 + $0x50] sm:$0xff]  }
0x241d   : > { %8202 = vmatprep.subr.bf16.mxu1 %v13257_v32  ;;  %13467 = vst [vmem:[#allocation48_spill] sm:$0xff] %v11927_v46 }
0x241f   : > { %7169 = vmatpush3.bf16.msra.mxu0 %v11920_v22 }
0x2420   : > { %8203 = vmatpush3.bf16.msra.mxu1 %v11261_v43  ;;  %7170 = vmatprep.subr.bf16.mxu0 %v11927_v46  ;;  %v11952_v43 = vld [vmem:[%s13077_s10] sm:$0xff]  }
0x2421   : > { %8204 = vmatprep.subr.bf16.mxu1 %v13257_v32 }
0x2423   : > { %7171 = vmatpush3.bf16.msra.mxu0 %v11269_v14  ;;  %v13468_v14 = vld [vmem:[#allocation3_spill] sm:$0xff] }
0x2424   : > { %8205 = vmatpush3.bf16.msra.mxu1 %v11275_v57  ;;  %7172 = vmatprep.subr.bf16.mxu0 %v11281_v4  ;;  %v11962_v57 = vld [vmem:[%s13077_s10 + $0x8] sm:$0xff]   ;;  %v13469_v4 = vld [vmem:[#allocation5_spill] sm:$0xff] }
0x2425   : > { %8206 = vmatprep.subr.bf16.mxu1 %v13257_v32 }
0x2427   : > { %7173 = vmatpush3.bf16.msra.mxu0 %v11288_v17  ;;  %v11971_v17 = vld [vmem:[%s13077_s10 + $0x10] sm:$0xff]  }
0x2428   : > { %8207 = vmatpush3.bf16.msra.mxu1 %v11294_v30  ;;  %7174 = vmatprep.subr.bf16.mxu0 %v11300_v20  ;;  %v11978_v30 = vld [vmem:[%s13077_s10 + $0x18] sm:$0xff]   ;;  %v11985_v20 = vld [vmem:[%s13077_s10 + $0x20] sm:$0xff]  }
0x2429   : > { %8208 = vmatprep.subr.bf16.mxu1 %v13257_v32  ;;  %13470 = vst [vmem:[#allocation49_spill] sm:$0xff] %v11985_v20 }
0x242b   : > { %7175 = vmatpush3.bf16.msra.mxu0 %v11307_v24  ;;  %v11992_v24 = vld [vmem:[%s13077_s10 + $0x28] sm:$0xff]  }
0x242c   : > { %8209 = vmatpush3.bf16.msra.mxu1 %v11313_v11  ;;  %7176 = vmatprep.subr.bf16.mxu0 %v11319_v34  ;;  %13471 = vst [vmem:[#allocation50_spill] sm:$0xff] %v11992_v24  ;;  %v11999_v11 = vld [vmem:[%s13077_s10 + $0x30] sm:$0xff]   ;;  %v12006_v34 = vld [vmem:[%s13077_s10 + $0x38] sm:$0xff]  }
0x242d   : > { %8210 = vmatprep.subr.bf16.mxu1 %v13257_v32  ;;  %13472 = vst [vmem:[#allocation51_spill] sm:$0xff] %v11999_v11  ;;  %13473 = vst [vmem:[#allocation52_spill] sm:$0xff] %v12006_v34 }
0x242f   : > { %7177 = vmatpush3.bf16.msra.mxu0 %v11326_v60 }
0x2430   : > { %8211 = vmatpush3.bf16.msra.mxu1 %v11332_v29  ;;  %7178 = vmatprep.subr.bf16.mxu0 %v11338_v48 }
0x2431   : > { %8232 = vmatprep.subr.bf16.mxu1 %v13257_v32 }
0x2433   : > { %7179 = vmatpush3.bf16.msra.mxu0 %v11345_v62  ;;  %8213 = vmatmul.mubr.bf16.vlgmr.msra.gmra.mrb[104].mxu1 %v4319_v28 }
0x2434   : > { %7180 = vmatprep.subr.bf16.mxu0 %v11352_v0  ;;  %8233 = vmatpush3.bf16.msra.mxu1 %v11952_v43 }
0x2435   : > { %8234 = vmatprep.subr.bf16.mxu1 %v13257_v32  ;;  %8248 = vmatprep.mubr.msk.bf16.mxu1 %vm9040_vm0, %v13257_v32 }
0x2437   : > { %7181 = vmatpush3.bf16.msra.mxu0 %v13468_v14 }
0x2438   : > { %8235 = vmatpush3.bf16.msra.mxu1 %v11962_v57 }
0x2439   : > { %8236 = vmatprep.subr.bf16.mxu1 %v13257_v32 }
0x243a   : > { %4440 = vmatmul.mubr.bf16.vlgmr.msra.gmra.mrb[104].mxu0 %v4319_v28 }
0x243b   : > { %8228 = vmatprep.mubr.msk.bf16.mxu0 %vm1148_vm1, %v13469_v4 }
0x243c   : > { %8237 = vmatpush3.bf16.msra.mxu1 %v11971_v17 }
0x243d   : > { %8238 = vmatprep.subr.bf16.mxu1 %v13257_v32 }
0x2440   : > { %8239 = vmatpush3.bf16.msra.mxu1 %v11978_v30 }
0x2441   : > { %8240 = vmatprep.subr.bf16.mxu1 %v13257_v32 }
0x2444   : > { %8241 = vmatpush3.bf16.msra.mxu1 %v11985_v20 }
0x2445   : > { %8242 = vmatprep.subr.bf16.mxu1 %v13257_v32 }
0x2448   : > { %8243 = vmatpush3.bf16.msra.mxu1 %v11992_v24 }
0x2449   : > { %8244 = vmatprep.subr.bf16.mxu1 %v13257_v32 }
0x244c   : > { %8245 = vmatpush3.bf16.msra.mxu1 %v11999_v11 }
0x244d   : > { %8246 = vmatprep.subr.bf16.mxu1 %v13257_v32 }
0x2450   : > { %8247 = vmatpush3.bf16.msra.mxu1 %v12006_v34 }
0x24e6   : > { %v4400_v60 = vpop.f32.mrb[100].mxu1 }
0x24e7   : > { %v8194_v29 = vpop.f32.mrb[101].mxu1 }
0x24e8   : > { %v4403_v48 = vpop.f32.mrb[102].mxu1 }
0x24e9   : > { %v8195_v62 = vpop.f32.mrb[103].mxu1 }
0x24ed   : > { %v7151_v0 = vpop.f32.mrb[100].mxu0 }
0x24ee   : > { %v7152_v28 = vpop.f32.mrb[101].mxu0 }
0x24ef   : > { %v7153_v59 = vadd.f32 %v7152_v28, %v7151_v0  ;;  %v7154_v7 = vpop.f32.mrb[102].mxu0 }
0x24f0   : > { %v7155_v27 = vpop.f32.mrb[103].mxu0 }
0x24f1   : > { %v4401_v23 = vadd.f32 %v7153_v59, %v4400_v60  ;;  %v7156_v51 = vadd.f32 %v7155_v27, %v7154_v7 }
0x24f3   : > { %v4404_v25 = vadd.f32 %v7156_v51, %v4403_v48 }
0x24f5   : > { %v4489_v36 = vpack.c.bf16 %v4404_v25, %v4401_v23 }
0x24f7   : > { %v4492_v55 = vunpack.c.h.bf16 %v4489_v36  ;;  %8216 = vmatprep.subr.bf16.mxu0 %v4489_v36  ;;  %v4491_v54 = vunpack.c.l.bf16 %v4489_v36 }
0x24f8   : > { %8217 = vmatpush3.bf16.msra.mxu0 %v4489_v36 }
0x24f9   : > { %v4496_v14 = vsub.f32 %v4404_v25, %v4492_v55  ;;  %v4495_v4 = vsub.f32 %v4401_v23, %v4491_v54 }
0x24fb   : > { %v4499_v46 = vpack.c.bf16 %v4496_v14, %v4495_v4  ;;  %v12041_v14 = vld [vmem:[%s9462_s19 + $0x8] sm:$0xff] }
0x2506   : > { %v4482_v22 = vpop.f32.mrb[104].mxu1 }
0x2507   : > { %v8214_v29 = vpop.f32.mrb[105].mxu1 }
0x2508   : > { %v4485_v31 = vpop.f32.mrb[106].mxu1 }
0x2509   : > { %v8215_v62 = vpop.f32.mrb[107].mxu1 }
0x250d   : > { %v7182_v47 = vpop.f32.mrb[104].mxu0 }
0x250e   : > { %v7183_v56 = vpop.f32.mrb[105].mxu0 }
0x250f   : > { %v7184_v0 = vadd.f32 %v7183_v56, %v7182_v47  ;;  %v7185_v28 = vpop.f32.mrb[106].mxu0  ;;  %v12035_v47 = vld [vmem:[%s9456_s24] sm:$0xff] }
0x2510   : > { %v7186_v26 = vpop.f32.mrb[107].mxu0 }
0x2511   : > { %v4483_v60 = vadd.f32 %v7184_v0, %v4482_v22  ;;  %v7187_v59 = vadd.f32 %v7186_v26, %v7185_v28  ;;  %v12031_v26 = vld [vmem:[%s9462_s19] sm:$0xff] }
0x2513   : > { %v4486_v48 = vadd.f32 %v7187_v59, %v4485_v31 }
0x2515   : > { %v4490_v7 = vpack.c.bf16 %v4486_v48, %v4483_v60 }
0x2517   : > { %v4494_v27 = vunpack.c.h.bf16 %v4490_v7  ;;  %8218 = vmatprep.subr.bf16.mxu0 %v4490_v7  ;;  %v4493_v51 = vunpack.c.l.bf16 %v4490_v7 }
0x2518   : > { %8219 = vmatpush3.bf16.msra.mxu0 %v4490_v7 }
0x2519   : > { %v4498_v25 = vsub.f32 %v4486_v48, %v4494_v27  ;;  %8220 = vmatprep.subr.bf16.mxu0 %v4499_v46  ;;  %v4497_v23 = vsub.f32 %v4483_v60, %v4493_v51 }
0x251b   : > { %v4500_v55 = vpack.c.bf16 %v4498_v25, %v4497_v23 }
0x251c   : > { %8221 = vmatpush3.bf16.msra.mxu0 %v4499_v46 }
0x251d   : > { %8222 = vmatprep.subr.bf16.mxu0 %v4500_v55 }
0x2520   : > { %8223 = vmatpush3.bf16.msra.mxu0 %v4500_v55 }
0x2521   : > { %8224 = vmatprep.subr.bf16.mxu0 %v4489_v36 }
0x2524   : > { %8225 = vmatpush3.bf16.msra.mxu0 %v4489_v36 }
0x2525   : > { %8226 = vmatprep.subr.bf16.mxu0 %v4490_v7 }
0x2528   : > { %8227 = vmatpush3.bf16.msra.mxu0 %v4490_v7 }
0x2529   : > { %8252 = vmatprep.subr.bf16.mxu0 %v13257_v32 }
0x252b   : > { %8229 = vmatmul.mubr.msk.bf16.vlgmr.msra.gmra.mrb[108].mxu0 %vm1148_vm1, %v11390_v38 }
0x252c   : > { %8253 = vmatpush3.bf16.msra.mxu0 %v11952_v43  ;;  %8268 = vmatprep.mubr.msk.bf16.mxu0 %vm9040_vm0, %v13257_v32 }
0x252d   : > { %8254 = vmatprep.subr.bf16.mxu0 %v13257_v32 }
0x2530   : > { %8255 = vmatpush3.bf16.msra.mxu0 %v11962_v57 }
0x2531   : > { %8256 = vmatprep.subr.bf16.mxu0 %v13257_v32 }
0x2534   : > { %8257 = vmatpush3.bf16.msra.mxu0 %v11971_v17 }
0x2535   : > { %8258 = vmatprep.subr.bf16.mxu0 %v13257_v32 }
0x2538   : > { %8259 = vmatpush3.bf16.msra.mxu0 %v11978_v30 }
0x2539   : > { %8260 = vmatprep.subr.bf16.mxu0 %v13257_v32 }
0x253c   : > { %8261 = vmatpush3.bf16.msra.mxu0 %v11985_v20 }
0x253d   : > { %8262 = vmatprep.subr.bf16.mxu0 %v13257_v32 }
0x2540   : > { %8263 = vmatpush3.bf16.msra.mxu0 %v11992_v24 }
0x2541   : > { %8264 = vmatprep.subr.bf16.mxu0 %v13257_v32 }
0x2544   : > { %8265 = vmatpush3.bf16.msra.mxu0 %v11999_v11 }
0x2545   : > { %8266 = vmatprep.subr.bf16.mxu0 %v13257_v32 }
0x2548   : > { %8267 = vmatpush3.bf16.msra.mxu0 %v12006_v34 }
0x2549   : > { %7231 = vmatprep.subr.bf16.mxu0 %v11414_v10  ;;  %v12045_v10 = vld [vmem:[%s9456_s24 + $0x8] sm:$0xff] }
0x25fe   : > { %v8230_v38 = vpop.f32.mrb[108].mxu0 }
0x25ff   : > { %v4552_v56 = vmul.f32 %v12031_v26, %v8230_v38  ;;  %v4569_v31 = vmul.f32 %v12035_v47, %v8230_v38  ;;  %v4535_v22 = vpop.f32.mrb[109].mxu0 }
0x2600   : > { %v4550_v46 = vmul.f32 %v12035_v47, %v4535_v22  ;;  %v4571_v36 = vmul.f32 %v12031_v26, %v4535_v22  ;;  %v8231_v54 = vpop.f32.mrb[110].mxu0 }
0x2601   : > { %v4553_v4 = vmul.f32 %v12041_v14, %v8231_v54  ;;  %v4570_v29 = vmul.f32 %v12045_v10, %v8231_v54  ;;  %v4538_v62 = vpop.f32.mrb[111].mxu0 }
0x2602   : > { %v4554_v0 = vadd.f32 %v4552_v56, %v4550_v46  ;;  %v4573_v28 = vsub.f32 %v4569_v31, %v4571_v36  ;;  %v4551_v60 = vmul.f32 %v12045_v10, %v4538_v62  ;;  %v4572_v59 = vmul.f32 %v12041_v14, %v4538_v62 }
0x2604   : > { %v4555_v48 = vadd.f32 %v4553_v4, %v4551_v60  ;;  %v4574_v7 = vsub.f32 %v4570_v29, %v4572_v59 }
0x2606   : > { %v4556_v27 = vpack.c.bf16 %v4555_v48, %v4554_v0  ;;  %v4575_v51 = vpack.c.bf16 %v4574_v7, %v4573_v28 }
0x2608   : > { %v4558_v25 = vunpack.c.h.bf16 %v4556_v27  ;;  %v4577_v23 = vunpack.c.h.bf16 %v4575_v51  ;;  %v4576_v55 = vunpack.c.l.bf16 %v4575_v51  ;;  %v4557_v38 = vunpack.c.l.bf16 %v4556_v27 }
0x260a   : > { %v4560_v22 = vsub.f32 %v4555_v48, %v4558_v25  ;;  %v4579_v34 = vsub.f32 %v4574_v7, %v4577_v23  ;;  %v4578_v11 = vsub.f32 %v4573_v28, %v4576_v55  ;;  %v4559_v24 = vsub.f32 %v4554_v0, %v4557_v38 }
0x260c   : > { %v4580_v54 = vpack.c.bf16 %v4579_v34, %v4578_v11  ;;  %v4561_v20 = vpack.c.bf16 %v4560_v22, %v4559_v24  ;;  %v13475_v24 = vld [vmem:[#allocation6_spill] sm:$0xff]  ;;  %v13476_v11 = vld [vmem:[#allocation7_spill] sm:$0xff]  ;;  %v13477_v34 = vld [vmem:[#allocation8_spill] sm:$0xff] }
0x260e   : > { %4582 = vrot.lane.b32.xlu0 %v4580_v54, %s9041_s20  ;;  %4563 = vrot.lane.b32.xlu1 %v4561_v20, %s9041_s20  ;;  %v13474_v20 = vld [vmem:[#allocation4_spill] sm:$0xff] }
0x2680   : > { %v4583_v56 = vpop.permute.xlu0 %4582  ;;  %v4564_v31 = vpop.permute.xlu1 %4563 }
0x2681   : > { %v4586_v46 = vsel %vm1219_vm2, %v4575_v51, %v4583_v56  ;;  %v4567_v36 = vsel %vm1219_vm2, %v4556_v27, %v4564_v31 }
0x2682   : > { %8249 = vmatmul.mubr.bf16.vlgmr.msra.gmra.mrb[108].mxu1 %v4567_v36  ;;  %8269 = vmatmul.mubr.bf16.vlgmr.msra.gmra.mrb[112].mxu0 %v4586_v46 }
0x2683   : > { %8284 = vmatprep.mubr.msk.bf16.mxu1 %vm1148_vm1, %v11432_v15  ;;  %7232 = vmatpush3.bf16.msra.mxu0 %v11439_v19  ;;  %v13478_v15 = vld [vmem:[#allocation9_spill] sm:$0xff]  ;;  %v13479_v19 = vld [vmem:[#allocation10_spill] sm:$0xff] }
0x2684   : > { %7233 = vmatprep.subr.bf16.mxu0 %v11445_v21  ;;  %v13480_v21 = vld [vmem:[#allocation11_spill] sm:$0xff] }
0x2687   : > { %7234 = vmatpush3.bf16.msra.mxu0 %v11451_v37  ;;  %v13481_v37 = vld [vmem:[#allocation12_spill] sm:$0xff] }
0x2688   : > { %7235 = vmatprep.subr.bf16.mxu0 %v11457_v16  ;;  %v13482_v16 = vld [vmem:[#allocation13_spill] sm:$0xff] }
0x268b   : > { %7236 = vmatpush3.bf16.msra.mxu0 %v11463_v61  ;;  %v13483_v61 = vld [vmem:[#allocation14_spill] sm:$0xff] }
0x268c   : > { %7237 = vmatprep.subr.bf16.mxu0 %v11469_v12  ;;  %v13484_v12 = vld [vmem:[#allocation16_spill] sm:$0xff] }
0x268d   : > { %v4588_v4 = vmul.f32 %v11592_v50, %v13484_v12  ;;  %v4631_v29 = vmul.f32 %v11604_v9, %v13484_v12  ;;  %v4589_v7 = vmul.f32 %v11595_v18, %v13484_v12  ;;  %v4632_v27 = vmul.f32 %v11607_v52, %v13484_v12 }
0x268f   : > { %7238 = vmatpush3.bf16.msra.mxu0 %v13474_v20 }
0x2690   : > { %7239 = vmatprep.subr.bf16.mxu0 %v13475_v24 }
0x2693   : > { %7240 = vmatpush3.bf16.msra.mxu0 %v13476_v11 }
0x2694   : > { %7241 = vmatprep.subr.bf16.mxu0 %v13477_v34 }
0x2697   : > { %7242 = vmatpush3.bf16.msra.mxu0 %v13478_v15 }
0x2698   : > { %7243 = vmatprep.subr.bf16.mxu0 %v13479_v19 }
0x269b   : > { %7244 = vmatpush3.bf16.msra.mxu0 %v13480_v21 }
0x269c   : > { %7245 = vmatprep.subr.bf16.mxu0 %v13481_v37 }
0x269f   : > { %7246 = vmatpush3.bf16.msra.mxu0 %v13482_v16 }
0x26a0   : > { %7262 = vmatprep.subr.bf16.mxu0 %v13483_v61 }
0x2755   : > { %v4624_v62 = vpop.f32.mrb[108].mxu1  ;;  %v4667_v0 = vpop.f32.mrb[112].mxu0 }
0x2756   : > { %v4625_v28 = vadd.f32 %v4624_v62, %v4588_v4  ;;  %v4668_v60 = vadd.f32 %v4667_v0, %v4631_v29  ;;  %v8250_v59 = vpop.f32.mrb[109].mxu1  ;;  %v8270_v48 = vpop.f32.mrb[113].mxu0 }
0x2757   : > { %v4627_v51 = vpop.f32.mrb[110].mxu1  ;;  %v4670_v25 = vpop.f32.mrb[114].mxu0 }
0x2758   : > { %v4674_v23 = vmul.f32 %v4625_v28, %v11592_v50  ;;  %v4676_v55 = vmul.f32 %v4668_v60, %v11604_v9  ;;  %v4628_v38 = vadd.f32 %v4627_v51, %v4589_v7  ;;  %v4671_v22 = vadd.f32 %v4670_v25, %v4632_v27  ;;  %v8251_v54 = vpop.f32.mrb[111].mxu1  ;;  %v8271_v56 = vpop.f32.mrb[115].mxu0 }
0x275a   : > { %v4675_v31 = vmul.f32 %v4628_v38, %v11595_v18  ;;  %v4677_v46 = vmul.f32 %v4671_v22, %v11607_v52  ;;  %v4678_v36 = vadd.f32 %v4676_v55, %v4674_v23 }
0x275c   : > { %v4679_v20 = vadd.f32 %v4677_v46, %v4675_v31  ;;  %v4680_v24 = vsel %vm1393_vm3, %v4678_v36, 0.0 }
0x275e   : > { %v4681_v11 = vsel %vm1393_vm3, %v4679_v20, 0.0 }
0x275f   : > { %v4682_v34 = vadd.f32 %v4681_v11, %v4680_v24 }
0x2761   : > { %4683 = vadd.xlane.f32.xlu1 %v4682_v34 }
0x27ee   : > { %v4684_v15 = vpop.xlane.xlu1 %4683 }
0x27ef   : > { %v4685_v19 = vrot.slane %v4684_v15, 4 }
0x27f1   : > { %v4686_v21 = vadd.f32 %v4685_v19, %v4684_v15 }
0x27f3   : > { %v4687_v37 = vrot.slane %v4686_v21, 2 }
0x27f5   : > { %v4688_v16 = vadd.f32 %v4687_v37, %v4686_v21 }
0x27f7   : > { %v4689_v61 = vrot.slane %v4688_v16, 1 }
0x27f9   : > { %v4690_v4 = vadd.f32 %v4689_v61, %v4688_v16 }
0x27fb   : > { %8586 = vpush %v4690_v4  ;;  %v4731_v4 = vadd.f32 1e-30, %v11586_v35 }
0x282c   : > { %s8587_s30 = spop %8586 }
0x282d   : > { %v4692_v29 = vstv %s8587_s30 }
0x282e   : > { %v4693_v62 = vadd.f32 1e-30, %v4692_v29 }
0x2830   : > { %8706 = vrcp.f32 %v4693_v62 }
0x2831   : > { %8708 = vrcp.f32 %v4731_v4 }
0x283a   : > { %v8707_v0 = vpop.eup %8706 }
0x283b   : > { %v4695_v59 = vmul.f32 %v8707_v0, %v11586_v35  ;;  %v8709_v29 = vpop.eup %8708 }
0x283d   : > { %v4704_v48 = vmul.f32 %v4695_v59, %v4625_v28  ;;  %v4705_v7 = vmul.f32 %v4695_v59, %v4628_v38  ;;  %v4708_v27 = vmul.f32 %v4695_v59, %v4668_v60  ;;  %v4709_v51 = vmul.f32 %v4695_v59, %v4671_v22 }
0x283e   : > { %v4700_v25 = vmul.f32 %v4695_v59, %v11604_v9  ;;  %v4697_v23 = vmul.f32 %v4695_v59, %v11595_v18  ;;  %v4701_v55 = vmul.f32 %v4695_v59, %v11607_v52  ;;  %v4696_v54 = vmul.f32 %v4695_v59, %v11592_v50 }
0x283f   : > { %v12092_v56 = vsub.f32 %v11552_v58, %v4704_v48  ;;  %v12095_v31 = vsub.f32 %v11555_v42, %v4705_v7  ;;  %v12098_v46 = vsub.f32 %v11558_v40, %v4708_v27  ;;  %v12101_v28 = vsub.f32 %v11561_v41, %v4709_v51  ;;  %v13485_v58 = vld [vmem:[#allocation15_spill] sm:$0xff] }
0x2840   : > { %v12104_v60 = vadd.f32 %v4700_v25, %v11564_v3  ;;  %v12107_v38 = vadd.f32 %v4697_v23, %v11567_v45  ;;  %v12110_v22 = vadd.f32 %v4701_v55, %v11570_v1  ;;  %v12113_v36 = vadd.f32 %v4696_v54, %v13485_v58 }
0x2841   : > { %v4712_v42 = vmul.f32 %v12092_v56, %v12092_v56  ;;  %v4713_v40 = vmul.f32 %v12095_v31, %v12095_v31  ;;  %v4714_v41 = vmul.f32 %v12098_v46, %v12098_v46  ;;  %v4715_v3 = vmul.f32 %v12101_v28, %v12101_v28 }
0x2843   : > { %v4716_v45 = vadd.f32 %v4714_v41, %v4712_v42  ;;  %v4717_v20 = vadd.f32 %v4715_v3, %v4713_v40 }
0x2845   : > { %v4718_v1 = vsel %vm1393_vm3, %v4716_v45, 0.0  ;;  %v4719_v24 = vsel %vm1393_vm3, %v4717_v20, 0.0 }
0x2846   : > { %v4720_v11 = vadd.f32 %v4719_v24, %v4718_v1 }
0x2848   : > { %4721 = vadd.xlane.f32.xlu0 %v4720_v11 }
0x28d5   : > { %v4722_v34 = vpop.xlane.xlu0 %4721 }
0x28d6   : > { %v4723_v15 = vrot.slane %v4722_v34, 4 }
0x28d8   : > { %v4724_v19 = vadd.f32 %v4723_v15, %v4722_v34 }
0x28da   : > { %v4725_v21 = vrot.slane %v4724_v19, 2 }
0x28dc   : > { %v4726_v37 = vadd.f32 %v4725_v21, %v4724_v19 }
0x28de   : > { %v4727_v16 = vrot.slane %v4726_v37, 1 }
0x28e0   : > { %v4728_v61 = vadd.f32 %v4727_v16, %v4726_v37 }
0x28e2   : > { %8588 = vpush %v4728_v61 }
0x2913   : > { %s8589_s13 = spop %8588 }
0x2914   : > { %v12126_v62 = vstv %s8589_s13  ;;  %s482_s13 = scalar_lea.vmem %s13078_s11, %s9186_s0 }
0x2915   : > { %v4733_v0 = vmul.f32 %v8709_v29, %v12126_v62 }
0x2917   : > { %v4734_v59 = vmul.f32 %v4733_v0, %v11592_v50  ;;  %v4735_v48 = vmul.f32 %v4733_v0, %v11595_v18  ;;  %v4738_v51 = vmul.f32 %v4733_v0, %v11604_v9  ;;  %v4739_v35 = vmul.f32 %v4733_v0, %v11607_v52 }
0x2919   : > { %v12132_v7 = vadd.f32 %v4734_v59, %v12092_v56  ;;  %v12135_v27 = vadd.f32 %v4735_v48, %v12095_v31  ;;  %v12144_v50 = vadd.f32 %v4738_v51, %v12098_v46  ;;  %v12147_v18 = vadd.f32 %v4739_v35, %v12101_v28 }
0x291b   : > { %4746 = vrot.lane.b32.xlu1 %v12135_v27, %s9042_s21  ;;  %4744 = vrot.lane.b32.xlu0 %v12132_v7, %s9042_s21 }
0x291f   : > { %4770 = vrot.lane.b32.xlu1 %v12144_v50, %s9042_s21  ;;  %4772 = vrot.lane.b32.xlu0 %v12147_v18, %s9042_s21 }
0x2923   : > { %4750 = vrot.lane.b32.xlu1 %v12132_v7, %s9043_s22  ;;  %4752 = vrot.lane.b32.xlu0 %v12135_v27, %s9043_s22 }
0x2927   : > { %4776 = vrot.lane.b32.xlu1 %v12144_v50, %s9043_s22  ;;  %4778 = vrot.lane.b32.xlu0 %v12147_v18, %s9043_s22 }
0x292b   : > { %4756 = vrot.lane.b32.xlu1 %v12132_v7, %s9044_s25  ;;  %4758 = vrot.lane.b32.xlu0 %v12135_v27, %s9044_s25 }
0x292f   : > { %4782 = vrot.lane.b32.xlu1 %v12144_v50, %s9044_s25  ;;  %4784 = vrot.lane.b32.xlu0 %v12147_v18, %s9044_s25 }
0x298d   : > { %v4747_v9 = vpop.permute.xlu1 %4746  ;;  %v4745_v52 = vpop.permute.xlu0 %4744 }
0x298e   : > { %v4762_v40 = vsel %vm1393_vm3, %v12132_v7, %v4745_v52  ;;  %v4763_v41 = vsel %vm1393_vm3, %v12135_v27, %v4747_v9 }
0x2991   : > { %v4771_v25 = vpop.permute.xlu1 %4770  ;;  %v4773_v23 = vpop.permute.xlu0 %4772 }
0x2992   : > { %v4788_v34 = vsel %vm1393_vm3, %v12144_v50, %v4771_v25  ;;  %v4789_v15 = vsel %vm1393_vm3, %v12147_v18, %v4773_v23 }
0x2995   : > { %v4751_v55 = vpop.permute.xlu1 %4750  ;;  %v4753_v54 = vpop.permute.xlu0 %4752 }
0x2996   : > { %v4764_v3 = vsel %vm1396_vm4, %v4762_v40, %v4751_v55  ;;  %v4765_v1 = vsel %vm1396_vm4, %v4763_v41, %v4753_v54 }
0x2999   : > { %v4777_v58 = vpop.permute.xlu1 %4776  ;;  %v4779_v42 = vpop.permute.xlu0 %4778 }
0x299a   : > { %v4790_v19 = vsel %vm1396_vm4, %v4788_v34, %v4777_v58  ;;  %v4791_v21 = vsel %vm1396_vm4, %v4789_v15, %v4779_v42 }
0x299d   : > { %v4757_v45 = vpop.permute.xlu1 %4756  ;;  %v4759_v20 = vpop.permute.xlu0 %4758 }
0x299e   : > { %v4766_v24 = vsel %vm1399_vm5, %v4764_v3, %v4757_v45  ;;  %v4767_v11 = vsel %vm1399_vm5, %v4765_v1, %v4759_v20 }
0x299f   : > { %v4794_v37 = vmul.f32 %v12035_v47, %v4766_v24  ;;  %v4802_v16 = vmul.f32 %v12031_v26, %v4766_v24  ;;  %v4795_v29 = vmul.f32 %v12045_v10, %v4767_v11  ;;  %v4803_v0 = vmul.f32 %v12041_v14, %v4767_v11 }
0x29a1   : > { %v4783_v61 = vpop.permute.xlu1 %4782  ;;  %v4785_v4 = vpop.permute.xlu0 %4784 }
0x29a2   : > { %v4792_v59 = vsel %vm1399_vm5, %v4790_v19, %v4783_v61  ;;  %v4793_v48 = vsel %vm1399_vm5, %v4791_v21, %v4785_v4 }
0x29a3   : > { %v4796_v51 = vmul.f32 %v12031_v26, %v4792_v59  ;;  %v4800_v35 = vmul.f32 %v12035_v47, %v4792_v59  ;;  %v4797_v9 = vmul.f32 %v12041_v14, %v4793_v48  ;;  %v4801_v52 = vmul.f32 %v12045_v10, %v4793_v48  ;;  %v13489_v59 = vld [vmem:[#allocation22_spill] sm:$0xff]  ;;  %v13490_v48 = vld [vmem:[#allocation23_spill] sm:$0xff] }
0x29a5   : > { %v4798_v25 = vsub.f32 %v4794_v37, %v4796_v51  ;;  %v4804_v23 = vadd.f32 %v4802_v16, %v4800_v35  ;;  %v4799_v55 = vsub.f32 %v4795_v29, %v4797_v9  ;;  %v4805_v54 = vadd.f32 %v4803_v0, %v4801_v52  ;;  %v13486_v37 = vld [vmem:[#allocation19_spill] sm:$0xff]  ;;  %v13487_v29 = vld [vmem:[#allocation20_spill] sm:$0xff]  ;;  %v13488_v0 = vld [vmem:[#allocation21_spill] sm:$0xff] }
0x29a6   : > { %v13491_v51 = vld [vmem:[#allocation24_spill] sm:$0xff]  ;;  %v13492_v35 = vld [vmem:[#allocation25_spill] sm:$0xff]  ;;  %v13493_v9 = vld [vmem:[#allocation26_spill] sm:$0xff] }
0x29a7   : > { %v4806_v58 = vpack.c.bf16 %v4799_v55, %v4798_v25  ;;  %v4807_v42 = vpack.c.bf16 %v4805_v54, %v4804_v23  ;;  %v13494_v52 = vld [vmem:[#allocation27_spill] sm:$0xff] }
0x29a9   : > { %8272 = vmatprep.subr.bf16.mxu1 %v4806_v58  ;;  %v4808_v40 = vunpack.c.l.bf16 %v4806_v58  ;;  %v4809_v41 = vunpack.c.h.bf16 %v4806_v58  ;;  %v4810_v3 = vunpack.c.l.bf16 %v4807_v42  ;;  %v4811_v45 = vunpack.c.h.bf16 %v4807_v42 }
0x29aa   : > { %8273 = vmatpush3.bf16.msra.mxu1 %v4806_v58 }
0x29ab   : > { %8274 = vmatprep.subr.bf16.mxu1 %v4807_v42  ;;  %v4812_v20 = vsub.f32 %v4798_v25, %v4808_v40  ;;  %v4813_v1 = vsub.f32 %v4799_v55, %v4809_v41  ;;  %v4814_v11 = vsub.f32 %v4804_v23, %v4810_v3  ;;  %v4815_v34 = vsub.f32 %v4805_v54, %v4811_v45  ;;  %v13495_v25 = vld [vmem:[#allocation28_spill] sm:$0xff]  ;;  %v13496_v23 = vld [vmem:[#allocation29_spill] sm:$0xff]  ;;  %v13497_v55 = vld [vmem:[#allocation30_spill] sm:$0xff] }
0x29ac   : > { %v13498_v54 = vld [vmem:[#allocation31_spill] sm:$0xff]  ;;  %v13501_v40 = vld [vmem:[#allocation34_spill] sm:$0xff]  ;;  %v13503_v3 = vld [vmem:[#allocation36_spill] sm:$0xff] }
0x29ad   : > { %v4816_v24 = vpack.c.bf16 %v4813_v1, %v4812_v20  ;;  %v4817_v15 = vpack.c.bf16 %v4815_v34, %v4814_v11  ;;  %v13502_v41 = vld [vmem:[#allocation35_spill] sm:$0xff]  ;;  %v13504_v45 = vld [vmem:[#allocation37_spill] sm:$0xff]  ;;  %v13505_v20 = vld [vmem:[#allocation38_spill] sm:$0xff] }
0x29ae   : > { %8275 = vmatpush3.bf16.msra.mxu1 %v4807_v42  ;;  %v13506_v1 = vld [vmem:[#allocation39_spill] sm:$0xff]  ;;  %v13508_v11 = vld [vmem:[#allocation41_spill] sm:$0xff]  ;;  %v13509_v34 = vld [vmem:[#allocation42_spill] sm:$0xff] }
0x29af   : > { %8276 = vmatprep.subr.bf16.mxu1 %v4816_v24 }
0x29b2   : > { %8277 = vmatpush3.bf16.msra.mxu1 %v4816_v24  ;;  %v13507_v24 = vld [vmem:[#allocation40_spill] sm:$0xff] }
0x29b3   : > { %8278 = vmatprep.subr.bf16.mxu1 %v4817_v15 }
0x29b6   : > { %8279 = vmatpush3.bf16.msra.mxu1 %v4817_v15 }
0x29b7   : > { %8280 = vmatprep.subr.bf16.mxu1 %v4806_v58 }
0x29ba   : > { %8281 = vmatpush3.bf16.msra.mxu1 %v4806_v58  ;;  %v13499_v58 = vld [vmem:[#allocation32_spill] sm:$0xff] }
0x29bb   : > { %8282 = vmatprep.subr.bf16.mxu1 %v4807_v42 }
0x29be   : > { %8283 = vmatpush3.bf16.msra.mxu1 %v4807_v42  ;;  %v13500_v42 = vld [vmem:[#allocation33_spill] sm:$0xff] }
0x29bf   : > { %8288 = vmatprep.subr.bf16.mxu1 %v13257_v32 }
0x29c1   : > { %8285 = vmatmul.mubr.msk.bf16.vlgmr.msra.gmra.mrb[112].mxu1 %vm1148_vm1, %v11657_v5 }
0x29c2   : > { %8289 = vmatpush3.bf16.msra.mxu1 %v11664_v13  ;;  %8304 = vmatprep.mubr.msk.bf16.mxu1 %vm9040_vm0, %v13257_v32 }
0x29c3   : > { %8290 = vmatprep.subr.bf16.mxu1 %v13257_v32 }
0x29c6   : > { %8291 = vmatpush3.bf16.msra.mxu1 %v11673_v49 }
0x29c7   : > { %8292 = vmatprep.subr.bf16.mxu1 %v13257_v32 }
0x29ca   : > { %8293 = vmatpush3.bf16.msra.mxu1 %v11680_v63 }
0x29cb   : > { %8294 = vmatprep.subr.bf16.mxu1 %v13257_v32 }
0x29ce   : > { %8295 = vmatpush3.bf16.msra.mxu1 %v11687_v39 }
0x29cf   : > { %8296 = vmatprep.subr.bf16.mxu1 %v13257_v32 }
0x29d2   : > { %8297 = vmatpush3.bf16.msra.mxu1 %v11694_v8 }
0x29d3   : > { %8298 = vmatprep.subr.bf16.mxu1 %v13257_v32 }
0x29d6   : > { %8299 = vmatpush3.bf16.msra.mxu1 %v11701_v53 }
0x29d7   : > { %8300 = vmatprep.subr.bf16.mxu1 %v13257_v32 }
0x29da   : > { %8301 = vmatpush3.bf16.msra.mxu1 %v11708_v44 }
0x29db   : > { %8302 = vmatprep.subr.bf16.mxu1 %v13257_v32 }
0x29de   : > { %8303 = vmatpush3.bf16.msra.mxu1 %v11715_v6 }
0x29df   : > { %8308 = vmatprep.subr.bf16.mxu1 %v13257_v32 }
0x2a94   : > { %v8286_v5 = vpop.f32.mrb[112].mxu1 }
0x2a95   : > { %4869 = vrot.lane.b32.xlu1 %v8286_v5, %s9041_s20  ;;  %v4852_v13 = vpop.f32.mrb[113].mxu1 }
0x2a96   : > { %v8287_v49 = vpop.f32.mrb[114].mxu1 }
0x2a97   : > { %4871 = vrot.lane.b32.xlu0 %v8287_v49, %s9041_s20  ;;  %v4855_v63 = vpop.f32.mrb[115].mxu1 }
0x2b07   : > { %v4870_v39 = vpop.permute.xlu1 %4869 }
0x2b08   : > { %v4875_v53 = vsel %vm1219_vm2, %v4852_v13, %v4870_v39 }
0x2b09   : > { %v4872_v8 = vpop.permute.xlu0 %4871 }
0x2b0a   : > { %v4876_v44 = vsel %vm1219_vm2, %v4855_v63, %v4872_v8 }
0x2b0b   : > { %v4877_v19 = vpack.c.bf16 %v4876_v44, %v4875_v53 }
0x2b0d   : > { %v4879_v21 = vunpack.c.h.bf16 %v4877_v19  ;;  %8305 = vmatmul.mubr.bf16.vlgmr.msra.gmra.mrb[116].mxu1 %v4877_v19  ;;  %v4878_v6 = vunpack.c.l.bf16 %v4877_v19 }
0x2b0e   : > { %8309 = vmatpush3.bf16.msra.mxu1 %v13486_v37  ;;  %8324 = vmatprep.mubr.msk.bf16.mxu1 %vm9040_vm0, %v13257_v32 }
0x2b0f   : > { %v4881_v16 = vsub.f32 %v4876_v44, %v4879_v21  ;;  %v4880_v61 = vsub.f32 %v4875_v53, %v4878_v6  ;;  %8310 = vmatprep.subr.bf16.mxu1 %v13257_v32 }
0x2b11   : > { %v4882_v4 = vpack.c.bf16 %v4881_v16, %v4880_v61 }
0x2b12   : > { %8311 = vmatpush3.bf16.msra.mxu1 %v13487_v29 }
0x2b13   : > { %4915 = vmatprep.mubr.bf16.mxu0 %v4882_v4  ;;  %8312 = vmatprep.subr.bf16.mxu1 %v13257_v32 }
0x2b14   : > { %4916 = vmatmul.mubr.bf16.vlgmr.msra.gmra.mrb[116].mxu0 %v4877_v19 }
0x2b15   : > { %7263 = vmatpush3.bf16.msra.mxu0 %v13488_v0 }
0x2b16   : > { %8313 = vmatpush3.bf16.msra.mxu1 %v13489_v59  ;;  %7264 = vmatprep.subr.bf16.mxu0 %v13490_v48  ;;  %v13510_v48 = vld [vmem:[#allocation43_spill] sm:$0xff] }
0x2b17   : > { %8314 = vmatprep.subr.bf16.mxu1 %v13257_v32 }
0x2b19   : > { %7265 = vmatpush3.bf16.msra.mxu0 %v13491_v51 }
0x2b1a   : > { %8315 = vmatpush3.bf16.msra.mxu1 %v13492_v35  ;;  %7266 = vmatprep.subr.bf16.mxu0 %v13493_v9  ;;  %v13511_v9 = vld [vmem:[#allocation44_spill] sm:$0xff] }
0x2b1b   : > { %8316 = vmatprep.subr.bf16.mxu1 %v13257_v32 }
0x2b1d   : > { %7267 = vmatpush3.bf16.msra.mxu0 %v13494_v52  ;;  %v12272_v52 = vld [vmem:[%s13076_s9 + $0x90] sm:$0xff]  }
0x2b1e   : > { %8317 = vmatpush3.bf16.msra.mxu1 %v13495_v25  ;;  %7268 = vmatprep.subr.bf16.mxu0 %v13496_v23  ;;  %v13513_v25 = vld [vmem:[#allocation46_spill] sm:$0xff]  ;;  %v13514_v23 = vld [vmem:[#allocation47_spill] sm:$0xff] }
0x2b1f   : > { %8318 = vmatprep.subr.bf16.mxu1 %v13257_v32 }
0x2b21   : > { %7269 = vmatpush3.bf16.msra.mxu0 %v13497_v55  ;;  %v12281_v55 = vld [vmem:[%s13076_s9 + $0x98] sm:$0xff]  }
0x2b22   : > { %8319 = vmatpush3.bf16.msra.mxu1 %v13498_v54  ;;  %7270 = vmatprep.subr.bf16.mxu0 %v13499_v58  ;;  %v13515_v54 = vld [vmem:[#allocation48_spill] sm:$0xff]  ;;  %v12289_v58 = vld [vmem:[%s13076_s9 + $0x10] sm:$0xff]  }
0x2b23   : > { %8320 = vmatprep.subr.bf16.mxu1 %v13257_v32 }
0x2b25   : > { %7271 = vmatpush3.bf16.msra.mxu0 %v13500_v42  ;;  %v12295_v42 = vld [vmem:[%s13076_s9 + $0xa0] sm:$0xff]  }
0x2b26   : > { %8321 = vmatpush3.bf16.msra.mxu1 %v13501_v40  ;;  %7272 = vmatprep.subr.bf16.mxu0 %v13502_v41  ;;  %v12301_v40 = vld [vmem:[%s13076_s9 + $0x58] sm:$0xff]  }
0x2b27   : > { %8322 = vmatprep.subr.bf16.mxu1 %v13257_v32  ;;  %v12308_v41 = vld [vmem:[%s13076_s9 + $0x18] sm:$0xff]  }
0x2b29   : > { %7273 = vmatpush3.bf16.msra.mxu0 %v13503_v3  ;;  %v12314_v3 = vld [vmem:[%s13076_s9 + $0xa8] sm:$0xff]  }
0x2b2a   : > { %8323 = vmatpush3.bf16.msra.mxu1 %v13504_v45  ;;  %7274 = vmatprep.subr.bf16.mxu0 %v13505_v20  ;;  %v12320_v45 = vld [vmem:[%s13076_s9 + $0x60] sm:$0xff]  }
0x2b2b   : > { %8328 = vmatprep.subr.bf16.mxu1 %v13257_v32  ;;  %v12327_v20 = vld [vmem:[%s13076_s9 + $0x20] sm:$0xff]  }
0x2b2d   : > { %7275 = vmatpush3.bf16.msra.mxu0 %v13506_v1  ;;  %v12333_v1 = vld [vmem:[%s13076_s9 + $0xb0] sm:$0xff]  }
0x2b2e   : > { %7276 = vmatprep.subr.bf16.mxu0 %v13507_v24  ;;  %v12339_v24 = vld [vmem:[%s13076_s9 + $0x68] sm:$0xff]  }
0x2b31   : > { %7277 = vmatpush3.bf16.msra.mxu0 %v13508_v11  ;;  %v12346_v11 = vld [vmem:[%s13076_s9 + $0x28] sm:$0xff]  }
0x2b32   : > { %7293 = vmatprep.subr.bf16.mxu0 %v13509_v34  ;;  %v12352_v34 = vld [vmem:[%s13076_s9 + $0xb8] sm:$0xff]  }
0x2be0   : > { %v4958_v15 = vpop.f32.mrb[116].mxu1 }
0x2be1   : > { %v8306_v5 = vpop.f32.mrb[117].mxu1 }
0x2be2   : > { %v4961_v13 = vpop.f32.mrb[118].mxu1  ;;  %v12365_v5 = vld [vmem:[%s13076_s9 + $0x30] sm:$0xff]  }
0x2be3   : > { %v8307_v49 = vpop.f32.mrb[119].mxu1  ;;  %13516 = vst [vmem:[#allocation17_spill] sm:$0xff] %v12365_v5 }
0x2be4   : > { %v12382_v49 = vld [vmem:[%s13076_s9 + $0x38] sm:$0xff]  }
0x2be5   : > { %13518 = vst [vmem:[#allocation3_spill] sm:$0xff] %v12382_v49 }
0x2be7   : > { %v7247_v63 = vpop.f32.mrb[116].mxu0 }
0x2be8   : > { %v7248_v39 = vpop.f32.mrb[117].mxu0 }
0x2be9   : > { %v7249_v8 = vadd.f32 %v7248_v39, %v7247_v63  ;;  %v7250_v53 = vpop.f32.mrb[118].mxu0  ;;  %v12391_v63 = vld [vmem:[%s13073_s6] sm:$0xff]   ;;  %v13520_v39 = vld [vmem:[#allocation49_spill] sm:$0xff] }
0x2bea   : > { %v7251_v44 = vpop.f32.mrb[119].mxu0  ;;  %13519 = vst [vmem:[#allocation5_spill] sm:$0xff] %v12391_v63 }
0x2beb   : > { %v4959_v19 = vadd.f32 %v7249_v8, %v4958_v15  ;;  %v7252_v21 = vadd.f32 %v7251_v44, %v7250_v53  ;;  %v12358_v15 = vld [vmem:[%s13076_s9 + $0x70] sm:$0xff]   ;;  %v13521_v8 = vld [vmem:[#allocation50_spill] sm:$0xff]  ;;  %v13522_v53 = vld [vmem:[#allocation51_spill] sm:$0xff] }
0x2bec   : > { %v13523_v44 = vld [vmem:[#allocation52_spill] sm:$0xff] }
0x2bed   : > { %v4965_v6 = vmul.f32 %v11878_v2, %v4959_v19  ;;  %v4962_v37 = vadd.f32 %v7252_v21, %v4961_v13  ;;  %v12372_v13 = vld [vmem:[%s13076_s9 + $0x78] sm:$0xff]  }
0x2bee   : > { %13517 = vst [vmem:[#allocation18_spill] sm:$0xff] %v12372_v13 }
0x2bef   : > { %v4966_v16 = vmul.f32 %v11882_v33, %v4962_v37  ;;  %v4967_v61 = vmul.f32 %v11878_v2, %v4965_v6 }
0x2bf1   : > { %v4968_v4 = vmul.f32 %v11882_v33, %v4966_v16  ;;  %v13512_v33 = vld [vmem:[#allocation45_spill] sm:$0xff] }
0x2bf3   : > { %v12256_v29 = vpack.c.bf16 %v4968_v4, %v4967_v61 }
0x2bf5   : > { %8325 = vmatmul.mubr.bf16.vlgmr.msra.gmra.mrb[120].mxu1 %v12256_v29  ;;  %v4970_v0 = vunpack.c.l.bf16 %v12256_v29  ;;  %v4971_v59 = vunpack.c.h.bf16 %v12256_v29 }
0x2bf6   : > { %8329 = vmatpush3.bf16.msra.mxu1 %v13510_v48  ;;  %8344 = vmatprep.mubr.msk.bf16.mxu1 %vm9040_vm0, %v13257_v32 }
0x2bf7   : > { %8330 = vmatprep.subr.bf16.mxu1 %v13257_v32  ;;  %v4972_v51 = vsub.f32 %v4967_v61, %v4970_v0  ;;  %v4973_v35 = vsub.f32 %v4968_v4, %v4971_v59 }
0x2bf9   : > { %v4974_v2 = vpack.c.bf16 %v4973_v35, %v4972_v51 }
0x2bfa   : > { %8331 = vmatpush3.bf16.msra.mxu1 %v13511_v9 }
0x2bfb   : > { %5007 = vmatprep.mubr.bf16.mxu0 %v4974_v2  ;;  %8332 = vmatprep.subr.bf16.mxu1 %v13257_v32 }
0x2bfc   : > { %5008 = vmatmul.mubr.bf16.vlgmr.msra.gmra.mrb[120].mxu0 %v12256_v29 }
0x2bfd   : > { %7294 = vmatpush3.bf16.msra.mxu0 %v13512_v33  ;;  %5089 = vmatprep.mubr.bf16.mxu0 %v4974_v2 }
0x2bfe   : > { %8333 = vmatpush3.bf16.msra.mxu1 %v12272_v52  ;;  %7295 = vmatprep.subr.bf16.mxu0 %v13513_v25 }
0x2bff   : > { %8334 = vmatprep.subr.bf16.mxu1 %v13257_v32 }
0x2c01   : > { %7296 = vmatpush3.bf16.msra.mxu0 %v13514_v23 }
0x2c02   : > { %8335 = vmatpush3.bf16.msra.mxu1 %v12281_v55  ;;  %7297 = vmatprep.subr.bf16.mxu0 %v13515_v54 }
0x2c03   : > { %8336 = vmatprep.subr.bf16.mxu1 %v13257_v32 }
0x2c05   : > { %7298 = vmatpush3.bf16.msra.mxu0 %v12289_v58 }
0x2c06   : > { %8337 = vmatpush3.bf16.msra.mxu1 %v12295_v42  ;;  %7299 = vmatprep.subr.bf16.mxu0 %v12301_v40 }
0x2c07   : > { %8338 = vmatprep.subr.bf16.mxu1 %v13257_v32 }
0x2c09   : > { %7300 = vmatpush3.bf16.msra.mxu0 %v12308_v41 }
0x2c0a   : > { %8339 = vmatpush3.bf16.msra.mxu1 %v12314_v3  ;;  %7301 = vmatprep.subr.bf16.mxu0 %v12320_v45 }
0x2c0b   : > { %8340 = vmatprep.subr.bf16.mxu1 %v13257_v32 }
0x2c0d   : > { %7302 = vmatpush3.bf16.msra.mxu0 %v12327_v20 }
0x2c0e   : > { %8341 = vmatpush3.bf16.msra.mxu1 %v12333_v1  ;;  %7303 = vmatprep.subr.bf16.mxu0 %v12339_v24 }
0x2c0f   : > { %8342 = vmatprep.subr.bf16.mxu1 %v13257_v32 }
0x2c11   : > { %7304 = vmatpush3.bf16.msra.mxu0 %v12346_v11 }
0x2c12   : > { %8343 = vmatpush3.bf16.msra.mxu1 %v12352_v34  ;;  %7305 = vmatprep.subr.bf16.mxu0 %v12358_v15 }
0x2c13   : > { %8364 = vmatprep.subr.bf16.mxu1 %v13257_v32 }
0x2c15   : > { %7306 = vmatpush3.bf16.msra.mxu0 %v12365_v5  ;;  %8345 = vmatmul.mubr.bf16.vlgmr.msra.gmra.mrb[124].mxu1 %v12256_v29 }
0x2c16   : > { %7307 = vmatprep.subr.bf16.mxu0 %v12372_v13  ;;  %8365 = vmatpush3.bf16.msra.mxu1 %v11952_v43 }
0x2c17   : > { %8366 = vmatprep.subr.bf16.mxu1 %v13257_v32  ;;  %8380 = vmatprep.mubr.msk.bf16.mxu1 %vm9040_vm0, %v13257_v32 }
0x2c19   : > { %7308 = vmatpush3.bf16.msra.mxu0 %v12382_v49 }
0x2c1a   : > { %8367 = vmatpush3.bf16.msra.mxu1 %v11962_v57 }
0x2c1b   : > { %8368 = vmatprep.subr.bf16.mxu1 %v13257_v32 }
0x2c1c   : > { %5090 = vmatmul.mubr.bf16.vlgmr.msra.gmra.mrb[124].mxu0 %v12256_v29 }
0x2c1d   : > { %8360 = vmatprep.mubr.msk.bf16.mxu0 %vm1148_vm1, %v12391_v63 }
0x2c1e   : > { %8369 = vmatpush3.bf16.msra.mxu1 %v11971_v17 }
0x2c1f   : > { %8370 = vmatprep.subr.bf16.mxu1 %v13257_v32 }
0x2c22   : > { %8371 = vmatpush3.bf16.msra.mxu1 %v11978_v30 }
0x2c23   : > { %8372 = vmatprep.subr.bf16.mxu1 %v13257_v32 }
0x2c26   : > { %8373 = vmatpush3.bf16.msra.mxu1 %v13520_v39 }
0x2c27   : > { %8374 = vmatprep.subr.bf16.mxu1 %v13257_v32 }
0x2c2a   : > { %8375 = vmatpush3.bf16.msra.mxu1 %v13521_v8 }
0x2c2b   : > { %8376 = vmatprep.subr.bf16.mxu1 %v13257_v32 }
0x2c2e   : > { %8377 = vmatpush3.bf16.msra.mxu1 %v13522_v53 }
0x2c2f   : > { %8378 = vmatprep.subr.bf16.mxu1 %v13257_v32 }
0x2c32   : > { %8379 = vmatpush3.bf16.msra.mxu1 %v13523_v44 }
0x2cc8   : > { %v5050_v19 = vpop.f32.mrb[120].mxu1 }
0x2cc9   : > { %v8326_v21 = vpop.f32.mrb[121].mxu1 }
0x2cca   : > { %v5053_v6 = vpop.f32.mrb[122].mxu1 }
0x2ccb   : > { %v8327_v37 = vpop.f32.mrb[123].mxu1 }
0x2ccf   : > { %v7278_v16 = vpop.f32.mrb[120].mxu0 }
0x2cd0   : > { %v7279_v61 = vpop.f32.mrb[121].mxu0 }
0x2cd1   : > { %v7280_v4 = vadd.f32 %v7279_v61, %v7278_v16  ;;  %v7281_v29 = vpop.f32.mrb[122].mxu0 }
0x2cd2   : > { %v7282_v0 = vpop.f32.mrb[123].mxu0 }
0x2cd3   : > { %v5051_v59 = vadd.f32 %v7280_v4, %v5050_v19  ;;  %v7283_v48 = vadd.f32 %v7282_v0, %v7281_v29 }
0x2cd5   : > { %v5054_v51 = vadd.f32 %v7283_v48, %v5053_v6 }
0x2cd7   : > { %v5139_v35 = vpack.c.bf16 %v5054_v51, %v5051_v59 }
0x2cd9   : > { %v5142_v2 = vunpack.c.h.bf16 %v5139_v35  ;;  %8348 = vmatprep.subr.bf16.mxu0 %v5139_v35  ;;  %v5141_v9 = vunpack.c.l.bf16 %v5139_v35 }
0x2cda   : > { %8349 = vmatpush3.bf16.msra.mxu0 %v5139_v35 }
0x2cdb   : > { %v5146_v33 = vsub.f32 %v5054_v51, %v5142_v2  ;;  %v5145_v25 = vsub.f32 %v5051_v59, %v5141_v9 }
0x2cdd   : > { %v5149_v23 = vpack.c.bf16 %v5146_v33, %v5145_v25 }
0x2ce8   : > { %v5132_v54 = vpop.f32.mrb[124].mxu1 }
0x2ce9   : > { %v8346_v21 = vpop.f32.mrb[125].mxu1 }
0x2cea   : > { %v5135_v63 = vpop.f32.mrb[126].mxu1 }
0x2ceb   : > { %v8347_v37 = vpop.f32.mrb[127].mxu1 }
0x2cef   : > { %v7309_v49 = vpop.f32.mrb[124].mxu0 }
0x2cf0   : > { %v7310_v13 = vpop.f32.mrb[125].mxu0 }
0x2cf1   : > { %v7311_v16 = vadd.f32 %v7310_v13, %v7309_v49  ;;  %v7312_v61 = vpop.f32.mrb[126].mxu0 }
0x2cf2   : > { %v7313_v5 = vpop.f32.mrb[127].mxu0 }
0x2cf3   : > { %v5133_v19 = vadd.f32 %v7311_v16, %v5132_v54  ;;  %v7314_v4 = vadd.f32 %v7313_v5, %v7312_v61  ;;  %v12410_v5 = vld [vmem:[%s13073_s6 + $0x8] sm:$0xff]  }
0x2cf5   : > { %v5136_v6 = vadd.f32 %v7314_v4, %v5135_v63 }
0x2cf7   : > { %v5140_v29 = vpack.c.bf16 %v5136_v6, %v5133_v19 }
0x2cf9   : > { %v5144_v0 = vunpack.c.h.bf16 %v5140_v29  ;;  %8350 = vmatprep.subr.bf16.mxu0 %v5140_v29  ;;  %v5143_v48 = vunpack.c.l.bf16 %v5140_v29 }
0x2cfa   : > { %8351 = vmatpush3.bf16.msra.mxu0 %v5140_v29 }
0x2cfb   : > { %v5148_v51 = vsub.f32 %v5136_v6, %v5144_v0  ;;  %8352 = vmatprep.subr.bf16.mxu0 %v5149_v23  ;;  %v5147_v59 = vsub.f32 %v5133_v19, %v5143_v48 }
0x2cfd   : > { %v5150_v2 = vpack.c.bf16 %v5148_v51, %v5147_v59 }
0x2cfe   : > { %8353 = vmatpush3.bf16.msra.mxu0 %v5149_v23 }
0x2cff   : > { %8354 = vmatprep.subr.bf16.mxu0 %v5150_v2 }
0x2d02   : > { %8355 = vmatpush3.bf16.msra.mxu0 %v5150_v2  ;;  %v12452_v2 = vld [vmem:[%s13072_s5] sm:$0xff]  }
0x2d03   : > { %8356 = vmatprep.subr.bf16.mxu0 %v5139_v35 }
0x2d06   : > { %8357 = vmatpush3.bf16.msra.mxu0 %v5139_v35 }
0x2d07   : > { %8358 = vmatprep.subr.bf16.mxu0 %v5140_v29 }
0x2d0a   : > { %8359 = vmatpush3.bf16.msra.mxu0 %v5140_v29 }
0x2d0b   : > { %8384 = vmatprep.subr.bf16.mxu0 %v13257_v32 }
0x2d0d   : > { %8361 = vmatmul.mubr.msk.bf16.vlgmr.msra.gmra.mrb[128].mxu0 %vm1148_vm1, %v12410_v5 }
0x2d0e   : > { %8385 = vmatpush3.bf16.msra.mxu0 %v11952_v43  ;;  %8400 = vmatprep.mubr.msk.bf16.mxu0 %vm9040_vm0, %v13257_v32  ;;  %v12434_v43 = vld [vmem:[%s13074_s7 + $0x40] sm:$0xff]  }
0x2d0f   : > { %8386 = vmatprep.subr.bf16.mxu0 %v13257_v32 }
0x2d12   : > { %8387 = vmatpush3.bf16.msra.mxu0 %v11962_v57 }
0x2d13   : > { %8388 = vmatprep.subr.bf16.mxu0 %v13257_v32 }
0x2d16   : > { %8389 = vmatpush3.bf16.msra.mxu0 %v11971_v17 }
0x2d17   : > { %8390 = vmatprep.subr.bf16.mxu0 %v13257_v32 }
0x2d1a   : > { %8391 = vmatpush3.bf16.msra.mxu0 %v11978_v30 }
0x2d1b   : > { %8392 = vmatprep.subr.bf16.mxu0 %v13257_v32 }
0x2d1e   : > { %8393 = vmatpush3.bf16.msra.mxu0 %v13520_v39 }
0x2d1f   : > { %8394 = vmatprep.subr.bf16.mxu0 %v13257_v32 }
0x2d22   : > { %8395 = vmatpush3.bf16.msra.mxu0 %v13521_v8 }
0x2d23   : > { %8396 = vmatprep.subr.bf16.mxu0 %v13257_v32 }
0x2d26   : > { %8397 = vmatpush3.bf16.msra.mxu0 %v13522_v53 }
0x2d27   : > { %8398 = vmatprep.subr.bf16.mxu0 %v13257_v32 }
0x2d2a   : > { %8399 = vmatpush3.bf16.msra.mxu0 %v13523_v44 }
0x2d2b   : > { %7358 = vmatprep.subr.bf16.mxu0 %v12434_v43 }
0x2de0   : > { %v8362_v57 = vpop.f32.mrb[128].mxu0 }
0x2de1   : > { %v5202_v17 = vmul.f32 %v12031_v26, %v8362_v57  ;;  %v5219_v30 = vmul.f32 %v12035_v47, %v8362_v57  ;;  %v5185_v13 = vpop.f32.mrb[129].mxu0  ;;  %v12459_v57 = vld [vmem:[%s13074_s7] sm:$0xff]  }
0x2de2   : > { %v5200_v49 = vmul.f32 %v12035_v47, %v5185_v13  ;;  %v5221_v63 = vmul.f32 %v12031_v26, %v5185_v13  ;;  %v8363_v39 = vpop.f32.mrb[130].mxu0  ;;  %v12477_v13 = vld [vmem:[%s13074_s7 + $0x50] sm:$0xff]  }
0x2de3   : > { %v5203_v8 = vmul.f32 %v12041_v14, %v8363_v39  ;;  %v5220_v53 = vmul.f32 %v12045_v10, %v8363_v39  ;;  %v5188_v44 = vpop.f32.mrb[131].mxu0  ;;  %v12495_v39 = vld [vmem:[%s13074_s7 + $0x18] sm:$0xff]  }
0x2de4   : > { %v5204_v35 = vadd.f32 %v5202_v17, %v5200_v49  ;;  %v5223_v9 = vsub.f32 %v5219_v30, %v5221_v63  ;;  %v5201_v33 = vmul.f32 %v12045_v10, %v5188_v44  ;;  %v5222_v25 = vmul.f32 %v12041_v14, %v5188_v44  ;;  %v12465_v17 = vld [vmem:[%s13074_s7 + $0x48] sm:$0xff]   ;;  %v12483_v49 = vld [vmem:[%s13074_s7 + $0x10] sm:$0xff]   ;;  %v12489_v63 = vld [vmem:[%s13074_s7 + $0x58] sm:$0xff]  }
0x2de5   : > { %v12471_v30 = vld [vmem:[%s13074_s7 + $0x8] sm:$0xff]  }
0x2de6   : > { %v5205_v23 = vadd.f32 %v5203_v8, %v5201_v33  ;;  %v5224_v54 = vsub.f32 %v5220_v53, %v5222_v25  ;;  %v12501_v8 = vld [vmem:[%s13074_s7 + $0x60] sm:$0xff]   ;;  %v12513_v44 = vld [vmem:[%s13074_s7 + $0x68] sm:$0xff]   ;;  %v12531_v33 = vld [vmem:[%s13074_s7 + $0x30] sm:$0xff]  }
0x2de7   : > { %v12507_v53 = vld [vmem:[%s13074_s7 + $0x20] sm:$0xff]   ;;  %13526 = vst [vmem:[#allocation7_spill] sm:$0xff] %v12531_v33  ;;  %v12537_v25 = vld [vmem:[%s13074_s7 + $0x78] sm:$0xff]  }
0x2de8   : > { %v5206_v21 = vpack.c.bf16 %v5205_v23, %v5204_v35  ;;  %v5225_v37 = vpack.c.bf16 %v5224_v54, %v5223_v9  ;;  %13527 = vst [vmem:[#allocation8_spill] sm:$0xff] %v12537_v25 }
0x2dea   : > { %v5207_v16 = vunpack.c.l.bf16 %v5206_v21  ;;  %v5208_v47 = vunpack.c.h.bf16 %v5206_v21  ;;  %v5226_v61 = vunpack.c.l.bf16 %v5225_v37  ;;  %v5227_v26 = vunpack.c.h.bf16 %v5225_v37 }
0x2dec   : > { %v5210_v19 = vsub.f32 %v5205_v23, %v5208_v47  ;;  %v5229_v4 = vsub.f32 %v5224_v54, %v5227_v26  ;;  %v5228_v6 = vsub.f32 %v5223_v9, %v5226_v61  ;;  %v5209_v29 = vsub.f32 %v5204_v35, %v5207_v16  ;;  %v12519_v35 = vld [vmem:[%s13074_s7 + $0x28] sm:$0xff]   ;;  %v12525_v9 = vld [vmem:[%s13074_s7 + $0x70] sm:$0xff]   ;;  %v12543_v23 = vld [vmem:[%s13074_s7 + $0x38] sm:$0xff]  }
0x2ded   : > { %13524 = vst [vmem:[#allocation4_spill] sm:$0xff] %v12519_v35  ;;  %13525 = vst [vmem:[#allocation6_spill] sm:$0xff] %v12525_v9  ;;  %v8977_v54 = vld [vmem:[%s13075_s8 + $0x40] sm:$0xff]  }
0x2dee   : > { %v5230_v0 = vpack.c.bf16 %v5229_v4, %v5228_v6  ;;  %v5211_v48 = vpack.c.bf16 %v5210_v19, %v5209_v29  ;;  %13528 = vst [vmem:[#allocation9_spill] sm:$0xff] %v12543_v23  ;;  %v5239_v6 = vmul.f32 %v12135_v27, %v13484_v12  ;;  %v5282_v29 = vmul.f32 %v12147_v18, %v13484_v12 }
0x2df0   : > { %5232 = vrot.lane.b32.xlu0 %v5230_v0, %s9041_s20  ;;  %5213 = vrot.lane.b32.xlu1 %v5211_v48, %s9041_s20 }
0x2e62   : > { %v5233_v10 = vpop.permute.xlu0 %5232  ;;  %v5214_v14 = vpop.permute.xlu1 %5213 }
0x2e63   : > { %v5236_v51 = vsel %vm1219_vm2, %v5225_v37, %v5233_v10  ;;  %v5217_v59 = vsel %vm1219_vm2, %v5206_v21, %v5214_v14  ;;  %v5238_v21 = vmul.f32 %v12132_v7, %v13484_v12  ;;  %v5281_v37 = vmul.f32 %v12144_v50, %v13484_v12 }
0x2e64   : > { %8381 = vmatmul.mubr.bf16.vlgmr.msra.gmra.mrb[128].mxu1 %v5217_v59  ;;  %8401 = vmatmul.mubr.bf16.vlgmr.msra.gmra.mrb[132].mxu0 %v5236_v51 }
0x2e65   : > { %8416 = vmatprep.mubr.msk.bf16.mxu1 %vm1148_vm1, %v12452_v2  ;;  %7359 = vmatpush3.bf16.msra.mxu0 %v12459_v57 }
0x2e66   : > { %7360 = vmatprep.subr.bf16.mxu0 %v12465_v17 }
0x2e69   : > { %7361 = vmatpush3.bf16.msra.mxu0 %v12471_v30 }
0x2e6a   : > { %7362 = vmatprep.subr.bf16.mxu0 %v12477_v13 }
0x2e6d   : > { %7363 = vmatpush3.bf16.msra.mxu0 %v12483_v49 }
0x2e6e   : > { %7364 = vmatprep.subr.bf16.mxu0 %v12489_v63 }
0x2e71   : > { %7365 = vmatpush3.bf16.msra.mxu0 %v12495_v39 }
0x2e72   : > { %7366 = vmatprep.subr.bf16.mxu0 %v12501_v8 }
0x2e75   : > { %7367 = vmatpush3.bf16.msra.mxu0 %v12507_v53 }
0x2e76   : > { %7368 = vmatprep.subr.bf16.mxu0 %v12513_v44 }
0x2e79   : > { %7369 = vmatpush3.bf16.msra.mxu0 %v12519_v35 }
0x2e7a   : > { %7370 = vmatprep.subr.bf16.mxu0 %v12525_v9 }
0x2e7d   : > { %7371 = vmatpush3.bf16.msra.mxu0 %v12531_v33 }
0x2e7e   : > { %7372 = vmatprep.subr.bf16.mxu0 %v12537_v25 }
0x2e81   : > { %7373 = vmatpush3.bf16.msra.mxu0 %v12543_v23 }
0x2e82   : > { %7389 = vmatprep.subr.bf16.mxu0 %v8977_v54 }
0x2f37   : > { %v5274_v16 = vpop.f32.mrb[128].mxu1  ;;  %v5317_v47 = vpop.f32.mrb[132].mxu0 }
0x2f38   : > { %v5275_v61 = vadd.f32 %v5274_v16, %v5238_v21  ;;  %v5318_v26 = vadd.f32 %v5317_v47, %v5281_v37  ;;  %v8382_v19 = vpop.f32.mrb[129].mxu1  ;;  %v8402_v4 = vpop.f32.mrb[133].mxu0 }
0x2f39   : > { %v5277_v0 = vpop.f32.mrb[130].mxu1  ;;  %v5320_v48 = vpop.f32.mrb[134].mxu0 }
0x2f3a   : > { %v5324_v10 = vmul.f32 %v5275_v61, %v12132_v7  ;;  %v5326_v14 = vmul.f32 %v5318_v26, %v12144_v50  ;;  %v5278_v51 = vadd.f32 %v5277_v0, %v5239_v6  ;;  %v5321_v59 = vadd.f32 %v5320_v48, %v5282_v29  ;;  %v8383_v54 = vpop.f32.mrb[131].mxu1  ;;  %v8403_v23 = vpop.f32.mrb[135].mxu0 }
0x2f3c   : > { %v5328_v21 = vadd.f32 %v5326_v14, %v5324_v10  ;;  %v5325_v37 = vmul.f32 %v5278_v51, %v12135_v27  ;;  %v5327_v16 = vmul.f32 %v5321_v59, %v12147_v18 }
0x2f3e   : > { %v5329_v47 = vadd.f32 %v5327_v16, %v5325_v37  ;;  %v5330_v19 = vsel %vm1393_vm3, %v5328_v21, 0.0 }
0x2f40   : > { %v5331_v4 = vsel %vm1393_vm3, %v5329_v47, 0.0 }
0x2f41   : > { %v5332_v12 = vadd.f32 %v5331_v4, %v5330_v19 }
0x2f43   : > { %5333 = vadd.xlane.f32.xlu1 %v5332_v12 }
0x2fd0   : > { %v5334_v25 = vpop.xlane.xlu1 %5333 }
0x2fd1   : > { %v5335_v33 = vrot.slane %v5334_v25, 4 }
0x2fd3   : > { %v5336_v9 = vadd.f32 %v5335_v33, %v5334_v25 }
0x2fd5   : > { %v5337_v35 = vrot.slane %v5336_v9, 2 }
0x2fd7   : > { %v5338_v6 = vadd.f32 %v5337_v35, %v5336_v9 }
0x2fd9   : > { %v5339_v29 = vrot.slane %v5338_v6, 1 }
0x2fdb   : > { %v5340_v0 = vadd.f32 %v5339_v29, %v5338_v6 }
0x2fdd   : > { %8590 = vpush %v5340_v0 }
0x300e   : > { %s8591_s26 = spop %8590 }
0x300f   : > { %v5342_v23 = vstv %s8591_s26 }
0x3010   : > { %v5343_v48 = vadd.f32 1e-30, %v5342_v23 }
0x3012   : > { %8710 = vrcp.f32 %v5343_v48 }
0x301c   : > { %v8711_v10 = vpop.eup %8710 }
0x301d   : > { %v5345_v14 = vmul.f32 %v8711_v10, %v12126_v62 }
0x301f   : > { %v5354_v54 = vmul.f32 %v5345_v14, %v5275_v61  ;;  %v5355_v21 = vmul.f32 %v5345_v14, %v5278_v51  ;;  %v5358_v37 = vmul.f32 %v5345_v14, %v5318_v26  ;;  %v5359_v16 = vmul.f32 %v5345_v14, %v5321_v59 }
0x3020   : > { %v5350_v12 = vmul.f32 %v5345_v14, %v12144_v50  ;;  %v5347_v33 = vmul.f32 %v5345_v14, %v12135_v27  ;;  %v5351_v35 = vmul.f32 %v5345_v14, %v12147_v18  ;;  %v5346_v9 = vmul.f32 %v5345_v14, %v12132_v7 }
0x3021   : > { %v5356_v25 = vsub.f32 %v12092_v56, %v5354_v54  ;;  %v5357_v47 = vsub.f32 %v12095_v31, %v5355_v21  ;;  %v5360_v19 = vsub.f32 %v12098_v46, %v5358_v37  ;;  %v5361_v4 = vsub.f32 %v12101_v28, %v5359_v16 }
0x3022   : > { %v12573_v61 = vadd.f32 %v5350_v12, %v12104_v60  ;;  %v12576_v26 = vadd.f32 %v5347_v33, %v12107_v38  ;;  %v12579_v51 = vadd.f32 %v5351_v35, %v12110_v22  ;;  %v12582_v59 = vadd.f32 %v5346_v9, %v12113_v36 }
0x3023   : > { %v5362_v6 = vmul.f32 %v5356_v25, %v5356_v25  ;;  %v5363_v56 = vmul.f32 %v5357_v47, %v5357_v47  ;;  %v5364_v29 = vmul.f32 %v5360_v19, %v5360_v19  ;;  %v5365_v31 = vmul.f32 %v5361_v4, %v5361_v4 }
0x3024   : > { %v5381_v21 = vadd.f32 1e-30, %v12126_v62 }
0x3025   : > { %v5366_v0 = vadd.f32 %v5364_v29, %v5362_v6  ;;  %v5367_v46 = vadd.f32 %v5365_v31, %v5363_v56 }
0x3026   : > { %8712 = vrcp.f32 %v5381_v21  ;;  %v12643_v21 = vld [vmem:[%s9456_s24] sm:$0xff] }
0x3027   : > { %v5368_v28 = vsel %vm1393_vm3, %v5366_v0, 0.0  ;;  %v5369_v60 = vsel %vm1393_vm3, %v5367_v46, 0.0 }
0x3028   : > { %v5370_v23 = vadd.f32 %v5369_v60, %v5368_v28 }
0x302a   : > { %5371 = vadd.xlane.f32.xlu0 %v5370_v23 }
0x3030   : > { %v8713_v37 = vpop.eup %8712 }
0x30b7   : > { %v5372_v38 = vpop.xlane.xlu0 %5371 }
0x30b8   : > { %v5373_v48 = vrot.slane %v5372_v38, 4 }
0x30ba   : > { %v5374_v10 = vadd.f32 %v5373_v48, %v5372_v38 }
0x30bc   : > { %v5375_v22 = vrot.slane %v5374_v10, 2 }
0x30be   : > { %v5376_v14 = vadd.f32 %v5375_v22, %v5374_v10 }
0x30c0   : > { %v5377_v54 = vrot.slane %v5376_v14, 1 }
0x30c2   : > { %v5378_v36 = vadd.f32 %v5377_v54, %v5376_v14 }
0x30c4   : > { %8592 = vpush %v5378_v36 }
0x30f5   : > { %s12587_s27 = spop %8592 }
0x30f6   : > { %v13234_v16 = vstv %s12587_s27 }
0x30f7   : > { %v5383_v12 = vmul.f32 %v8713_v37, %v13234_v16 }
0x30f9   : > { %v5384_v33 = vmul.f32 %v5383_v12, %v12132_v7  ;;  %v5385_v35 = vmul.f32 %v5383_v12, %v12135_v27  ;;  %v5388_v56 = vmul.f32 %v5383_v12, %v12144_v50  ;;  %v5389_v62 = vmul.f32 %v5383_v12, %v12147_v18  ;;  %v12647_v12 = vld [vmem:[%s9462_s19] sm:$0xff] }
0x30fb   : > { %v12594_v9 = vadd.f32 %v5384_v33, %v5356_v25  ;;  %v12596_v6 = vadd.f32 %v5385_v35, %v5357_v47  ;;  %v12604_v29 = vadd.f32 %v5388_v56, %v5360_v19  ;;  %v12606_v31 = vadd.f32 %v5389_v62, %v5361_v4  ;;  %v12651_v62 = vld [vmem:[%s9456_s24 + $0x8] sm:$0xff] }
0x30fd   : > { %5396 = vrot.lane.b32.xlu1 %v12596_v6, %s9042_s21  ;;  %5394 = vrot.lane.b32.xlu0 %v12594_v9, %s9042_s21 }
0x3101   : > { %5420 = vrot.lane.b32.xlu1 %v12604_v29, %s9042_s21  ;;  %5422 = vrot.lane.b32.xlu0 %v12606_v31, %s9042_s21 }
0x3105   : > { %5400 = vrot.lane.b32.xlu1 %v12594_v9, %s9043_s22  ;;  %5402 = vrot.lane.b32.xlu0 %v12596_v6, %s9043_s22 }
0x3109   : > { %5426 = vrot.lane.b32.xlu1 %v12604_v29, %s9043_s22  ;;  %5428 = vrot.lane.b32.xlu0 %v12606_v31, %s9043_s22 }
0x310d   : > { %5406 = vrot.lane.b32.xlu1 %v12594_v9, %s9044_s25  ;;  %5408 = vrot.lane.b32.xlu0 %v12596_v6, %s9044_s25 }
0x3111   : > { %5432 = vrot.lane.b32.xlu1 %v12604_v29, %s9044_s25  ;;  %5434 = vrot.lane.b32.xlu0 %v12606_v31, %s9044_s25 }
0x316f   : > { %v5397_v7 = vpop.permute.xlu1 %5396  ;;  %v5395_v27 = vpop.permute.xlu0 %5394 }
0x3170   : > { %v5412_v0 = vsel %vm1393_vm3, %v12594_v9, %v5395_v27  ;;  %v5413_v46 = vsel %vm1393_vm3, %v12596_v6, %v5397_v7  ;;  %v12655_v27 = vld [vmem:[%s9462_s19 + $0x8] sm:$0xff] }
0x3173   : > { %v5421_v50 = vpop.permute.xlu1 %5420  ;;  %v5423_v18 = vpop.permute.xlu0 %5422 }
0x3174   : > { %v5438_v22 = vsel %vm1393_vm3, %v12604_v29, %v5421_v50  ;;  %v5439_v14 = vsel %vm1393_vm3, %v12606_v31, %v5423_v18 }
0x3177   : > { %v5401_v25 = vpop.permute.xlu1 %5400  ;;  %v5403_v47 = vpop.permute.xlu0 %5402 }
0x3178   : > { %v5414_v28 = vsel %vm1396_vm4, %v5412_v0, %v5401_v25  ;;  %v5415_v38 = vsel %vm1396_vm4, %v5413_v46, %v5403_v47 }
0x317b   : > { %v5427_v19 = vpop.permute.xlu1 %5426  ;;  %v5429_v4 = vpop.permute.xlu0 %5428 }
0x317c   : > { %v5440_v54 = vsel %vm1396_vm4, %v5438_v22, %v5427_v19  ;;  %v5441_v36 = vsel %vm1396_vm4, %v5439_v14, %v5429_v4 }
0x317f   : > { %v5407_v60 = vpop.permute.xlu1 %5406  ;;  %v5409_v23 = vpop.permute.xlu0 %5408 }
0x3180   : > { %v5416_v48 = vsel %vm1399_vm5, %v5414_v28, %v5407_v60  ;;  %v5417_v10 = vsel %vm1399_vm5, %v5415_v38, %v5409_v23 }
0x3181   : > { %v5444_v37 = vmul.f32 %v12643_v21, %v5416_v48  ;;  %v5452_v33 = vmul.f32 %v12647_v12, %v5416_v48  ;;  %v5445_v7 = vmul.f32 %v12651_v62, %v5417_v10  ;;  %v5453_v50 = vmul.f32 %v12655_v27, %v5417_v10 }
0x3183   : > { %v5433_v35 = vpop.permute.xlu1 %5432  ;;  %v5435_v56 = vpop.permute.xlu0 %5434 }
0x3184   : > { %v5442_v18 = vsel %vm1399_vm5, %v5440_v54, %v5433_v35  ;;  %v5443_v25 = vsel %vm1399_vm5, %v5441_v36, %v5435_v56 }
0x3185   : > { %v5446_v47 = vmul.f32 %v12647_v12, %v5442_v18  ;;  %v5450_v19 = vmul.f32 %v12643_v21, %v5442_v18  ;;  %v5447_v4 = vmul.f32 %v12655_v27, %v5443_v25  ;;  %v5451_v0 = vmul.f32 %v12651_v62, %v5443_v25  ;;  %v12698_v25 = vld [vmem:[%s13074_s7 + $0x98] sm:$0xff]  }
0x3186   : > { %13529 = vst [vmem:[#allocation10_spill] sm:$0xff] %v12698_v25 }
0x3187   : > { %v5448_v46 = vsub.f32 %v5444_v37, %v5446_v47  ;;  %v5454_v28 = vadd.f32 %v5452_v33, %v5450_v19  ;;  %v5449_v60 = vsub.f32 %v5445_v7, %v5447_v4  ;;  %v5455_v23 = vadd.f32 %v5453_v50, %v5451_v0  ;;  %v12668_v33 = vld [vmem:[%s13072_s5 + $0x8] sm:$0xff]   ;;  %v12691_v50 = vld [vmem:[%s13074_s7 + $0x90] sm:$0xff]   ;;  %v12705_v47 = vld [vmem:[%s13074_s7 + $0xa0] sm:$0xff]  }
0x3188   : > { %v12684_v7 = vld [vmem:[%s13074_s7 + $0x88] sm:$0xff]   ;;  %13530 = vst [vmem:[#allocation11_spill] sm:$0xff] %v12705_v47  ;;  %v12719_v4 = vld [vmem:[%s13074_s7 + $0xb0] sm:$0xff]   ;;  %v12726_v0 = vld [vmem:[%s13074_s7 + $0xb8] sm:$0xff]  }
0x3189   : > { %v5456_v38 = vpack.c.bf16 %v5449_v60, %v5448_v46  ;;  %v5457_v48 = vpack.c.bf16 %v5455_v23, %v5454_v28  ;;  %v12712_v19 = vld [vmem:[%s13074_s7 + $0xa8] sm:$0xff]   ;;  %13532 = vst [vmem:[#allocation13_spill] sm:$0xff] %v12719_v4  ;;  %13533 = vst [vmem:[#allocation14_spill] sm:$0xff] %v12726_v0 }
0x318a   : > { %13531 = vst [vmem:[#allocation12_spill] sm:$0xff] %v12712_v19 }
0x318b   : > { %8404 = vmatprep.subr.bf16.mxu1 %v5456_v38  ;;  %v5458_v10 = vunpack.c.l.bf16 %v5456_v38  ;;  %v5459_v22 = vunpack.c.h.bf16 %v5456_v38  ;;  %v5460_v14 = vunpack.c.l.bf16 %v5457_v48  ;;  %v5461_v54 = vunpack.c.h.bf16 %v5457_v48 }
0x318c   : > { %8405 = vmatpush3.bf16.msra.mxu1 %v5456_v38 }
0x318d   : > { %8406 = vmatprep.subr.bf16.mxu1 %v5457_v48  ;;  %v5462_v36 = vsub.f32 %v5448_v46, %v5458_v10  ;;  %v5463_v35 = vsub.f32 %v5449_v60, %v5459_v22  ;;  %v5464_v18 = vsub.f32 %v5454_v28, %v5460_v14  ;;  %v5465_v16 = vsub.f32 %v5455_v23, %v5461_v54 }
0x318f   : > { %v5466_v56 = vpack.c.bf16 %v5463_v35, %v5462_v36  ;;  %v5467_v37 = vpack.c.bf16 %v5465_v16, %v5464_v18  ;;  %v12675_v16 = vld [vmem:[%s13074_s7 + $0x80] sm:$0xff]  }
0x3190   : > { %8407 = vmatpush3.bf16.msra.mxu1 %v5457_v48  ;;  %v8991_v35 = vld [vmem:[%s13075_s8 + $0x80] sm:$0xff]  }
0x3191   : > { %8408 = vmatprep.subr.bf16.mxu1 %v5466_v56 }
0x3194   : > { %8409 = vmatpush3.bf16.msra.mxu1 %v5466_v56 }
0x3195   : > { %8410 = vmatprep.subr.bf16.mxu1 %v5467_v37 }
0x3198   : > { %8411 = vmatpush3.bf16.msra.mxu1 %v5467_v37 }
0x3199   : > { %8412 = vmatprep.subr.bf16.mxu1 %v5456_v38 }
0x319c   : > { %8413 = vmatpush3.bf16.msra.mxu1 %v5456_v38 }
0x319d   : > { %8414 = vmatprep.subr.bf16.mxu1 %v5457_v48 }
0x31a0   : > { %8415 = vmatpush3.bf16.msra.mxu1 %v5457_v48 }
0x31a1   : > { %8420 = vmatprep.subr.bf16.mxu1 %v13257_v32 }
0x31a3   : > { %8417 = vmatmul.mubr.msk.bf16.vlgmr.msra.gmra.mrb[132].mxu1 %vm1148_vm1, %v12668_v33 }
0x31a4   : > { %8421 = vmatpush3.bf16.msra.mxu1 %v12675_v16  ;;  %8436 = vmatprep.mubr.msk.bf16.mxu1 %vm9040_vm0, %v13257_v32 }
0x31a5   : > { %8422 = vmatprep.subr.bf16.mxu1 %v13257_v32 }
0x31a8   : > { %8423 = vmatpush3.bf16.msra.mxu1 %v12684_v7 }
0x31a9   : > { %8424 = vmatprep.subr.bf16.mxu1 %v13257_v32 }
0x31ac   : > { %8425 = vmatpush3.bf16.msra.mxu1 %v12691_v50 }
0x31ad   : > { %8426 = vmatprep.subr.bf16.mxu1 %v13257_v32 }
0x31b0   : > { %8427 = vmatpush3.bf16.msra.mxu1 %v12698_v25 }
0x31b1   : > { %8428 = vmatprep.subr.bf16.mxu1 %v13257_v32 }
0x31b4   : > { %8429 = vmatpush3.bf16.msra.mxu1 %v12705_v47 }
0x31b5   : > { %8430 = vmatprep.subr.bf16.mxu1 %v13257_v32 }
0x31b8   : > { %8431 = vmatpush3.bf16.msra.mxu1 %v12712_v19 }
0x31b9   : > { %8432 = vmatprep.subr.bf16.mxu1 %v13257_v32 }
0x31bc   : > { %8433 = vmatpush3.bf16.msra.mxu1 %v12719_v4 }
0x31bd   : > { %8434 = vmatprep.subr.bf16.mxu1 %v13257_v32 }
0x31c0   : > { %8435 = vmatpush3.bf16.msra.mxu1 %v12726_v0  ;;  %v9016_v0 = vld [vmem:[%s9203_s17 + $0x8] sm:$0xff] }
0x31c1   : > { %8440 = vmatprep.subr.bf16.mxu1 %v13257_v32 }
0x3276   : > { %v8418_v46 = vpop.f32.mrb[132].mxu1 }
0x3277   : > { %5519 = vrot.lane.b32.xlu1 %v8418_v46, %s9041_s20  ;;  %v5502_v28 = vpop.f32.mrb[133].mxu1  ;;  %v8992_v46 = vld [vmem:[%s13075_s8 + $0x88] sm:$0xff]  }
0x3278   : > { %v8419_v60 = vpop.f32.mrb[134].mxu1 }
0x3279   : > { %5521 = vrot.lane.b32.xlu0 %v8419_v60, %s9041_s20  ;;  %v5505_v23 = vpop.f32.mrb[135].mxu1  ;;  %v8994_v60 = vld [vmem:[%s13075_s8 + $0x90] sm:$0xff]  }
0x32e9   : > { %v5520_v38 = vpop.permute.xlu1 %5519 }
0x32ea   : > { %v5525_v10 = vsel %vm1219_vm2, %v5502_v28, %v5520_v38  ;;  %v8993_v28 = vld [vmem:[%s13075_s8] sm:$0xff]   ;;  %v8996_v38 = vld [vmem:[%s13075_s8 + $0x8] sm:$0xff]  }
0x32eb   : > { %v5522_v48 = vpop.permute.xlu0 %5521 }
0x32ec   : > { %v5526_v22 = vsel %vm1219_vm2, %v5505_v23, %v5522_v48  ;;  %v8995_v23 = vld [vmem:[%s13075_s8 + $0x48] sm:$0xff]   ;;  %v8997_v48 = vld [vmem:[%s13075_s8 + $0x98] sm:$0xff]  }
0x32ed   : > { %v5527_v14 = vpack.c.bf16 %v5526_v22, %v5525_v10 }
0x32ef   : > { %v5529_v54 = vunpack.c.h.bf16 %v5527_v14  ;;  %8437 = vmatmul.mubr.bf16.vlgmr.msra.gmra.mrb[136].mxu1 %v5527_v14  ;;  %v5528_v36 = vunpack.c.l.bf16 %v5527_v14 }
0x32f0   : > { %8441 = vmatpush3.bf16.msra.mxu1 %v8991_v35  ;;  %8456 = vmatprep.mubr.msk.bf16.mxu1 %vm9040_vm0, %v13257_v32  ;;  %v9003_v35 = vld [vmem:[%s13075_s8 + $0xa8] sm:$0xff]  }
0x32f1   : > { %v5531_v56 = vsub.f32 %v5526_v22, %v5529_v54  ;;  %v5530_v18 = vsub.f32 %v5525_v10, %v5528_v36  ;;  %8442 = vmatprep.subr.bf16.mxu1 %v13257_v32  ;;  %v8998_v10 = vld [vmem:[%s13075_s8 + $0x50] sm:$0xff]   ;;  %v9001_v54 = vld [vmem:[%s13075_s8 + $0x58] sm:$0xff]  }
0x32f2   : > { %v8999_v22 = vld [vmem:[%s13075_s8 + $0x10] sm:$0xff]   ;;  %v9002_v36 = vld [vmem:[%s13075_s8 + $0x18] sm:$0xff]  }
0x32f3   : > { %v5532_v37 = vpack.c.bf16 %v5531_v56, %v5530_v18  ;;  %v9004_v56 = vld [vmem:[%s13075_s8 + $0x60] sm:$0xff]  }
0x32f4   : > { %8443 = vmatpush3.bf16.msra.mxu1 %v8992_v46  ;;  %v9005_v18 = vld [vmem:[%s13075_s8 + $0x20] sm:$0xff]   ;;  %v9007_v46 = vld [vmem:[%s13075_s8 + $0x68] sm:$0xff]  }
0x32f5   : > { %5565 = vmatprep.mubr.bf16.mxu0 %v5532_v37  ;;  %8444 = vmatprep.subr.bf16.mxu1 %v13257_v32  ;;  %v9006_v37 = vld [vmem:[%s13075_s8 + $0xb0] sm:$0xff]  }
0x32f6   : > { %5566 = vmatmul.mubr.bf16.vlgmr.msra.gmra.mrb[136].mxu0 %v5527_v14  ;;  %v9000_v14 = vld [vmem:[%s13075_s8 + $0xa0] sm:$0xff]  }
0x32f7   : > { %7390 = vmatpush3.bf16.msra.mxu0 %v8993_v28  ;;  %v9008_v28 = vld [vmem:[%s13075_s8 + $0x28] sm:$0xff]  }
0x32f8   : > { %8445 = vmatpush3.bf16.msra.mxu1 %v8994_v60  ;;  %7391 = vmatprep.subr.bf16.mxu0 %v8995_v23  ;;  %v9009_v60 = vld [vmem:[%s13075_s8 + $0xb8] sm:$0xff]   ;;  %v9010_v23 = vld [vmem:[%s13075_s8 + $0x70] sm:$0xff]  }
0x32f9   : > { %8446 = vmatprep.subr.bf16.mxu1 %v13257_v32 }
0x32fb   : > { %7392 = vmatpush3.bf16.msra.mxu0 %v8996_v38  ;;  %v9011_v38 = vld [vmem:[%s13075_s8 + $0x30] sm:$0xff]  }
0x32fc   : > { %8447 = vmatpush3.bf16.msra.mxu1 %v8997_v48  ;;  %7393 = vmatprep.subr.bf16.mxu0 %v8998_v10  ;;  %v9012_v48 = vld [vmem:[%s13075_s8 + $0x78] sm:$0xff]  }
0x32fd   : > { %8448 = vmatprep.subr.bf16.mxu1 %v13257_v32  ;;  %v9013_v10 = vld [vmem:[%s13075_s8 + $0x38] sm:$0xff]  }
0x32ff   : > { %7394 = vmatpush3.bf16.msra.mxu0 %v8999_v22  ;;  %v9014_v22 = vld [vmem:[%s13076_s9 + $0x40] sm:$0xff]  }
0x3300   : > { %8449 = vmatpush3.bf16.msra.mxu1 %v9000_v14  ;;  %7395 = vmatprep.subr.bf16.mxu0 %v9001_v54 }
0x3301   : > { %8450 = vmatprep.subr.bf16.mxu1 %v13257_v32 }
0x3303   : > { %7396 = vmatpush3.bf16.msra.mxu0 %v9002_v36 }
0x3304   : > { %8451 = vmatpush3.bf16.msra.mxu1 %v9003_v35  ;;  %7397 = vmatprep.subr.bf16.mxu0 %v9004_v56 }
0x3305   : > { %8452 = vmatprep.subr.bf16.mxu1 %v13257_v32 }
0x3307   : > { %7398 = vmatpush3.bf16.msra.mxu0 %v9005_v18 }
0x3308   : > { %8453 = vmatpush3.bf16.msra.mxu1 %v9006_v37  ;;  %7399 = vmatprep.subr.bf16.mxu0 %v9007_v46 }
0x3309   : > { %8454 = vmatprep.subr.bf16.mxu1 %v13257_v32 }
0x330b   : > { %7400 = vmatpush3.bf16.msra.mxu0 %v9008_v28 }
0x330c   : > { %8455 = vmatpush3.bf16.msra.mxu1 %v9009_v60  ;;  %7401 = vmatprep.subr.bf16.mxu0 %v9010_v23 }
0x330d   : > { %8460 = vmatprep.subr.bf16.mxu1 %v13257_v32 }
0x330f   : > { %7402 = vmatpush3.bf16.msra.mxu0 %v9011_v38  ;;  %v9015_v38 = vld [vmem:[%s9203_s17] sm:$0xff] }
0x3310   : > { %7403 = vmatprep.subr.bf16.mxu0 %v9012_v48 }
0x3313   : > { %7404 = vmatpush3.bf16.msra.mxu0 %v9013_v10 }
0x3314   : > { %7420 = vmatprep.subr.bf16.mxu0 %v9014_v22 }
0x33c2   : > { %v5608_v14 = vpop.f32.mrb[136].mxu1 }
0x33c3   : > { %v8438_v54 = vpop.f32.mrb[137].mxu1 }
0x33c4   : > { %v5611_v36 = vpop.f32.mrb[138].mxu1 }
0x33c5   : > { %v8439_v35 = vpop.f32.mrb[139].mxu1 }
0x33c6   : > { %v9017_v35 = vld [vmem:[%s13076_s9 + $0x80] sm:$0xff]  }
0x33c9   : > { %v7374_v56 = vpop.f32.mrb[136].mxu0 }
0x33ca   : > { %v7375_v18 = vpop.f32.mrb[137].mxu0 }
0x33cb   : > { %v7376_v37 = vadd.f32 %v7375_v18, %v7374_v56  ;;  %v7377_v46 = vpop.f32.mrb[138].mxu0  ;;  %v9022_v18 = vld [vmem:[%s13076_s9 + $0x50] sm:$0xff]  }
0x33cc   : > { %v7378_v28 = vpop.f32.mrb[139].mxu0 }
0x33cd   : > { %v5609_v60 = vadd.f32 %v7376_v37, %v5608_v14  ;;  %v7379_v23 = vadd.f32 %v7378_v28, %v7377_v46 }
0x33cf   : > { %v5615_v48 = vmul.f32 %v9015_v38, %v5609_v60  ;;  %v5612_v10 = vadd.f32 %v7379_v23, %v5611_v36 }
0x33d1   : > { %v5616_v4 = vmul.f32 %v9016_v0, %v5612_v10  ;;  %v5617_v19 = vmul.f32 %v9015_v38, %v5615_v48 }
0x33d3   : > { %v5618_v47 = vmul.f32 %v9016_v0, %v5616_v4  ;;  %v9018_v4 = vld [vmem:[%s13076_s9 + $0x88] sm:$0xff]   ;;  %v9019_v0 = vld [vmem:[%s13076_s9] sm:$0xff]  }
0x33d5   : > { %v5619_v25 = vpack.c.bf16 %v5618_v47, %v5617_v19 }
0x33d7   : > { %8457 = vmatmul.mubr.bf16.vlgmr.msra.gmra.mrb[140].mxu1 %v5619_v25  ;;  %v5620_v22 = vunpack.c.l.bf16 %v5619_v25  ;;  %v5621_v54 = vunpack.c.h.bf16 %v5619_v25 }
0x33d8   : > { %8461 = vmatpush3.bf16.msra.mxu1 %v9017_v35  ;;  %8476 = vmatprep.mubr.msk.bf16.mxu1 %vm9040_vm0, %v13257_v32 }
0x33d9   : > { %8462 = vmatprep.subr.bf16.mxu1 %v13257_v32  ;;  %v5622_v14 = vsub.f32 %v5617_v19, %v5620_v22  ;;  %v5623_v36 = vsub.f32 %v5618_v47, %v5621_v54  ;;  %v9020_v47 = vld [vmem:[%s13076_s9 + $0x48] sm:$0xff]  }
0x33da   : > { %v9021_v19 = vld [vmem:[%s13076_s9 + $0x8] sm:$0xff]  }
0x33db   : > { %v5624_v56 = vpack.c.bf16 %v5623_v36, %v5622_v14 }
0x33dc   : > { %8463 = vmatpush3.bf16.msra.mxu1 %v9018_v4 }
0x33dd   : > { %5657 = vmatprep.mubr.bf16.mxu0 %v5624_v56  ;;  %8464 = vmatprep.subr.bf16.mxu1 %v13257_v32 }
0x33de   : > { %5658 = vmatmul.mubr.bf16.vlgmr.msra.gmra.mrb[140].mxu0 %v5619_v25 }
0x33df   : > { %7421 = vmatpush3.bf16.msra.mxu0 %v9019_v0  ;;  %5739 = vmatprep.mubr.bf16.mxu0 %v5624_v56 }
0x33e0   : > { %8465 = vmatpush3.bf16.msra.mxu1 %v12272_v52  ;;  %7422 = vmatprep.subr.bf16.mxu0 %v9020_v47  ;;  %v13534_v52 = vld [vmem:[#allocation17_spill] sm:$0xff] }
0x33e1   : > { %8466 = vmatprep.subr.bf16.mxu1 %v13257_v32 }
0x33e3   : > { %7423 = vmatpush3.bf16.msra.mxu0 %v9021_v19 }
0x33e4   : > { %8467 = vmatpush3.bf16.msra.mxu1 %v12281_v55  ;;  %7424 = vmatprep.subr.bf16.mxu0 %v9022_v18  ;;  %v13535_v55 = vld [vmem:[#allocation18_spill] sm:$0xff] }
0x33e5   : > { %8468 = vmatprep.subr.bf16.mxu1 %v13257_v32 }
0x33e7   : > { %7425 = vmatpush3.bf16.msra.mxu0 %v12289_v58  ;;  %v12865_v58 = vld [vmem:[%s13077_s10] sm:$0xff]  }
0x33e8   : > { %8469 = vmatpush3.bf16.msra.mxu1 %v12295_v42  ;;  %7426 = vmatprep.subr.bf16.mxu0 %v12301_v40  ;;  %v13536_v42 = vld [vmem:[#allocation3_spill] sm:$0xff]  ;;  %v12875_v40 = vld [vmem:[%s13077_s10 + $0x8] sm:$0xff]  }
0x33e9   : > { %8470 = vmatprep.subr.bf16.mxu1 %v13257_v32 }
0x33eb   : > { %7427 = vmatpush3.bf16.msra.mxu0 %v12308_v41  ;;  %v13537_v41 = vld [vmem:[#allocation5_spill] sm:$0xff] }
0x33ec   : > { %8471 = vmatpush3.bf16.msra.mxu1 %v12314_v3  ;;  %7428 = vmatprep.subr.bf16.mxu0 %v12320_v45  ;;  %v12884_v3 = vld [vmem:[%s13077_s10 + $0x10] sm:$0xff]   ;;  %v12891_v45 = vld [vmem:[%s13077_s10 + $0x18] sm:$0xff]  }
0x33ed   : > { %8472 = vmatprep.subr.bf16.mxu1 %v13257_v32 }
0x33ef   : > { %7429 = vmatpush3.bf16.msra.mxu0 %v12327_v20  ;;  %v12898_v20 = vld [vmem:[%s13077_s10 + $0x20] sm:$0xff]  }
0x33f0   : > { %8473 = vmatpush3.bf16.msra.mxu1 %v12333_v1  ;;  %7430 = vmatprep.subr.bf16.mxu0 %v12339_v24  ;;  %v12905_v1 = vld [vmem:[%s13077_s10 + $0x28] sm:$0xff]   ;;  %v12912_v24 = vld [vmem:[%s13077_s10 + $0x30] sm:$0xff]  }
0x33f1   : > { %8474 = vmatprep.subr.bf16.mxu1 %v13257_v32 }
0x33f3   : > { %7431 = vmatpush3.bf16.msra.mxu0 %v12346_v11  ;;  %v12919_v11 = vld [vmem:[%s13077_s10 + $0x38] sm:$0xff]  }
0x33f4   : > { %8475 = vmatpush3.bf16.msra.mxu1 %v12352_v34  ;;  %7432 = vmatprep.subr.bf16.mxu0 %v12358_v15 }
0x33f5   : > { %8496 = vmatprep.subr.bf16.mxu1 %v13257_v32 }
0x33f7   : > { %7433 = vmatpush3.bf16.msra.mxu0 %v13534_v52  ;;  %8477 = vmatmul.mubr.bf16.vlgmr.msra.gmra.mrb[144].mxu1 %v5619_v25 }
0x33f8   : > { %7434 = vmatprep.subr.bf16.mxu0 %v13535_v55  ;;  %8497 = vmatpush3.bf16.msra.mxu1 %v12865_v58 }
0x33f9   : > { %8498 = vmatprep.subr.bf16.mxu1 %v13257_v32  ;;  %8512 = vmatprep.mubr.msk.bf16.mxu1 %vm9040_vm0, %v13257_v32 }
0x33fb   : > { %7435 = vmatpush3.bf16.msra.mxu0 %v13536_v42 }
0x33fc   : > { %8499 = vmatpush3.bf16.msra.mxu1 %v12875_v40 }
0x33fd   : > { %8500 = vmatprep.subr.bf16.mxu1 %v13257_v32 }
0x33fe   : > { %5740 = vmatmul.mubr.bf16.vlgmr.msra.gmra.mrb[144].mxu0 %v5619_v25 }
0x33ff   : > { %8492 = vmatprep.mubr.msk.bf16.mxu0 %vm1148_vm1, %v13537_v41 }
0x3400   : > { %8501 = vmatpush3.bf16.msra.mxu1 %v12884_v3 }
0x3401   : > { %8502 = vmatprep.subr.bf16.mxu1 %v13257_v32 }
0x3404   : > { %8503 = vmatpush3.bf16.msra.mxu1 %v12891_v45 }
0x3405   : > { %8504 = vmatprep.subr.bf16.mxu1 %v13257_v32 }
0x3408   : > { %8505 = vmatpush3.bf16.msra.mxu1 %v12898_v20 }
0x3409   : > { %8506 = vmatprep.subr.bf16.mxu1 %v13257_v32 }
0x340c   : > { %8507 = vmatpush3.bf16.msra.mxu1 %v12905_v1 }
0x340d   : > { %8508 = vmatprep.subr.bf16.mxu1 %v13257_v32 }
0x3410   : > { %8509 = vmatpush3.bf16.msra.mxu1 %v12912_v24 }
0x3411   : > { %8510 = vmatprep.subr.bf16.mxu1 %v13257_v32 }
0x3414   : > { %8511 = vmatpush3.bf16.msra.mxu1 %v12919_v11 }
0x34aa   : > { %v5700_v34 = vpop.f32.mrb[140].mxu1 }
0x34ab   : > { %v8458_v15 = vpop.f32.mrb[141].mxu1 }
0x34ac   : > { %v5703_v25 = vpop.f32.mrb[142].mxu1 }
0x34ad   : > { %v8459_v37 = vpop.f32.mrb[143].mxu1 }
0x34b1   : > { %v7405_v46 = vpop.f32.mrb[140].mxu0 }
0x34b2   : > { %v7406_v28 = vpop.f32.mrb[141].mxu0 }
0x34b3   : > { %v7407_v60 = vadd.f32 %v7406_v28, %v7405_v46  ;;  %v7408_v23 = vpop.f32.mrb[142].mxu0 }
0x34b4   : > { %v7409_v38 = vpop.f32.mrb[143].mxu0 }
0x34b5   : > { %v5701_v48 = vadd.f32 %v7407_v60, %v5700_v34  ;;  %v7410_v10 = vadd.f32 %v7409_v38, %v7408_v23 }
0x34b7   : > { %v5704_v22 = vadd.f32 %v7410_v10, %v5703_v25 }
0x34b9   : > { %v5789_v54 = vpack.c.bf16 %v5704_v22, %v5701_v48 }
0x34bb   : > { %v5792_v35 = vunpack.c.h.bf16 %v5789_v54  ;;  %8480 = vmatprep.subr.bf16.mxu0 %v5789_v54  ;;  %v5791_v14 = vunpack.c.l.bf16 %v5789_v54 }
0x34bc   : > { %8481 = vmatpush3.bf16.msra.mxu0 %v5789_v54 }
0x34bd   : > { %v5796_v36 = vsub.f32 %v5704_v22, %v5792_v35  ;;  %v5795_v56 = vsub.f32 %v5701_v48, %v5791_v14 }
0x34bf   : > { %v5799_v4 = vpack.c.bf16 %v5796_v36, %v5795_v56 }
0x34ca   : > { %v5782_v0 = vpop.f32.mrb[144].mxu1 }
0x34cb   : > { %v8478_v47 = vpop.f32.mrb[145].mxu1 }
0x34cc   : > { %v5785_v19 = vpop.f32.mrb[146].mxu1 }
0x34cd   : > { %v8479_v18 = vpop.f32.mrb[147].mxu1 }
0x34d1   : > { %v7436_v52 = vpop.f32.mrb[144].mxu0 }
0x34d2   : > { %v7437_v55 = vpop.f32.mrb[145].mxu0 }
0x34d3   : > { %v7438_v42 = vadd.f32 %v7437_v55, %v7436_v52  ;;  %v7439_v41 = vpop.f32.mrb[146].mxu0 }
0x34d4   : > { %v7440_v15 = vpop.f32.mrb[147].mxu0 }
0x34d5   : > { %v5783_v34 = vadd.f32 %v7438_v42, %v5782_v0  ;;  %v7441_v37 = vadd.f32 %v7440_v15, %v7439_v41 }
0x34d7   : > { %v5786_v25 = vadd.f32 %v7441_v37, %v5785_v19 }
0x34d9   : > { %v5790_v46 = vpack.c.bf16 %v5786_v25, %v5783_v34 }
0x34db   : > { %v5794_v28 = vunpack.c.h.bf16 %v5790_v46  ;;  %8482 = vmatprep.subr.bf16.mxu0 %v5790_v46  ;;  %v5793_v60 = vunpack.c.l.bf16 %v5790_v46 }
0x34dc   : > { %8483 = vmatpush3.bf16.msra.mxu0 %v5790_v46 }
0x34dd   : > { %v5798_v23 = vsub.f32 %v5786_v25, %v5794_v28  ;;  %8484 = vmatprep.subr.bf16.mxu0 %v5799_v4  ;;  %v5797_v38 = vsub.f32 %v5783_v34, %v5793_v60 }
0x34df   : > { %v5800_v48 = vpack.c.bf16 %v5798_v23, %v5797_v38 }
0x34e0   : > { %8485 = vmatpush3.bf16.msra.mxu0 %v5799_v4 }
0x34e1   : > { %8486 = vmatprep.subr.bf16.mxu0 %v5800_v48 }
0x34e4   : > { %8487 = vmatpush3.bf16.msra.mxu0 %v5800_v48 }
0x34e5   : > { %8488 = vmatprep.subr.bf16.mxu0 %v5789_v54 }
0x34e8   : > { %8489 = vmatpush3.bf16.msra.mxu0 %v5789_v54 }
0x34e9   : > { %8490 = vmatprep.subr.bf16.mxu0 %v5790_v46 }
0x34ec   : > { %8491 = vmatpush3.bf16.msra.mxu0 %v5790_v46 }
0x34ed   : > { %8516 = vmatprep.subr.bf16.mxu0 %v13257_v32 }
0x34ef   : > { %8493 = vmatmul.mubr.msk.bf16.vlgmr.msra.gmra.mrb[148].mxu0 %vm1148_vm1, %v12410_v5 }
0x34f0   : > { %8517 = vmatpush3.bf16.msra.mxu0 %v12865_v58  ;;  %8532 = vmatprep.mubr.msk.bf16.mxu0 %vm9040_vm0, %v13257_v32 }
0x34f1   : > { %8518 = vmatprep.subr.bf16.mxu0 %v13257_v32 }
0x34f4   : > { %8519 = vmatpush3.bf16.msra.mxu0 %v12875_v40 }
0x34f5   : > { %8520 = vmatprep.subr.bf16.mxu0 %v13257_v32 }
0x34f8   : > { %8521 = vmatpush3.bf16.msra.mxu0 %v12884_v3 }
0x34f9   : > { %8522 = vmatprep.subr.bf16.mxu0 %v13257_v32 }
0x34fc   : > { %8523 = vmatpush3.bf16.msra.mxu0 %v12891_v45 }
0x34fd   : > { %8524 = vmatprep.subr.bf16.mxu0 %v13257_v32 }
0x3500   : > { %8525 = vmatpush3.bf16.msra.mxu0 %v12898_v20 }
0x3501   : > { %8526 = vmatprep.subr.bf16.mxu0 %v13257_v32 }
0x3504   : > { %8527 = vmatpush3.bf16.msra.mxu0 %v12905_v1 }
0x3505   : > { %8528 = vmatprep.subr.bf16.mxu0 %v13257_v32 }
0x3508   : > { %8529 = vmatpush3.bf16.msra.mxu0 %v12912_v24 }
0x3509   : > { %8530 = vmatprep.subr.bf16.mxu0 %v13257_v32 }
0x350c   : > { %8531 = vmatpush3.bf16.msra.mxu0 %v12919_v11 }
0x350d   : > { %7485 = vmatprep.subr.bf16.mxu0 %v12434_v43 }
0x35c2   : > { %v8494_v5 = vpop.f32.mrb[148].mxu0 }
0x35c3   : > { %v5852_v58 = vmul.f32 %v12647_v12, %v8494_v5  ;;  %v5869_v40 = vmul.f32 %v12643_v21, %v8494_v5  ;;  %v5835_v3 = vpop.f32.mrb[149].mxu0 }
0x35c4   : > { %v5850_v45 = vmul.f32 %v12643_v21, %v5835_v3  ;;  %v5871_v20 = vmul.f32 %v12647_v12, %v5835_v3  ;;  %v8495_v1 = vpop.f32.mrb[150].mxu0 }
0x35c5   : > { %v5853_v10 = vmul.f32 %v12655_v27, %v8495_v1  ;;  %v5870_v24 = vmul.f32 %v12651_v62, %v8495_v1  ;;  %v5838_v22 = vpop.f32.mrb[151].mxu0 }
0x35c6   : > { %v5854_v54 = vadd.f32 %v5852_v58, %v5850_v45  ;;  %v5873_v11 = vsub.f32 %v5869_v40, %v5871_v20  ;;  %v5851_v43 = vmul.f32 %v12651_v62, %v5838_v22  ;;  %v5872_v35 = vmul.f32 %v12655_v27, %v5838_v22 }
0x35c8   : > { %v5855_v14 = vadd.f32 %v5853_v10, %v5851_v43  ;;  %v5874_v36 = vsub.f32 %v5870_v24, %v5872_v35 }
0x35ca   : > { %v5856_v56 = vpack.c.bf16 %v5855_v14, %v5854_v54  ;;  %v5875_v4 = vpack.c.bf16 %v5874_v36, %v5873_v11 }
0x35cc   : > { %v5857_v0 = vunpack.c.l.bf16 %v5856_v56  ;;  %v5858_v47 = vunpack.c.h.bf16 %v5856_v56  ;;  %v5876_v19 = vunpack.c.l.bf16 %v5875_v4  ;;  %v5877_v18 = vunpack.c.h.bf16 %v5875_v4 }
0x35ce   : > { %v5860_v52 = vsub.f32 %v5855_v14, %v5858_v47  ;;  %v5879_v55 = vsub.f32 %v5874_v36, %v5877_v18  ;;  %v5878_v42 = vsub.f32 %v5873_v11, %v5876_v19  ;;  %v5859_v41 = vsub.f32 %v5854_v54, %v5857_v0 }
0x35d0   : > { %v5880_v15 = vpack.c.bf16 %v5879_v55, %v5878_v42  ;;  %v5861_v34 = vpack.c.bf16 %v5860_v52, %v5859_v41 }
0x35d2   : > { %5882 = vrot.lane.b32.xlu0 %v5880_v15, %s9041_s20  ;;  %5863 = vrot.lane.b32.xlu1 %v5861_v34, %s9041_s20  ;;  %v13544_v15 = vstv %s12587_s27 }
0x3644   : > { %v5883_v37 = vpop.permute.xlu0 %5882  ;;  %v5864_v25 = vpop.permute.xlu1 %5863 }
0x3645   : > { %v5886_v46 = vsel %vm1219_vm2, %v5875_v4, %v5883_v37  ;;  %v5867_v28 = vsel %vm1219_vm2, %v5856_v56, %v5864_v25 }
0x3646   : > { %8513 = vmatmul.mubr.bf16.vlgmr.msra.gmra.mrb[148].mxu1 %v5867_v28  ;;  %8533 = vmatmul.mubr.bf16.vlgmr.msra.gmra.mrb[152].mxu0 %v5886_v46 }
0x3647   : > { %8548 = vmatprep.mubr.msk.bf16.mxu1 %vm1148_vm1, %v12452_v2  ;;  %7486 = vmatpush3.bf16.msra.mxu0 %v12459_v57  ;;  %v13538_v2 = vld [vmem:[#allocation4_spill] sm:$0xff]  ;;  %v13539_v57 = vld [vmem:[#allocation6_spill] sm:$0xff] }
0x3648   : > { %7487 = vmatprep.subr.bf16.mxu0 %v12465_v17  ;;  %v13540_v17 = vld [vmem:[#allocation7_spill] sm:$0xff] }
0x364b   : > { %7488 = vmatpush3.bf16.msra.mxu0 %v12471_v30  ;;  %v13541_v30 = vld [vmem:[#allocation8_spill] sm:$0xff] }
0x364c   : > { %7489 = vmatprep.subr.bf16.mxu0 %v12477_v13  ;;  %v13542_v13 = vld [vmem:[#allocation9_spill] sm:$0xff] }
0x364f   : > { %7490 = vmatpush3.bf16.msra.mxu0 %v12483_v49  ;;  %v13543_v49 = vld [vmem:[#allocation16_spill] sm:$0xff] }
0x3650   : > { %7491 = vmatprep.subr.bf16.mxu0 %v12489_v63  ;;  %v5888_v63 = vmul.f32 %v12594_v9, %v13543_v49  ;;  %v5889_v48 = vmul.f32 %v12596_v6, %v13543_v49  ;;  %v5932_v5 = vmul.f32 %v12606_v31, %v13543_v49 }
0x3653   : > { %7492 = vmatpush3.bf16.msra.mxu0 %v12495_v39  ;;  %v5931_v39 = vmul.f32 %v12604_v29, %v13543_v49 }
0x3654   : > { %7493 = vmatprep.subr.bf16.mxu0 %v12501_v8 }
0x3657   : > { %7494 = vmatpush3.bf16.msra.mxu0 %v12507_v53 }
0x3658   : > { %7495 = vmatprep.subr.bf16.mxu0 %v12513_v44 }
0x365b   : > { %7496 = vmatpush3.bf16.msra.mxu0 %v13538_v2 }
0x365c   : > { %7497 = vmatprep.subr.bf16.mxu0 %v13539_v57 }
0x365f   : > { %7498 = vmatpush3.bf16.msra.mxu0 %v13540_v17 }
0x3660   : > { %7499 = vmatprep.subr.bf16.mxu0 %v13541_v30 }
0x3663   : > { %7500 = vmatpush3.bf16.msra.mxu0 %v13542_v13 }
0x3719   : > { %v5924_v8 = vpop.f32.mrb[148].mxu1  ;;  %v5967_v53 = vpop.f32.mrb[152].mxu0 }
0x371a   : > { %v5925_v60 = vadd.f32 %v5924_v8, %v5888_v63  ;;  %v5968_v44 = vadd.f32 %v5967_v53, %v5931_v39  ;;  %v8514_v23 = vpop.f32.mrb[149].mxu1  ;;  %v8534_v38 = vpop.f32.mrb[153].mxu0 }
0x371b   : > { %v5927_v58 = vpop.f32.mrb[150].mxu1  ;;  %v5970_v40 = vpop.f32.mrb[154].mxu0 }
0x371c   : > { %v5974_v3 = vmul.f32 %v5925_v60, %v12594_v9  ;;  %v5976_v45 = vmul.f32 %v5968_v44, %v12604_v29  ;;  %v5928_v20 = vadd.f32 %v5927_v58, %v5889_v48  ;;  %v5971_v1 = vadd.f32 %v5970_v40, %v5932_v5  ;;  %v8515_v10 = vpop.f32.mrb[151].mxu1  ;;  %v8535_v24 = vpop.f32.mrb[155].mxu0 }
0x371e   : > { %v5978_v22 = vadd.f32 %v5976_v45, %v5974_v3  ;;  %v5975_v54 = vmul.f32 %v5928_v20, %v12596_v6  ;;  %v5977_v11 = vmul.f32 %v5971_v1, %v12606_v31 }
0x3720   : > { %v5979_v43 = vadd.f32 %v5977_v11, %v5975_v54  ;;  %v5980_v35 = vsel %vm1393_vm3, %v5978_v22, 0.0 }
0x3722   : > { %v5981_v14 = vsel %vm1393_vm3, %v5979_v43, 0.0 }
0x3723   : > { %v5982_v36 = vadd.f32 %v5981_v14, %v5980_v35 }
0x3725   : > { %5983 = vadd.xlane.f32.xlu1 %v5982_v36 }
0x37b2   : > { %v5984_v56 = vpop.xlane.xlu1 %5983 }
0x37b3   : > { %v5985_v4 = vrot.slane %v5984_v56, 4 }
0x37b5   : > { %v5986_v0 = vadd.f32 %v5985_v4, %v5984_v56 }
0x37b7   : > { %v5987_v47 = vrot.slane %v5986_v0, 2 }
0x37b9   : > { %v5988_v19 = vadd.f32 %v5987_v47, %v5986_v0 }
0x37bb   : > { %v5989_v18 = vrot.slane %v5988_v19, 1 }
0x37bd   : > { %v5990_v52 = vadd.f32 %v5989_v18, %v5988_v19 }
0x37bf   : > { %8594 = vpush %v5990_v52 }
0x37f0   : > { %s8595_s29 = spop %8594 }
0x37f1   : > { %v5992_v55 = vstv %s8595_s29 }
0x37f2   : > { %v5993_v42 = vadd.f32 1e-30, %v5992_v55 }
0x37f4   : > { %8714 = vrcp.f32 %v5993_v42 }
0x37fe   : > { %v8715_v41 = vpop.eup %8714 }
0x37ff   : > { %v5995_v34 = vmul.f32 %v8715_v41, %v13544_v15 }
0x3801   : > { %v6000_v37 = vmul.f32 %v5995_v34, %v12604_v29  ;;  %v5997_v25 = vmul.f32 %v5995_v34, %v12596_v6  ;;  %v6001_v2 = vmul.f32 %v5995_v34, %v12606_v31  ;;  %v5996_v17 = vmul.f32 %v5995_v34, %v12594_v9 }
0x3803   : > { %v6002_v46 = vadd.f32 %v6000_v37, %v12573_v61  ;;  %v5999_v28 = vadd.f32 %v5997_v25, %v12576_v26  ;;  %v6003_v57 = vadd.f32 %v6001_v2, %v12579_v51  ;;  %v5998_v29 = vadd.f32 %v5996_v17, %v12582_v59  ;;  %v13545_v25 = vld [vmem:[#allocation10_spill] sm:$0xff] }
0x3805   : > { %6006 = vrot.lane.b32.xlu0 %v6002_v46, %s9042_s21  ;;  %6034 = vrot.lane.b32.xlu1 %v5999_v28, %s9044_s25 }
0x3809   : > { %6008 = vrot.lane.b32.xlu0 %v6003_v57, %s9042_s21 }
0x380d   : > { %6020 = vrot.lane.b32.xlu0 %v5998_v29, %s9042_s21 }
0x3811   : > { %6022 = vrot.lane.b32.xlu0 %v5999_v28, %s9042_s21 }
0x3815   : > { %6026 = vrot.lane.b32.xlu0 %v5998_v29, %s9043_s22 }
0x3819   : > { %6028 = vrot.lane.b32.xlu0 %v5999_v28, %s9043_s22 }
0x381d   : > { %6044 = vrot.lane.b32.xlu0 %v6002_v46, %s9043_s22 }
0x3821   : > { %6046 = vrot.lane.b32.xlu0 %v6003_v57, %s9043_s22  ;;  %s487_s22 = scalar_lea.vmem %s13079_s12, %s9186_s0 }
0x3825   : > { %6032 = vrot.lane.b32.xlu0 %v5998_v29, %s9044_s25 }
0x3829   : > { %6050 = vrot.lane.b32.xlu0 %v6002_v46, %s9044_s25 }
0x382d   : > { %6052 = vrot.lane.b32.xlu0 %v6003_v57, %s9044_s25 }
0x3877   : > { %v6007_v61 = vpop.permute.xlu0 %6006  ;;  %v6035_v48 = vpop.permute.xlu1 %6034 }
0x3878   : > { %v6012_v26 = vsel %vm1393_vm3, %v5998_v29, %v6007_v61  ;;  %v6056_v60 = vsel %vm1393_vm3, %v6002_v46, %v6007_v61  ;;  %v13548_v46 = vld [vmem:[#allocation13_spill] sm:$0xff] }
0x3879   : > { %v6014_v51 = vsel %vm1396_vm4, %v6012_v26, 0.0 }
0x387a   : > { %6016 = vst [vmem:[%s482_s13] sm:$0xff] %v6014_v51 }
0x387b   : > { %v6009_v59 = vpop.permute.xlu0 %6008 }
0x387c   : > { %v6013_v9 = vsel %vm1393_vm3, %v5999_v28, %v6009_v59  ;;  %v6057_v45 = vsel %vm1393_vm3, %v6003_v57, %v6009_v59 }
0x387d   : > { %v6015_v6 = vsel %vm1396_vm4, %v6013_v9, 0.0 }
0x387e   : > { %6017 = vst [vmem:[%s482_s13 + $0x8] sm:$0xff] %v6015_v6 }
0x387f   : > { %v6021_v31 = vpop.permute.xlu0 %6020 }
0x3880   : > { %v6038_v5 = vsel %vm1393_vm3, %v5998_v29, %v6021_v31 }
0x3883   : > { %v6023_v30 = vpop.permute.xlu0 %6022 }
0x3884   : > { %v6039_v53 = vsel %vm1393_vm3, %v5999_v28, %v6023_v30 }
0x3887   : > { %v6027_v13 = vpop.permute.xlu0 %6026 }
0x3888   : > { %v6040_v40 = vsel %vm1396_vm4, %v6038_v5, %v6027_v13 }
0x388b   : > { %v6029_v49 = vpop.permute.xlu0 %6028 }
0x388c   : > { %v6041_v44 = vsel %vm1396_vm4, %v6039_v53, %v6029_v49 }
0x388d   : > { %v6043_v3 = vsel %vm1399_vm5, %v6041_v44, %v6035_v48 }
0x388e   : > { %v6063_v54 = vmul.f32 %v12651_v62, %v6043_v3  ;;  %v6071_v11 = vmul.f32 %v12655_v27, %v6043_v3 }
0x388f   : > { %v6045_v63 = vpop.permute.xlu0 %6044 }
0x3890   : > { %v6058_v23 = vsel %vm1396_vm4, %v6056_v60, %v6045_v63 }
0x3893   : > { %v6047_v39 = vpop.permute.xlu0 %6046 }
0x3894   : > { %v6059_v1 = vsel %vm1396_vm4, %v6057_v45, %v6047_v39 }
0x3897   : > { %v6033_v8 = vpop.permute.xlu0 %6032 }
0x3898   : > { %v6042_v20 = vsel %vm1399_vm5, %v6040_v40, %v6033_v8 }
0x3899   : > { %v6062_v35 = vmul.f32 %v12643_v21, %v6042_v20  ;;  %v6070_v14 = vmul.f32 %v12647_v12, %v6042_v20 }
0x389b   : > { %v6051_v38 = vpop.permute.xlu0 %6050 }
0x389c   : > { %v6060_v58 = vsel %vm1399_vm5, %v6058_v23, %v6051_v38 }
0x389d   : > { %v6064_v10 = vmul.f32 %v12647_v12, %v6060_v58  ;;  %v6068_v24 = vmul.f32 %v12643_v21, %v6060_v58 }
0x389f   : > { %v6053_v22 = vpop.permute.xlu0 %6052  ;;  %v6066_v4 = vsub.f32 %v6062_v35, %v6064_v10  ;;  %v6072_v0 = vadd.f32 %v6070_v14, %v6068_v24 }
0x38a0   : > { %v6061_v43 = vsel %vm1399_vm5, %v6059_v1, %v6053_v22 }
0x38a1   : > { %v6065_v36 = vmul.f32 %v12655_v27, %v6061_v43  ;;  %v6069_v56 = vmul.f32 %v12651_v62, %v6061_v43 }
0x38a3   : > { %v6067_v47 = vsub.f32 %v6063_v54, %v6065_v36  ;;  %v6073_v19 = vadd.f32 %v6071_v11, %v6069_v56 }
0x38a5   : > { %v6074_v18 = vpack.c.bf16 %v6067_v47, %v6066_v4  ;;  %v6075_v52 = vpack.c.bf16 %v6073_v19, %v6072_v0 }
0x38a7   : > { %8536 = vmatprep.subr.bf16.mxu1 %v6074_v18  ;;  %v6076_v55 = vunpack.c.l.bf16 %v6074_v18  ;;  %v6077_v42 = vunpack.c.h.bf16 %v6074_v18  ;;  %v6078_v41 = vunpack.c.l.bf16 %v6075_v52  ;;  %v6079_v15 = vunpack.c.h.bf16 %v6075_v52 }
0x38a8   : > { %8537 = vmatpush3.bf16.msra.mxu1 %v6074_v18 }
0x38a9   : > { %8538 = vmatprep.subr.bf16.mxu1 %v6075_v52  ;;  %v6080_v21 = vsub.f32 %v6066_v4, %v6076_v55  ;;  %v6081_v34 = vsub.f32 %v6067_v47, %v6077_v42  ;;  %v6082_v37 = vsub.f32 %v6072_v0, %v6078_v41  ;;  %v6083_v27 = vsub.f32 %v6073_v19, %v6079_v15 }
0x38ab   : > { %v6084_v12 = vpack.c.bf16 %v6081_v34, %v6080_v21  ;;  %v6085_v62 = vpack.c.bf16 %v6083_v27, %v6082_v37 }
0x38ac   : > { %8539 = vmatpush3.bf16.msra.mxu1 %v6075_v52 }
0x38ad   : > { %8540 = vmatprep.subr.bf16.mxu1 %v6084_v12 }
0x38b0   : > { %8541 = vmatpush3.bf16.msra.mxu1 %v6084_v12 }
0x38b1   : > { %8542 = vmatprep.subr.bf16.mxu1 %v6085_v62 }
0x38b4   : > { %8543 = vmatpush3.bf16.msra.mxu1 %v6085_v62 }
0x38b5   : > { %8544 = vmatprep.subr.bf16.mxu1 %v6074_v18 }
0x38b8   : > { %8545 = vmatpush3.bf16.msra.mxu1 %v6074_v18 }
0x38b9   : > { %8546 = vmatprep.subr.bf16.mxu1 %v6075_v52 }
0x38bc   : > { %8547 = vmatpush3.bf16.msra.mxu1 %v6075_v52 }
0x38bd   : > { %8552 = vmatprep.subr.bf16.mxu1 %v13257_v32 }
0x38bf   : > { %8549 = vmatmul.mubr.msk.bf16.vlgmr.msra.gmra.mrb[152].mxu1 %vm1148_vm1, %v12668_v33  ;;  %v13546_v33 = vld [vmem:[#allocation11_spill] sm:$0xff] }
0x38c0   : > { %8553 = vmatpush3.bf16.msra.mxu1 %v12675_v16  ;;  %8568 = vmatprep.mubr.msk.bf16.mxu1 %vm9040_vm0, %v13257_v32  ;;  %v13547_v16 = vld [vmem:[#allocation12_spill] sm:$0xff] }
0x38c1   : > { %8554 = vmatprep.subr.bf16.mxu1 %v13257_v32 }
0x38c4   : > { %8555 = vmatpush3.bf16.msra.mxu1 %v12684_v7  ;;  %v13549_v7 = vld [vmem:[#allocation14_spill] sm:$0xff] }
0x38c5   : > { %8556 = vmatprep.subr.bf16.mxu1 %v13257_v32 }
0x38c8   : > { %8557 = vmatpush3.bf16.msra.mxu1 %v12691_v50 }
0x38c9   : > { %8558 = vmatprep.subr.bf16.mxu1 %v13257_v32 }
0x38cc   : > { %8559 = vmatpush3.bf16.msra.mxu1 %v13545_v25 }
0x38cd   : > { %8560 = vmatprep.subr.bf16.mxu1 %v13257_v32 }
0x38d0   : > { %8561 = vmatpush3.bf16.msra.mxu1 %v13546_v33 }
0x38d1   : > { %8562 = vmatprep.subr.bf16.mxu1 %v13257_v32 }
0x38d4   : > { %8563 = vmatpush3.bf16.msra.mxu1 %v13547_v16 }
0x38d5   : > { %8564 = vmatprep.subr.bf16.mxu1 %v13257_v32 }
0x38d8   : > { %8565 = vmatpush3.bf16.msra.mxu1 %v13548_v46 }
0x38d9   : > { %8566 = vmatprep.subr.bf16.mxu1 %v13257_v32 }
0x38dc   : > { %8567 = vmatpush3.bf16.msra.mxu1 %v13549_v7 }
0x3992   : > { %v8550_v50 = vpop.f32.mrb[152].mxu1 }
0x3993   : > { %6137 = vrot.lane.b32.xlu0 %v8550_v50, %s9041_s20  ;;  %v6120_v28 = vpop.f32.mrb[153].mxu1 }
0x3994   : > { %v8551_v2 = vpop.f32.mrb[154].mxu1 }
0x3995   : > { %v6123_v57 = vpop.f32.mrb[155].mxu1 }
0x3997   : > { %6139 = vrot.lane.b32.xlu0 %v8551_v2, %s9041_s20 }
0x3a05   : > { %v6138_v17 = vpop.permute.xlu0 %6137 }
0x3a06   : > { %v6143_v61 = vsel %vm1219_vm2, %v6120_v28, %v6138_v17 }
0x3a09   : > { %v6140_v29 = vpop.permute.xlu0 %6139 }
0x3a0a   : > { %v6144_v26 = vsel %vm1219_vm2, %v6123_v57, %v6140_v29 }
0x3a0b   : > { %v6145_v51 = vpack.c.bf16 %v6144_v26, %v6143_v61 }
0x3a0d   : > { %v6147_v59 = vunpack.c.h.bf16 %v6145_v51  ;;  %8569 = vmatmul.mubr.bf16.vlgmr.msra.gmra.mrb[156].mxu1 %v6145_v51  ;;  %v6146_v32 = vunpack.c.l.bf16 %v6145_v51 }
0x3a0f   : > { %v6149_v9 = vsub.f32 %v6144_v26, %v6147_v59  ;;  %v6148_v6 = vsub.f32 %v6143_v61, %v6146_v32 }
0x3a11   : > { %v6150_v31 = vpack.c.bf16 %v6149_v9, %v6148_v6 }
0x3a13   : > { %6183 = vmatprep.mubr.bf16.mxu0 %v6150_v31 }
0x3a14   : > { %6184 = vmatmul.mubr.bf16.vlgmr.msra.gmra.mrb[156].mxu0 %v6145_v51 }
0x3ae0   : > { %v6226_v30 = vpop.f32.mrb[156].mxu1 }
0x3ae1   : > { %v8570_v13 = vpop.f32.mrb[157].mxu1 }
0x3ae2   : > { %v6229_v49 = vpop.f32.mrb[158].mxu1 }
0x3ae3   : > { %v8571_v63 = vpop.f32.mrb[159].mxu1 }
0x3ae7   : > { %v7501_v39 = vpop.f32.mrb[156].mxu0 }
0x3ae8   : > { %v7502_v8 = vpop.f32.mrb[157].mxu0 }
0x3ae9   : > { %v7503_v53 = vadd.f32 %v7502_v8, %v7501_v39  ;;  %v7504_v60 = vpop.f32.mrb[158].mxu0 }
0x3aea   : > { %v7505_v44 = vpop.f32.mrb[159].mxu0 }
0x3aeb   : > { %v6227_v23 = vadd.f32 %v7503_v53, %v6226_v30  ;;  %v7506_v38 = vadd.f32 %v7505_v44, %v7504_v60 }
0x3aed   : > { %6233 = vst [vmem:[%s487_s22] sm:$0xff] %v6227_v23  ;;  %v6230_v48 = vadd.f32 %v7506_v38, %v6229_v49 }
0x3aef   : > { %6234 = vst [vmem:[%s487_s22 + $0x8] sm:$0xff] %v6230_v48 }
0x3af0 PF: > { %s24_s23 = sadd.s32 1, %s9037_s23  }
0x3af1   : > { %p21_p4 = scmp.ge.s32.totalorder %s24_s23, 4  }
0x3af3   :  { %23 = sbr.rel (!%p21_p4) target bundleno = 2 (0x2), region = 115 }

</bundles_post_ra>
